<compile_context>
chip_gen: v6e
topology: v6e:2x2x1
jax: 0.10.0
libtpu: 0.0.40
codegen_flags: <defaults>
</compile_context>

<pallas_src>
import functools

import jax
import jax.numpy as jnp
import numpy as np
from jax.experimental import pallas as pl
from jax.experimental.pallas import tpu as pltpu

EPS = 1e-5


# ------------------------------------------------------------------------- utils


def _compiler_params(block_defs):
    """'parallel' batch axis + a VMEM budget sized from the actual tile buffers."""
    def padded_bytes(shape, dtype):
        s = list(shape)
        if len(s) < 2:
            s = [1] + s
        s[-2] = -(-s[-2] // 8) * 8          # sublane padding
        s[-1] = -(-s[-1] // 128) * 128      # lane padding
        n = 1
        for d in s:
            n *= int(d)
        return n * np.dtype(dtype).itemsize

    need = sum(padded_bytes(s, d) for s, d in block_defs)
    # double-buffered pipeline blocks + scratch + compiler temporaries, floored and
    # capped so it stays inside the v7x 64 MiB physical VMEM.
    limit = int(min(max(6 * need, 16 << 20), 48 << 20))
    return pltpu.CompilerParams(dimension_semantics=("parallel",),
                                vmem_limit_bytes=limit)


# ----------------------------------------------------------------- kernel helpers


def _halo_zero(pad_ref, n, h, w, c):
    """Zero only the 1-pixel halo of an (n, h+2, w+2, c) padded VMEM scratch."""
    zrow = jnp.zeros((n, 1, w + 2, c), jnp.float32)
    pad_ref[:, 0:1, :, :] = zrow
    pad_ref[:, h + 1:h + 2, :, :] = zrow
    zcol = jnp.zeros((n, h + 2, 1, c), jnp.float32)
    pad_ref[:, :, 0:1, :] = zcol
    pad_ref[:, :, w + 1:w + 2, :] = zcol


def _im2col_conv(pad_ref, cols_ref, w_ref, *, n, ho, wo, cin, stride):
    """3x3 conv as a single MXU matmul with contraction K = 9*cin.

    The 9 taps are sliced straight from the padded VMEM scratch ref and packed
    into the (M, 9*cin) im2col scratch with static lane-offset stores; the matmul
    runs with bf16 operands and f32 accumulation (one MXU pass)."""
    m = n * ho * wo
    ext_h = (ho - 1) * stride + 1
    ext_w = (wo - 1) * stride + 1
    for dy in range(3):
        for dx in range(3):
            tap = pad_ref[:, dy:dy + ext_h, dx:dx + ext_w, :]
            if stride > 1:
                # TODO(synk): for stride>1 a one-shot strided gather into a compact
                # scratch would avoid 9 strided relayouts; this path is functional
                # but not tuned (the test configs all use stride=1).
                tap = tap[:, ::stride, ::stride, :]
            k = (dy * 3 + dx) * cin
            cols_ref[:, k:k + cin] = tap.reshape(m, cin)
    cols = cols_ref[...].astype(jnp.bfloat16)
    return jnp.dot(cols, w_ref[...], preferred_element_type=jnp.float32)


def _partial_stats(acc):
    """Single-pass per-channel (sum, sum-of-squares) in f32 -> shape (1, 2, C)."""
    s = jnp.sum(acc, axis=0, keepdims=True)
    ss = jnp.sum(acc * acc, axis=0, keepdims=True)
    return jnp.concatenate([s, ss], axis=0)[None]


def _store_lane_dense(out_ref, acc, *, rows, wo, cout):
    """Store an (rows*wo, cout) accumulator into a lane-dense (rows, wo*cout) block.

    Done with `wo` small static lane-offset stores (sublane->lane repack) so the
    output HBM array, its VMEM block and the write-back DMA are fully lane-dense."""
    a3 = acc.reshape(rows, wo, cout)
    for j in range(wo):
        out_ref[:, j * cout:(j + 1) * cout] = a3[:, j, :]


# ------------------------------------------------------------------------ kernels


def _conv1_kernel(*refs, tn, h, w, cin, cout, stride, has_shortcut):
    """conv1 (+ optional 1x1 projection shortcut) + BN partial statistics."""
    if has_shortcut:
        (x_ref, w1_ref, wsc_ref,
         y1_ref, st1_ref, sc_ref, stsc_ref, xpad, cols) = refs
    else:
        x_ref, w1_ref, y1_ref, st1_ref, xpad, cols = refs

    ho = (h - 1) // stride + 1
    wo = (w - 1) // stride + 1
    m = tn * ho * wo
    rows = tn * ho

    # Build the zero-padded input tile in VMEM: halo-only zeroing + interior copy.
    # Load the input tile from VMEM exactly once; it is reused for the shortcut.
    x = x_ref[...]
    _halo_zero(xpad, tn, h, w, cin)
    xpad[:, 1:h + 1, 1:w + 1, :] = x

    acc1 = _im2col_conv(xpad, cols, w1_ref, n=tn, ho=ho, wo=wo, cin=cin,
                        stride=stride)
    st1_ref[...] = _partial_stats(acc1)
    _store_lane_dense(y1_ref, acc1, rows=rows, wo=wo, cout=cout)

    if has_shortcut:
        xs = x
        if stride > 1:
            xs = xs[:, ::stride, ::stride, :]
        sc = jnp.dot(xs.reshape(m, cin).astype(jnp.bfloat16), wsc_ref[...],
                     preferred_element_type=jnp.float32)
        stsc_ref[...] = _partial_stats(sc)
        _store_lane_dense(sc_ref, sc, rows=rows, wo=wo, cout=cout)


def _conv2_kernel(y1_ref, a1_ref, b1_ref, w2_ref, y2_ref, st2_ref, hpad, cols,
                  *, tn, ho, wo, cout):
    """BN1 (folded global scale/shift) + ReLU + conv2 + BN2 partial statistics."""
    rows = tn * ho
    h1 = jnp.maximum(y1_ref[...] * a1_ref[...] + b1_ref[...], 0.0)

    _halo_zero(hpad, tn, ho, wo, cout)
    for j in range(wo):
        col = h1[:, j * cout:(j + 1) * cout]
        hpad[:, 1:ho + 1, j + 1:j + 2, :] = col.reshape(tn, ho, 1, cout)

    acc2 = _im2col_conv(hpad, cols, w2_ref, n=tn, ho=ho, wo=wo, cin=cout, stride=1)
    st2_ref[...] = _partial_stats(acc2)
    _store_lane_dense(y2_ref, acc2, rows=rows, wo=wo, cout=cout)


def _residual_kernel(*refs, has_shortcut):
    """BN2 + shortcut BN (or plain identity) + residual add + ReLU, lane-dense."""
    if has_shortcut:
        y2_ref, a2_ref, b2_ref, sc_ref, asc_ref, bsc_ref, out_ref = refs
        sc = sc_ref[...] * asc_ref[...] + bsc_ref[...]
    else:
        y2_ref, a2_ref, b2_ref, sc_ref, out_ref = refs
        sc = sc_ref[...]
    out_ref[...] = jnp.maximum(y2_ref[...] * a2_ref[...] + b2_ref[...] + sc, 0.0)


# ----------------------------------------------------------------------- wrapper


def _bn_affine(partial, gamma, beta, count, wo):
    """Reduce per-tile (sum, sumsq) -> training-mode BN folded into per-channel
    scale/shift, tiled to the lane-dense (1, wo*C) layout."""
    s = jnp.sum(partial, axis=0)                          # (2, C), global reduction
    mean = s[0] / count
    var = jnp.maximum(s[1] / count - mean * mean, 0.0)    # biased (training) var
    scale = gamma * jax.lax.rsqrt(var + EPS)
    shift = beta - mean * scale
    c = gamma.shape[0]
    return (jnp.tile(scale, wo).reshape(1, wo * c),
            jnp.tile(shift, wo).reshape(1, wo * c))


def basic_residual_block(x_nhwc, w1_hwio, g1, b1, w2_hwio, g2, b2,
                         wsc_hwio=None, gsc=None, bsc=None, *, stride,
                         batch_tile=1):
    N, H, W, Cin = x_nhwc.shape
    Cout = w1_hwio.shape[-1]
    has_shortcut = (stride != 1) or (Cin != Cout)
    Ho = (H - 1) // stride + 1
    Wo = (W - 1) // stride + 1
    TN = batch_tile
    assert N % TN == 0, "batch_tile must divide the batch"
    G = N // TN
    M_total = N * Ho * Wo
    M_tile = TN * Ho * Wo
    rows_tile = TN * Ho
    lanes = Wo * Cout
    f32 = jnp.float32
    bf16 = jnp.bfloat16

    # 3x3 weights flattened to the im2col layout [9*C, Cout]; cast to bf16 once so
    # the MXU runs a single pass (f32 accumulation via preferred_element_type).
    w1 = w1_hwio.reshape(9 * Cin, Cout).astype(bf16)
    w2 = w2_hwio.reshape(9 * Cout, Cout).astype(bf16)

    row_spec = pl.BlockSpec((rows_tile, lanes), lambda b: (b, 0))
    vec_spec = pl.BlockSpec((1, lanes), lambda b: (0, 0))
    stat_spec = pl.BlockSpec((1, 2, Cout), lambda b: (b, 0, 0))
    row_shape = jax.ShapeDtypeStruct((N * Ho, lanes), f32)
    stat_shape = jax.ShapeDtypeStruct((G, 2, Cout), f32)

    # ---- pass A: conv1 (+ projection shortcut) + BN partial stats ----------------
    in_specs_a = [pl.BlockSpec((TN, H, W, Cin), lambda b: (b, 0, 0, 0)),
                  pl.BlockSpec((9 * Cin, Cout), lambda b: (0, 0))]
    args_a = [x_nhwc, w1]
    out_shapes_a = [row_shape, stat_shape]
    out_specs_a = [row_spec, stat_spec]
    if has_shortcut:
        wsc = wsc_hwio.reshape(Cin, Cout).astype(bf16)
        in_specs_a.append(pl.BlockSpec((Cin, Cout), lambda b: (0, 0)))
        args_a.append(wsc)
        out_shapes_a += [row_shape, stat_shape]
        out_specs_a += [row_spec, stat_spec]

    blocks_a = [((TN, H, W, Cin), f32), ((rows_tile, lanes), f32),
                ((rows_tile, lanes), f32), ((TN, H + 2, W + 2, Cin), f32),
                ((M_tile, 9 * Cin), f32)]
    res_a = pl.pallas_call(
        functools.partial(_conv1_kernel, tn=TN, h=H, w=W, cin=Cin, cout=Cout,
                          stride=stride, has_shortcut=has_shortcut),
        grid=(G,),
        in_specs=in_specs_a,
        out_specs=out_specs_a,
        out_shape=out_shapes_a,
        scratch_shapes=[pltpu.VMEM((TN, H + 2, W + 2, Cin), f32),
                        pltpu.VMEM((M_tile, 9 * Cin), f32)],
        compiler_params=_compiler_params(blocks_a),
    )(*args_a)
    if has_shortcut:
        y1_raw, st1, sc_raw, stsc = res_a
    else:
        y1_raw, st1 = res_a

    # Global (whole-batch, N*Ho*Wo) BN1 statistics -> folded scale / shift.
    a1s, a1t = _bn_affine(st1, g1, b1, M_total, Wo)

    # ---- pass B: BN1 + ReLU + conv2 + BN2 partial stats --------------------------
    blocks_b = [((rows_tile, lanes), f32), ((rows_tile, lanes), f32),
                ((TN, Ho + 2, Wo + 2, Cout), f32), ((M_tile, 9 * Cout), f32)]
    y2_raw, st2 = pl.pallas_call(
        functools.partial(_conv2_kernel, tn=TN, ho=Ho, wo=Wo, cout=Cout),
        grid=(G,),
        in_specs=[row_spec, vec_spec, vec_spec,
                  pl.BlockSpec((9 * Cout, Cout), lambda b: (0, 0))],
        out_specs=[row_spec, stat_spec],
        out_shape=[row_shape, stat_shape],
        scratch_shapes=[pltpu.VMEM((TN, Ho + 2, Wo + 2, Cout), f32),
                        pltpu.VMEM((M_tile, 9 * Cout), f32)],
        compiler_params=_compiler_params(blocks_b),
    )(y1_raw, a1s, a1t, w2)

    a2s, a2t = _bn_affine(st2, g2, b2, M_total, Wo)

    # ---- pass C: BN2 + shortcut BN/identity + residual add + ReLU ----------------
    in_specs_c = [row_spec, vec_spec, vec_spec, row_spec]
    args_c = [y2_raw, a2s, a2t]
    if has_shortcut:
        ascs, asct = _bn_affine(stsc, gsc, bsc, M_total, Wo)
        args_c += [sc_raw, ascs, asct]
        in_specs_c += [vec_spec, vec_spec]
    else:
        # identity shortcut: Cin==Cout, stride==1 -> already lane-dense in HBM
        args_c += [x_nhwc.reshape(N * Ho, lanes)]

    blocks_c = [((rows_tile, lanes), f32)] * 3
    out2d = pl.pallas_call(
        functools.partial(_residual_kernel, has_shortcut=has_shortcut),
        grid=(G,),
        in_specs=in_specs_c,
        out_specs=row_spec,
        out_shape=row_shape,
        compiler_params=_compiler_params(blocks_c),
    )(*args_c)

    # Lane-dense (N*Ho, Wo*Cout) -> NHWC for the caller (layout glue outside the
    # kernels; a real network would keep the lane-dense layout flowing).
    return out2d.reshape(N, Ho, Wo, Cout)


# --------------------------------------------------------------------- reference


def reference_nhwc(x, w1_hwio, g1, b1, w2_hwio, g2, b2, wsc_hwio, gsc, bsc,
                   *, stride, has_shortcut):
    dn = ('NHWC', 'HWIO', 'NHWC')
    hi = jax.lax.Precision.HIGHEST

    def bn(v, g, b):
        m = jnp.mean(v, axis=(0, 1, 2), keepdims=True)
        var = jnp.mean((v - m) ** 2, axis=(0, 1, 2), keepdims=True)
        return (v - m) * jax.lax.rsqrt(var + EPS) * g + b

    out = jax.nn.relu(bn(jax.lax.conv_general_dilated(
        x, w1_hwio, (stride, stride), ((1, 1), (1, 1)),
        dimension_numbers=dn, precision=hi), g1, b1))
    out = bn(jax.lax.conv_general_dilated(
        out, w2_hwio, (1, 1), ((1, 1), (1, 1)),
        dimension_numbers=dn, precision=hi), g2, b2)
    if has_shortcut:
        sc = bn(jax.lax.conv_general_dilated(
            x, wsc_hwio, (stride, stride), 'VALID',
            dimension_numbers=dn, precision=hi), gsc, bsc)
    else:
        sc = x
    return jax.nn.relu(out + sc)


if __name__ == "__main__":
    # Config 1: BasicResidualBlock(4, 8, stride=1)  -> 1x1-conv projection shortcut
    # Config 2: BasicResidualBlock(8, 8, stride=1)  -> identity shortcut
    configs = [(2, 4, 16, 16, 8, 1), (2, 8, 16, 16, 8, 1)]
    for idx, (N, Cin, H, W, Cout, stride) in enumerate(configs):
        has_sc = (stride != 1) or (Cin != Cout)
        key = jax.random.fold_in(jax.random.PRNGKey(0), idx)
        kx, k1, k2, k3, kg = jax.random.split(key, 5)

        # PyTorch-layout input (NCHW) and conv weights (OIHW) -> NHWC / HWIO.
        x_nchw = jax.random.normal(kx, (N, Cin, H, W), jnp.float32)
        x_nhwc = jnp.transpose(x_nchw, (0, 2, 3, 1))
        w1_oihw = jax.random.normal(k1, (Cout, Cin, 3, 3), jnp.float32) / np.sqrt(Cin * 9)
        w2_oihw = jax.random.normal(k2, (Cout, Cout, 3, 3), jnp.float32) / np.sqrt(Cout * 9)
        w1_hwio = jnp.transpose(w1_oihw, (2, 3, 1, 0))
        w2_hwio = jnp.transpose(w2_oihw, (2, 3, 1, 0))

        kg1, kb1, kg2, kb2, kg3, kb3 = jax.random.split(kg, 6)
        g1 = 1.0 + 0.1 * jax.random.normal(kg1, (Cout,), jnp.float32)
        b1 = 0.1 * jax.random.normal(kb1, (Cout,), jnp.float32)
        g2 = 1.0 + 0.1 * jax.random.normal(kg2, (Cout,), jnp.float32)
        b2 = 0.1 * jax.random.normal(kb2, (Cout,), jnp.float32)
        if has_sc:
            wsc_oihw = jax.random.normal(k3, (Cout, Cin, 1, 1), jnp.float32) / np.sqrt(Cin)
            wsc_hwio = jnp.transpose(wsc_oihw, (2, 3, 1, 0))
            gsc = 1.0 + 0.1 * jax.random.normal(kg3, (Cout,), jnp.float32)
            bsc = 0.1 * jax.random.normal(kb3, (Cout,), jnp.float32)
        else:
            wsc_hwio = gsc = bsc = None

        fwd = jax.jit(functools.partial(basic_residual_block, stride=stride,
                                        batch_tile=1))
        out = jax.block_until_ready(
            fwd(x_nhwc, w1_hwio, g1, b1, w2_hwio, g2, b2, wsc_hwio, gsc, bsc))

        ref = reference_nhwc(x_nhwc, w1_hwio, g1, b1, w2_hwio, g2, b2,
                             wsc_hwio, gsc, bsc, stride=stride,
                             has_shortcut=has_sc)
        # Kernel matmuls run single-pass bf16 on the MXU (f32 accumulation), the
        # reference runs full-f32 convs -> compare at bf16-appropriate tolerance.
        np.testing.assert_allclose(np.asarray(out), np.asarray(ref),
                                   rtol=2e-2, atol=2e-2)

    print("KERNEL_OK")
</pallas_src>

<mosaic_0001>
module attributes {stable_mosaic.version = 11 : i64} {
  func.func @_conv1_kernel(%arg0: i32, %arg1: memref<1x16x16x4xf32, #tpu.memory_space<vmem>>, %arg2: memref<36x8xbf16, #tpu.memory_space<vmem>>, %arg3: memref<4x8xbf16, #tpu.memory_space<vmem>>, %arg4: memref<16x128xf32, #tpu.memory_space<vmem>>, %arg5: memref<1x2x8xf32, #tpu.memory_space<vmem>>, %arg6: memref<16x128xf32, #tpu.memory_space<vmem>>, %arg7: memref<1x2x8xf32, #tpu.memory_space<vmem>>, %arg8: memref<1x18x18x4xf32, #tpu.memory_space<vmem>>, %arg9: memref<256x36xf32, #tpu.memory_space<vmem>>) attributes {dimension_semantics = [#tpu.dimension_semantics<parallel>], iteration_bounds = array<i64: 2>, scalar_prefetch = 0 : i64, scratch_operands = 2 : i64, tpu.core_type = #tpu.core_type<tc>, window_params = [{transform_indices = @transform_0, window_bounds = array<i64: 1, 16, 16, 4>}, {pipeline_mode = #tpu.pipeline_mode<synchronous>, transform_indices = @transform_1, window_bounds = array<i64: 36, 8>}, {pipeline_mode = #tpu.pipeline_mode<synchronous>, transform_indices = @transform_2, window_bounds = array<i64: 4, 8>}, {transform_indices = @transform_3, window_bounds = array<i64: 16, 128>}, {transform_indices = @transform_4, window_bounds = array<i64: 1, 2, 8>}, {transform_indices = @transform_5, window_bounds = array<i64: 16, 128>}, {transform_indices = @transform_6, window_bounds = array<i64: 1, 2, 8>}]} {
    %c0 = arith.constant 0 : index
    %c0_0 = arith.constant 0 : index
    %c0_1 = arith.constant 0 : index
    %c0_2 = arith.constant 0 : index
    %0 = vector.load %arg1[%c0, %c0_0, %c0_1, %c0_2] : memref<1x16x16x4xf32, #tpu.memory_space<vmem>>, vector<1x16x16x4xf32>
    %cst = arith.constant 0.000000e+00 : f32
    %1 = vector.broadcast %cst : f32 to vector<1x1x18x4xf32>
    %c0_3 = arith.constant 0 : index
    %c0_4 = arith.constant 0 : index
    %c0_5 = arith.constant 0 : index
    %c0_6 = arith.constant 0 : index
    %2 = vector.load %arg8[%c0_3, %c0_4, %c0_5, %c0_6] : memref<1x18x18x4xf32, #tpu.memory_space<vmem>>, vector<1x1x18x4xf32>
    tpu.vector_store %arg8[%c0_3, %c0_4, %c0_5, %c0_6], %1 {strides = array<i32>} : memref<1x18x18x4xf32, #tpu.memory_space<vmem>>, vector<1x1x18x4xf32>,
    %c0_7 = arith.constant 0 : index
    %c17 = arith.constant 17 : index
    %c0_8 = arith.constant 0 : index
    %c0_9 = arith.constant 0 : index
    %3 = vector.load %arg8[%c0_7, %c17, %c0_8, %c0_9] : memref<1x18x18x4xf32, #tpu.memory_space<vmem>>, vector<1x1x18x4xf32>
    tpu.vector_store %arg8[%c0_7, %c17, %c0_8, %c0_9], %1 {strides = array<i32>} : memref<1x18x18x4xf32, #tpu.memory_space<vmem>>, vector<1x1x18x4xf32>,
    %cst_10 = arith.constant 0.000000e+00 : f32
    %4 = vector.broadcast %cst_10 : f32 to vector<1x18x1x4xf32>
    %c0_11 = arith.constant 0 : index
    %c0_12 = arith.constant 0 : index
    %c0_13 = arith.constant 0 : index
    %c0_14 = arith.constant 0 : index
    %5 = vector.load %arg8[%c0_11, %c0_12, %c0_13, %c0_14] : memref<1x18x18x4xf32, #tpu.memory_space<vmem>>, vector<1x18x1x4xf32>
    tpu.vector_store %arg8[%c0_11, %c0_12, %c0_13, %c0_14], %4 {strides = array<i32>} : memref<1x18x18x4xf32, #tpu.memory_space<vmem>>, vector<1x18x1x4xf32>,
    %c0_15 = arith.constant 0 : index
    %c0_16 = arith.constant 0 : index
    %c17_17 = arith.constant 17 : index
    %c0_18 = arith.constant 0 : index
    %6 = vector.load %arg8[%c0_15, %c0_16, %c17_17, %c0_18] : memref<1x18x18x4xf32, #tpu.memory_space<vmem>>, vector<1x18x1x4xf32>
    tpu.vector_store %arg8[%c0_15, %c0_16, %c17_17, %c0_18], %4 {strides = array<i32>} : memref<1x18x18x4xf32, #tpu.memory_space<vmem>>, vector<1x18x1x4xf32>,
    %c0_19 = arith.constant 0 : index
    %c1 = arith.constant 1 : index
    %c1_20 = arith.constant 1 : index
    %c0_21 = arith.constant 0 : index
    %7 = vector.load %arg8[%c0_19, %c1, %c1_20, %c0_21] : memref<1x18x18x4xf32, #tpu.memory_space<vmem>>, vector<1x16x16x4xf32>
    tpu.vector_store %arg8[%c0_19, %c1, %c1_20, %c0_21], %0 {strides = array<i32>} : memref<1x18x18x4xf32, #tpu.memory_space<vmem>>, vector<1x16x16x4xf32>,
    %c0_22 = arith.constant 0 : index
    %c0_23 = arith.constant 0 : index
    %c0_24 = arith.constant 0 : index
    %c0_25 = arith.constant 0 : index
    %8 = vector.load %arg8[%c0_22, %c0_23, %c0_24, %c0_25] : memref<1x18x18x4xf32, #tpu.memory_space<vmem>>, vector<1x16x16x4xf32>
    %9 = vector.shape_cast %8 : vector<1x16x16x4xf32> to vector<256x4xf32>
    %c0_26 = arith.constant 0 : index
    %c0_27 = arith.constant 0 : index
    %10 = vector.load %arg9[%c0_26, %c0_27] : memref<256x36xf32, #tpu.memory_space<vmem>>, vector<256x4xf32>
    tpu.vector_store %arg9[%c0_26, %c0_27], %9 {strides = array<i32>} : memref<256x36xf32, #tpu.memory_space<vmem>>, vector<256x4xf32>,
    %c0_28 = arith.constant 0 : index
    %c0_29 = arith.constant 0 : index
    %c1_30 = arith.constant 1 : index
    %c0_31 = arith.constant 0 : index
    %11 = vector.load %arg8[%c0_28, %c0_29, %c1_30, %c0_31] : memref<1x18x18x4xf32, #tpu.memory_space<vmem>>, vector<1x16x16x4xf32>
    %12 = vector.shape_cast %11 : vector<1x16x16x4xf32> to vector<256x4xf32>
    %c0_32 = arith.constant 0 : index
    %c4 = arith.constant 4 : index
    %13 = vector.load %arg9[%c0_32, %c4] : memref<256x36xf32, #tpu.memory_space<vmem>>, vector<256x4xf32>
    tpu.vector_store %arg9[%c0_32, %c4], %12 {strides = array<i32>} : memref<256x36xf32, #tpu.memory_space<vmem>>, vector<256x4xf32>,
    %c0_33 = arith.constant 0 : index
    %c0_34 = arith.constant 0 : index
    %c2 = arith.constant 2 : index
    %c0_35 = arith.constant 0 : index
    %14 = vector.load %arg8[%c0_33, %c0_34, %c2, %c0_35] : memref<1x18x18x4xf32, #tpu.memory_space<vmem>>, vector<1x16x16x4xf32>
    %15 = vector.shape_cast %14 : vector<1x16x16x4xf32> to vector<256x4xf32>
    %c0_36 = arith.constant 0 : index
    %c8 = arith.constant 8 : index
    %16 = vector.load %arg9[%c0_36, %c8] : memref<256x36xf32, #tpu.memory_space<vmem>>, vector<256x4xf32>
    tpu.vector_store %arg9[%c0_36, %c8], %15 {strides = array<i32>} : memref<256x36xf32, #tpu.memory_space<vmem>>, vector<256x4xf32>,
    %c0_37 = arith.constant 0 : index
    %c1_38 = arith.constant 1 : index
    %c0_39 = arith.constant 0 : index
    %c0_40 = arith.constant 0 : index
    %17 = vector.load %arg8[%c0_37, %c1_38, %c0_39, %c0_40] : memref<1x18x18x4xf32, #tpu.memory_space<vmem>>, vector<1x16x16x4xf32>
    %18 = vector.shape_cast %17 : vector<1x16x16x4xf32> to vector<256x4xf32>
    %c0_41 = arith.constant 0 : index
    %c12 = arith.constant 12 : index
    %19 = vector.load %arg9[%c0_41, %c12] : memref<256x36xf32, #tpu.memory_space<vmem>>, vector<256x4xf32>
    tpu.vector_store %arg9[%c0_41, %c12], %18 {strides = array<i32>} : memref<256x36xf32, #tpu.memory_space<vmem>>, vector<256x4xf32>,
    %c0_42 = arith.constant 0 : index
    %c1_43 = arith.constant 1 : index
    %c1_44 = arith.constant 1 : index
    %c0_45 = arith.constant 0 : index
    %20 = vector.load %arg8[%c0_42, %c1_43, %c1_44, %c0_45] : memref<1x18x18x4xf32, #tpu.memory_space<vmem>>, vector<1x16x16x4xf32>
    %21 = vector.shape_cast %20 : vector<1x16x16x4xf32> to vector<256x4xf32>
    %c0_46 = arith.constant 0 : index
    %c16 = arith.constant 16 : index
    %22 = vector.load %arg9[%c0_46, %c16] : memref<256x36xf32, #tpu.memory_space<vmem>>, vector<256x4xf32>
    tpu.vector_store %arg9[%c0_46, %c16], %21 {strides = array<i32>} : memref<256x36xf32, #tpu.memory_space<vmem>>, vector<256x4xf32>,
    %c0_47 = arith.constant 0 : index
    %c1_48 = arith.constant 1 : index
    %c2_49 = arith.constant 2 : index
    %c0_50 = arith.constant 0 : index
    %23 = vector.load %arg8[%c0_47, %c1_48, %c2_49, %c0_50] : memref<1x18x18x4xf32, #tpu.memory_space<vmem>>, vector<1x16x16x4xf32>
    %24 = vector.shape_cast %23 : vector<1x16x16x4xf32> to vector<256x4xf32>
    %c0_51 = arith.constant 0 : index
    %c20 = arith.constant 20 : index
    %25 = vector.load %arg9[%c0_51, %c20] : memref<256x36xf32, #tpu.memory_space<vmem>>, vector<256x4xf32>
    tpu.vector_store %arg9[%c0_51, %c20], %24 {strides = array<i32>} : memref<256x36xf32, #tpu.memory_space<vmem>>, vector<256x4xf32>,
    %c0_52 = arith.constant 0 : index
    %c2_53 = arith.constant 2 : index
    %c0_54 = arith.constant 0 : index
    %c0_55 = arith.constant 0 : index
    %26 = vector.load %arg8[%c0_52, %c2_53, %c0_54, %c0_55] : memref<1x18x18x4xf32, #tpu.memory_space<vmem>>, vector<1x16x16x4xf32>
    %27 = vector.shape_cast %26 : vector<1x16x16x4xf32> to vector<256x4xf32>
    %c0_56 = arith.constant 0 : index
    %c24 = arith.constant 24 : index
    %28 = vector.load %arg9[%c0_56, %c24] : memref<256x36xf32, #tpu.memory_space<vmem>>, vector<256x4xf32>
    tpu.vector_store %arg9[%c0_56, %c24], %27 {strides = array<i32>} : memref<256x36xf32, #tpu.memory_space<vmem>>, vector<256x4xf32>,
    %c0_57 = arith.constant 0 : index
    %c2_58 = arith.constant 2 : index
    %c1_59 = arith.constant 1 : index
    %c0_60 = arith.constant 0 : index
    %29 = vector.load %arg8[%c0_57, %c2_58, %c1_59, %c0_60] : memref<1x18x18x4xf32, #tpu.memory_space<vmem>>, vector<1x16x16x4xf32>
    %30 = vector.shape_cast %29 : vector<1x16x16x4xf32> to vector<256x4xf32>
    %c0_61 = arith.constant 0 : index
    %c28 = arith.constant 28 : index
    %31 = vector.load %arg9[%c0_61, %c28] : memref<256x36xf32, #tpu.memory_space<vmem>>, vector<256x4xf32>
    tpu.vector_store %arg9[%c0_61, %c28], %30 {strides = array<i32>} : memref<256x36xf32, #tpu.memory_space<vmem>>, vector<256x4xf32>,
    %c0_62 = arith.constant 0 : index
    %c2_63 = arith.constant 2 : index
    %c2_64 = arith.constant 2 : index
    %c0_65 = arith.constant 0 : index
    %32 = vector.load %arg8[%c0_62, %c2_63, %c2_64, %c0_65] : memref<1x18x18x4xf32, #tpu.memory_space<vmem>>, vector<1x16x16x4xf32>
    %33 = vector.shape_cast %32 : vector<1x16x16x4xf32> to vector<256x4xf32>
    %c0_66 = arith.constant 0 : index
    %c32 = arith.constant 32 : index
    %34 = vector.load %arg9[%c0_66, %c32] : memref<256x36xf32, #tpu.memory_space<vmem>>, vector<256x4xf32>
    tpu.vector_store %arg9[%c0_66, %c32], %33 {strides = array<i32>} : memref<256x36xf32, #tpu.memory_space<vmem>>, vector<256x4xf32>,
    %c0_67 = arith.constant 0 : index
    %c0_68 = arith.constant 0 : index
    %35 = vector.load %arg9[%c0_67, %c0_68] : memref<256x36xf32, #tpu.memory_space<vmem>>, vector<256x36xf32>
    %36 = arith.truncf %35 : vector<256x36xf32> to vector<256x36xbf16>
    %c0_69 = arith.constant 0 : index
    %c0_70 = arith.constant 0 : index
    %37 = vector.load %arg2[%c0_69, %c0_70] : memref<36x8xbf16, #tpu.memory_space<vmem>>, vector<36x8xbf16>
    %cst_71 = arith.constant dense<0.000000e+00> : vector<256x8xf32>
    %38 = tpu.matmul %36, %37, %cst_71 {dimension_numbers = #tpu.dot_dimension_numbers<[1], [0], [0], [1], [0, 0, 1, 1], [], []>} : vector<256x36xbf16>, vector<36x8xbf16>, vector<256x8xf32> -> vector<256x8xf32>
    %cst_72 = arith.constant dense<0.000000e+00> : vector<8xf32>
    %39 = vector.multi_reduction <add>, %38, %cst_72 [0] : vector<256x8xf32> to vector<8xf32>
    %40 = vector.shape_cast %39 : vector<8xf32> to vector<1x8xf32>
    %41 = arith.mulf %38, %38 : vector<256x8xf32>
    %cst_73 = arith.constant dense<0.000000e+00> : vector<8xf32>
    %42 = vector.multi_reduction <add>, %41, %cst_73 [0] : vector<256x8xf32> to vector<8xf32>
    %43 = vector.shape_cast %42 : vector<8xf32> to vector<1x8xf32>
    %44 = tpu.concatenate %40, %43 in 0 : vector<1x8xf32>, vector<1x8xf32> -> vector<2x8xf32>
    %45 = vector.shape_cast %44 : vector<2x8xf32> to vector<1x2x8xf32>
    %c0_74 = arith.constant 0 : index
    %c0_75 = arith.constant 0 : index
    %c0_76 = arith.constant 0 : index
    %46 = vector.load %arg5[%c0_74, %c0_75, %c0_76] : memref<1x2x8xf32, #tpu.memory_space<vmem>>, vector<1x2x8xf32>
    tpu.vector_store %arg5[%c0_74, %c0_75, %c0_76], %45 {strides = array<i32>} : memref<1x2x8xf32, #tpu.memory_space<vmem>>, vector<1x2x8xf32>,
    %47 = vector.shape_cast %38 : vector<256x8xf32> to vector<16x16x8xf32>
    %48 = vector.extract_strided_slice %47 {offsets = [0, 0, 0], sizes = [16, 1, 8], strides = [1, 1, 1]} : vector<16x16x8xf32> to vector<16x1x8xf32>
    %49 = vector.shape_cast %48 : vector<16x1x8xf32> to vector<16x8xf32>
    %c0_77 = arith.constant 0 : index
    %c0_78 = arith.constant 0 : index
    %50 = vector.load %arg4[%c0_77, %c0_78] : memref<16x128xf32, #tpu.memory_space<vmem>>, vector<16x8xf32>
    tpu.vector_store %arg4[%c0_77, %c0_78], %49 {strides = array<i32>} : memref<16x128xf32, #tpu.memory_space<vmem>>, vector<16x8xf32>,
    %51 = vector.extract_strided_slice %47 {offsets = [0, 1, 0], sizes = [16, 1, 8], strides = [1, 1, 1]} : vector<16x16x8xf32> to vector<16x1x8xf32>
    %52 = vector.shape_cast %51 : vector<16x1x8xf32> to vector<16x8xf32>
    %c0_79 = arith.constant 0 : index
    %c8_80 = arith.constant 8 : index
    %53 = vector.load %arg4[%c0_79, %c8_80] : memref<16x128xf32, #tpu.memory_space<vmem>>, vector<16x8xf32>
    tpu.vector_store %arg4[%c0_79, %c8_80], %52 {strides = array<i32>} : memref<16x128xf32, #tpu.memory_space<vmem>>, vector<16x8xf32>,
    %54 = vector.extract_strided_slice %47 {offsets = [0, 2, 0], sizes = [16, 1, 8], strides = [1, 1, 1]} : vector<16x16x8xf32> to vector<16x1x8xf32>
    %55 = vector.shape_cast %54 : vector<16x1x8xf32> to vector<16x8xf32>
    %c0_81 = arith.constant 0 : index
    %c16_82 = arith.constant 16 : index
    %56 = vector.load %arg4[%c0_81, %c16_82] : memref<16x128xf32, #tpu.memory_space<vmem>>, vector<16x8xf32>
    tpu.vector_store %arg4[%c0_81, %c16_82], %55 {strides = array<i32>} : memref<16x128xf32, #tpu.memory_space<vmem>>, vector<16x8xf32>,
    %57 = vector.extract_strided_slice %47 {offsets = [0, 3, 0], sizes = [16, 1, 8], strides = [1, 1, 1]} : vector<16x16x8xf32> to vector<16x1x8xf32>
    %58 = vector.shape_cast %57 : vector<16x1x8xf32> to vector<16x8xf32>
    %c0_83 = arith.constant 0 : index
    %c24_84 = arith.constant 24 : index
    %59 = vector.load %arg4[%c0_83, %c24_84] : memref<16x128xf32, #tpu.memory_space<vmem>>, vector<16x8xf32>
    tpu.vector_store %arg4[%c0_83, %c24_84], %58 {strides = array<i32>} : memref<16x128xf32, #tpu.memory_space<vmem>>, vector<16x8xf32>,
    %60 = vector.extract_strided_slice %47 {offsets = [0, 4, 0], sizes = [16, 1, 8], strides = [1, 1, 1]} : vector<16x16x8xf32> to vector<16x1x8xf32>
    %61 = vector.shape_cast %60 : vector<16x1x8xf32> to vector<16x8xf32>
    %c0_85 = arith.constant 0 : index
    %c32_86 = arith.constant 32 : index
    %62 = vector.load %arg4[%c0_85, %c32_86] : memref<16x128xf32, #tpu.memory_space<vmem>>, vector<16x8xf32>
    tpu.vector_store %arg4[%c0_85, %c32_86], %61 {strides = array<i32>} : memref<16x128xf32, #tpu.memory_space<vmem>>, vector<16x8xf32>,
    %63 = vector.extract_strided_slice %47 {offsets = [0, 5, 0], sizes = [16, 1, 8], strides = [1, 1, 1]} : vector<16x16x8xf32> to vector<16x1x8xf32>
    %64 = vector.shape_cast %63 : vector<16x1x8xf32> to vector<16x8xf32>
    %c0_87 = arith.constant 0 : index
    %c40 = arith.constant 40 : index
    %65 = vector.load %arg4[%c0_87, %c40] : memref<16x128xf32, #tpu.memory_space<vmem>>, vector<16x8xf32>
    tpu.vector_store %arg4[%c0_87, %c40], %64 {strides = array<i32>} : memref<16x128xf32, #tpu.memory_space<vmem>>, vector<16x8xf32>,
    %66 = vector.extract_strided_slice %47 {offsets = [0, 6, 0], sizes = [16, 1, 8], strides = [1, 1, 1]} : vector<16x16x8xf32> to vector<16x1x8xf32>
    %67 = vector.shape_cast %66 : vector<16x1x8xf32> to vector<16x8xf32>
    %c0_88 = arith.constant 0 : index
    %c48 = arith.constant 48 : index
    %68 = vector.load %arg4[%c0_88, %c48] : memref<16x128xf32, #tpu.memory_space<vmem>>, vector<16x8xf32>
    tpu.vector_store %arg4[%c0_88, %c48], %67 {strides = array<i32>} : memref<16x128xf32, #tpu.memory_space<vmem>>, vector<16x8xf32>,
    %69 = vector.extract_strided_slice %47 {offsets = [0, 7, 0], sizes = [16, 1, 8], strides = [1, 1, 1]} : vector<16x16x8xf32> to vector<16x1x8xf32>
    %70 = vector.shape_cast %69 : vector<16x1x8xf32> to vector<16x8xf32>
    %c0_89 = arith.constant 0 : index
    %c56 = arith.constant 56 : index
    %71 = vector.load %arg4[%c0_89, %c56] : memref<16x128xf32, #tpu.memory_space<vmem>>, vector<16x8xf32>
    tpu.vector_store %arg4[%c0_89, %c56], %70 {strides = array<i32>} : memref<16x128xf32, #tpu.memory_space<vmem>>, vector<16x8xf32>,
    %72 = vector.extract_strided_slice %47 {offsets = [0, 8, 0], sizes = [16, 1, 8], strides = [1, 1, 1]} : vector<16x16x8xf32> to vector<16x1x8xf32>
    %73 = vector.shape_cast %72 : vector<16x1x8xf32> to vector<16x8xf32>
    %c0_90 = arith.constant 0 : index
    %c64 = arith.constant 64 : index
    %74 = vector.load %arg4[%c0_90, %c64] : memref<16x128xf32, #tpu.memory_space<vmem>>, vector<16x8xf32>
    tpu.vector_store %arg4[%c0_90, %c64], %73 {strides = array<i32>} : memref<16x128xf32, #tpu.memory_space<vmem>>, vector<16x8xf32>,
    %75 = vector.extract_strided_slice %47 {offsets = [0, 9, 0], sizes = [16, 1, 8], strides = [1, 1, 1]} : vector<16x16x8xf32> to vector<16x1x8xf32>
    %76 = vector.shape_cast %75 : vector<16x1x8xf32> to vector<16x8xf32>
    %c0_91 = arith.constant 0 : index
    %c72 = arith.constant 72 : index
    %77 = vector.load %arg4[%c0_91, %c72] : memref<16x128xf32, #tpu.memory_space<vmem>>, vector<16x8xf32>
    tpu.vector_store %arg4[%c0_91, %c72], %76 {strides = array<i32>} : memref<16x128xf32, #tpu.memory_space<vmem>>, vector<16x8xf32>,
    %78 = vector.extract_strided_slice %47 {offsets = [0, 10, 0], sizes = [16, 1, 8], strides = [1, 1, 1]} : vector<16x16x8xf32> to vector<16x1x8xf32>
    %79 = vector.shape_cast %78 : vector<16x1x8xf32> to vector<16x8xf32>
    %c0_92 = arith.constant 0 : index
    %c80 = arith.constant 80 : index
    %80 = vector.load %arg4[%c0_92, %c80] : memref<16x128xf32, #tpu.memory_space<vmem>>, vector<16x8xf32>
    tpu.vector_store %arg4[%c0_92, %c80], %79 {strides = array<i32>} : memref<16x128xf32, #tpu.memory_space<vmem>>, vector<16x8xf32>,
    %81 = vector.extract_strided_slice %47 {offsets = [0, 11, 0], sizes = [16, 1, 8], strides = [1, 1, 1]} : vector<16x16x8xf32> to vector<16x1x8xf32>
    %82 = vector.shape_cast %81 : vector<16x1x8xf32> to vector<16x8xf32>
    %c0_93 = arith.constant 0 : index
    %c88 = arith.constant 88 : index
    %83 = vector.load %arg4[%c0_93, %c88] : memref<16x128xf32, #tpu.memory_space<vmem>>, vector<16x8xf32>
    tpu.vector_store %arg4[%c0_93, %c88], %82 {strides = array<i32>} : memref<16x128xf32, #tpu.memory_space<vmem>>, vector<16x8xf32>,
    %84 = vector.extract_strided_slice %47 {offsets = [0, 12, 0], sizes = [16, 1, 8], strides = [1, 1, 1]} : vector<16x16x8xf32> to vector<16x1x8xf32>
    %85 = vector.shape_cast %84 : vector<16x1x8xf32> to vector<16x8xf32>
    %c0_94 = arith.constant 0 : index
    %c96 = arith.constant 96 : index
    %86 = vector.load %arg4[%c0_94, %c96] : memref<16x128xf32, #tpu.memory_space<vmem>>, vector<16x8xf32>
    tpu.vector_store %arg4[%c0_94, %c96], %85 {strides = array<i32>} : memref<16x128xf32, #tpu.memory_space<vmem>>, vector<16x8xf32>,
    %87 = vector.extract_strided_slice %47 {offsets = [0, 13, 0], sizes = [16, 1, 8], strides = [1, 1, 1]} : vector<16x16x8xf32> to vector<16x1x8xf32>
    %88 = vector.shape_cast %87 : vector<16x1x8xf32> to vector<16x8xf32>
    %c0_95 = arith.constant 0 : index
    %c104 = arith.constant 104 : index
    %89 = vector.load %arg4[%c0_95, %c104] : memref<16x128xf32, #tpu.memory_space<vmem>>, vector<16x8xf32>
    tpu.vector_store %arg4[%c0_95, %c104], %88 {strides = array<i32>} : memref<16x128xf32, #tpu.memory_space<vmem>>, vector<16x8xf32>,
    %90 = vector.extract_strided_slice %47 {offsets = [0, 14, 0], sizes = [16, 1, 8], strides = [1, 1, 1]} : vector<16x16x8xf32> to vector<16x1x8xf32>
    %91 = vector.shape_cast %90 : vector<16x1x8xf32> to vector<16x8xf32>
    %c0_96 = arith.constant 0 : index
    %c112 = arith.constant 112 : index
    %92 = vector.load %arg4[%c0_96, %c112] : memref<16x128xf32, #tpu.memory_space<vmem>>, vector<16x8xf32>
    tpu.vector_store %arg4[%c0_96, %c112], %91 {strides = array<i32>} : memref<16x128xf32, #tpu.memory_space<vmem>>, vector<16x8xf32>,
    %93 = vector.extract_strided_slice %47 {offsets = [0, 15, 0], sizes = [16, 1, 8], strides = [1, 1, 1]} : vector<16x16x8xf32> to vector<16x1x8xf32>
    %94 = vector.shape_cast %93 : vector<16x1x8xf32> to vector<16x8xf32>
    %c0_97 = arith.constant 0 : index
    %c120 = arith.constant 120 : index
    %95 = vector.load %arg4[%c0_97, %c120] : memref<16x128xf32, #tpu.memory_space<vmem>>, vector<16x8xf32>
    tpu.vector_store %arg4[%c0_97, %c120], %94 {strides = array<i32>} : memref<16x128xf32, #tpu.memory_space<vmem>>, vector<16x8xf32>,
    %96 = vector.shape_cast %0 : vector<1x16x16x4xf32> to vector<256x4xf32>
    %97 = arith.truncf %96 : vector<256x4xf32> to vector<256x4xbf16>
    %c0_98 = arith.constant 0 : index
    %c0_99 = arith.constant 0 : index
    %98 = vector.load %arg3[%c0_98, %c0_99] : memref<4x8xbf16, #tpu.memory_space<vmem>>, vector<4x8xbf16>
    %cst_100 = arith.constant dense<0.000000e+00> : vector<256x8xf32>
    %99 = tpu.matmul %97, %98, %cst_100 {dimension_numbers = #tpu.dot_dimension_numbers<[1], [0], [0], [1], [0, 0, 1, 1], [], []>} : vector<256x4xbf16>, vector<4x8xbf16>, vector<256x8xf32> -> vector<256x8xf32>
    %cst_101 = arith.constant dense<0.000000e+00> : vector<8xf32>
    %100 = vector.multi_reduction <add>, %99, %cst_101 [0] : vector<256x8xf32> to vector<8xf32>
    %101 = vector.shape_cast %100 : vector<8xf32> to vector<1x8xf32>
    %102 = arith.mulf %99, %99 : vector<256x8xf32>
    %cst_102 = arith.constant dense<0.000000e+00> : vector<8xf32>
    %103 = vector.multi_reduction <add>, %102, %cst_102 [0] : vector<256x8xf32> to vector<8xf32>
    %104 = vector.shape_cast %103 : vector<8xf32> to vector<1x8xf32>
    %105 = tpu.concatenate %101, %104 in 0 : vector<1x8xf32>, vector<1x8xf32> -> vector<2x8xf32>
    %106 = vector.shape_cast %105 : vector<2x8xf32> to vector<1x2x8xf32>
    %c0_103 = arith.constant 0 : index
    %c0_104 = arith.constant 0 : index
    %c0_105 = arith.constant 0 : index
    %107 = vector.load %arg7[%c0_103, %c0_104, %c0_105] : memref<1x2x8xf32, #tpu.memory_space<vmem>>, vector<1x2x8xf32>
    tpu.vector_store %arg7[%c0_103, %c0_104, %c0_105], %106 {strides = array<i32>} : memref<1x2x8xf32, #tpu.memory_space<vmem>>, vector<1x2x8xf32>,
    %108 = vector.shape_cast %99 : vector<256x8xf32> to vector<16x16x8xf32>
    %109 = vector.extract_strided_slice %108 {offsets = [0, 0, 0], sizes = [16, 1, 8], strides = [1, 1, 1]} : vector<16x16x8xf32> to vector<16x1x8xf32>
    %110 = vector.shape_cast %109 : vector<16x1x8xf32> to vector<16x8xf32>
    %c0_106 = arith.constant 0 : index
    %c0_107 = arith.constant 0 : index
    %111 = vector.load %arg6[%c0_106, %c0_107] : memref<16x128xf32, #tpu.memory_space<vmem>>, vector<16x8xf32>
    tpu.vector_store %arg6[%c0_106, %c0_107], %110 {strides = array<i32>} : memref<16x128xf32, #tpu.memory_space<vmem>>, vector<16x8xf32>,
    %112 = vector.extract_strided_slice %108 {offsets = [0, 1, 0], sizes = [16, 1, 8], strides = [1, 1, 1]} : vector<16x16x8xf32> to vector<16x1x8xf32>
    %113 = vector.shape_cast %112 : vector<16x1x8xf32> to vector<16x8xf32>
    %c0_108 = arith.constant 0 : index
    %c8_109 = arith.constant 8 : index
    %114 = vector.load %arg6[%c0_108, %c8_109] : memref<16x128xf32, #tpu.memory_space<vmem>>, vector<16x8xf32>
    tpu.vector_store %arg6[%c0_108, %c8_109], %113 {strides = array<i32>} : memref<16x128xf32, #tpu.memory_space<vmem>>, vector<16x8xf32>,
    %115 = vector.extract_strided_slice %108 {offsets = [0, 2, 0], sizes = [16, 1, 8], strides = [1, 1, 1]} : vector<16x16x8xf32> to vector<16x1x8xf32>
    %116 = vector.shape_cast %115 : vector<16x1x8xf32> to vector<16x8xf32>
    %c0_110 = arith.constant 0 : index
    %c16_111 = arith.constant 16 : index
    %117 = vector.load %arg6[%c0_110, %c16_111] : memref<16x128xf32, #tpu.memory_space<vmem>>, vector<16x8xf32>
    tpu.vector_store %arg6[%c0_110, %c16_111], %116 {strides = array<i32>} : memref<16x128xf32, #tpu.memory_space<vmem>>, vector<16x8xf32>,
    %118 = vector.extract_strided_slice %108 {offsets = [0, 3, 0], sizes = [16, 1, 8], strides = [1, 1, 1]} : vector<16x16x8xf32> to vector<16x1x8xf32>
    %119 = vector.shape_cast %118 : vector<16x1x8xf32> to vector<16x8xf32>
    %c0_112 = arith.constant 0 : index
    %c24_113 = arith.constant 24 : index
    %120 = vector.load %arg6[%c0_112, %c24_113] : memref<16x128xf32, #tpu.memory_space<vmem>>, vector<16x8xf32>
    tpu.vector_store %arg6[%c0_112, %c24_113], %119 {strides = array<i32>} : memref<16x128xf32, #tpu.memory_space<vmem>>, vector<16x8xf32>,
    %121 = vector.extract_strided_slice %108 {offsets = [0, 4, 0], sizes = [16, 1, 8], strides = [1, 1, 1]} : vector<16x16x8xf32> to vector<16x1x8xf32>
    %122 = vector.shape_cast %121 : vector<16x1x8xf32> to vector<16x8xf32>
    %c0_114 = arith.constant 0 : index
    %c32_115 = arith.constant 32 : index
    %123 = vector.load %arg6[%c0_114, %c32_115] : memref<16x128xf32, #tpu.memory_space<vmem>>, vector<16x8xf32>
    tpu.vector_store %arg6[%c0_114, %c32_115], %122 {strides = array<i32>} : memref<16x128xf32, #tpu.memory_space<vmem>>, vector<16x8xf32>,
    %124 = vector.extract_strided_slice %108 {offsets = [0, 5, 0], sizes = [16, 1, 8], strides = [1, 1, 1]} : vector<16x16x8xf32> to vector<16x1x8xf32>
    %125 = vector.shape_cast %124 : vector<16x1x8xf32> to vector<16x8xf32>
    %c0_116 = arith.constant 0 : index
    %c40_117 = arith.constant 40 : index
    %126 = vector.load %arg6[%c0_116, %c40_117] : memref<16x128xf32, #tpu.memory_space<vmem>>, vector<16x8xf32>
    tpu.vector_store %arg6[%c0_116, %c40_117], %125 {strides = array<i32>} : memref<16x128xf32, #tpu.memory_space<vmem>>, vector<16x8xf32>,
    %127 = vector.extract_strided_slice %108 {offsets = [0, 6, 0], sizes = [16, 1, 8], strides = [1, 1, 1]} : vector<16x16x8xf32> to vector<16x1x8xf32>
    %128 = vector.shape_cast %127 : vector<16x1x8xf32> to vector<16x8xf32>
    %c0_118 = arith.constant 0 : index
    %c48_119 = arith.constant 48 : index
    %129 = vector.load %arg6[%c0_118, %c48_119] : memref<16x128xf32, #tpu.memory_space<vmem>>, vector<16x8xf32>
    tpu.vector_store %arg6[%c0_118, %c48_119], %128 {strides = array<i32>} : memref<16x128xf32, #tpu.memory_space<vmem>>, vector<16x8xf32>,
    %130 = vector.extract_strided_slice %108 {offsets = [0, 7, 0], sizes = [16, 1, 8], strides = [1, 1, 1]} : vector<16x16x8xf32> to vector<16x1x8xf32>
    %131 = vector.shape_cast %130 : vector<16x1x8xf32> to vector<16x8xf32>
    %c0_120 = arith.constant 0 : index
    %c56_121 = arith.constant 56 : index
    %132 = vector.load %arg6[%c0_120, %c56_121] : memref<16x128xf32, #tpu.memory_space<vmem>>, vector<16x8xf32>
    tpu.vector_store %arg6[%c0_120, %c56_121], %131 {strides = array<i32>} : memref<16x128xf32, #tpu.memory_space<vmem>>, vector<16x8xf32>,
    %133 = vector.extract_strided_slice %108 {offsets = [0, 8, 0], sizes = [16, 1, 8], strides = [1, 1, 1]} : vector<16x16x8xf32> to vector<16x1x8xf32>
    %134 = vector.shape_cast %133 : vector<16x1x8xf32> to vector<16x8xf32>
    %c0_122 = arith.constant 0 : index
    %c64_123 = arith.constant 64 : index
    %135 = vector.load %arg6[%c0_122, %c64_123] : memref<16x128xf32, #tpu.memory_space<vmem>>, vector<16x8xf32>
    tpu.vector_store %arg6[%c0_122, %c64_123], %134 {strides = array<i32>} : memref<16x128xf32, #tpu.memory_space<vmem>>, vector<16x8xf32>,
    %136 = vector.extract_strided_slice %108 {offsets = [0, 9, 0], sizes = [16, 1, 8], strides = [1, 1, 1]} : vector<16x16x8xf32> to vector<16x1x8xf32>
    %137 = vector.shape_cast %136 : vector<16x1x8xf32> to vector<16x8xf32>
    %c0_124 = arith.constant 0 : index
    %c72_125 = arith.constant 72 : index
    %138 = vector.load %arg6[%c0_124, %c72_125] : memref<16x128xf32, #tpu.memory_space<vmem>>, vector<16x8xf32>
    tpu.vector_store %arg6[%c0_124, %c72_125], %137 {strides = array<i32>} : memref<16x128xf32, #tpu.memory_space<vmem>>, vector<16x8xf32>,
    %139 = vector.extract_strided_slice %108 {offsets = [0, 10, 0], sizes = [16, 1, 8], strides = [1, 1, 1]} : vector<16x16x8xf32> to vector<16x1x8xf32>
    %140 = vector.shape_cast %139 : vector<16x1x8xf32> to vector<16x8xf32>
    %c0_126 = arith.constant 0 : index
    %c80_127 = arith.constant 80 : index
    %141 = vector.load %arg6[%c0_126, %c80_127] : memref<16x128xf32, #tpu.memory_space<vmem>>, vector<16x8xf32>
    tpu.vector_store %arg6[%c0_126, %c80_127], %140 {strides = array<i32>} : memref<16x128xf32, #tpu.memory_space<vmem>>, vector<16x8xf32>,
    %142 = vector.extract_strided_slice %108 {offsets = [0, 11, 0], sizes = [16, 1, 8], strides = [1, 1, 1]} : vector<16x16x8xf32> to vector<16x1x8xf32>
    %143 = vector.shape_cast %142 : vector<16x1x8xf32> to vector<16x8xf32>
    %c0_128 = arith.constant 0 : index
    %c88_129 = arith.constant 88 : index
    %144 = vector.load %arg6[%c0_128, %c88_129] : memref<16x128xf32, #tpu.memory_space<vmem>>, vector<16x8xf32>
    tpu.vector_store %arg6[%c0_128, %c88_129], %143 {strides = array<i32>} : memref<16x128xf32, #tpu.memory_space<vmem>>, vector<16x8xf32>,
    %145 = vector.extract_strided_slice %108 {offsets = [0, 12, 0], sizes = [16, 1, 8], strides = [1, 1, 1]} : vector<16x16x8xf32> to vector<16x1x8xf32>
    %146 = vector.shape_cast %145 : vector<16x1x8xf32> to vector<16x8xf32>
    %c0_130 = arith.constant 0 : index
    %c96_131 = arith.constant 96 : index
    %147 = vector.load %arg6[%c0_130, %c96_131] : memref<16x128xf32, #tpu.memory_space<vmem>>, vector<16x8xf32>
    tpu.vector_store %arg6[%c0_130, %c96_131], %146 {strides = array<i32>} : memref<16x128xf32, #tpu.memory_space<vmem>>, vector<16x8xf32>,
    %148 = vector.extract_strided_slice %108 {offsets = [0, 13, 0], sizes = [16, 1, 8], strides = [1, 1, 1]} : vector<16x16x8xf32> to vector<16x1x8xf32>
    %149 = vector.shape_cast %148 : vector<16x1x8xf32> to vector<16x8xf32>
    %c0_132 = arith.constant 0 : index
    %c104_133 = arith.constant 104 : index
    %150 = vector.load %arg6[%c0_132, %c104_133] : memref<16x128xf32, #tpu.memory_space<vmem>>, vector<16x8xf32>
    tpu.vector_store %arg6[%c0_132, %c104_133], %149 {strides = array<i32>} : memref<16x128xf32, #tpu.memory_space<vmem>>, vector<16x8xf32>,
    %151 = vector.extract_strided_slice %108 {offsets = [0, 14, 0], sizes = [16, 1, 8], strides = [1, 1, 1]} : vector<16x16x8xf32> to vector<16x1x8xf32>
    %152 = vector.shape_cast %151 : vector<16x1x8xf32> to vector<16x8xf32>
    %c0_134 = arith.constant 0 : index
    %c112_135 = arith.constant 112 : index
    %153 = vector.load %arg6[%c0_134, %c112_135] : memref<16x128xf32, #tpu.memory_space<vmem>>, vector<16x8xf32>
    tpu.vector_store %arg6[%c0_134, %c112_135], %152 {strides = array<i32>} : memref<16x128xf32, #tpu.memory_space<vmem>>, vector<16x8xf32>,
    %154 = vector.extract_strided_slice %108 {offsets = [0, 15, 0], sizes = [16, 1, 8], strides = [1, 1, 1]} : vector<16x16x8xf32> to vector<16x1x8xf32>
    %155 = vector.shape_cast %154 : vector<16x1x8xf32> to vector<16x8xf32>
    %c0_136 = arith.constant 0 : index
    %c120_137 = arith.constant 120 : index
    %156 = vector.load %arg6[%c0_136, %c120_137] : memref<16x128xf32, #tpu.memory_space<vmem>>, vector<16x8xf32>
    tpu.vector_store %arg6[%c0_136, %c120_137], %155 {strides = array<i32>} : memref<16x128xf32, #tpu.memory_space<vmem>>, vector<16x8xf32>,
    return
  }
  func.func @transform_0(%arg0: i32) -> (i32, i32, i32, i32) {
    %c0_i32 = arith.constant 0 : i32
    %c0_i32_0 = arith.constant 0 : i32
    %c0_i32_1 = arith.constant 0 : i32
    %c0_i32_2 = arith.constant 0 : i32
    return %arg0, %c0_i32, %c0_i32_0, %c0_i32_1 : i32, i32, i32, i32
  }
  func.func @transform_1(%arg0: i32) -> (i32, i32) {
    %c0_i32 = arith.constant 0 : i32
    %c0_i32_0 = arith.constant 0 : i32
    %c0_i32_1 = arith.constant 0 : i32
    return %c0_i32, %c0_i32_0 : i32, i32
  }
  func.func @transform_2(%arg0: i32) -> (i32, i32) {
    %c0_i32 = arith.constant 0 : i32
    %c0_i32_0 = arith.constant 0 : i32
    %c0_i32_1 = arith.constant 0 : i32
    return %c0_i32, %c0_i32_0 : i32, i32
  }
  func.func @transform_3(%arg0: i32) -> (i32, i32) {
    %c0_i32 = arith.constant 0 : i32
    %c0_i32_0 = arith.constant 0 : i32
    return %arg0, %c0_i32 : i32, i32
  }
  func.func @transform_4(%arg0: i32) -> (i32, i32, i32) {
    %c0_i32 = arith.constant 0 : i32
    %c0_i32_0 = arith.constant 0 : i32
    %c0_i32_1 = arith.constant 0 : i32
    return %arg0, %c0_i32, %c0_i32_0 : i32, i32, i32
  }
  func.func @transform_5(%arg0: i32) -> (i32, i32) {
    %c0_i32 = arith.constant 0 : i32
    %c0_i32_0 = arith.constant 0 : i32
    return %arg0, %c0_i32 : i32, i32
  }
  func.func @transform_6(%arg0: i32) -> (i32, i32, i32) {
    %c0_i32 = arith.constant 0 : i32
    %c0_i32_0 = arith.constant 0 : i32
    %c0_i32_1 = arith.constant 0 : i32
    return %arg0, %c0_i32, %c0_i32_0 : i32, i32, i32
  }
}

module attributes {stable_mosaic.version = 11 : i64} {
  func.func @_residual_kernel(%arg0: i32, %arg1: memref<16x128xf32, #tpu.memory_space<vmem>>, %arg2: memref<1x128xf32, #tpu.memory_space<vmem>>, %arg3: memref<1x128xf32, #tpu.memory_space<vmem>>, %arg4: memref<16x128xf32, #tpu.memory_space<vmem>>, %arg5: memref<1x128xf32, #tpu.memory_space<vmem>>, %arg6: memref<1x128xf32, #tpu.memory_space<vmem>>, %arg7: memref<16x128xf32, #tpu.memory_space<vmem>>) attributes {dimension_semantics = [#tpu.dimension_semantics<parallel>], iteration_bounds = array<i64: 2>, scalar_prefetch = 0 : i64, scratch_operands = 0 : i64, tpu.core_type = #tpu.core_type<tc>, window_params = [{transform_indices = @transform_0, window_bounds = array<i64: 16, 128>}, {pipeline_mode = #tpu.pipeline_mode<synchronous>, transform_indices = @transform_1, window_bounds = array<i64: 1, 128>}, {pipeline_mode = #tpu.pipeline_mode<synchronous>, transform_indices = @transform_2, window_bounds = array<i64: 1, 128>}, {transform_indices = @transform_3, window_bounds = array<i64: 16, 128>}, {pipeline_mode = #tpu.pipeline_mode<synchronous>, transform_indices = @transform_4, window_bounds = array<i64: 1, 128>}, {pipeline_mode = #tpu.pipeline_mode<synchronous>, transform_indices = @transform_5, window_bounds = array<i64: 1, 128>}, {transform_indices = @transform_6, window_bounds = array<i64: 16, 128>}]} {
    %c0 = arith.constant 0 : index
    %c0_0 = arith.constant 0 : index
    %0 = vector.load %arg4[%c0, %c0_0] : memref<16x128xf32, #tpu.memory_space<vmem>>, vector<16x128xf32>
    %c0_1 = arith.constant 0 : index
    %c0_2 = arith.constant 0 : index
    %1 = vector.load %arg5[%c0_1, %c0_2] : memref<1x128xf32, #tpu.memory_space<vmem>>, vector<1x128xf32>
    %2 = vector.broadcast %1 : vector<1x128xf32> to vector<16x128xf32>
    %3 = arith.mulf %0, %2 : vector<16x128xf32>
    %c0_3 = arith.constant 0 : index
    %c0_4 = arith.constant 0 : index
    %4 = vector.load %arg6[%c0_3, %c0_4] : memref<1x128xf32, #tpu.memory_space<vmem>>, vector<1x128xf32>
    %5 = vector.broadcast %4 : vector<1x128xf32> to vector<16x128xf32>
    %6 = arith.addf %3, %5 : vector<16x128xf32>
    %c0_5 = arith.constant 0 : index
    %c0_6 = arith.constant 0 : index
    %7 = vector.load %arg1[%c0_5, %c0_6] : memref<16x128xf32, #tpu.memory_space<vmem>>, vector<16x128xf32>
    %c0_7 = arith.constant 0 : index
    %c0_8 = arith.constant 0 : index
    %8 = vector.load %arg2[%c0_7, %c0_8] : memref<1x128xf32, #tpu.memory_space<vmem>>, vector<1x128xf32>
    %9 = vector.broadcast %8 : vector<1x128xf32> to vector<16x128xf32>
    %10 = arith.mulf %7, %9 : vector<16x128xf32>
    %c0_9 = arith.constant 0 : index
    %c0_10 = arith.constant 0 : index
    %11 = vector.load %arg3[%c0_9, %c0_10] : memref<1x128xf32, #tpu.memory_space<vmem>>, vector<1x128xf32>
    %12 = vector.broadcast %11 : vector<1x128xf32> to vector<16x128xf32>
    %13 = arith.addf %10, %12 : vector<16x128xf32>
    %14 = arith.addf %13, %6 : vector<16x128xf32>
    %cst = arith.constant 0.000000e+00 : f32
    %15 = vector.broadcast %cst : f32 to vector<16x128xf32>
    %16 = arith.maximumf %14, %15 : vector<16x128xf32>
    %c0_11 = arith.constant 0 : index
    %c0_12 = arith.constant 0 : index
    %17 = vector.load %arg7[%c0_11, %c0_12] : memref<16x128xf32, #tpu.memory_space<vmem>>, vector<16x128xf32>
    tpu.vector_store %arg7[%c0_11, %c0_12], %16 {strides = array<i32>} : memref<16x128xf32, #tpu.memory_space<vmem>>, vector<16x128xf32>,
    return
  }
  func.func @transform_0(%arg0: i32) -> (i32, i32) {
    %c0_i32 = arith.constant 0 : i32
    %c0_i32_0 = arith.constant 0 : i32
    return %arg0, %c0_i32 : i32, i32
  }
  func.func @transform_1(%arg0: i32) -> (i32, i32) {
    %c0_i32 = arith.constant 0 : i32
    %c0_i32_0 = arith.constant 0 : i32
    %c0_i32_1 = arith.constant 0 : i32
    return %c0_i32, %c0_i32_0 : i32, i32
  }
  func.func @transform_2(%arg0: i32) -> (i32, i32) {
    %c0_i32 = arith.constant 0 : i32
    %c0_i32_0 = arith.constant 0 : i32
    %c0_i32_1 = arith.constant 0 : i32
    return %c0_i32, %c0_i32_0 : i32, i32
  }
  func.func @transform_3(%arg0: i32) -> (i32, i32) {
    %c0_i32 = arith.constant 0 : i32
    %c0_i32_0 = arith.constant 0 : i32
    return %arg0, %c0_i32 : i32, i32
  }
  func.func @transform_4(%arg0: i32) -> (i32, i32) {
    %c0_i32 = arith.constant 0 : i32
    %c0_i32_0 = arith.constant 0 : i32
    %c0_i32_1 = arith.constant 0 : i32
    return %c0_i32, %c0_i32_0 : i32, i32
  }
  func.func @transform_5(%arg0: i32) -> (i32, i32) {
    %c0_i32 = arith.constant 0 : i32
    %c0_i32_0 = arith.constant 0 : i32
    %c0_i32_1 = arith.constant 0 : i32
    return %c0_i32, %c0_i32_0 : i32, i32
  }
  func.func @transform_6(%arg0: i32) -> (i32, i32) {
    %c0_i32 = arith.constant 0 : i32
    %c0_i32_0 = arith.constant 0 : i32
    return %arg0, %c0_i32 : i32, i32
  }
}

module attributes {stable_mosaic.version = 11 : i64} {
  func.func @_conv2_kernel(%arg0: i32, %arg1: memref<16x128xf32, #tpu.memory_space<vmem>>, %arg2: memref<1x128xf32, #tpu.memory_space<vmem>>, %arg3: memref<1x128xf32, #tpu.memory_space<vmem>>, %arg4: memref<72x8xbf16, #tpu.memory_space<vmem>>, %arg5: memref<16x128xf32, #tpu.memory_space<vmem>>, %arg6: memref<1x2x8xf32, #tpu.memory_space<vmem>>, %arg7: memref<1x18x18x8xf32, #tpu.memory_space<vmem>>, %arg8: memref<256x72xf32, #tpu.memory_space<vmem>>) attributes {dimension_semantics = [#tpu.dimension_semantics<parallel>], iteration_bounds = array<i64: 2>, scalar_prefetch = 0 : i64, scratch_operands = 2 : i64, tpu.core_type = #tpu.core_type<tc>, window_params = [{transform_indices = @transform_0, window_bounds = array<i64: 16, 128>}, {pipeline_mode = #tpu.pipeline_mode<synchronous>, transform_indices = @transform_1, window_bounds = array<i64: 1, 128>}, {pipeline_mode = #tpu.pipeline_mode<synchronous>, transform_indices = @transform_2, window_bounds = array<i64: 1, 128>}, {pipeline_mode = #tpu.pipeline_mode<synchronous>, transform_indices = @transform_3, window_bounds = array<i64: 72, 8>}, {transform_indices = @transform_4, window_bounds = array<i64: 16, 128>}, {transform_indices = @transform_5, window_bounds = array<i64: 1, 2, 8>}]} {
    %c0 = arith.constant 0 : index
    %c0_0 = arith.constant 0 : index
    %0 = vector.load %arg1[%c0, %c0_0] : memref<16x128xf32, #tpu.memory_space<vmem>>, vector<16x128xf32>
    %c0_1 = arith.constant 0 : index
    %c0_2 = arith.constant 0 : index
    %1 = vector.load %arg2[%c0_1, %c0_2] : memref<1x128xf32, #tpu.memory_space<vmem>>, vector<1x128xf32>
    %2 = vector.broadcast %1 : vector<1x128xf32> to vector<16x128xf32>
    %3 = arith.mulf %0, %2 : vector<16x128xf32>
    %c0_3 = arith.constant 0 : index
    %c0_4 = arith.constant 0 : index
    %4 = vector.load %arg3[%c0_3, %c0_4] : memref<1x128xf32, #tpu.memory_space<vmem>>, vector<1x128xf32>
    %5 = vector.broadcast %4 : vector<1x128xf32> to vector<16x128xf32>
    %6 = arith.addf %3, %5 : vector<16x128xf32>
    %cst = arith.constant 0.000000e+00 : f32
    %7 = vector.broadcast %cst : f32 to vector<16x128xf32>
    %8 = arith.maximumf %6, %7 : vector<16x128xf32>
    %cst_5 = arith.constant 0.000000e+00 : f32
    %9 = vector.broadcast %cst_5 : f32 to vector<1x1x18x8xf32>
    %c0_6 = arith.constant 0 : index
    %c0_7 = arith.constant 0 : index
    %c0_8 = arith.constant 0 : index
    %c0_9 = arith.constant 0 : index
    %10 = vector.load %arg7[%c0_6, %c0_7, %c0_8, %c0_9] : memref<1x18x18x8xf32, #tpu.memory_space<vmem>>, vector<1x1x18x8xf32>
    tpu.vector_store %arg7[%c0_6, %c0_7, %c0_8, %c0_9], %9 {strides = array<i32>} : memref<1x18x18x8xf32, #tpu.memory_space<vmem>>, vector<1x1x18x8xf32>,
    %c0_10 = arith.constant 0 : index
    %c17 = arith.constant 17 : index
    %c0_11 = arith.constant 0 : index
    %c0_12 = arith.constant 0 : index
    %11 = vector.load %arg7[%c0_10, %c17, %c0_11, %c0_12] : memref<1x18x18x8xf32, #tpu.memory_space<vmem>>, vector<1x1x18x8xf32>
    tpu.vector_store %arg7[%c0_10, %c17, %c0_11, %c0_12], %9 {strides = array<i32>} : memref<1x18x18x8xf32, #tpu.memory_space<vmem>>, vector<1x1x18x8xf32>,
    %cst_13 = arith.constant 0.000000e+00 : f32
    %12 = vector.broadcast %cst_13 : f32 to vector<1x18x1x8xf32>
    %c0_14 = arith.constant 0 : index
    %c0_15 = arith.constant 0 : index
    %c0_16 = arith.constant 0 : index
    %c0_17 = arith.constant 0 : index
    %13 = vector.load %arg7[%c0_14, %c0_15, %c0_16, %c0_17] : memref<1x18x18x8xf32, #tpu.memory_space<vmem>>, vector<1x18x1x8xf32>
    tpu.vector_store %arg7[%c0_14, %c0_15, %c0_16, %c0_17], %12 {strides = array<i32>} : memref<1x18x18x8xf32, #tpu.memory_space<vmem>>, vector<1x18x1x8xf32>,
    %c0_18 = arith.constant 0 : index
    %c0_19 = arith.constant 0 : index
    %c17_20 = arith.constant 17 : index
    %c0_21 = arith.constant 0 : index
    %14 = vector.load %arg7[%c0_18, %c0_19, %c17_20, %c0_21] : memref<1x18x18x8xf32, #tpu.memory_space<vmem>>, vector<1x18x1x8xf32>
    tpu.vector_store %arg7[%c0_18, %c0_19, %c17_20, %c0_21], %12 {strides = array<i32>} : memref<1x18x18x8xf32, #tpu.memory_space<vmem>>, vector<1x18x1x8xf32>,
    %15 = vector.extract_strided_slice %8 {offsets = [0, 0], sizes = [16, 8], strides = [1, 1]} : vector<16x128xf32> to vector<16x8xf32>
    %16 = vector.shape_cast %15 : vector<16x8xf32> to vector<1x16x1x8xf32>
    %c0_22 = arith.constant 0 : index
    %c1 = arith.constant 1 : index
    %c1_23 = arith.constant 1 : index
    %c0_24 = arith.constant 0 : index
    %17 = vector.load %arg7[%c0_22, %c1, %c1_23, %c0_24] : memref<1x18x18x8xf32, #tpu.memory_space<vmem>>, vector<1x16x1x8xf32>
    tpu.vector_store %arg7[%c0_22, %c1, %c1_23, %c0_24], %16 {strides = array<i32>} : memref<1x18x18x8xf32, #tpu.memory_space<vmem>>, vector<1x16x1x8xf32>,
    %18 = vector.extract_strided_slice %8 {offsets = [0, 8], sizes = [16, 8], strides = [1, 1]} : vector<16x128xf32> to vector<16x8xf32>
    %19 = vector.shape_cast %18 : vector<16x8xf32> to vector<1x16x1x8xf32>
    %c0_25 = arith.constant 0 : index
    %c1_26 = arith.constant 1 : index
    %c2 = arith.constant 2 : index
    %c0_27 = arith.constant 0 : index
    %20 = vector.load %arg7[%c0_25, %c1_26, %c2, %c0_27] : memref<1x18x18x8xf32, #tpu.memory_space<vmem>>, vector<1x16x1x8xf32>
    tpu.vector_store %arg7[%c0_25, %c1_26, %c2, %c0_27], %19 {strides = array<i32>} : memref<1x18x18x8xf32, #tpu.memory_space<vmem>>, vector<1x16x1x8xf32>,
    %21 = vector.extract_strided_slice %8 {offsets = [0, 16], sizes = [16, 8], strides = [1, 1]} : vector<16x128xf32> to vector<16x8xf32>
    %22 = vector.shape_cast %21 : vector<16x8xf32> to vector<1x16x1x8xf32>
    %c0_28 = arith.constant 0 : index
    %c1_29 = arith.constant 1 : index
    %c3 = arith.constant 3 : index
    %c0_30 = arith.constant 0 : index
    %23 = vector.load %arg7[%c0_28, %c1_29, %c3, %c0_30] : memref<1x18x18x8xf32, #tpu.memory_space<vmem>>, vector<1x16x1x8xf32>
    tpu.vector_store %arg7[%c0_28, %c1_29, %c3, %c0_30], %22 {strides = array<i32>} : memref<1x18x18x8xf32, #tpu.memory_space<vmem>>, vector<1x16x1x8xf32>,
    %24 = vector.extract_strided_slice %8 {offsets = [0, 24], sizes = [16, 8], strides = [1, 1]} : vector<16x128xf32> to vector<16x8xf32>
    %25 = vector.shape_cast %24 : vector<16x8xf32> to vector<1x16x1x8xf32>
    %c0_31 = arith.constant 0 : index
    %c1_32 = arith.constant 1 : index
    %c4 = arith.constant 4 : index
    %c0_33 = arith.constant 0 : index
    %26 = vector.load %arg7[%c0_31, %c1_32, %c4, %c0_33] : memref<1x18x18x8xf32, #tpu.memory_space<vmem>>, vector<1x16x1x8xf32>
    tpu.vector_store %arg7[%c0_31, %c1_32, %c4, %c0_33], %25 {strides = array<i32>} : memref<1x18x18x8xf32, #tpu.memory_space<vmem>>, vector<1x16x1x8xf32>,
    %27 = vector.extract_strided_slice %8 {offsets = [0, 32], sizes = [16, 8], strides = [1, 1]} : vector<16x128xf32> to vector<16x8xf32>
    %28 = vector.shape_cast %27 : vector<16x8xf32> to vector<1x16x1x8xf32>
    %c0_34 = arith.constant 0 : index
    %c1_35 = arith.constant 1 : index
    %c5 = arith.constant 5 : index
    %c0_36 = arith.constant 0 : index
    %29 = vector.load %arg7[%c0_34, %c1_35, %c5, %c0_36] : memref<1x18x18x8xf32, #tpu.memory_space<vmem>>, vector<1x16x1x8xf32>
    tpu.vector_store %arg7[%c0_34, %c1_35, %c5, %c0_36], %28 {strides = array<i32>} : memref<1x18x18x8xf32, #tpu.memory_space<vmem>>, vector<1x16x1x8xf32>,
    %30 = vector.extract_strided_slice %8 {offsets = [0, 40], sizes = [16, 8], strides = [1, 1]} : vector<16x128xf32> to vector<16x8xf32>
    %31 = vector.shape_cast %30 : vector<16x8xf32> to vector<1x16x1x8xf32>
    %c0_37 = arith.constant 0 : index
    %c1_38 = arith.constant 1 : index
    %c6 = arith.constant 6 : index
    %c0_39 = arith.constant 0 : index
    %32 = vector.load %arg7[%c0_37, %c1_38, %c6, %c0_39] : memref<1x18x18x8xf32, #tpu.memory_space<vmem>>, vector<1x16x1x8xf32>
    tpu.vector_store %arg7[%c0_37, %c1_38, %c6, %c0_39], %31 {strides = array<i32>} : memref<1x18x18x8xf32, #tpu.memory_space<vmem>>, vector<1x16x1x8xf32>,
    %33 = vector.extract_strided_slice %8 {offsets = [0, 48], sizes = [16, 8], strides = [1, 1]} : vector<16x128xf32> to vector<16x8xf32>
    %34 = vector.shape_cast %33 : vector<16x8xf32> to vector<1x16x1x8xf32>
    %c0_40 = arith.constant 0 : index
    %c1_41 = arith.constant 1 : index
    %c7 = arith.constant 7 : index
    %c0_42 = arith.constant 0 : index
    %35 = vector.load %arg7[%c0_40, %c1_41, %c7, %c0_42] : memref<1x18x18x8xf32, #tpu.memory_space<vmem>>, vector<1x16x1x8xf32>
    tpu.vector_store %arg7[%c0_40, %c1_41, %c7, %c0_42], %34 {strides = array<i32>} : memref<1x18x18x8xf32, #tpu.memory_space<vmem>>, vector<1x16x1x8xf32>,
    %36 = vector.extract_strided_slice %8 {offsets = [0, 56], sizes = [16, 8], strides = [1, 1]} : vector<16x128xf32> to vector<16x8xf32>
    %37 = vector.shape_cast %36 : vector<16x8xf32> to vector<1x16x1x8xf32>
    %c0_43 = arith.constant 0 : index
    %c1_44 = arith.constant 1 : index
    %c8 = arith.constant 8 : index
    %c0_45 = arith.constant 0 : index
    %38 = vector.load %arg7[%c0_43, %c1_44, %c8, %c0_45] : memref<1x18x18x8xf32, #tpu.memory_space<vmem>>, vector<1x16x1x8xf32>
    tpu.vector_store %arg7[%c0_43, %c1_44, %c8, %c0_45], %37 {strides = array<i32>} : memref<1x18x18x8xf32, #tpu.memory_space<vmem>>, vector<1x16x1x8xf32>,
    %39 = vector.extract_strided_slice %8 {offsets = [0, 64], sizes = [16, 8], strides = [1, 1]} : vector<16x128xf32> to vector<16x8xf32>
    %40 = vector.shape_cast %39 : vector<16x8xf32> to vector<1x16x1x8xf32>
    %c0_46 = arith.constant 0 : index
    %c1_47 = arith.constant 1 : index
    %c9 = arith.constant 9 : index
    %c0_48 = arith.constant 0 : index
    %41 = vector.load %arg7[%c0_46, %c1_47, %c9, %c0_48] : memref<1x18x18x8xf32, #tpu.memory_space<vmem>>, vector<1x16x1x8xf32>
    tpu.vector_store %arg7[%c0_46, %c1_47, %c9, %c0_48], %40 {strides = array<i32>} : memref<1x18x18x8xf32, #tpu.memory_space<vmem>>, vector<1x16x1x8xf32>,
    %42 = vector.extract_strided_slice %8 {offsets = [0, 72], sizes = [16, 8], strides = [1, 1]} : vector<16x128xf32> to vector<16x8xf32>
    %43 = vector.shape_cast %42 : vector<16x8xf32> to vector<1x16x1x8xf32>
    %c0_49 = arith.constant 0 : index
    %c1_50 = arith.constant 1 : index
    %c10 = arith.constant 10 : index
    %c0_51 = arith.constant 0 : index
    %44 = vector.load %arg7[%c0_49, %c1_50, %c10, %c0_51] : memref<1x18x18x8xf32, #tpu.memory_space<vmem>>, vector<1x16x1x8xf32>
    tpu.vector_store %arg7[%c0_49, %c1_50, %c10, %c0_51], %43 {strides = array<i32>} : memref<1x18x18x8xf32, #tpu.memory_space<vmem>>, vector<1x16x1x8xf32>,
    %45 = vector.extract_strided_slice %8 {offsets = [0, 80], sizes = [16, 8], strides = [1, 1]} : vector<16x128xf32> to vector<16x8xf32>
    %46 = vector.shape_cast %45 : vector<16x8xf32> to vector<1x16x1x8xf32>
    %c0_52 = arith.constant 0 : index
    %c1_53 = arith.constant 1 : index
    %c11 = arith.constant 11 : index
    %c0_54 = arith.constant 0 : index
    %47 = vector.load %arg7[%c0_52, %c1_53, %c11, %c0_54] : memref<1x18x18x8xf32, #tpu.memory_space<vmem>>, vector<1x16x1x8xf32>
    tpu.vector_store %arg7[%c0_52, %c1_53, %c11, %c0_54], %46 {strides = array<i32>} : memref<1x18x18x8xf32, #tpu.memory_space<vmem>>, vector<1x16x1x8xf32>,
    %48 = vector.extract_strided_slice %8 {offsets = [0, 88], sizes = [16, 8], strides = [1, 1]} : vector<16x128xf32> to vector<16x8xf32>
    %49 = vector.shape_cast %48 : vector<16x8xf32> to vector<1x16x1x8xf32>
    %c0_55 = arith.constant 0 : index
    %c1_56 = arith.constant 1 : index
    %c12 = arith.constant 12 : index
    %c0_57 = arith.constant 0 : index
    %50 = vector.load %arg7[%c0_55, %c1_56, %c12, %c0_57] : memref<1x18x18x8xf32, #tpu.memory_space<vmem>>, vector<1x16x1x8xf32>
    tpu.vector_store %arg7[%c0_55, %c1_56, %c12, %c0_57], %49 {strides = array<i32>} : memref<1x18x18x8xf32, #tpu.memory_space<vmem>>, vector<1x16x1x8xf32>,
    %51 = vector.extract_strided_slice %8 {offsets = [0, 96], sizes = [16, 8], strides = [1, 1]} : vector<16x128xf32> to vector<16x8xf32>
    %52 = vector.shape_cast %51 : vector<16x8xf32> to vector<1x16x1x8xf32>
    %c0_58 = arith.constant 0 : index
    %c1_59 = arith.constant 1 : index
    %c13 = arith.constant 13 : index
    %c0_60 = arith.constant 0 : index
    %53 = vector.load %arg7[%c0_58, %c1_59, %c13, %c0_60] : memref<1x18x18x8xf32, #tpu.memory_space<vmem>>, vector<1x16x1x8xf32>
    tpu.vector_store %arg7[%c0_58, %c1_59, %c13, %c0_60], %52 {strides = array<i32>} : memref<1x18x18x8xf32, #tpu.memory_space<vmem>>, vector<1x16x1x8xf32>,
    %54 = vector.extract_strided_slice %8 {offsets = [0, 104], sizes = [16, 8], strides = [1, 1]} : vector<16x128xf32> to vector<16x8xf32>
    %55 = vector.shape_cast %54 : vector<16x8xf32> to vector<1x16x1x8xf32>
    %c0_61 = arith.constant 0 : index
    %c1_62 = arith.constant 1 : index
    %c14 = arith.constant 14 : index
    %c0_63 = arith.constant 0 : index
    %56 = vector.load %arg7[%c0_61, %c1_62, %c14, %c0_63] : memref<1x18x18x8xf32, #tpu.memory_space<vmem>>, vector<1x16x1x8xf32>
    tpu.vector_store %arg7[%c0_61, %c1_62, %c14, %c0_63], %55 {strides = array<i32>} : memref<1x18x18x8xf32, #tpu.memory_space<vmem>>, vector<1x16x1x8xf32>,
    %57 = vector.extract_strided_slice %8 {offsets = [0, 112], sizes = [16, 8], strides = [1, 1]} : vector<16x128xf32> to vector<16x8xf32>
    %58 = vector.shape_cast %57 : vector<16x8xf32> to vector<1x16x1x8xf32>
    %c0_64 = arith.constant 0 : index
    %c1_65 = arith.constant 1 : index
    %c15 = arith.constant 15 : index
    %c0_66 = arith.constant 0 : index
    %59 = vector.load %arg7[%c0_64, %c1_65, %c15, %c0_66] : memref<1x18x18x8xf32, #tpu.memory_space<vmem>>, vector<1x16x1x8xf32>
    tpu.vector_store %arg7[%c0_64, %c1_65, %c15, %c0_66], %58 {strides = array<i32>} : memref<1x18x18x8xf32, #tpu.memory_space<vmem>>, vector<1x16x1x8xf32>,
    %60 = vector.extract_strided_slice %8 {offsets = [0, 120], sizes = [16, 8], strides = [1, 1]} : vector<16x128xf32> to vector<16x8xf32>
    %61 = vector.shape_cast %60 : vector<16x8xf32> to vector<1x16x1x8xf32>
    %c0_67 = arith.constant 0 : index
    %c1_68 = arith.constant 1 : index
    %c16 = arith.constant 16 : index
    %c0_69 = arith.constant 0 : index
    %62 = vector.load %arg7[%c0_67, %c1_68, %c16, %c0_69] : memref<1x18x18x8xf32, #tpu.memory_space<vmem>>, vector<1x16x1x8xf32>
    tpu.vector_store %arg7[%c0_67, %c1_68, %c16, %c0_69], %61 {strides = array<i32>} : memref<1x18x18x8xf32, #tpu.memory_space<vmem>>, vector<1x16x1x8xf32>,
    %c0_70 = arith.constant 0 : index
    %c0_71 = arith.constant 0 : index
    %c0_72 = arith.constant 0 : index
    %c0_73 = arith.constant 0 : index
    %63 = vector.load %arg7[%c0_70, %c0_71, %c0_72, %c0_73] : memref<1x18x18x8xf32, #tpu.memory_space<vmem>>, vector<1x16x16x8xf32>
    %64 = vector.shape_cast %63 : vector<1x16x16x8xf32> to vector<256x8xf32>
    %c0_74 = arith.constant 0 : index
    %c0_75 = arith.constant 0 : index
    %65 = vector.load %arg8[%c0_74, %c0_75] : memref<256x72xf32, #tpu.memory_space<vmem>>, vector<256x8xf32>
    tpu.vector_store %arg8[%c0_74, %c0_75], %64 {strides = array<i32>} : memref<256x72xf32, #tpu.memory_space<vmem>>, vector<256x8xf32>,
    %c0_76 = arith.constant 0 : index
    %c0_77 = arith.constant 0 : index
    %c1_78 = arith.constant 1 : index
    %c0_79 = arith.constant 0 : index
    %66 = vector.load %arg7[%c0_76, %c0_77, %c1_78, %c0_79] : memref<1x18x18x8xf32, #tpu.memory_space<vmem>>, vector<1x16x16x8xf32>
    %67 = vector.shape_cast %66 : vector<1x16x16x8xf32> to vector<256x8xf32>
    %c0_80 = arith.constant 0 : index
    %c8_81 = arith.constant 8 : index
    %68 = vector.load %arg8[%c0_80, %c8_81] : memref<256x72xf32, #tpu.memory_space<vmem>>, vector<256x8xf32>
    tpu.vector_store %arg8[%c0_80, %c8_81], %67 {strides = array<i32>} : memref<256x72xf32, #tpu.memory_space<vmem>>, vector<256x8xf32>,
    %c0_82 = arith.constant 0 : index
    %c0_83 = arith.constant 0 : index
    %c2_84 = arith.constant 2 : index
    %c0_85 = arith.constant 0 : index
    %69 = vector.load %arg7[%c0_82, %c0_83, %c2_84, %c0_85] : memref<1x18x18x8xf32, #tpu.memory_space<vmem>>, vector<1x16x16x8xf32>
    %70 = vector.shape_cast %69 : vector<1x16x16x8xf32> to vector<256x8xf32>
    %c0_86 = arith.constant 0 : index
    %c16_87 = arith.constant 16 : index
    %71 = vector.load %arg8[%c0_86, %c16_87] : memref<256x72xf32, #tpu.memory_space<vmem>>, vector<256x8xf32>
    tpu.vector_store %arg8[%c0_86, %c16_87], %70 {strides = array<i32>} : memref<256x72xf32, #tpu.memory_space<vmem>>, vector<256x8xf32>,
    %c0_88 = arith.constant 0 : index
    %c1_89 = arith.constant 1 : index
    %c0_90 = arith.constant 0 : index
    %c0_91 = arith.constant 0 : index
    %72 = vector.load %arg7[%c0_88, %c1_89, %c0_90, %c0_91] : memref<1x18x18x8xf32, #tpu.memory_space<vmem>>, vector<1x16x16x8xf32>
    %73 = vector.shape_cast %72 : vector<1x16x16x8xf32> to vector<256x8xf32>
    %c0_92 = arith.constant 0 : index
    %c24 = arith.constant 24 : index
    %74 = vector.load %arg8[%c0_92, %c24] : memref<256x72xf32, #tpu.memory_space<vmem>>, vector<256x8xf32>
    tpu.vector_store %arg8[%c0_92, %c24], %73 {strides = array<i32>} : memref<256x72xf32, #tpu.memory_space<vmem>>, vector<256x8xf32>,
    %c0_93 = arith.constant 0 : index
    %c1_94 = arith.constant 1 : index
    %c1_95 = arith.constant 1 : index
    %c0_96 = arith.constant 0 : index
    %75 = vector.load %arg7[%c0_93, %c1_94, %c1_95, %c0_96] : memref<1x18x18x8xf32, #tpu.memory_space<vmem>>, vector<1x16x16x8xf32>
    %76 = vector.shape_cast %75 : vector<1x16x16x8xf32> to vector<256x8xf32>
    %c0_97 = arith.constant 0 : index
    %c32 = arith.constant 32 : index
    %77 = vector.load %arg8[%c0_97, %c32] : memref<256x72xf32, #tpu.memory_space<vmem>>, vector<256x8xf32>
    tpu.vector_store %arg8[%c0_97, %c32], %76 {strides = array<i32>} : memref<256x72xf32, #tpu.memory_space<vmem>>, vector<256x8xf32>,
    %c0_98 = arith.constant 0 : index
    %c1_99 = arith.constant 1 : index
    %c2_100 = arith.constant 2 : index
    %c0_101 = arith.constant 0 : index
    %78 = vector.load %arg7[%c0_98, %c1_99, %c2_100, %c0_101] : memref<1x18x18x8xf32, #tpu.memory_space<vmem>>, vector<1x16x16x8xf32>
    %79 = vector.shape_cast %78 : vector<1x16x16x8xf32> to vector<256x8xf32>
    %c0_102 = arith.constant 0 : index
    %c40 = arith.constant 40 : index
    %80 = vector.load %arg8[%c0_102, %c40] : memref<256x72xf32, #tpu.memory_space<vmem>>, vector<256x8xf32>
    tpu.vector_store %arg8[%c0_102, %c40], %79 {strides = array<i32>} : memref<256x72xf32, #tpu.memory_space<vmem>>, vector<256x8xf32>,
    %c0_103 = arith.constant 0 : index
    %c2_104 = arith.constant 2 : index
    %c0_105 = arith.constant 0 : index
    %c0_106 = arith.constant 0 : index
    %81 = vector.load %arg7[%c0_103, %c2_104, %c0_105, %c0_106] : memref<1x18x18x8xf32, #tpu.memory_space<vmem>>, vector<1x16x16x8xf32>
    %82 = vector.shape_cast %81 : vector<1x16x16x8xf32> to vector<256x8xf32>
    %c0_107 = arith.constant 0 : index
    %c48 = arith.constant 48 : index
    %83 = vector.load %arg8[%c0_107, %c48] : memref<256x72xf32, #tpu.memory_space<vmem>>, vector<256x8xf32>
    tpu.vector_store %arg8[%c0_107, %c48], %82 {strides = array<i32>} : memref<256x72xf32, #tpu.memory_space<vmem>>, vector<256x8xf32>,
    %c0_108 = arith.constant 0 : index
    %c2_109 = arith.constant 2 : index
    %c1_110 = arith.constant 1 : index
    %c0_111 = arith.constant 0 : index
    %84 = vector.load %arg7[%c0_108, %c2_109, %c1_110, %c0_111] : memref<1x18x18x8xf32, #tpu.memory_space<vmem>>, vector<1x16x16x8xf32>
    %85 = vector.shape_cast %84 : vector<1x16x16x8xf32> to vector<256x8xf32>
    %c0_112 = arith.constant 0 : index
    %c56 = arith.constant 56 : index
    %86 = vector.load %arg8[%c0_112, %c56] : memref<256x72xf32, #tpu.memory_space<vmem>>, vector<256x8xf32>
    tpu.vector_store %arg8[%c0_112, %c56], %85 {strides = array<i32>} : memref<256x72xf32, #tpu.memory_space<vmem>>, vector<256x8xf32>,
    %c0_113 = arith.constant 0 : index
    %c2_114 = arith.constant 2 : index
    %c2_115 = arith.constant 2 : index
    %c0_116 = arith.constant 0 : index
    %87 = vector.load %arg7[%c0_113, %c2_114, %c2_115, %c0_116] : memref<1x18x18x8xf32, #tpu.memory_space<vmem>>, vector<1x16x16x8xf32>
    %88 = vector.shape_cast %87 : vector<1x16x16x8xf32> to vector<256x8xf32>
    %c0_117 = arith.constant 0 : index
    %c64 = arith.constant 64 : index
    %89 = vector.load %arg8[%c0_117, %c64] : memref<256x72xf32, #tpu.memory_space<vmem>>, vector<256x8xf32>
    tpu.vector_store %arg8[%c0_117, %c64], %88 {strides = array<i32>} : memref<256x72xf32, #tpu.memory_space<vmem>>, vector<256x8xf32>,
    %c0_118 = arith.constant 0 : index
    %c0_119 = arith.constant 0 : index
    %90 = vector.load %arg8[%c0_118, %c0_119] : memref<256x72xf32, #tpu.memory_space<vmem>>, vector<256x72xf32>
    %91 = arith.truncf %90 : vector<256x72xf32> to vector<256x72xbf16>
    %c0_120 = arith.constant 0 : index
    %c0_121 = arith.constant 0 : index
    %92 = vector.load %arg4[%c0_120, %c0_121] : memref<72x8xbf16, #tpu.memory_space<vmem>>, vector<72x8xbf16>
    %cst_122 = arith.constant dense<0.000000e+00> : vector<256x8xf32>
    %93 = tpu.matmul %91, %92, %cst_122 {dimension_numbers = #tpu.dot_dimension_numbers<[1], [0], [0], [1], [0, 0, 1, 1], [], []>} : vector<256x72xbf16>, vector<72x8xbf16>, vector<256x8xf32> -> vector<256x8xf32>
    %cst_123 = arith.constant dense<0.000000e+00> : vector<8xf32>
    %94 = vector.multi_reduction <add>, %93, %cst_123 [0] : vector<256x8xf32> to vector<8xf32>
    %95 = vector.shape_cast %94 : vector<8xf32> to vector<1x8xf32>
    %96 = arith.mulf %93, %93 : vector<256x8xf32>
    %cst_124 = arith.constant dense<0.000000e+00> : vector<8xf32>
    %97 = vector.multi_reduction <add>, %96, %cst_124 [0] : vector<256x8xf32> to vector<8xf32>
    %98 = vector.shape_cast %97 : vector<8xf32> to vector<1x8xf32>
    %99 = tpu.concatenate %95, %98 in 0 : vector<1x8xf32>, vector<1x8xf32> -> vector<2x8xf32>
    %100 = vector.shape_cast %99 : vector<2x8xf32> to vector<1x2x8xf32>
    %c0_125 = arith.constant 0 : index
    %c0_126 = arith.constant 0 : index
    %c0_127 = arith.constant 0 : index
    %101 = vector.load %arg6[%c0_125, %c0_126, %c0_127] : memref<1x2x8xf32, #tpu.memory_space<vmem>>, vector<1x2x8xf32>
    tpu.vector_store %arg6[%c0_125, %c0_126, %c0_127], %100 {strides = array<i32>} : memref<1x2x8xf32, #tpu.memory_space<vmem>>, vector<1x2x8xf32>,
    %102 = vector.shape_cast %93 : vector<256x8xf32> to vector<16x16x8xf32>
    %103 = vector.extract_strided_slice %102 {offsets = [0, 0, 0], sizes = [16, 1, 8], strides = [1, 1, 1]} : vector<16x16x8xf32> to vector<16x1x8xf32>
    %104 = vector.shape_cast %103 : vector<16x1x8xf32> to vector<16x8xf32>
    %c0_128 = arith.constant 0 : index
    %c0_129 = arith.constant 0 : index
    %105 = vector.load %arg5[%c0_128, %c0_129] : memref<16x128xf32, #tpu.memory_space<vmem>>, vector<16x8xf32>
    tpu.vector_store %arg5[%c0_128, %c0_129], %104 {strides = array<i32>} : memref<16x128xf32, #tpu.memory_space<vmem>>, vector<16x8xf32>,
    %106 = vector.extract_strided_slice %102 {offsets = [0, 1, 0], sizes = [16, 1, 8], strides = [1, 1, 1]} : vector<16x16x8xf32> to vector<16x1x8xf32>
    %107 = vector.shape_cast %106 : vector<16x1x8xf32> to vector<16x8xf32>
    %c0_130 = arith.constant 0 : index
    %c8_131 = arith.constant 8 : index
    %108 = vector.load %arg5[%c0_130, %c8_131] : memref<16x128xf32, #tpu.memory_space<vmem>>, vector<16x8xf32>
    tpu.vector_store %arg5[%c0_130, %c8_131], %107 {strides = array<i32>} : memref<16x128xf32, #tpu.memory_space<vmem>>, vector<16x8xf32>,
    %109 = vector.extract_strided_slice %102 {offsets = [0, 2, 0], sizes = [16, 1, 8], strides = [1, 1, 1]} : vector<16x16x8xf32> to vector<16x1x8xf32>
    %110 = vector.shape_cast %109 : vector<16x1x8xf32> to vector<16x8xf32>
    %c0_132 = arith.constant 0 : index
    %c16_133 = arith.constant 16 : index
    %111 = vector.load %arg5[%c0_132, %c16_133] : memref<16x128xf32, #tpu.memory_space<vmem>>, vector<16x8xf32>
    tpu.vector_store %arg5[%c0_132, %c16_133], %110 {strides = array<i32>} : memref<16x128xf32, #tpu.memory_space<vmem>>, vector<16x8xf32>,
    %112 = vector.extract_strided_slice %102 {offsets = [0, 3, 0], sizes = [16, 1, 8], strides = [1, 1, 1]} : vector<16x16x8xf32> to vector<16x1x8xf32>
    %113 = vector.shape_cast %112 : vector<16x1x8xf32> to vector<16x8xf32>
    %c0_134 = arith.constant 0 : index
    %c24_135 = arith.constant 24 : index
    %114 = vector.load %arg5[%c0_134, %c24_135] : memref<16x128xf32, #tpu.memory_space<vmem>>, vector<16x8xf32>
    tpu.vector_store %arg5[%c0_134, %c24_135], %113 {strides = array<i32>} : memref<16x128xf32, #tpu.memory_space<vmem>>, vector<16x8xf32>,
    %115 = vector.extract_strided_slice %102 {offsets = [0, 4, 0], sizes = [16, 1, 8], strides = [1, 1, 1]} : vector<16x16x8xf32> to vector<16x1x8xf32>
    %116 = vector.shape_cast %115 : vector<16x1x8xf32> to vector<16x8xf32>
    %c0_136 = arith.constant 0 : index
    %c32_137 = arith.constant 32 : index
    %117 = vector.load %arg5[%c0_136, %c32_137] : memref<16x128xf32, #tpu.memory_space<vmem>>, vector<16x8xf32>
    tpu.vector_store %arg5[%c0_136, %c32_137], %116 {strides = array<i32>} : memref<16x128xf32, #tpu.memory_space<vmem>>, vector<16x8xf32>,
    %118 = vector.extract_strided_slice %102 {offsets = [0, 5, 0], sizes = [16, 1, 8], strides = [1, 1, 1]} : vector<16x16x8xf32> to vector<16x1x8xf32>
    %119 = vector.shape_cast %118 : vector<16x1x8xf32> to vector<16x8xf32>
    %c0_138 = arith.constant 0 : index
    %c40_139 = arith.constant 40 : index
    %120 = vector.load %arg5[%c0_138, %c40_139] : memref<16x128xf32, #tpu.memory_space<vmem>>, vector<16x8xf32>
    tpu.vector_store %arg5[%c0_138, %c40_139], %119 {strides = array<i32>} : memref<16x128xf32, #tpu.memory_space<vmem>>, vector<16x8xf32>,
    %121 = vector.extract_strided_slice %102 {offsets = [0, 6, 0], sizes = [16, 1, 8], strides = [1, 1, 1]} : vector<16x16x8xf32> to vector<16x1x8xf32>
    %122 = vector.shape_cast %121 : vector<16x1x8xf32> to vector<16x8xf32>
    %c0_140 = arith.constant 0 : index
    %c48_141 = arith.constant 48 : index
    %123 = vector.load %arg5[%c0_140, %c48_141] : memref<16x128xf32, #tpu.memory_space<vmem>>, vector<16x8xf32>
    tpu.vector_store %arg5[%c0_140, %c48_141], %122 {strides = array<i32>} : memref<16x128xf32, #tpu.memory_space<vmem>>, vector<16x8xf32>,
    %124 = vector.extract_strided_slice %102 {offsets = [0, 7, 0], sizes = [16, 1, 8], strides = [1, 1, 1]} : vector<16x16x8xf32> to vector<16x1x8xf32>
    %125 = vector.shape_cast %124 : vector<16x1x8xf32> to vector<16x8xf32>
    %c0_142 = arith.constant 0 : index
    %c56_143 = arith.constant 56 : index
    %126 = vector.load %arg5[%c0_142, %c56_143] : memref<16x128xf32, #tpu.memory_space<vmem>>, vector<16x8xf32>
    tpu.vector_store %arg5[%c0_142, %c56_143], %125 {strides = array<i32>} : memref<16x128xf32, #tpu.memory_space<vmem>>, vector<16x8xf32>,
    %127 = vector.extract_strided_slice %102 {offsets = [0, 8, 0], sizes = [16, 1, 8], strides = [1, 1, 1]} : vector<16x16x8xf32> to vector<16x1x8xf32>
    %128 = vector.shape_cast %127 : vector<16x1x8xf32> to vector<16x8xf32>
    %c0_144 = arith.constant 0 : index
    %c64_145 = arith.constant 64 : index
    %129 = vector.load %arg5[%c0_144, %c64_145] : memref<16x128xf32, #tpu.memory_space<vmem>>, vector<16x8xf32>
    tpu.vector_store %arg5[%c0_144, %c64_145], %128 {strides = array<i32>} : memref<16x128xf32, #tpu.memory_space<vmem>>, vector<16x8xf32>,
    %130 = vector.extract_strided_slice %102 {offsets = [0, 9, 0], sizes = [16, 1, 8], strides = [1, 1, 1]} : vector<16x16x8xf32> to vector<16x1x8xf32>
    %131 = vector.shape_cast %130 : vector<16x1x8xf32> to vector<16x8xf32>
    %c0_146 = arith.constant 0 : index
    %c72 = arith.constant 72 : index
    %132 = vector.load %arg5[%c0_146, %c72] : memref<16x128xf32, #tpu.memory_space<vmem>>, vector<16x8xf32>
    tpu.vector_store %arg5[%c0_146, %c72], %131 {strides = array<i32>} : memref<16x128xf32, #tpu.memory_space<vmem>>, vector<16x8xf32>,
    %133 = vector.extract_strided_slice %102 {offsets = [0, 10, 0], sizes = [16, 1, 8], strides = [1, 1, 1]} : vector<16x16x8xf32> to vector<16x1x8xf32>
    %134 = vector.shape_cast %133 : vector<16x1x8xf32> to vector<16x8xf32>
    %c0_147 = arith.constant 0 : index
    %c80 = arith.constant 80 : index
    %135 = vector.load %arg5[%c0_147, %c80] : memref<16x128xf32, #tpu.memory_space<vmem>>, vector<16x8xf32>
    tpu.vector_store %arg5[%c0_147, %c80], %134 {strides = array<i32>} : memref<16x128xf32, #tpu.memory_space<vmem>>, vector<16x8xf32>,
    %136 = vector.extract_strided_slice %102 {offsets = [0, 11, 0], sizes = [16, 1, 8], strides = [1, 1, 1]} : vector<16x16x8xf32> to vector<16x1x8xf32>
    %137 = vector.shape_cast %136 : vector<16x1x8xf32> to vector<16x8xf32>
    %c0_148 = arith.constant 0 : index
    %c88 = arith.constant 88 : index
    %138 = vector.load %arg5[%c0_148, %c88] : memref<16x128xf32, #tpu.memory_space<vmem>>, vector<16x8xf32>
    tpu.vector_store %arg5[%c0_148, %c88], %137 {strides = array<i32>} : memref<16x128xf32, #tpu.memory_space<vmem>>, vector<16x8xf32>,
    %139 = vector.extract_strided_slice %102 {offsets = [0, 12, 0], sizes = [16, 1, 8], strides = [1, 1, 1]} : vector<16x16x8xf32> to vector<16x1x8xf32>
    %140 = vector.shape_cast %139 : vector<16x1x8xf32> to vector<16x8xf32>
    %c0_149 = arith.constant 0 : index
    %c96 = arith.constant 96 : index
    %141 = vector.load %arg5[%c0_149, %c96] : memref<16x128xf32, #tpu.memory_space<vmem>>, vector<16x8xf32>
    tpu.vector_store %arg5[%c0_149, %c96], %140 {strides = array<i32>} : memref<16x128xf32, #tpu.memory_space<vmem>>, vector<16x8xf32>,
    %142 = vector.extract_strided_slice %102 {offsets = [0, 13, 0], sizes = [16, 1, 8], strides = [1, 1, 1]} : vector<16x16x8xf32> to vector<16x1x8xf32>
    %143 = vector.shape_cast %142 : vector<16x1x8xf32> to vector<16x8xf32>
    %c0_150 = arith.constant 0 : index
    %c104 = arith.constant 104 : index
    %144 = vector.load %arg5[%c0_150, %c104] : memref<16x128xf32, #tpu.memory_space<vmem>>, vector<16x8xf32>
    tpu.vector_store %arg5[%c0_150, %c104], %143 {strides = array<i32>} : memref<16x128xf32, #tpu.memory_space<vmem>>, vector<16x8xf32>,
    %145 = vector.extract_strided_slice %102 {offsets = [0, 14, 0], sizes = [16, 1, 8], strides = [1, 1, 1]} : vector<16x16x8xf32> to vector<16x1x8xf32>
    %146 = vector.shape_cast %145 : vector<16x1x8xf32> to vector<16x8xf32>
    %c0_151 = arith.constant 0 : index
    %c112 = arith.constant 112 : index
    %147 = vector.load %arg5[%c0_151, %c112] : memref<16x128xf32, #tpu.memory_space<vmem>>, vector<16x8xf32>
    tpu.vector_store %arg5[%c0_151, %c112], %146 {strides = array<i32>} : memref<16x128xf32, #tpu.memory_space<vmem>>, vector<16x8xf32>,
    %148 = vector.extract_strided_slice %102 {offsets = [0, 15, 0], sizes = [16, 1, 8], strides = [1, 1, 1]} : vector<16x16x8xf32> to vector<16x1x8xf32>
    %149 = vector.shape_cast %148 : vector<16x1x8xf32> to vector<16x8xf32>
    %c0_152 = arith.constant 0 : index
    %c120 = arith.constant 120 : index
    %150 = vector.load %arg5[%c0_152, %c120] : memref<16x128xf32, #tpu.memory_space<vmem>>, vector<16x8xf32>
    tpu.vector_store %arg5[%c0_152, %c120], %149 {strides = array<i32>} : memref<16x128xf32, #tpu.memory_space<vmem>>, vector<16x8xf32>,
    return
  }
  func.func @transform_0(%arg0: i32) -> (i32, i32) {
    %c0_i32 = arith.constant 0 : i32
    %c0_i32_0 = arith.constant 0 : i32
    return %arg0, %c0_i32 : i32, i32
  }
  func.func @transform_1(%arg0: i32) -> (i32, i32) {
    %c0_i32 = arith.constant 0 : i32
    %c0_i32_0 = arith.constant 0 : i32
    %c0_i32_1 = arith.constant 0 : i32
    return %c0_i32, %c0_i32_0 : i32, i32
  }
  func.func @transform_2(%arg0: i32) -> (i32, i32) {
    %c0_i32 = arith.constant 0 : i32
    %c0_i32_0 = arith.constant 0 : i32
    %c0_i32_1 = arith.constant 0 : i32
    return %c0_i32, %c0_i32_0 : i32, i32
  }
  func.func @transform_3(%arg0: i32) -> (i32, i32) {
    %c0_i32 = arith.constant 0 : i32
    %c0_i32_0 = arith.constant 0 : i32
    %c0_i32_1 = arith.constant 0 : i32
    return %c0_i32, %c0_i32_0 : i32, i32
  }
  func.func @transform_4(%arg0: i32) -> (i32, i32) {
    %c0_i32 = arith.constant 0 : i32
    %c0_i32_0 = arith.constant 0 : i32
    return %arg0, %c0_i32 : i32, i32
  }
  func.func @transform_5(%arg0: i32) -> (i32, i32, i32) {
    %c0_i32 = arith.constant 0 : i32
    %c0_i32_0 = arith.constant 0 : i32
    %c0_i32_1 = arith.constant 0 : i32
    return %arg0, %c0_i32, %c0_i32_0 : i32, i32, i32
  }
}

</mosaic_0001>

<bundles_post_ra>
// kernel: tile.34
= control target key start
LH: loop header
LB: loop body
LE: loop exit
PB: predicated region body
PF: predicated region fallthrough
CT: control target
= control target key end

     0   :  { %s133_s10 = smov 120   ;;  %s134_s11 = smov 104   ;;  %vm3_vm0 = vcmask 64512   ;;  %vm9_vm1 = vcmask 1048512   ;;  %vm15_vm2 = vcmask 982912   ;;  %vm21_vm3 = vcmask 917312   ;;  %s209_s0 = inlined_call_operand.vmem [shape: f32[16,8], index: 0, kind: input, shape index: {}]   ;;  %s210_s1 = inlined_call_operand.vmem [shape: f32[1,128], index: 1, kind: output, shape index: {}]  }
   0x1   :  { %v103_v0 = vld [vmem:[%s209_s0 + $0xf] sm:$0x1]   ;;  %v105_v1 = vld [vmem:[%s209_s0 + $0xd] sm:$0x1]   ;;  %v104_v2 = vld [vmem:[%s209_s0 + $0xe] sm:$0x1]  }
   0x2   :  { %7 = vrot.lane.b32.xlu0 %v103_v0, %s133_s10  ;;  %19 = vrot.lane.b32.xlu1 %v105_v1, %s134_s11  ;;  %v106_v3 = vld [vmem:[%s209_s0 + $0xc] sm:$0x1]   ;;  %s135_s16 = smov 112   ;;  %s136_s17 = smov 96   ;;  %v107_v4 = vld [vmem:[%s209_s0 + $0xb] sm:$0x1]  }
   0x3   :  { %v108_v5 = vld [vmem:[%s209_s0 + $0xa] sm:$0x1]   ;;  %v2_v6 = vld [vmem:[%s209_s0] sm:$0x1]   ;;  %s137_s24 = smov 88   ;;  %s138_s25 = smov 80  }
   0x4   :  { %4 = vst.msk [vmem:[#allocation0] sm:$0x1] %vm3_vm0, %v2_v6   ;;  %v109_v7 = vld [vmem:[%s209_s0 + $0x9] sm:$0x1]   ;;  %v110_v8 = vld [vmem:[%s209_s0 + $0x8] sm:$0x1]  }
   0x5   :  { %s139_s30 = smov 72   ;;  %s140_s2 = smov 64   ;;  %v111_v9 = vld [vmem:[%s209_s0 + $0x7] sm:$0x1]   ;;  %v112_v10 = vld [vmem:[%s209_s0 + $0x6] sm:$0x1]  }
   0x6   :  { %13 = vrot.lane.b32.xlu0 %v104_v2, %s135_s16  ;;  %25 = vrot.lane.b32.xlu1 %v106_v3, %s136_s17  ;;  %s141_s7 = smov 56   ;;  %s142_s8 = smov 48   ;;  %v113_v11 = vld [vmem:[%s209_s0 + $0x5] sm:$0x1]   ;;  %v114_v12 = vld [vmem:[%s209_s0 + $0x4] sm:$0x1]  }
   0x7   :  { %s143_s13 = smov 40   ;;  %s144_s14 = smov 32   ;;  %v115_v13 = vld [vmem:[%s209_s0 + $0x3] sm:$0x1]   ;;  %v116_v14 = vld [vmem:[%s209_s0 + $0x2] sm:$0x1]  }
   0x8   :  { %s145_s19 = smov 24   ;;  %s146_s20 = smov 16   ;;  %v117_v15 = vld [vmem:[%s209_s0 + $0x1] sm:$0x1]   ;;  %vm27_vm4 = vcmask 851712   ;;  %vm33_vm5 = vcmask 786112  }
   0x9   :  { %s147_s0 = smov 8   ;;  %vm39_vm6 = vcmask 720512   ;;  %vm45_vm7 = vcmask 654912   ;;  %vm51_vm8 = vcmask 589312   ;;  %vm57_vm9 = vcmask 523712  }
   0xa   :  { %31 = vrot.lane.b32.xlu0 %v107_v4, %s137_s24  ;;  %37 = vrot.lane.b32.xlu1 %v108_v5, %s138_s25  ;;  %vm63_vm10 = vcmask 458112   ;;  %vm69_vm11 = vcmask 392512   ;;  %vm75_vm12 = vcmask 326912   ;;  %vm81_vm13 = vcmask 261312  }
   0xb   :  { %vm87_vm14 = vcmask 195712   ;;  %vm93_vm15 = vcmask 130112  }
   0xe   :  { %43 = vrot.lane.b32.xlu0 %v109_v7, %s139_s30  ;;  %49 = vrot.lane.b32.xlu1 %v110_v8, %s140_s2 }
  0x12   :  { %55 = vrot.lane.b32.xlu0 %v111_v9, %s141_s7  ;;  %61 = vrot.lane.b32.xlu1 %v112_v10, %s142_s8 }
  0x16   :  { %67 = vrot.lane.b32.xlu0 %v113_v11, %s143_s13  ;;  %73 = vrot.lane.b32.xlu1 %v114_v12, %s144_s14 }
  0x1a   :  { %79 = vrot.lane.b32.xlu0 %v115_v13, %s145_s19  ;;  %85 = vrot.lane.b32.xlu1 %v116_v14, %s146_s20 }
  0x1e   :  { %91 = vrot.lane.b32.xlu0 %v117_v15, %s147_s0 }
  0x74   :  { %v8_v16 = vpop.permute.xlu0 %7   ;;  %v20_v17 = vpop.permute.xlu1 %19  }
  0x75   :  { %10 = vst.msk [vmem:[#allocation0] sm:$0x1] %vm9_vm1, %v8_v16  }
  0x78   :  { %v14_v18 = vpop.permute.xlu0 %13   ;;  %v26_v19 = vpop.permute.xlu1 %25  }
  0x79   :  { %16 = vst.msk [vmem:[#allocation0] sm:$0x1] %vm15_vm2, %v14_v18  }
  0x7a   :  { %22 = vst.msk [vmem:[#allocation0] sm:$0x1] %vm21_vm3, %v20_v17  }
  0x7b   :  { %28 = vst.msk [vmem:[#allocation0] sm:$0x1] %vm27_vm4, %v26_v19  }
  0x7c   :  { %v32_v20 = vpop.permute.xlu0 %31   ;;  %v38_v21 = vpop.permute.xlu1 %37  }
  0x7d   :  { %34 = vst.msk [vmem:[#allocation0] sm:$0x1] %vm33_vm5, %v32_v20  }
  0x7e   :  { %40 = vst.msk [vmem:[#allocation0] sm:$0x1] %vm39_vm6, %v38_v21  }
  0x80   :  { %v44_v22 = vpop.permute.xlu0 %43   ;;  %v50_v23 = vpop.permute.xlu1 %49  }
  0x81   :  { %46 = vst.msk [vmem:[#allocation0] sm:$0x1] %vm45_vm7, %v44_v22  }
  0x82   :  { %52 = vst.msk [vmem:[#allocation0] sm:$0x1] %vm51_vm8, %v50_v23  }
  0x84   :  { %v56_v24 = vpop.permute.xlu0 %55   ;;  %v62_v25 = vpop.permute.xlu1 %61  }
  0x85   :  { %58 = vst.msk [vmem:[#allocation0] sm:$0x1] %vm57_vm9, %v56_v24  }
  0x86   :  { %64 = vst.msk [vmem:[#allocation0] sm:$0x1] %vm63_vm10, %v62_v25  }
  0x88   :  { %v68_v26 = vpop.permute.xlu0 %67   ;;  %v74_v27 = vpop.permute.xlu1 %73  }
  0x89   :  { %70 = vst.msk [vmem:[#allocation0] sm:$0x1] %vm69_vm11, %v68_v26  }
  0x8a   :  { %76 = vst.msk [vmem:[#allocation0] sm:$0x1] %vm75_vm12, %v74_v27  }
  0x8c   :  { %v80_v28 = vpop.permute.xlu0 %79   ;;  %v86_v29 = vpop.permute.xlu1 %85  }
  0x8d   :  { %82 = vst.msk [vmem:[#allocation0] sm:$0x1] %vm81_vm13, %v80_v28  }
  0x8e   :  { %88 = vst.msk [vmem:[#allocation0] sm:$0x1] %vm87_vm14, %v86_v29  }
  0x90   :  { %v92_v30 = vpop.permute.xlu0 %91  }
  0x91   :  { %94 = vst.msk [vmem:[#allocation0] sm:$0x1] %vm93_vm15, %v92_v30  }
  0x98   :  { %v99_v31 = vld [vmem:[#allocation0] sm:$0x1] }
  0x99   :  { %102 = vst [vmem:[%s210_s1] sm:$0x1] %v99_v31 }

// kernel: tile.33
= control target key start
LH: loop header
LB: loop body
LE: loop exit
PB: predicated region body
PF: predicated region fallthrough
CT: control target
= control target key end

     0   :  { %s28_s0 = inlined_call_operand.vmem [shape: f32[8], index: 0, kind: input, shape index: {}]   ;;  %s29_s1 = inlined_call_operand.vmem [shape: f32[16,8], index: 1, kind: output, shape index: {}]  }
   0x1   :  { %v4_v0 = vld [vmem:[%s28_s0] ss:$0 sm:$0xff] }
   0x2   :  { %5 = vst [vmem:[%s29_s1] sm:$0xff] %v4_v0  ;;  %8 = vst [vmem:[%s29_s1 + $0x8] sm:$0xff] %v4_v0 }

// kernel: basic_residual_block.5
= control target key start
LH: loop header
LB: loop body
LE: loop exit
PB: predicated region body
PF: predicated region fallthrough
CT: control target
= control target key end

     0   :  { %s459_s21 = smov 0   ;;  %s491_s0 = inlined_call_operand.vmem [shape: f32[32,128], index: 0, kind: input, shape index: {}]   ;;  %s492_s1 = inlined_call_operand.vmem [shape: f32[1,128], index: 1, kind: input, shape index: {}]   ;;  %s493_s2 = inlined_call_operand.vmem [shape: f32[1,128], index: 2, kind: input, shape index: {}]   ;;  %s494_s3 = inlined_call_operand.vmem [shape: f32[32,128], index: 3, kind: input, shape index: {}]   ;;  %s495_s4 = inlined_call_operand.vmem [shape: f32[1,128], index: 4, kind: input, shape index: {}]   ;;  %s496_s5 = inlined_call_operand.vmem [shape: f32[1,128], index: 5, kind: input, shape index: {}]   ;;  %s497_s6 = inlined_call_operand.vmem [shape: f32[32,128], index: 6, kind: output, shape index: {}]  }
   0x1 LB: > { %s391_s22 = sadd.s32 4294967295, %s422_s21   ;;  %p395_p0 = scmp.ge.s32.totalorder %s422_s21, 1  ;;  %s422_s21 = sphi %s459_s21, %s16_s21  }
   0x2   : > { %p224_p1 = scmp.lt.s32.totalorder %s422_s21, 3 }
   0x4   : > { %p225_p2 = pnand %p395_p0, %p224_p1 }
   0x5   : > { %s396_s23 = sshll.u32 (!%p225_p2), %s391_s22, 1 }
   0x6   : > { %228 = sbr.rel (%p225_p2) target bundleno = 26 (0x1a), region = 44  ;;  %p260_p3 = scmp.lt.s32.totalorder (!%p225_p2), %s396_s23, 3 }
   0xb   : > { %s499_s23 = smov (!%p260_p3, %s396_s23), 3  ;;  %v402_v0 = vld [vmem:[%s495_s4] ss:$0 sm:$0xff] }
   0xc   : > { %s397_s24 = sshll.u32 %s499_s23, 3  ;;  %v404_v1 = vld [vmem:[%s492_s1] ss:$0 sm:$0xff] }
   0xd   : > { %s263_s7 = scalar_lea.vmem %s491_s0, %s397_s24  ;;  %s269_s10 = scalar_lea.vmem %s494_s3, %s397_s24  ;;  %v403_v2 = vld [vmem:[%s496_s5] ss:$0 sm:$0xff] }
   0xe   : > { %v405_v3 = vld [vmem:[%s493_s2] ss:$0 sm:$0xff]  ;;  %v278_v5 = vld [vmem:[%s269_s10 + $0x8] sm:$0xff]  ;;  %s275_s17 = scalar_lea.vmem %s497_s6, %s397_s24 }
   0xf   : > { %v277_v4 = vld [vmem:[%s269_s10] sm:$0xff]  ;;  %v287_v8 = vmul.f32 %v402_v0, %v278_v5  ;;  %v298_v9 = vld [vmem:[%s263_s7 + $0x8] sm:$0xff] }
  0x10   : > { %v297_v6 = vld [vmem:[%s263_s7] sm:$0xff]  ;;  %v286_v7 = vmul.f32 %v402_v0, %v277_v4  ;;  %v307_v11 = vmul.f32 %v404_v1, %v298_v9 }
  0x11   : > { %v306_v10 = vmul.f32 %v404_v1, %v297_v6  ;;  %v296_v13 = vadd.f32 %v403_v2, %v287_v8 }
  0x12   : > { %v295_v12 = vadd.f32 %v403_v2, %v286_v7  ;;  %v316_v15 = vadd.f32 %v405_v3, %v307_v11 }
  0x13   : > { %v315_v14 = vadd.f32 %v405_v3, %v306_v10 }
  0x14   : > { %v318_v17 = vadd.f32 %v316_v15, %v296_v13 }
  0x15   : > { %v317_v16 = vadd.f32 %v315_v14, %v295_v12 }
  0x16   : > { %v320_v19 = vmax.f32 %v318_v17, 0.0 }
  0x17   : > { %v319_v18 = vmax.f32 %v317_v16, 0.0 }
  0x18   : > { %322 = vst [vmem:[%s275_s17 + $0x8] sm:$0xff] %v320_v19 }
  0x19   : > { %321 = vst [vmem:[%s275_s17] sm:$0xff] %v319_v18 }
  0x1a PF: > { %s16_s21 = sadd.s32 1, %s422_s21  }
  0x1b   : > { %p13_p4 = scmp.ge.s32.totalorder %s16_s21, 4  }
  0x1d   :  { %15 = sbr.rel (!%p13_p4) target bundleno = 1 (0x1), region = 77 }

// kernel: basic_residual_block.3
= control target key start
LH: loop header
LB: loop body
LE: loop exit
PB: predicated region body
PF: predicated region fallthrough
CT: control target
= control target key end

     0   :  { %s4223_s21 = smov 0   ;;  %s7374_s0 = inlined_call_operand.vmem [shape: f32[2,16,16,4], index: 0, kind: input, shape index: {}]   ;;  %s7375_s1 = inlined_call_operand.vmem [shape: bf16[36,8], index: 1, kind: input, shape index: {}]   ;;  %s7376_s2 = inlined_call_operand.vmem [shape: bf16[4,8], index: 2, kind: input, shape index: {}]   ;;  %s7377_s3 = inlined_call_operand.vmem [shape: f32[32,128], index: 3, kind: output, shape index: {0}]   ;;  %s7378_s4 = inlined_call_operand.vmem [shape: f32[2,2,8], index: 4, kind: output, shape index: {1}]   ;;  %s7379_s5 = inlined_call_operand.vmem [shape: f32[32,128], index: 5, kind: output, shape index: {2}]   ;;  %s7380_s6 = inlined_call_operand.vmem [shape: f32[2,2,8], index: 6, kind: output, shape index: {3}]  }
   0x1 LB: > { %s4229_s22 = sadd.s32 4294967295, %s4166_s21   ;;  %p3972_p0 = scmp.ge.s32.totalorder %s4166_s21, 1  ;;  %s4166_s21 = sphi %s4223_s21, %s17_s21  }
   0x2   : > { %p219_p1 = scmp.lt.s32.totalorder %s4166_s21, 3 }
   0x4   : > { %p220_p2 = pnand %p3972_p0, %p219_p1 }
   0x6   : > { %223 = sbr.rel (%p220_p2) target bundleno = 1161 (0x489), region = 32 }
   0xb   : > { %vm320_vm0 = vcmask 31744   ;;  %vm329_vm1 = vcmask 24576   ;;  %p262_p3 = scmp.lt.s32.totalorder %s4229_s22, 1  ;;  %vm323_vm2 = vcmask 25600   ;;  %v4168_v0 = vmov 0.0   ;;  %s4169_s28 = smov 4  }
   0xc   : > { %321 = vst.msk [vmem:[#allocation2] sm:$0xff] %vm320_vm0, %v4168_v0  ;;  %322 = vst.msk [vmem:[#allocation2 + $0x8] sm:$0xff] %vm320_vm0, %v4168_v0  ;;  %s4170_s29 = smov 8   ;;  %vm623_vm3 = vcmask 64544   ;;  %s4171_s30 = smov 12   ;;  %vm816_vm4 = vcmask 97344  }
   0xd   : > { %326 = vst.msk [vmem:[#allocation2 + $0x198] sm:$0xff] %vm320_vm0, %v4168_v0  ;;  %327 = vst.msk [vmem:[#allocation2 + $0x1a0] sm:$0xff] %vm320_vm0, %v4168_v0  ;;  %s4276_s23 = scalar_select %p262_p3, %s4229_s22, 1  ;;  %vm1009_vm5 = vcmask 130144   ;;  %vm2125_vm6 = vcmask 1041408   ;;  %vm1202_vm7 = vcmask 162944  }
   0xe   : > { %331 = vst.msk [vmem:[#allocation2 + $0x18] sm:$0x1] %vm329_vm1, %v4168_v0  ;;  %332 = vst.msk [vmem:[#allocation2 + $0x30] sm:$0x1] %vm329_vm1, %v4168_v0  ;;  %s4172_s7 = smov 16   ;;  %s4173_s8 = smov 20  }
   0xf   : > { %333 = vst.msk [vmem:[#allocation2 + $0x48] sm:$0x1] %vm329_vm1, %v4168_v0  ;;  %334 = vst.msk [vmem:[#allocation2 + $0x60] sm:$0x1] %vm329_vm1, %v4168_v0  ;;  %s4018_s24 = sshll.u32 %s4276_s23, 8  ;;  %s4174_s9 = smov 24  }
  0x10   : > { %335 = vst.msk [vmem:[#allocation2 + $0x78] sm:$0x1] %vm329_vm1, %v4168_v0  ;;  %336 = vst.msk [vmem:[#allocation2 + $0x90] sm:$0x1] %vm329_vm1, %v4168_v0  ;;  %s4285_s27 = scalar_lea.vmem %s7374_s0, %s4018_s24  ;;  %s4175_s10 = smov 28   ;;  %vm1395_vm8 = vcmask 195744  }
  0x11   : > { %337 = vst.msk [vmem:[#allocation2 + $0xa8] sm:$0x1] %vm329_vm1, %v4168_v0  ;;  %338 = vst.msk [vmem:[#allocation2 + $0xc0] sm:$0x1] %vm329_vm1, %v4168_v0  ;;  %v4288_v1 = vld [vmem:[%s4285_s27] sm:$0xff]  ;;  %v4291_v2 = vld [vmem:[%s4285_s27 + $0x8] sm:$0xff] }
  0x12   : > { %339 = vst.msk [vmem:[#allocation2 + $0xd8] sm:$0x1] %vm329_vm1, %v4168_v0  ;;  %340 = vst.msk [vmem:[#allocation2 + $0xf0] sm:$0x1] %vm329_vm1, %v4168_v0  ;;  %v4294_v3 = vld [vmem:[%s4285_s27 + $0x10] sm:$0xff]  ;;  %v4303_v4 = vld [vmem:[%s4285_s27 + $0x18] sm:$0xff] }
  0x13   : > { %341 = vst.msk [vmem:[#allocation2 + $0x108] sm:$0x1] %vm329_vm1, %v4168_v0  ;;  %342 = vst.msk [vmem:[#allocation2 + $0x120] sm:$0x1] %vm329_vm1, %v4168_v0  ;;  %v4306_v5 = vld [vmem:[%s4285_s27 + $0x20] sm:$0xff]  ;;  %v4309_v6 = vld [vmem:[%s4285_s27 + $0x28] sm:$0xff] }
  0x14   : > { %343 = vst.msk [vmem:[#allocation2 + $0x138] sm:$0x1] %vm329_vm1, %v4168_v0  ;;  %344 = vst.msk [vmem:[#allocation2 + $0x150] sm:$0x1] %vm329_vm1, %v4168_v0  ;;  %v463_v7 = vld [vmem:[#allocation2 + $0x1] sm:$0xff]  ;;  %v4318_v9 = vld [vmem:[%s4285_s27 + $0x30] sm:$0xff] }
  0x15   : > { %345 = vst.msk [vmem:[#allocation2 + $0x168] sm:$0x1] %vm329_vm1, %v4168_v0  ;;  %346 = vst.msk [vmem:[#allocation2 + $0x180] sm:$0x1] %vm329_vm1, %v4168_v0  ;;  %527 = vrot.lane.b32.xlu0 %v463_v7, %s4169_s28  ;;  %v4324_v10 = vld [vmem:[%s4285_s27 + $0x38] sm:$0xff]  ;;  %v4327_v11 = vld [vmem:[%s4285_s27 + $0x40] sm:$0xff] }
  0x16   : > { %349 = vst.msk [vmem:[#allocation2 + $0x29] sm:$0x1] %vm329_vm1, %v4168_v0  ;;  %350 = vst.msk [vmem:[#allocation2 + $0x41] sm:$0x1] %vm329_vm1, %v4168_v0  ;;  %v4330_v12 = vld [vmem:[%s4285_s27 + $0x48] sm:$0xff]  ;;  %v4339_v13 = vld [vmem:[%s4285_s27 + $0x50] sm:$0xff] }
  0x17   : > { %351 = vst.msk [vmem:[#allocation2 + $0x59] sm:$0x1] %vm329_vm1, %v4168_v0  ;;  %352 = vst.msk [vmem:[#allocation2 + $0x71] sm:$0x1] %vm329_vm1, %v4168_v0  ;;  %v4342_v14 = vld [vmem:[%s4285_s27 + $0x58] sm:$0xff]  ;;  %v4345_v15 = vld [vmem:[%s4285_s27 + $0x60] sm:$0xff] }
  0x18   : > { %353 = vst.msk [vmem:[#allocation2 + $0x89] sm:$0x1] %vm329_vm1, %v4168_v0  ;;  %354 = vst.msk [vmem:[#allocation2 + $0xa1] sm:$0x1] %vm329_vm1, %v4168_v0  ;;  %v4354_v16 = vld [vmem:[%s4285_s27 + $0x68] sm:$0xff]  ;;  %v4357_v17 = vld [vmem:[%s4285_s27 + $0x70] sm:$0xff] }
  0x19   : > { %355 = vst.msk [vmem:[#allocation2 + $0xb9] sm:$0x1] %vm329_vm1, %v4168_v0  ;;  %356 = vst.msk [vmem:[#allocation2 + $0xd1] sm:$0x1] %vm329_vm1, %v4168_v0  ;;  %v4360_v18 = vld [vmem:[%s4285_s27 + $0x78] sm:$0xff]  ;;  %v4369_v19 = vld [vmem:[%s4285_s27 + $0x80] sm:$0xff] }
  0x1a   : > { %357 = vst.msk [vmem:[#allocation2 + $0xe9] sm:$0x1] %vm329_vm1, %v4168_v0  ;;  %358 = vst.msk [vmem:[#allocation2 + $0x101] sm:$0x1] %vm329_vm1, %v4168_v0  ;;  %v4372_v20 = vld [vmem:[%s4285_s27 + $0x88] sm:$0xff]  ;;  %v4375_v21 = vld [vmem:[%s4285_s27 + $0x90] sm:$0xff] }
  0x1b   : > { %359 = vst.msk [vmem:[#allocation2 + $0x119] sm:$0x1] %vm329_vm1, %v4168_v0  ;;  %360 = vst.msk [vmem:[#allocation2 + $0x131] sm:$0x1] %vm329_vm1, %v4168_v0  ;;  %v4385_v22 = vld [vmem:[%s4285_s27 + $0x98] sm:$0xff]  ;;  %v4388_v23 = vld [vmem:[%s4285_s27 + $0xa0] sm:$0xff] }
  0x1c   : > { %361 = vst.msk [vmem:[#allocation2 + $0x149] sm:$0x1] %vm329_vm1, %v4168_v0  ;;  %362 = vst.msk [vmem:[#allocation2 + $0x161] sm:$0x1] %vm329_vm1, %v4168_v0  ;;  %v4391_v24 = vld [vmem:[%s4285_s27 + $0xa8] sm:$0xff]  ;;  %v4408_v28 = vld [vmem:[%s4285_s27 + $0xb0] sm:$0xff] }
  0x1d   : > { %363 = vst.msk [vmem:[#allocation2 + $0x179] sm:$0x1] %vm329_vm1, %v4168_v0  ;;  %364 = vst.msk [vmem:[#allocation2 + $0x191] sm:$0x1] %vm329_vm1, %v4168_v0  ;;  %v4411_v29 = vld [vmem:[%s4285_s27 + $0xb8] sm:$0xff]  ;;  %v4430_v33 = vld [vmem:[%s4285_s27 + $0xc0] sm:$0xff] }
  0x1e   : > { %324 = vst.msk [vmem:[#allocation2 + $0x10] sm:$0x3] %vm323_vm2, %v4168_v0  ;;  %328 = vst.msk [vmem:[#allocation2 + $0x1a8] sm:$0x3] %vm323_vm2, %v4168_v0  ;;  %v4433_v34 = vld [vmem:[%s4285_s27 + $0xc8] sm:$0xff]  ;;  %v4436_v35 = vld [vmem:[%s4285_s27 + $0xd0] sm:$0xff] }
  0x1f   : > { %330 = vst.msk [vmem:[#allocation2] sm:$0x1] %vm329_vm1, %v4168_v0  ;;  %347 = vst.msk [vmem:[#allocation2 + $0x198] sm:$0x1] %vm329_vm1, %v4168_v0  ;;  %v4447_v36 = vld [vmem:[%s4285_s27 + $0xd8] sm:$0xff]  ;;  %v4450_v37 = vld [vmem:[%s4285_s27 + $0xe0] sm:$0xff] }
  0x20   : > { %348 = vst.msk [vmem:[#allocation2 + $0x11] sm:$0x1] %vm329_vm1, %v4168_v0  ;;  %365 = vst.msk [vmem:[#allocation2 + $0x1a9] sm:$0x1] %vm329_vm1, %v4168_v0  ;;  %v4453_v38 = vld [vmem:[%s4285_s27 + $0xe8] sm:$0xff]  ;;  %s4176_s15 = smov 32  }
  0x21   : > { %7487 = vst [vmem:[#allocation4_spill] sm:$0xff] %v4288_v1  ;;  %7488 = vst [vmem:[#allocation5_spill] sm:$0xff] %v4291_v2  ;;  %v400_v48 = vld [vmem:[#allocation2 + $0x8] sm:$0xff]  ;;  %vm1589_vm9 = vcmask 228544   ;;  %vm1782_vm10 = vcmask 261344   ;;  %vm1975_vm11 = vcmask 294144  }
  0x22   : > { %7489 = vst [vmem:[#allocation6_spill] sm:$0xff] %v4294_v3  ;;  %367 = vst.msk [vmem:[#allocation2 + $0x19] sm:$0xff] %vm320_vm0, %v4288_v1  ;;  %vm2076_vm12 = vcmask 293888   ;;  %vm2290_vm13 = vcmask 64512   ;;  %vm2488_vm14 = vcmask 1043459   ;;  %vm2491_vm15 = vcmask 1044484  }
  0x23   : > { %368 = vst.msk [vmem:[#allocation2 + $0x21] sm:$0xff] %vm320_vm0, %v4291_v2  ;;  %369 = vst.msk [vmem:[#allocation2 + $0x31] sm:$0xff] %vm320_vm0, %v4294_v3  ;;  %v656_v3 = vld [vmem:[#allocation2 + $0x2] sm:$0xff]  ;;  %vm2497_vm1 = vcmask 1046534   ;;  %vm2482_vm2 = vcmask 1041409   ;;  %s3975_s20 = sshll.u32 %s4229_s22, 1 }
  0x24   : > { %7490 = vst [vmem:[#allocation7_spill] sm:$0xff] %v4303_v4  ;;  %7491 = vst [vmem:[#allocation8_spill] sm:$0xff] %v4306_v5  ;;  %p5602_p4 = scmp.lt.s32.totalorder %s3975_s20, 3  ;;  %s4177_s11 = smov 40  }
  0x25   : > { %7492 = vst [vmem:[#allocation9_spill] sm:$0xff] %v4309_v6  ;;  %v464_v8 = vld [vmem:[#allocation2 + $0x9] sm:$0xff]  ;;  %370 = vst.msk [vmem:[#allocation2 + $0x39] sm:$0xff] %vm320_vm0, %v4303_v4  ;;  %s4179_s16 = smov 56   ;;  %s4180_s17 = smov 64  }
  0x26   : > { %371 = vst.msk [vmem:[#allocation2 + $0x49] sm:$0xff] %vm320_vm0, %v4306_v5  ;;  %372 = vst.msk [vmem:[#allocation2 + $0x51] sm:$0xff] %vm320_vm0, %v4309_v6  ;;  %529 = vrot.lane.b32.xlu0 %v464_v8, %s4169_s28  ;;  %v399_v45 = vld [vmem:[#allocation2] sm:$0xff]  ;;  %v4670_v6 = vld [vmem:[%s4285_s27 + $0xf0] sm:$0xff]  ;;  %s7699_s20 = smov (!%p5602_p4, %s3975_s20), 3  ;;  %s4181_s18 = smov 72  }
  0x27   : > { %7493 = vst [vmem:[#allocation10_spill] sm:$0xff] %v4318_v9  ;;  %373 = vst.msk [vmem:[#allocation2 + $0x61] sm:$0xff] %vm320_vm0, %v4318_v9  ;;  %v4673_v5 = vld [vmem:[%s4285_s27 + $0xf8] sm:$0xff]  ;;  %s3976_s22 = sshll.u32 %s7699_s20, 3  ;;  %s4182_s19 = smov 80  }
  0x28   : > { %7494 = vst [vmem:[#allocation11_spill] sm:$0xff] %v4324_v10  ;;  %7495 = vst [vmem:[#allocation12_spill] sm:$0xff] %v4327_v11  ;;  %s5714_s27 = scalar_lea.vmem %s7377_s3, %s3976_s22  ;;  %s4183_s24 = smov 88  }
  0x29   : > { %7496 = vst [vmem:[#allocation13_spill] sm:$0xff] %v4330_v12  ;;  %374 = vst.msk [vmem:[#allocation2 + $0x69] sm:$0xff] %vm320_vm0, %v4324_v10  ;;  %v4393_v25 = vld [vmem:[#allocation2 + $0x19] sm:$0xff]  ;;  %s4184_s20 = smov 96  }
  0x2a   : > { %375 = vst.msk [vmem:[#allocation2 + $0x79] sm:$0xff] %vm320_vm0, %v4327_v11  ;;  %376 = vst.msk [vmem:[#allocation2 + $0x81] sm:$0xff] %vm320_vm0, %v4330_v12  ;;  %v4395_v26 = vld [vmem:[#allocation2 + $0x31] sm:$0xff]  ;;  %531 = vrot.lane.b32.xlu1 %v4393_v25, %s4169_s28  ;;  %v4405_v27 = vld [vmem:[#allocation2 + $0x21] sm:$0xff] }
  0x2b   : > { %7497 = vst [vmem:[#allocation14_spill] sm:$0xff] %v4339_v13  ;;  %7498 = vst [vmem:[#allocation15_spill] sm:$0xff] %v4342_v14  ;;  %535 = vrot.lane.b32.xlu0 %v4395_v26, %s4169_s28  ;;  %v4485_v46 = vld [vmem:[#allocation2 + $0x18] sm:$0xff]  ;;  %v4495_v49 = vld [vmem:[#allocation2 + $0x20] sm:$0xff] }
  0x2c   : > { %7499 = vst [vmem:[#allocation16_spill] sm:$0xff] %v4345_v15  ;;  %377 = vst.msk [vmem:[#allocation2 + $0x91] sm:$0xff] %vm320_vm0, %v4339_v13  ;;  %v4423_v31 = vld [vmem:[#allocation2 + $0x39] sm:$0xff]  ;;  %v4501_v51 = vld [vmem:[#allocation2 + $0x30] sm:$0xff] }
  0x2d   : > { %378 = vst.msk [vmem:[#allocation2 + $0x99] sm:$0xff] %vm320_vm0, %v4342_v14  ;;  %379 = vst.msk [vmem:[#allocation2 + $0xa9] sm:$0xff] %vm320_vm0, %v4345_v15  ;;  %v4419_v30 = vld [vmem:[#allocation2 + $0x49] sm:$0xff]  ;;  %v4455_v39 = vld [vmem:[#allocation2 + $0x51] sm:$0xff] }
  0x2e   : > { %7500 = vst [vmem:[#allocation17_spill] sm:$0xff] %v4354_v16  ;;  %7501 = vst [vmem:[#allocation18_spill] sm:$0xff] %v4357_v17  ;;  %533 = vrot.lane.b32.xlu1 %v4405_v27, %s4169_s28  ;;  %v4427_v32 = vld [vmem:[#allocation2 + $0x61] sm:$0xff]  ;;  %v4503_v52 = vld [vmem:[#allocation2 + $0x38] sm:$0xff] }
  0x2f   : > { %7502 = vst [vmem:[#allocation19_spill] sm:$0xff] %v4360_v18  ;;  %380 = vst.msk [vmem:[#allocation2 + $0xb1] sm:$0xff] %vm320_vm0, %v4354_v16  ;;  %539 = vrot.lane.b32.xlu0 %v4419_v30, %s4169_s28  ;;  %v4513_v54 = vld [vmem:[#allocation2 + $0x48] sm:$0xff]  ;;  %v4515_v55 = vld [vmem:[#allocation2 + $0x50] sm:$0xff] }
  0x30   : > { %381 = vst.msk [vmem:[#allocation2 + $0xc1] sm:$0xff] %vm320_vm0, %v4357_v17  ;;  %382 = vst.msk [vmem:[#allocation2 + $0xc9] sm:$0xff] %vm320_vm0, %v4360_v18  ;;  %v4469_v41 = vld [vmem:[#allocation2 + $0x69] sm:$0xff]  ;;  %v4523_v57 = vld [vmem:[#allocation2 + $0x60] sm:$0xff] }
  0x31   : > { %7503 = vst [vmem:[#allocation20_spill] sm:$0xff] %v4369_v19  ;;  %7504 = vst [vmem:[#allocation21_spill] sm:$0xff] %v4372_v20  ;;  %v4465_v40 = vld [vmem:[#allocation2 + $0x79] sm:$0xff]  ;;  %v4477_v43 = vld [vmem:[#allocation2 + $0x81] sm:$0xff] }
  0x32   : > { %7505 = vst [vmem:[#allocation22_spill] sm:$0xff] %v4375_v21  ;;  %383 = vst.msk [vmem:[#allocation2 + $0xd9] sm:$0xff] %vm320_vm0, %v4369_v19  ;;  %537 = vrot.lane.b32.xlu1 %v4423_v31, %s4169_s28  ;;  %v4525_v58 = vld [vmem:[#allocation2 + $0x68] sm:$0xff]  ;;  %v4527_v59 = vld [vmem:[#allocation2 + $0x78] sm:$0xff] }
  0x33   : > { %384 = vst.msk [vmem:[#allocation2 + $0xe1] sm:$0xff] %vm320_vm0, %v4372_v20  ;;  %385 = vst.msk [vmem:[#allocation2 + $0xf1] sm:$0xff] %vm320_vm0, %v4375_v21  ;;  %543 = vrot.lane.b32.xlu0 %v4427_v32, %s4169_s28  ;;  %v4473_v42 = vld [vmem:[#allocation2 + $0x91] sm:$0xff]  ;;  %v4537_v60 = vld [vmem:[#allocation2 + $0x80] sm:$0xff] }
  0x34   : > { %7506 = vst [vmem:[#allocation23_spill] sm:$0xff] %v4385_v22  ;;  %7507 = vst [vmem:[#allocation24_spill] sm:$0xff] %v4388_v23  ;;  %v4481_v44 = vld [vmem:[#allocation2 + $0xa9] sm:$0xff]  ;;  %v4487_v47 = vld [vmem:[#allocation2 + $0x99] sm:$0xff] }
  0x35   : > { %7508 = vst [vmem:[#allocation25_spill] sm:$0xff] %v4391_v24  ;;  %386 = vst.msk [vmem:[#allocation2 + $0xf9] sm:$0xff] %vm320_vm0, %v4385_v22  ;;  %v4539_v61 = vld [vmem:[#allocation2 + $0x90] sm:$0xff]  ;;  %v4541_v62 = vld [vmem:[#allocation2 + $0x98] sm:$0xff] }
  0x36   : > { %387 = vst.msk [vmem:[#allocation2 + $0x109] sm:$0xff] %vm320_vm0, %v4388_v23  ;;  %388 = vst.msk [vmem:[#allocation2 + $0x111] sm:$0xff] %vm320_vm0, %v4391_v24  ;;  %541 = vrot.lane.b32.xlu1 %v4455_v39, %s4169_s28  ;;  %v4507_v53 = vld [vmem:[#allocation2 + $0xb1] sm:$0xff]  ;;  %v4551_v0 = vld [vmem:[#allocation2 + $0xa8] sm:$0xff] }
  0x37   : > { %7509 = vst [vmem:[#allocation26_spill] sm:$0xff] %v4408_v28  ;;  %7510 = vst [vmem:[#allocation27_spill] sm:$0xff] %v4411_v29  ;;  %547 = vrot.lane.b32.xlu0 %v4465_v40, %s4169_s28  ;;  %v4497_v50 = vld [vmem:[#allocation2 + $0xc1] sm:$0xff]  ;;  %v4543_v63 = vld [vmem:[#allocation2 + $0xc9] sm:$0xff] }
  0x38   : > { %389 = vst.msk [vmem:[#allocation2 + $0x121] sm:$0xff] %vm320_vm0, %v4408_v28  ;;  %390 = vst.msk [vmem:[#allocation2 + $0x129] sm:$0xff] %vm320_vm0, %v4411_v29  ;;  %v4553_v7 = vld [vmem:[#allocation2 + $0xb0] sm:$0xff]  ;;  %v4555_v8 = vld [vmem:[#allocation2 + $0xc0] sm:$0xff] }
  0x39   : > { %7511 = vst [vmem:[#allocation28_spill] sm:$0xff] %v4430_v33  ;;  %7512 = vst [vmem:[#allocation29_spill] sm:$0xff] %v4433_v34  ;;  %v4517_v56 = vld [vmem:[#allocation2 + $0xd9] sm:$0xff] }
  0x3a   : > { %7513 = vst [vmem:[#allocation30_spill] sm:$0xff] %v4436_v35  ;;  %391 = vst.msk [vmem:[#allocation2 + $0x139] sm:$0xff] %vm320_vm0, %v4430_v33  ;;  %545 = vrot.lane.b32.xlu1 %v4469_v41, %s4169_s28  ;;  %v4593_v33 = vld [vmem:[#allocation2 + $0xf1] sm:$0xff]  ;;  %v4603_v24 = vld [vmem:[#allocation2 + $0xe1] sm:$0xff] }
  0x3b   : > { %392 = vst.msk [vmem:[#allocation2 + $0x141] sm:$0xff] %vm320_vm0, %v4433_v34  ;;  %393 = vst.msk [vmem:[#allocation2 + $0x151] sm:$0xff] %vm320_vm0, %v4436_v35  ;;  %551 = vrot.lane.b32.xlu0 %v4473_v42, %s4169_s28  ;;  %v4690_v1 = vld [vmem:[#allocation2 + $0x1a] sm:$0xff] }
  0x3c   : > { %7514 = vst [vmem:[#allocation31_spill] sm:$0xff] %v4447_v36  ;;  %7515 = vst [vmem:[#allocation32_spill] sm:$0xff] %v4450_v37  ;;  %v4619_v20 = vld [vmem:[#allocation2 + $0xf9] sm:$0xff] }
  0x3d   : > { %7516 = vst [vmem:[#allocation33_spill] sm:$0xff] %v4453_v38  ;;  %394 = vst.msk [vmem:[#allocation2 + $0x159] sm:$0xff] %vm320_vm0, %v4447_v36  ;;  %v4579_v36 = vld [vmem:[#allocation2 + $0xf8] sm:$0xff]  ;;  %v4581_v35 = vld [vmem:[#allocation2 + $0x108] sm:$0xff] }
  0x3e   : > { %395 = vst.msk [vmem:[#allocation2 + $0x169] sm:$0xff] %vm320_vm0, %v4450_v37  ;;  %396 = vst.msk [vmem:[#allocation2 + $0x171] sm:$0xff] %vm320_vm0, %v4453_v38  ;;  %549 = vrot.lane.b32.xlu1 %v4477_v43, %s4169_s28  ;;  %v4569_v38 = vld [vmem:[#allocation2 + $0xe0] sm:$0xff]  ;;  %v4577_v37 = vld [vmem:[#allocation2 + $0xf0] sm:$0xff] }
  0x3f   : > { %431 = vst.msk [vmem:[#allocation3] sm:$0xff] %vm320_vm0, %v399_v45  ;;  %433 = vst.msk [vmem:[#allocation3 + $0x10] sm:$0xff] %vm320_vm0, %v4485_v46  ;;  %555 = vrot.lane.b32.xlu0 %v4481_v44, %s4169_s28  ;;  %v4565_v45 = vld [vmem:[#allocation2 + $0xc8] sm:$0xff]  ;;  %v4591_v34 = vld [vmem:[#allocation2 + $0x110] sm:$0xff] }
  0x40   : > { %432 = vst.msk [vmem:[#allocation3 + $0x8] sm:$0xff] %vm320_vm0, %v400_v48  ;;  %434 = vst.msk [vmem:[#allocation3 + $0x18] sm:$0xff] %vm320_vm0, %v4495_v49  ;;  %v4567_v48 = vld [vmem:[#allocation2 + $0xd8] sm:$0xff]  ;;  %v4599_v29 = vld [vmem:[#allocation2 + $0x120] sm:$0xff] }
  0x41   : > { %435 = vst.msk [vmem:[#allocation3 + $0x20] sm:$0xff] %vm320_vm0, %v4501_v51  ;;  %436 = vst.msk [vmem:[#allocation3 + $0x28] sm:$0xff] %vm320_vm0, %v4503_v52  ;;  %v4601_v28 = vld [vmem:[#allocation2 + $0x128] sm:$0xff]  ;;  %v4615_v22 = vld [vmem:[#allocation2 + $0x138] sm:$0xff] }
  0x42   : > { %553 = vrot.lane.b32.xlu1 %v4487_v47, %s4169_s28  ;;  %437 = vst.msk [vmem:[#allocation3 + $0x30] sm:$0xff] %vm320_vm0, %v4513_v54  ;;  %438 = vst.msk [vmem:[#allocation3 + $0x38] sm:$0xff] %vm320_vm0, %v4515_v55  ;;  %v4611_v23 = vld [vmem:[#allocation2 + $0x109] sm:$0xff]  ;;  %v4617_v21 = vld [vmem:[#allocation2 + $0x140] sm:$0xff] }
  0x43   : > { %559 = vrot.lane.b32.xlu0 %v4497_v50, %s4169_s28  ;;  %439 = vst.msk [vmem:[#allocation3 + $0x40] sm:$0xff] %vm320_vm0, %v4523_v57  ;;  %440 = vst.msk [vmem:[#allocation3 + $0x48] sm:$0xff] %vm320_vm0, %v4525_v58  ;;  %v4627_v19 = vld [vmem:[#allocation2 + $0x121] sm:$0xff]  ;;  %v4631_v18 = vld [vmem:[#allocation2 + $0x150] sm:$0xff] }
  0x44   : > { %441 = vst.msk [vmem:[#allocation3 + $0x50] sm:$0xff] %vm320_vm0, %v4527_v59  ;;  %442 = vst.msk [vmem:[#allocation3 + $0x58] sm:$0xff] %vm320_vm0, %v4537_v60  ;;  %v4633_v17 = vld [vmem:[#allocation2 + $0x158] sm:$0xff]  ;;  %v4651_v12 = vld [vmem:[#allocation2 + $0x129] sm:$0xff] }
  0x45   : > { %443 = vst.msk [vmem:[#allocation3 + $0x60] sm:$0xff] %vm320_vm0, %v4539_v61  ;;  %444 = vst.msk [vmem:[#allocation3 + $0x68] sm:$0xff] %vm320_vm0, %v4541_v62  ;;  %v4635_v16 = vld [vmem:[#allocation2 + $0x111] sm:$0xff]  ;;  %v4643_v15 = vld [vmem:[#allocation2 + $0x139] sm:$0xff] }
  0x46   : > { %557 = vrot.lane.b32.xlu1 %v4507_v53, %s4169_s28  ;;  %445 = vst.msk [vmem:[#allocation3 + $0x70] sm:$0xff] %vm320_vm0, %v4551_v0  ;;  %446 = vst.msk [vmem:[#allocation3 + $0x78] sm:$0xff] %vm320_vm0, %v4553_v7  ;;  %v4647_v14 = vld [vmem:[#allocation2 + $0x168] sm:$0xff]  ;;  %v4649_v13 = vld [vmem:[#allocation2 + $0x170] sm:$0xff] }
  0x47   : > { %447 = vst.msk [vmem:[#allocation3 + $0x80] sm:$0xff] %vm320_vm0, %v4555_v8  ;;  %448 = vst.msk [vmem:[#allocation3 + $0x88] sm:$0xff] %vm320_vm0, %v4565_v45  ;;  %563 = vrot.lane.b32.xlu0 %v4517_v56, %s4169_s28  ;;  %v4659_v11 = vld [vmem:[#allocation2 + $0x151] sm:$0xff]  ;;  %v4663_v10 = vld [vmem:[#allocation2 + $0x141] sm:$0xff] }
  0x48   : > { %449 = vst.msk [vmem:[#allocation3 + $0x90] sm:$0xff] %vm320_vm0, %v4567_v48  ;;  %450 = vst.msk [vmem:[#allocation3 + $0x98] sm:$0xff] %vm320_vm0, %v4569_v38  ;;  %v4667_v9 = vld [vmem:[#allocation2 + $0x169] sm:$0xff]  ;;  %v4681_v4 = vld [vmem:[#allocation2 + $0x159] sm:$0xff] }
  0x49   : > { %451 = vst.msk [vmem:[#allocation3 + $0xa0] sm:$0xff] %vm320_vm0, %v4577_v37  ;;  %452 = vst.msk [vmem:[#allocation3 + $0xa8] sm:$0xff] %vm320_vm0, %v4579_v36  ;;  %v4687_v2 = vld [vmem:[#allocation2 + $0x171] sm:$0xff] }
  0x4a   : > { %453 = vst.msk [vmem:[#allocation3 + $0xb0] sm:$0xff] %vm320_vm0, %v4581_v35  ;;  %454 = vst.msk [vmem:[#allocation3 + $0xb8] sm:$0xff] %vm320_vm0, %v4591_v34  ;;  %561 = vrot.lane.b32.xlu1 %v4543_v63, %s4169_s28 }
  0x4b   : > { %455 = vst.msk [vmem:[#allocation3 + $0xc0] sm:$0xff] %vm320_vm0, %v4599_v29  ;;  %456 = vst.msk [vmem:[#allocation3 + $0xc8] sm:$0xff] %vm320_vm0, %v4601_v28  ;;  %567 = vrot.lane.b32.xlu0 %v4593_v33, %s4169_s28 }
  0x4c   : > { %457 = vst.msk [vmem:[#allocation3 + $0xd0] sm:$0xff] %vm320_vm0, %v4615_v22  ;;  %458 = vst.msk [vmem:[#allocation3 + $0xd8] sm:$0xff] %vm320_vm0, %v4617_v21 }
  0x4d   : > { %459 = vst.msk [vmem:[#allocation3 + $0xe0] sm:$0xff] %vm320_vm0, %v4631_v18  ;;  %460 = vst.msk [vmem:[#allocation3 + $0xe8] sm:$0xff] %vm320_vm0, %v4633_v17 }
  0x4e   : > { %565 = vrot.lane.b32.xlu1 %v4603_v24, %s4169_s28  ;;  %7517 = vst [vmem:[#allocation34_spill] sm:$0xff] %v4651_v12  ;;  %461 = vst.msk [vmem:[#allocation3 + $0xf0] sm:$0xff] %vm320_vm0, %v4647_v14 }
  0x4f   : > { %571 = vrot.lane.b32.xlu0 %v4611_v23, %s4169_s28  ;;  %462 = vst.msk [vmem:[#allocation3 + $0xf8] sm:$0xff] %vm320_vm0, %v4649_v13  ;;  %7518 = vst [vmem:[#allocation35_spill] sm:$0xff] %v4659_v11 }
  0x50   : > { %7519 = vst [vmem:[#allocation36_spill] sm:$0xff] %v4663_v10  ;;  %7520 = vst [vmem:[#allocation37_spill] sm:$0xff] %v4667_v9 }
  0x51   : > { %7521 = vst [vmem:[#allocation38_spill] sm:$0xff] %v4670_v6  ;;  %7522 = vst [vmem:[#allocation39_spill] sm:$0xff] %v4673_v5 }
  0x52   : > { %569 = vrot.lane.b32.xlu1 %v4619_v20, %s4169_s28  ;;  %397 = vst.msk [vmem:[#allocation2 + $0x181] sm:$0xff] %vm320_vm0, %v4670_v6  ;;  %398 = vst.msk [vmem:[#allocation2 + $0x189] sm:$0xff] %vm320_vm0, %v4673_v5  ;;  %v657_v5 = vld [vmem:[#allocation2 + $0xa] sm:$0xff]  ;;  %v4696_v6 = vld [vmem:[#allocation2 + $0x32] sm:$0xff] }
  0x53   : > { %575 = vrot.lane.b32.xlu0 %v4627_v19, %s4169_s28  ;;  %7523 = vst [vmem:[#allocation40_spill] sm:$0xff] %v4681_v4  ;;  %7524 = vst [vmem:[#allocation41_spill] sm:$0xff] %v4687_v2 }
  0x54   : > { %7525 = vst [vmem:[#allocation42_spill] sm:$0xff] %v4690_v1  ;;  %7526 = vst [vmem:[#allocation43_spill] sm:$0xff] %v4696_v6 }
  0x56   : > { %573 = vrot.lane.b32.xlu1 %v4635_v16, %s4169_s28 }
  0x57   : > { %579 = vrot.lane.b32.xlu0 %v4643_v15, %s4169_s28 }
  0x5a   : > { %577 = vrot.lane.b32.xlu1 %v4651_v12, %s4169_s28  ;;  %v685_v12 = vld [vmem:[#allocation2 + $0x15a] sm:$0xff] }
  0x5b   : > { %583 = vrot.lane.b32.xlu0 %v4659_v11, %s4169_s28  ;;  %v675_v11 = vld [vmem:[#allocation2 + $0xe2] sm:$0xff] }
  0x5e   : > { %581 = vrot.lane.b32.xlu1 %v4663_v10, %s4169_s28  ;;  %v671_v10 = vld [vmem:[#allocation2 + $0xb2] sm:$0xff] }
  0x5f   : > { %587 = vrot.lane.b32.xlu0 %v4667_v9, %s4169_s28  ;;  %v4699_v9 = vld [vmem:[#allocation2 + $0x22] sm:$0xff] }
  0x60   : > { %7527 = vst [vmem:[#allocation44_spill] sm:$0xff] %v4699_v9 }
  0x62   : > { %585 = vrot.lane.b32.xlu1 %v4681_v4, %s4169_s28  ;;  %v4703_v4 = vld [vmem:[#allocation2 + $0x4a] sm:$0xff] }
  0x63   : > { %720 = vrot.lane.b32.xlu0 %v656_v3, %s4170_s29  ;;  %7528 = vst [vmem:[#allocation45_spill] sm:$0xff] %v4703_v4  ;;  %v4707_v3 = vld [vmem:[#allocation2 + $0x3a] sm:$0xff] }
  0x64   : > { %7529 = vst [vmem:[#allocation46_spill] sm:$0xff] %v4707_v3 }
  0x66   : > { %589 = vrot.lane.b32.xlu1 %v4687_v2, %s4169_s28  ;;  %v670_v2 = vld [vmem:[#allocation2 + $0xaa] sm:$0xff]  ;;  %s3977_s28 = sshll.u32 %s4276_s23, 1  ;;  %s4178_s23 = smov 48  }
  0x67   : > { %724 = vrot.lane.b32.xlu0 %v4690_v1, %s4170_s29  ;;  %v4711_v1 = vld [vmem:[#allocation2 + $0x62] sm:$0xff]  ;;  %s276_s14 = scalar_lea.vmem %s7378_s4, %s3977_s28 }
  0x68   : > { %7530 = vst [vmem:[#allocation47_spill] sm:$0xff] %v4711_v1 }
  0x6a   : > { %722 = vrot.lane.b32.xlu1 %v657_v5, %s4170_s29  ;;  %v4715_v5 = vld [vmem:[#allocation2 + $0x52] sm:$0xff] }
  0x6b   : > { %728 = vrot.lane.b32.xlu0 %v4696_v6, %s4170_s29  ;;  %7531 = vst [vmem:[#allocation48_spill] sm:$0xff] %v4715_v5  ;;  %v4719_v6 = vld [vmem:[#allocation2 + $0x7a] sm:$0xff] }
  0x6c   : > { %7532 = vst [vmem:[#allocation49_spill] sm:$0xff] %v4719_v6 }
  0x6e   : > { %726 = vrot.lane.b32.xlu1 %v4699_v9, %s4170_s29  ;;  %v4723_v9 = vld [vmem:[#allocation2 + $0x6a] sm:$0xff] }
  0x6f   : > { %732 = vrot.lane.b32.xlu0 %v4703_v4, %s4170_s29  ;;  %7533 = vst [vmem:[#allocation50_spill] sm:$0xff] %v4723_v9  ;;  %v668_v4 = vld [vmem:[#allocation2 + $0x92] sm:$0xff] }
  0x72   : > { %730 = vrot.lane.b32.xlu1 %v4707_v3, %s4170_s29  ;;  %v4729_v3 = vld [vmem:[#allocation2 + $0x82] sm:$0xff] }
  0x73   : > { %736 = vrot.lane.b32.xlu0 %v4711_v1, %s4170_s29  ;;  %7534 = vst [vmem:[#allocation51_spill] sm:$0xff] %v4729_v3  ;;  %v669_v1 = vld [vmem:[#allocation2 + $0x9a] sm:$0xff] }
  0x76   : > { %734 = vrot.lane.b32.xlu1 %v4715_v5, %s4170_s29  ;;  %v672_v5 = vld [vmem:[#allocation2 + $0xc2] sm:$0xff] }
  0x77   : > { %740 = vrot.lane.b32.xlu0 %v4719_v6, %s4170_s29  ;;  %v674_v6 = vld [vmem:[#allocation2 + $0xda] sm:$0xff] }
  0x7a   : > { %738 = vrot.lane.b32.xlu1 %v4723_v9, %s4170_s29  ;;  %v673_v9 = vld [vmem:[#allocation2 + $0xca] sm:$0xff] }
  0x7b   : > { %744 = vrot.lane.b32.xlu0 %v668_v4, %s4170_s29  ;;  %v676_v4 = vld [vmem:[#allocation2 + $0xf2] sm:$0xff] }
  0x7e   : > { %742 = vrot.lane.b32.xlu1 %v4729_v3, %s4170_s29  ;;  %v678_v3 = vld [vmem:[#allocation2 + $0x10a] sm:$0xff] }
  0x7f   : > { %748 = vrot.lane.b32.xlu0 %v670_v2, %s4170_s29  ;;  %v677_v2 = vld [vmem:[#allocation2 + $0xfa] sm:$0xff] }
  0x82   : > { %746 = vrot.lane.b32.xlu1 %v669_v1, %s4170_s29  ;;  %v680_v1 = vld [vmem:[#allocation2 + $0x122] sm:$0xff] }
  0x83   : > { %752 = vrot.lane.b32.xlu0 %v672_v5, %s4170_s29  ;;  %v679_v5 = vld [vmem:[#allocation2 + $0x112] sm:$0xff] }
  0x86   : > { %750 = vrot.lane.b32.xlu1 %v671_v10, %s4170_s29  ;;  %v681_v10 = vld [vmem:[#allocation2 + $0x12a] sm:$0xff] }
  0x87   : > { %756 = vrot.lane.b32.xlu0 %v674_v6, %s4170_s29  ;;  %v682_v6 = vld [vmem:[#allocation2 + $0x13a] sm:$0xff] }
  0x8a   : > { %754 = vrot.lane.b32.xlu1 %v673_v9, %s4170_s29  ;;  %v528_v9 = vpop.permute.xlu0 %527 }
  0x8b   : > { %760 = vrot.lane.b32.xlu0 %v676_v4, %s4170_s29  ;;  %624 = vst.msk [vmem:[#allocation3] sm:$0xff] %vm623_vm3, %v528_v9  ;;  %v683_v4 = vld [vmem:[#allocation2 + $0x142] sm:$0xff] }
  0x8e   : > { %758 = vrot.lane.b32.xlu1 %v675_v11, %s4170_s29  ;;  %v684_v11 = vld [vmem:[#allocation2 + $0x152] sm:$0xff] }
  0x8f   : > { %764 = vrot.lane.b32.xlu0 %v678_v3, %s4170_s29 }
  0x92   : > { %762 = vrot.lane.b32.xlu1 %v677_v2, %s4170_s29 }
  0x93   : > { %768 = vrot.lane.b32.xlu0 %v680_v1, %s4170_s29  ;;  %v686_v1 = vld [vmem:[#allocation2 + $0x16a] sm:$0xff] }
  0x96   : > { %766 = vrot.lane.b32.xlu1 %v679_v5, %s4170_s29 }
  0x97   : > { %772 = vrot.lane.b32.xlu0 %v682_v6, %s4170_s29 }
  0x98   : > { %v530_v3 = vpop.permute.xlu0 %529 }
  0x99   : > { %625 = vst.msk [vmem:[#allocation3 + $0x8] sm:$0xff] %vm623_vm3, %v530_v3 }
  0x9a   : > { %770 = vrot.lane.b32.xlu1 %v681_v10, %s4170_s29  ;;  %v687_v10 = vld [vmem:[#allocation2 + $0x172] sm:$0xff] }
  0x9b   : > { %776 = vrot.lane.b32.xlu0 %v684_v11, %s4170_s29 }
  0x9c   : > { %v532_v2 = vpop.permute.xlu1 %531 }
  0x9d   : > { %626 = vst.msk [vmem:[#allocation3 + $0x10] sm:$0xff] %vm623_vm3, %v532_v2  ;;  %v536_v5 = vpop.permute.xlu0 %535 }
  0x9e   : > { %774 = vrot.lane.b32.xlu1 %v683_v4, %s4170_s29  ;;  %628 = vst.msk [vmem:[#allocation3 + $0x20] sm:$0xff] %vm623_vm3, %v536_v5 }
  0x9f   : > { %780 = vrot.lane.b32.xlu0 %v686_v1, %s4170_s29 }
  0xa0   : > { %v534_v6 = vpop.permute.xlu1 %533 }
  0xa1   : > { %627 = vst.msk [vmem:[#allocation3 + $0x18] sm:$0xff] %vm623_vm3, %v534_v6  ;;  %v540_v9 = vpop.permute.xlu0 %539 }
  0xa2   : > { %778 = vrot.lane.b32.xlu1 %v685_v12, %s4170_s29  ;;  %630 = vst.msk [vmem:[#allocation3 + $0x30] sm:$0xff] %vm623_vm3, %v540_v9 }
  0xa3   : > { %913 = vrot.lane.b32.xlu0 %v4485_v46, %s4171_s30 }
  0xa4   : > { %v538_v11 = vpop.permute.xlu1 %537 }
  0xa5   : > { %629 = vst.msk [vmem:[#allocation3 + $0x28] sm:$0xff] %vm623_vm3, %v538_v11  ;;  %v544_v3 = vpop.permute.xlu0 %543 }
  0xa6   : > { %782 = vrot.lane.b32.xlu1 %v687_v10, %s4170_s29  ;;  %632 = vst.msk [vmem:[#allocation3 + $0x40] sm:$0xff] %vm623_vm3, %v544_v3 }
  0xa7   : > { %917 = vrot.lane.b32.xlu0 %v4501_v51, %s4171_s30 }
  0xa8   : > { %v542_v4 = vpop.permute.xlu1 %541 }
  0xa9   : > { %631 = vst.msk [vmem:[#allocation3 + $0x38] sm:$0xff] %vm623_vm3, %v542_v4  ;;  %v548_v12 = vpop.permute.xlu0 %547 }
  0xaa   : > { %915 = vrot.lane.b32.xlu1 %v4495_v49, %s4171_s30  ;;  %634 = vst.msk [vmem:[#allocation3 + $0x50] sm:$0xff] %vm623_vm3, %v548_v12 }
  0xab   : > { %921 = vrot.lane.b32.xlu0 %v4513_v54, %s4171_s30 }
  0xac   : > { %v546_v46 = vpop.permute.xlu1 %545 }
  0xad   : > { %633 = vst.msk [vmem:[#allocation3 + $0x48] sm:$0xff] %vm623_vm3, %v546_v46  ;;  %v552_v2 = vpop.permute.xlu0 %551 }
  0xae   : > { %919 = vrot.lane.b32.xlu1 %v4503_v52, %s4171_s30  ;;  %636 = vst.msk [vmem:[#allocation3 + $0x60] sm:$0xff] %vm623_vm3, %v552_v2 }
  0xaf   : > { %925 = vrot.lane.b32.xlu0 %v4523_v57, %s4171_s30 }
  0xb0   : > { %v550_v1 = vpop.permute.xlu1 %549 }
  0xb1   : > { %635 = vst.msk [vmem:[#allocation3 + $0x58] sm:$0xff] %vm623_vm3, %v550_v1  ;;  %v556_v49 = vpop.permute.xlu0 %555 }
  0xb2   : > { %923 = vrot.lane.b32.xlu1 %v4515_v55, %s4171_s30  ;;  %638 = vst.msk [vmem:[#allocation3 + $0x70] sm:$0xff] %vm623_vm3, %v556_v49 }
  0xb3   : > { %929 = vrot.lane.b32.xlu0 %v4527_v59, %s4171_s30 }
  0xb4   : > { %v554_v5 = vpop.permute.xlu1 %553 }
  0xb5   : > { %637 = vst.msk [vmem:[#allocation3 + $0x68] sm:$0xff] %vm623_vm3, %v554_v5  ;;  %v560_v6 = vpop.permute.xlu0 %559 }
  0xb6   : > { %927 = vrot.lane.b32.xlu1 %v4525_v58, %s4171_s30  ;;  %640 = vst.msk [vmem:[#allocation3 + $0x80] sm:$0xff] %vm623_vm3, %v560_v6 }
  0xb7   : > { %933 = vrot.lane.b32.xlu0 %v4539_v61, %s4171_s30 }
  0xb8   : > { %v558_v9 = vpop.permute.xlu1 %557 }
  0xb9   : > { %639 = vst.msk [vmem:[#allocation3 + $0x78] sm:$0xff] %vm623_vm3, %v558_v9  ;;  %v564_v10 = vpop.permute.xlu0 %563 }
  0xba   : > { %931 = vrot.lane.b32.xlu1 %v4537_v60, %s4171_s30  ;;  %642 = vst.msk [vmem:[#allocation3 + $0x90] sm:$0xff] %vm623_vm3, %v564_v10 }
  0xbb   : > { %937 = vrot.lane.b32.xlu0 %v4551_v0, %s4171_s30 }
  0xbc   : > { %v562_v11 = vpop.permute.xlu1 %561 }
  0xbd   : > { %641 = vst.msk [vmem:[#allocation3 + $0x88] sm:$0xff] %vm623_vm3, %v562_v11  ;;  %v568_v3 = vpop.permute.xlu0 %567 }
  0xbe   : > { %935 = vrot.lane.b32.xlu1 %v4541_v62, %s4171_s30  ;;  %644 = vst.msk [vmem:[#allocation3 + $0xa0] sm:$0xff] %vm623_vm3, %v568_v3 }
  0xbf   : > { %941 = vrot.lane.b32.xlu0 %v4555_v8, %s4171_s30 }
  0xc0   : > { %v566_v4 = vpop.permute.xlu1 %565 }
  0xc1   : > { %643 = vst.msk [vmem:[#allocation3 + $0x98] sm:$0xff] %vm623_vm3, %v566_v4  ;;  %v572_v12 = vpop.permute.xlu0 %571 }
  0xc2   : > { %939 = vrot.lane.b32.xlu1 %v4553_v7, %s4171_s30  ;;  %646 = vst.msk [vmem:[#allocation3 + $0xb0] sm:$0xff] %vm623_vm3, %v572_v12  ;;  %v880_v12 = vld [vmem:[#allocation2 + $0x188] sm:$0xff] }
  0xc3   : > { %945 = vrot.lane.b32.xlu0 %v4567_v48, %s4171_s30 }
  0xc4   : > { %v570_v46 = vpop.permute.xlu1 %569 }
  0xc5   : > { %645 = vst.msk [vmem:[#allocation3 + $0xa8] sm:$0xff] %vm623_vm3, %v570_v46  ;;  %v576_v2 = vpop.permute.xlu0 %575 }
  0xc6   : > { %943 = vrot.lane.b32.xlu1 %v4565_v45, %s4171_s30  ;;  %648 = vst.msk [vmem:[#allocation3 + $0xc0] sm:$0xff] %vm623_vm3, %v576_v2 }
  0xc7   : > { %949 = vrot.lane.b32.xlu0 %v4577_v37, %s4171_s30 }
  0xc8   : > { %v574_v1 = vpop.permute.xlu1 %573 }
  0xc9   : > { %647 = vst.msk [vmem:[#allocation3 + $0xb8] sm:$0xff] %vm623_vm3, %v574_v1  ;;  %v580_v49 = vpop.permute.xlu0 %579 }
  0xca   : > { %947 = vrot.lane.b32.xlu1 %v4569_v38, %s4171_s30  ;;  %650 = vst.msk [vmem:[#allocation3 + $0xd0] sm:$0xff] %vm623_vm3, %v580_v49  ;;  %v7536_v49 = vld [vmem:[#allocation35_spill] sm:$0xff] }
  0xcb   : > { %953 = vrot.lane.b32.xlu0 %v4581_v35, %s4171_s30 }
  0xcc   : > { %v578_v5 = vpop.permute.xlu1 %577 }
  0xcd   : > { %649 = vst.msk [vmem:[#allocation3 + $0xc8] sm:$0xff] %vm623_vm3, %v578_v5  ;;  %v584_v6 = vpop.permute.xlu0 %583 }
  0xce   : > { %951 = vrot.lane.b32.xlu1 %v4579_v36, %s4171_s30  ;;  %652 = vst.msk [vmem:[#allocation3 + $0xe0] sm:$0xff] %vm623_vm3, %v584_v6  ;;  %v7538_v6 = vld [vmem:[#allocation37_spill] sm:$0xff] }
  0xcf   : > { %957 = vrot.lane.b32.xlu0 %v4599_v29, %s4171_s30 }
  0xd0   : > { %v582_v37 = vpop.permute.xlu1 %581 }
  0xd1   : > { %651 = vst.msk [vmem:[#allocation3 + $0xd8] sm:$0xff] %vm623_vm3, %v582_v37  ;;  %v588_v9 = vpop.permute.xlu0 %587  ;;  %v1072_v37 = vld [vmem:[#allocation2 + $0x181] sm:$0xff] }
  0xd2   : > { %955 = vrot.lane.b32.xlu1 %v4591_v34, %s4171_s30  ;;  %654 = vst.msk [vmem:[#allocation3 + $0xf0] sm:$0xff] %vm623_vm3, %v588_v9  ;;  %v7539_v9 = vld [vmem:[#allocation40_spill] sm:$0xff] }
  0xd3   : > { %961 = vrot.lane.b32.xlu0 %v4615_v22, %s4171_s30 }
  0xd4   : > { %v586_v10 = vpop.permute.xlu1 %585 }
  0xd5   : > { %653 = vst.msk [vmem:[#allocation3 + $0xe8] sm:$0xff] %vm623_vm3, %v586_v10  ;;  %v721_v11 = vpop.permute.xlu0 %720 }
  0xd6   : > { %959 = vrot.lane.b32.xlu1 %v4601_v28, %s4171_s30  ;;  %817 = vst.msk [vmem:[#allocation3] sm:$0xff] %vm816_vm4, %v721_v11  ;;  %v879_v28 = vld [vmem:[#allocation2 + $0x180] sm:$0xff] }
  0xd7   : > { %965 = vrot.lane.b32.xlu0 %v4631_v18, %s4171_s30 }
  0xd8   : > { %v590_v29 = vpop.permute.xlu1 %589 }
  0xd9   : > { %655 = vst.msk [vmem:[#allocation3 + $0xf8] sm:$0xff] %vm623_vm3, %v590_v29  ;;  %v725_v3 = vpop.permute.xlu0 %724  ;;  %v7540_v29 = vld [vmem:[#allocation41_spill] sm:$0xff]  ;;  %vm2485_vm3 = vcmask 1042434  }
  0xda   : > { %963 = vrot.lane.b32.xlu1 %v4617_v21, %s4171_s30  ;;  %819 = vst.msk [vmem:[#allocation3 + $0x10] sm:$0xff] %vm816_vm4, %v725_v3 }
  0xdb   : > { %969 = vrot.lane.b32.xlu0 %v4647_v14, %s4171_s30 }
  0xdc   : > { %v723_v22 = vpop.permute.xlu1 %722 }
  0xdd   : > { %818 = vst.msk [vmem:[#allocation3 + $0x8] sm:$0xff] %vm816_vm4, %v723_v22  ;;  %v729_v4 = vpop.permute.xlu0 %728  ;;  %v1073_v22 = vld [vmem:[#allocation2 + $0x189] sm:$0xff] }
  0xde   : > { %967 = vrot.lane.b32.xlu1 %v4633_v17, %s4171_s30  ;;  %821 = vst.msk [vmem:[#allocation3 + $0x20] sm:$0xff] %vm816_vm4, %v729_v4  ;;  %v7541_v4 = vld [vmem:[#allocation42_spill] sm:$0xff] }
  0xdf   : > { %973 = vrot.lane.b32.xlu0 %v879_v28, %s4171_s30 }
  0xe0   : > { %v727_v18 = vpop.permute.xlu1 %726 }
  0xe1   : > { %820 = vst.msk [vmem:[#allocation3 + $0x18] sm:$0xff] %vm816_vm4, %v727_v18  ;;  %v733_v21 = vpop.permute.xlu0 %732 }
  0xe2   : > { %971 = vrot.lane.b32.xlu1 %v4649_v13, %s4171_s30  ;;  %823 = vst.msk [vmem:[#allocation3 + $0x30] sm:$0xff] %vm816_vm4, %v733_v21 }
  0xe3   : > { %1106 = vrot.lane.b32.xlu0 %v4393_v25, %s4172_s7 }
  0xe4   : > { %v731_v14 = vpop.permute.xlu1 %730 }
  0xe5   : > { %822 = vst.msk [vmem:[#allocation3 + $0x28] sm:$0xff] %vm816_vm4, %v731_v14  ;;  %v737_v17 = vpop.permute.xlu0 %736  ;;  %v7543_v14 = vld [vmem:[#allocation44_spill] sm:$0xff] }
  0xe6   : > { %975 = vrot.lane.b32.xlu1 %v880_v12, %s4171_s30  ;;  %825 = vst.msk [vmem:[#allocation3 + $0x40] sm:$0xff] %vm816_vm4, %v737_v17  ;;  %v7542_v12 = vld [vmem:[#allocation43_spill] sm:$0xff]  ;;  %s4186_s30 = smov 112  }
  0xe7   : > { %1110 = vrot.lane.b32.xlu0 %v4395_v26, %s4172_s7 }
  0xe8   : > { %v735_v46 = vpop.permute.xlu1 %734 }
  0xe9   : > { %824 = vst.msk [vmem:[#allocation3 + $0x38] sm:$0xff] %vm816_vm4, %v735_v46  ;;  %v741_v13 = vpop.permute.xlu0 %740 }
  0xea   : > { %1108 = vrot.lane.b32.xlu1 %v4405_v27, %s4172_s7  ;;  %827 = vst.msk [vmem:[#allocation3 + $0x50] sm:$0xff] %vm816_vm4, %v741_v13  ;;  %v7544_v13 = vld [vmem:[#allocation45_spill] sm:$0xff] }
  0xeb   : > { %1114 = vrot.lane.b32.xlu0 %v4419_v30, %s4172_s7 }
  0xec   : > { %v739_v25 = vpop.permute.xlu1 %738 }
  0xed   : > { %826 = vst.msk [vmem:[#allocation3 + $0x48] sm:$0xff] %vm816_vm4, %v739_v25  ;;  %v745_v2 = vpop.permute.xlu0 %744  ;;  %v7545_v25 = vld [vmem:[#allocation46_spill] sm:$0xff] }
  0xee   : > { %1112 = vrot.lane.b32.xlu1 %v4423_v31, %s4172_s7  ;;  %829 = vst.msk [vmem:[#allocation3 + $0x60] sm:$0xff] %vm816_vm4, %v745_v2 }
  0xef   : > { %1118 = vrot.lane.b32.xlu0 %v4427_v32, %s4172_s7 }
  0xf0   : > { %v743_v26 = vpop.permute.xlu1 %742 }
  0xf1   : > { %828 = vst.msk [vmem:[#allocation3 + $0x58] sm:$0xff] %vm816_vm4, %v743_v26  ;;  %v749_v27 = vpop.permute.xlu0 %748 }
  0xf2   : > { %1116 = vrot.lane.b32.xlu1 %v4455_v39, %s4172_s7  ;;  %831 = vst.msk [vmem:[#allocation3 + $0x70] sm:$0xff] %vm816_vm4, %v749_v27  ;;  %v7546_v27 = vld [vmem:[#allocation47_spill] sm:$0xff] }
  0xf3   : > { %1122 = vrot.lane.b32.xlu0 %v4465_v40, %s4172_s7 }
  0xf4   : > { %v747_v30 = vpop.permute.xlu1 %746 }
  0xf5   : > { %830 = vst.msk [vmem:[#allocation3 + $0x68] sm:$0xff] %vm816_vm4, %v747_v30  ;;  %v753_v31 = vpop.permute.xlu0 %752  ;;  %v7547_v30 = vld [vmem:[#allocation48_spill] sm:$0xff] }
  0xf6   : > { %1120 = vrot.lane.b32.xlu1 %v4469_v41, %s4172_s7  ;;  %833 = vst.msk [vmem:[#allocation3 + $0x80] sm:$0xff] %vm816_vm4, %v753_v31 }
  0xf7   : > { %1126 = vrot.lane.b32.xlu0 %v4473_v42, %s4172_s7 }
  0xf8   : > { %v751_v32 = vpop.permute.xlu1 %750 }
  0xf9   : > { %832 = vst.msk [vmem:[#allocation3 + $0x78] sm:$0xff] %vm816_vm4, %v751_v32  ;;  %v757_v39 = vpop.permute.xlu0 %756 }
  0xfa   : > { %1124 = vrot.lane.b32.xlu1 %v4477_v43, %s4172_s7  ;;  %835 = vst.msk [vmem:[#allocation3 + $0x90] sm:$0xff] %vm816_vm4, %v757_v39  ;;  %v7548_v39 = vld [vmem:[#allocation49_spill] sm:$0xff] }
  0xfb   : > { %1130 = vrot.lane.b32.xlu0 %v4481_v44, %s4172_s7 }
  0xfc   : > { %v755_v40 = vpop.permute.xlu1 %754 }
  0xfd   : > { %834 = vst.msk [vmem:[#allocation3 + $0x88] sm:$0xff] %vm816_vm4, %v755_v40  ;;  %v761_v41 = vpop.permute.xlu0 %760  ;;  %v7549_v40 = vld [vmem:[#allocation50_spill] sm:$0xff] }
  0xfe   : > { %1128 = vrot.lane.b32.xlu1 %v4487_v47, %s4172_s7  ;;  %837 = vst.msk [vmem:[#allocation3 + $0xa0] sm:$0xff] %vm816_vm4, %v761_v41 }
  0xff   : > { %1134 = vrot.lane.b32.xlu0 %v4497_v50, %s4172_s7 }
 0x100   : > { %v759_v42 = vpop.permute.xlu1 %758 }
 0x101   : > { %836 = vst.msk [vmem:[#allocation3 + $0x98] sm:$0xff] %vm816_vm4, %v759_v42  ;;  %v765_v43 = vpop.permute.xlu0 %764 }
 0x102   : > { %1132 = vrot.lane.b32.xlu1 %v4507_v53, %s4172_s7  ;;  %839 = vst.msk [vmem:[#allocation3 + $0xb0] sm:$0xff] %vm816_vm4, %v765_v43  ;;  %v7550_v43 = vld [vmem:[#allocation51_spill] sm:$0xff] }
 0x103   : > { %1138 = vrot.lane.b32.xlu0 %v4517_v56, %s4172_s7 }
 0x104   : > { %v763_v44 = vpop.permute.xlu1 %762 }
 0x105   : > { %838 = vst.msk [vmem:[#allocation3 + $0xa8] sm:$0xff] %vm816_vm4, %v763_v44  ;;  %v769_v47 = vpop.permute.xlu0 %768 }
 0x106   : > { %1136 = vrot.lane.b32.xlu1 %v4543_v63, %s4172_s7  ;;  %841 = vst.msk [vmem:[#allocation3 + $0xc0] sm:$0xff] %vm816_vm4, %v769_v47 }
 0x107   : > { %1142 = vrot.lane.b32.xlu0 %v4593_v33, %s4172_s7 }
 0x108   : > { %v767_v50 = vpop.permute.xlu1 %766 }
 0x109   : > { %840 = vst.msk [vmem:[#allocation3 + $0xb8] sm:$0xff] %vm816_vm4, %v767_v50  ;;  %v773_v53 = vpop.permute.xlu0 %772  ;;  %v1622_v50 = vld [vmem:[#allocation2 + $0x31] sm:$0xff] }
 0x10a   : > { %1140 = vrot.lane.b32.xlu1 %v4603_v24, %s4172_s7  ;;  %843 = vst.msk [vmem:[#allocation3 + $0xd0] sm:$0xff] %vm816_vm4, %v773_v53 }
 0x10b   : > { %1146 = vrot.lane.b32.xlu0 %v4611_v23, %s4172_s7 }
 0x10c   : > { %v771_v56 = vpop.permute.xlu1 %770 }
 0x10d   : > { %842 = vst.msk [vmem:[#allocation3 + $0xc8] sm:$0xff] %vm816_vm4, %v771_v56  ;;  %v777_v63 = vpop.permute.xlu0 %776  ;;  %v1624_v56 = vld [vmem:[#allocation2 + $0x49] sm:$0xff] }
 0x10e   : > { %1144 = vrot.lane.b32.xlu1 %v4619_v20, %s4172_s7  ;;  %845 = vst.msk [vmem:[#allocation3 + $0xe0] sm:$0xff] %vm816_vm4, %v777_v63  ;;  %v7535_v20 = vld [vmem:[#allocation34_spill] sm:$0xff] }
 0x10f   : > { %1150 = vrot.lane.b32.xlu0 %v4627_v19, %s4172_s7 }
 0x110   : > { %v775_v33 = vpop.permute.xlu1 %774 }
 0x111   : > { %844 = vst.msk [vmem:[#allocation3 + $0xd8] sm:$0xff] %vm816_vm4, %v775_v33  ;;  %v781_v24 = vpop.permute.xlu0 %780 }
 0x112   : > { %1148 = vrot.lane.b32.xlu1 %v4635_v16, %s4172_s7  ;;  %847 = vst.msk [vmem:[#allocation3 + $0xf0] sm:$0xff] %vm816_vm4, %v781_v24  ;;  %v7537_v16 = vld [vmem:[#allocation36_spill] sm:$0xff] }
 0x113   : > { %1154 = vrot.lane.b32.xlu0 %v4643_v15, %s4172_s7 }
 0x114   : > { %v779_v23 = vpop.permute.xlu1 %778 }
 0x115   : > { %846 = vst.msk [vmem:[#allocation3 + $0xe8] sm:$0xff] %vm816_vm4, %v779_v23  ;;  %v914_v1 = vpop.permute.xlu0 %913  ;;  %v4158_v23 = vld [vmem:[%s7375_s1 + $0x8] sm:$0xff]  }
 0x116   : > { %1152 = vrot.lane.b32.xlu1 %v7535_v20, %s4172_s7  ;;  %1010 = vst.msk [vmem:[#allocation3] sm:$0xff] %vm1009_vm5, %v914_v1  ;;  %v1625_v20 = vld [vmem:[#allocation2 + $0x51] sm:$0xff] }
 0x117   : > { %1158 = vrot.lane.b32.xlu0 %v7536_v49, %s4172_s7 }
 0x118   : > { %v783_v19 = vpop.permute.xlu1 %782 }
 0x119   : > { %848 = vst.msk [vmem:[#allocation3 + $0xf8] sm:$0xff] %vm816_vm4, %v783_v19  ;;  %v918_v5 = vpop.permute.xlu0 %917  ;;  %v4159_v19 = vld [vmem:[%s7375_s1] sm:$0xff]   ;;  %vm2500_vm4 = vcmask 1047559  }
 0x11a   : > { %1156 = vrot.lane.b32.xlu1 %v7537_v16, %s4172_s7  ;;  %1012 = vst.msk [vmem:[#allocation3 + $0x10] sm:$0xff] %vm1009_vm5, %v918_v5 }
 0x11b   : > { %1162 = vrot.lane.b32.xlu0 %v7538_v6, %s4172_s7 }
 0x11c   : > { %v916_v15 = vpop.permute.xlu1 %915 }
 0x11d   : > { %1011 = vst.msk [vmem:[#allocation3 + $0x8] sm:$0xff] %vm1009_vm5, %v916_v15  ;;  %v922_v10 = vpop.permute.xlu0 %921 }
 0x11e   : > { %1160 = vrot.lane.b32.xlu1 %v7539_v9, %s4172_s7  ;;  %1014 = vst.msk [vmem:[#allocation3 + $0x20] sm:$0xff] %vm1009_vm5, %v922_v10  ;;  %v1626_v9 = vld [vmem:[#allocation2 + $0x61] sm:$0xff] }
 0x11f   : > { %1166 = vrot.lane.b32.xlu0 %v1072_v37, %s4172_s7 }
 0x120   : > { %v920_v11 = vpop.permute.xlu1 %919 }
 0x121   : > { %1013 = vst.msk [vmem:[#allocation3 + $0x18] sm:$0xff] %vm1009_vm5, %v920_v11  ;;  %v926_v3 = vpop.permute.xlu0 %925  ;;  %v1628_v11 = vld [vmem:[#allocation2 + $0x79] sm:$0xff] }
 0x122   : > { %1164 = vrot.lane.b32.xlu1 %v7540_v29, %s4172_s7  ;;  %1016 = vst.msk [vmem:[#allocation3 + $0x30] sm:$0xff] %vm1009_vm5, %v926_v3  ;;  %v1627_v29 = vld [vmem:[#allocation2 + $0x69] sm:$0xff] }
 0x123   : > { %1299 = vrot.lane.b32.xlu0 %v7541_v4, %s4173_s8 }
 0x124   : > { %v924_v28 = vpop.permute.xlu1 %923 }
 0x125   : > { %1015 = vst.msk [vmem:[#allocation3 + $0x28] sm:$0xff] %vm1009_vm5, %v924_v28  ;;  %v930_v18 = vpop.permute.xlu0 %929  ;;  %v1629_v28 = vld [vmem:[#allocation2 + $0x81] sm:$0xff] }
 0x126   : > { %1168 = vrot.lane.b32.xlu1 %v1073_v22, %s4172_s7  ;;  %1018 = vst.msk [vmem:[#allocation3 + $0x40] sm:$0xff] %vm1009_vm5, %v930_v18 }
 0x127   : > { %1303 = vrot.lane.b32.xlu0 %v7542_v12, %s4173_s8 }
 0x128   : > { %v928_v21 = vpop.permute.xlu1 %927 }
 0x129   : > { %1017 = vst.msk [vmem:[#allocation3 + $0x38] sm:$0xff] %vm1009_vm5, %v928_v21  ;;  %v934_v17 = vpop.permute.xlu0 %933  ;;  %v1820_v21 = vld [vmem:[#allocation2 + $0x6a] sm:$0xff] }
 0x12a   : > { %1301 = vrot.lane.b32.xlu1 %v7543_v14, %s4173_s8  ;;  %1020 = vst.msk [vmem:[#allocation3 + $0x50] sm:$0xff] %vm1009_vm5, %v934_v17  ;;  %v1245_v14 = vld [vmem:[#allocation2 + $0x92] sm:$0xff] }
 0x12b   : > { %1307 = vrot.lane.b32.xlu0 %v7544_v13, %s4173_s8 }
 0x12c   : > { %v932_v46 = vpop.permute.xlu1 %931 }
 0x12d   : > { %1019 = vst.msk [vmem:[#allocation3 + $0x48] sm:$0xff] %vm1009_vm5, %v932_v46  ;;  %v938_v2 = vpop.permute.xlu0 %937  ;;  %v1822_v46 = vld [vmem:[#allocation2 + $0x82] sm:$0xff] }
 0x12e   : > { %1305 = vrot.lane.b32.xlu1 %v7545_v25, %s4173_s8  ;;  %1022 = vst.msk [vmem:[#allocation3 + $0x60] sm:$0xff] %vm1009_vm5, %v938_v2  ;;  %v1246_v2 = vld [vmem:[#allocation2 + $0x9a] sm:$0xff] }
 0x12f   : > { %1311 = vrot.lane.b32.xlu0 %v7546_v27, %s4173_s8 }
 0x130   : > { %v936_v26 = vpop.permute.xlu1 %935 }
 0x131   : > { %1021 = vst.msk [vmem:[#allocation3 + $0x58] sm:$0xff] %vm1009_vm5, %v936_v26  ;;  %v942_v31 = vpop.permute.xlu0 %941 }
 0x132   : > { %1309 = vrot.lane.b32.xlu1 %v7547_v30, %s4173_s8  ;;  %1024 = vst.msk [vmem:[#allocation3 + $0x70] sm:$0xff] %vm1009_vm5, %v942_v31  ;;  %v1630_v31 = vld [vmem:[#allocation2 + $0x91] sm:$0xff] }
 0x133   : > { %1315 = vrot.lane.b32.xlu0 %v7548_v39, %s4173_s8  ;;  %v1632_v39 = vld [vmem:[#allocation2 + $0xa9] sm:$0xff] }
 0x134   : > { %v940_v32 = vpop.permute.xlu1 %939 }
 0x135   : > { %1023 = vst.msk [vmem:[#allocation3 + $0x68] sm:$0xff] %vm1009_vm5, %v940_v32  ;;  %v946_v41 = vpop.permute.xlu0 %945 }
 0x136   : > { %1313 = vrot.lane.b32.xlu1 %v7549_v40, %s4173_s8  ;;  %1026 = vst.msk [vmem:[#allocation3 + $0x80] sm:$0xff] %vm1009_vm5, %v946_v41 }
 0x137   : > { %1493 = vrot.lane.b32.xlu0 %v4501_v51, %s4174_s9 }
 0x138   : > { %v944_v42 = vpop.permute.xlu1 %943 }
 0x139   : > { %1025 = vst.msk [vmem:[#allocation3 + $0x78] sm:$0xff] %vm1009_vm5, %v944_v42  ;;  %v950_v44 = vpop.permute.xlu0 %949  ;;  %v1633_v42 = vld [vmem:[#allocation2 + $0xb1] sm:$0xff] }
 0x13a   : > { %1317 = vrot.lane.b32.xlu1 %v7550_v43, %s4173_s8  ;;  %1028 = vst.msk [vmem:[#allocation3 + $0x90] sm:$0xff] %vm1009_vm5, %v950_v44 }
 0x13b   : > { %1497 = vrot.lane.b32.xlu0 %v4513_v54, %s4174_s9  ;;  %v4157_v54 = vld [vmem:[%s7375_s1 + $0x10] ss:$0 sps:$4 sm:$0x33]  }
 0x13c   : > { %v948_v47 = vpop.permute.xlu1 %947  ;;  %4127 = vmatprep.subr.msk.bf16.mxu0 %vm2125_vm6, %v4157_v54  ;;  %v2127_v33 = vsel %vm2125_vm6, %v4157_v54, 0 }
 0x13d   : > { %1027 = vst.msk [vmem:[#allocation3 + $0x88] sm:$0xff] %vm1009_vm5, %v948_v47  ;;  %v954_v53 = vpop.permute.xlu0 %953  ;;  %4056 = vmatpush3.bf16.msra.mxu0 %v2127_v33  ;;  %v1250_v33 = vld [vmem:[#allocation2 + $0xca] sm:$0xff] }
 0x13e   : > { %1495 = vrot.lane.b32.xlu1 %v4503_v52, %s4174_s9  ;;  %1030 = vst.msk [vmem:[#allocation3 + $0xa0] sm:$0xff] %vm1009_vm5, %v954_v53  ;;  %v1623_v52 = vld [vmem:[#allocation2 + $0x39] sm:$0xff]  ;;  %4057 = vmatprep.subr.bf16.mxu0 %v4158_v23 }
 0x13f   : > { %1686 = vrot.lane.b32.xlu0 %v1622_v50, %s4175_s10  ;;  %v1826_v53 = vld [vmem:[#allocation2 + $0xb2] sm:$0xff] }
 0x140   : > { %v952_v51 = vpop.permute.xlu1 %951 }
 0x141   : > { %1029 = vst.msk [vmem:[#allocation3 + $0x98] sm:$0xff] %vm1009_vm5, %v952_v51  ;;  %v958_v63 = vpop.permute.xlu0 %957  ;;  %4058 = vmatpush3.bf16.msra.mxu0 %v4158_v23 }
 0x142   : > { %1499 = vrot.lane.b32.xlu1 %v4515_v55, %s4174_s9  ;;  %1032 = vst.msk [vmem:[#allocation3 + $0xb0] sm:$0xff] %vm1009_vm5, %v958_v63  ;;  %4059 = vmatprep.subr.bf16.mxu0 %v4159_v19 }
 0x143   : > { %1690 = vrot.lane.b32.xlu0 %v1624_v56, %s4175_s10  ;;  %v1249_v56 = vld [vmem:[#allocation2 + $0xc2] sm:$0xff] }
 0x144   : > { %v956_v24 = vpop.permute.xlu1 %955 }
 0x145   : > { %1031 = vst.msk [vmem:[#allocation3 + $0xa8] sm:$0xff] %vm1009_vm5, %v956_v24  ;;  %v962_v55 = vpop.permute.xlu0 %961  ;;  %4060 = vmatpush3.bf16.msra.mxu0 %v4159_v19  ;;  %v1636_v19 = vld [vmem:[#allocation2 + $0xd9] sm:$0xff] }
 0x146   : > { %1688 = vrot.lane.b32.xlu1 %v1623_v52, %s4175_s10  ;;  %1034 = vst.msk [vmem:[#allocation3 + $0xc0] sm:$0xff] %vm1009_vm5, %v962_v55 }
 0x147   : > { %1879 = vrot.lane.b32.xlu0 %v7542_v12, %s4176_s15 }
 0x148   : > { %v960_v1 = vpop.permute.xlu1 %959 }
 0x149   : > { %1033 = vst.msk [vmem:[#allocation3 + $0xb8] sm:$0xff] %vm1009_vm5, %v960_v1  ;;  %v966_v49 = vpop.permute.xlu0 %965 }
 0x14a   : > { %1692 = vrot.lane.b32.xlu1 %v1625_v20, %s4175_s10  ;;  %1036 = vst.msk [vmem:[#allocation3 + $0xd0] sm:$0xff] %vm1009_vm5, %v966_v49  ;;  %v1634_v20 = vld [vmem:[#allocation2 + $0xc1] sm:$0xff]  ;;  %v1635_v49 = vld [vmem:[#allocation2 + $0xc9] sm:$0xff] }
 0x14b   : > { %1883 = vrot.lane.b32.xlu0 %v7544_v13, %s4176_s15 }
 0x14c   : > { %v964_v16 = vpop.permute.xlu1 %963 }
 0x14d   : > { %1035 = vst.msk [vmem:[#allocation3 + $0xc8] sm:$0xff] %vm1009_vm5, %v964_v16  ;;  %v970_v5 = vpop.permute.xlu0 %969 }
 0x14e   : > { %1881 = vrot.lane.b32.xlu1 %v7545_v25, %s4176_s15  ;;  %1038 = vst.msk [vmem:[#allocation3 + $0xe0] sm:$0xff] %vm1009_vm5, %v970_v5  ;;  %v1637_v5 = vld [vmem:[#allocation2 + $0xe1] sm:$0xff] }
 0x14f   : > { %1501 = vrot.lane.b32.xlu0 %v4523_v57, %s4174_s9 }
 0x150   : > { %v968_v15 = vpop.permute.xlu1 %967 }
 0x151   : > { %1037 = vst.msk [vmem:[#allocation3 + $0xd8] sm:$0xff] %vm1009_vm5, %v968_v15  ;;  %v974_v6 = vpop.permute.xlu0 %973 }
 0x152   : > { %1885 = vrot.lane.b32.xlu1 %v7547_v30, %s4176_s15  ;;  %1040 = vst.msk [vmem:[#allocation3 + $0xf0] sm:$0xff] %vm1009_vm5, %v974_v6 }
 0x153   : > { %1505 = vrot.lane.b32.xlu0 %v4527_v59, %s4174_s9 }
 0x154   : > { %v972_v37 = vpop.permute.xlu1 %971 }
 0x155   : > { %1039 = vst.msk [vmem:[#allocation3 + $0xe8] sm:$0xff] %vm1009_vm5, %v972_v37  ;;  %v1107_v57 = vpop.permute.xlu0 %1106 }
 0x156   : > { %1503 = vrot.lane.b32.xlu1 %v4525_v58, %s4174_s9  ;;  %1203 = vst.msk [vmem:[#allocation3] sm:$0xff] %vm1202_vm7, %v1107_v57  ;;  %v1819_v58 = vld [vmem:[#allocation2 + $0x62] sm:$0xff] }
 0x157   : > { %1694 = vrot.lane.b32.xlu0 %v1626_v9, %s4175_s10  ;;  %v1830_v57 = vld [vmem:[#allocation2 + $0xe2] sm:$0xff] }
 0x158   : > { %v976_v10 = vpop.permute.xlu1 %975 }
 0x159   : > { %1041 = vst.msk [vmem:[#allocation3 + $0xf8] sm:$0xff] %vm1009_vm5, %v976_v10  ;;  %v1111_v59 = vpop.permute.xlu0 %1110  ;;  %vm2461_vm5 = vcmask 1040384  }
 0x15a   : > { %1507 = vrot.lane.b32.xlu1 %v4537_v60, %s4174_s9  ;;  %1205 = vst.msk [vmem:[#allocation3 + $0x10] sm:$0xff] %vm1202_vm7, %v1111_v59  ;;  %v1821_v60 = vld [vmem:[#allocation2 + $0x7a] sm:$0xff] }
 0x15b   : > { %1698 = vrot.lane.b32.xlu0 %v1628_v11, %s4175_s10  ;;  %v1253_v11 = vld [vmem:[#allocation2 + $0xf2] sm:$0xff] }
 0x15c   : > { %v1109_v3 = vpop.permute.xlu1 %1108 }
 0x15d   : > { %1204 = vst.msk [vmem:[#allocation3 + $0x8] sm:$0xff] %vm1202_vm7, %v1109_v3  ;;  %v1115_v22 = vpop.permute.xlu0 %1114  ;;  %v1445_v3 = vld [vmem:[#allocation2 + $0xf0] sm:$0xff] }
 0x15e   : > { %1696 = vrot.lane.b32.xlu1 %v1627_v29, %s4175_s10  ;;  %1207 = vst.msk [vmem:[#allocation3 + $0x20] sm:$0xff] %vm1202_vm7, %v1115_v22  ;;  %v1254_v22 = vld [vmem:[#allocation2 + $0xfa] sm:$0xff] }
 0x15f   : > { %1887 = vrot.lane.b32.xlu0 %v1819_v58, %s4176_s15 }
 0x160   : > { %v1113_v4 = vpop.permute.xlu1 %1112 }
 0x161   : > { %1206 = vst.msk [vmem:[#allocation3 + $0x18] sm:$0xff] %vm1202_vm7, %v1113_v4  ;;  %v1119_v18 = vpop.permute.xlu0 %1118 }
 0x162   : > { %1700 = vrot.lane.b32.xlu1 %v1629_v28, %s4175_s10  ;;  %1209 = vst.msk [vmem:[#allocation3 + $0x30] sm:$0xff] %vm1202_vm7, %v1119_v18  ;;  %v1638_v18 = vld [vmem:[#allocation2 + $0xf1] sm:$0xff] }
 0x163   : > { %1891 = vrot.lane.b32.xlu0 %v1821_v60, %s4176_s15 }
 0x164   : > { %v1117_v12 = vpop.permute.xlu1 %1116 }
 0x165   : > { %1208 = vst.msk [vmem:[#allocation3 + $0x28] sm:$0xff] %vm1202_vm7, %v1117_v12  ;;  %v1123_v17 = vpop.permute.xlu0 %1122 }
 0x166   : > { %1889 = vrot.lane.b32.xlu1 %v1820_v21, %s4176_s15  ;;  %1211 = vst.msk [vmem:[#allocation3 + $0x40] sm:$0xff] %vm1202_vm7, %v1123_v17  ;;  %v1639_v17 = vld [vmem:[#allocation2 + $0xf9] sm:$0xff] }
 0x167   : > { %1319 = vrot.lane.b32.xlu0 %v1245_v14, %s4173_s8 }
 0x168   : > { %v1121_v13 = vpop.permute.xlu1 %1120 }
 0x169   : > { %1210 = vst.msk [vmem:[#allocation3 + $0x38] sm:$0xff] %vm1202_vm7, %v1121_v13  ;;  %v1127_v25 = vpop.permute.xlu0 %1126  ;;  %v1641_v13 = vld [vmem:[#allocation2 + $0x111] sm:$0xff] }
 0x16a   : > { %1893 = vrot.lane.b32.xlu1 %v1822_v46, %s4176_s15  ;;  %1213 = vst.msk [vmem:[#allocation3 + $0x50] sm:$0xff] %vm1202_vm7, %v1127_v25 }
 0x16b   : > { %1509 = vrot.lane.b32.xlu0 %v4539_v61, %s4174_s9 }
 0x16c   : > { %v1125_v26 = vpop.permute.xlu1 %1124 }
 0x16d   : > { %1212 = vst.msk [vmem:[#allocation3 + $0x48] sm:$0xff] %vm1202_vm7, %v1125_v26  ;;  %v1131_v27 = vpop.permute.xlu0 %1130 }
 0x16e   : > { %1321 = vrot.lane.b32.xlu1 %v1246_v2, %s4173_s8  ;;  %1215 = vst.msk [vmem:[#allocation3 + $0x60] sm:$0xff] %vm1202_vm7, %v1131_v27 }
 0x16f   : > { %1513 = vrot.lane.b32.xlu0 %v4551_v0, %s4174_s9  ;;  %v1631_v0 = vld [vmem:[#allocation2 + $0x99] sm:$0xff] }
 0x170   : > { %v1129_v30 = vpop.permute.xlu1 %1128 }
 0x171   : > { %1214 = vst.msk [vmem:[#allocation3 + $0x58] sm:$0xff] %vm1202_vm7, %v1129_v30  ;;  %v1135_v32 = vpop.permute.xlu0 %1134  ;;  %v1834_v30 = vld [vmem:[#allocation2 + $0x112] sm:$0xff] }
 0x172   : > { %1511 = vrot.lane.b32.xlu1 %v4541_v62, %s4174_s9  ;;  %1217 = vst.msk [vmem:[#allocation3 + $0x70] sm:$0xff] %vm1202_vm7, %v1135_v32  ;;  %v1257_v32 = vld [vmem:[#allocation2 + $0x122] sm:$0xff] }
 0x173   : > { %1702 = vrot.lane.b32.xlu0 %v1630_v31, %s4175_s10 }
 0x174   : > { %v1133_v61 = vpop.permute.xlu1 %1132 }
 0x175   : > { %1216 = vst.msk [vmem:[#allocation3 + $0x68] sm:$0xff] %vm1202_vm7, %v1133_v61  ;;  %v1139_v40 = vpop.permute.xlu0 %1138 }
 0x176   : > { %1515 = vrot.lane.b32.xlu1 %v4553_v7, %s4174_s9  ;;  %1219 = vst.msk [vmem:[#allocation3 + $0x80] sm:$0xff] %vm1202_vm7, %v1139_v40  ;;  %v1825_v7 = vld [vmem:[#allocation2 + $0xaa] sm:$0xff] }
 0x177   : > { %1706 = vrot.lane.b32.xlu0 %v1632_v39, %s4175_s10 }
 0x178   : > { %v1137_v41 = vpop.permute.xlu1 %1136 }
 0x179   : > { %1218 = vst.msk [vmem:[#allocation3 + $0x78] sm:$0xff] %vm1202_vm7, %v1137_v41  ;;  %v1143_v62 = vpop.permute.xlu0 %1142 }
 0x17a   : > { %1704 = vrot.lane.b32.xlu1 %v1631_v0, %s4175_s10  ;;  %1221 = vst.msk [vmem:[#allocation3 + $0x90] sm:$0xff] %vm1202_vm7, %v1143_v62  ;;  %v1449_v62 = vld [vmem:[#allocation2 + $0x120] sm:$0xff] }
 0x17b   : > { %1895 = vrot.lane.b32.xlu0 %v1245_v14, %s4176_s15  ;;  %v1640_v14 = vld [vmem:[#allocation2 + $0x109] sm:$0xff] }
 0x17c   : > { %v1141_v43 = vpop.permute.xlu1 %1140 }
 0x17d   : > { %1220 = vst.msk [vmem:[#allocation3 + $0x88] sm:$0xff] %vm1202_vm7, %v1141_v43  ;;  %v1147_v44 = vpop.permute.xlu0 %1146 }
 0x17e   : > { %1708 = vrot.lane.b32.xlu1 %v1633_v42, %s4175_s10  ;;  %1223 = vst.msk [vmem:[#allocation3 + $0xa0] sm:$0xff] %vm1202_vm7, %v1147_v44 }
 0x17f   : > { %1899 = vrot.lane.b32.xlu0 %v1825_v7, %s4176_s15 }
 0x180   : > { %v1145_v47 = vpop.permute.xlu1 %1144 }
 0x181   : > { %1222 = vst.msk [vmem:[#allocation3 + $0x98] sm:$0xff] %vm1202_vm7, %v1145_v47  ;;  %v1151_v50 = vpop.permute.xlu0 %1150 }
 0x182   : > { %1897 = vrot.lane.b32.xlu1 %v1246_v2, %s4176_s15  ;;  %1225 = vst.msk [vmem:[#allocation3 + $0xb0] sm:$0xff] %vm1202_vm7, %v1151_v50 }
 0x183   : > { %1323 = vrot.lane.b32.xlu0 %v1825_v7, %s4173_s8  ;;  %v1258_v7 = vld [vmem:[#allocation2 + $0x12a] sm:$0xff] }
 0x184   : > { %v1149_v51 = vpop.permute.xlu1 %1148 }
 0x185   : > { %1224 = vst.msk [vmem:[#allocation3 + $0xa8] sm:$0xff] %vm1202_vm7, %v1149_v51  ;;  %v1155_v54 = vpop.permute.xlu0 %1154 }
 0x186   : > { %1901 = vrot.lane.b32.xlu1 %v1826_v53, %s4176_s15  ;;  %1227 = vst.msk [vmem:[#allocation3 + $0xc0] sm:$0xff] %vm1202_vm7, %v1155_v54 }
 0x187   : > { %1327 = vrot.lane.b32.xlu0 %v1249_v56, %s4173_s8 }
 0x188   : > { %v1153_v63 = vpop.permute.xlu1 %1152 }
 0x189   : > { %1226 = vst.msk [vmem:[#allocation3 + $0xb8] sm:$0xff] %vm1202_vm7, %v1153_v63  ;;  %v1159_v52 = vpop.permute.xlu0 %1158  ;;  %v1642_v63 = vld [vmem:[#allocation2 + $0x121] sm:$0xff] }
 0x18a   : > { %1325 = vrot.lane.b32.xlu1 %v1826_v53, %s4173_s8  ;;  %1229 = vst.msk [vmem:[#allocation3 + $0xd0] sm:$0xff] %vm1202_vm7, %v1159_v52  ;;  %v1451_v53 = vld [vmem:[#allocation2 + $0x138] sm:$0xff] }
 0x18b   : > { %1517 = vrot.lane.b32.xlu0 %v4555_v8, %s4174_s9 }
 0x18c   : > { %v1157_v24 = vpop.permute.xlu1 %1156 }
 0x18d   : > { %1228 = vst.msk [vmem:[#allocation3 + $0xc8] sm:$0xff] %vm1202_vm7, %v1157_v24  ;;  %v1163_v23 = vpop.permute.xlu0 %1162 }
 0x18e   : > { %1329 = vrot.lane.b32.xlu1 %v1250_v33, %s4173_s8  ;;  %1231 = vst.msk [vmem:[#allocation3 + $0xe0] sm:$0xff] %vm1202_vm7, %v1163_v23  ;;  %v1644_v23 = vld [vmem:[#allocation2 + $0x139] sm:$0xff] }
 0x18f   : > { %1521 = vrot.lane.b32.xlu0 %v4567_v48, %s4174_s9 }
 0x190   : > { %v1161_v55 = vpop.permute.xlu1 %1160 }
 0x191   : > { %1230 = vst.msk [vmem:[#allocation3 + $0xd8] sm:$0xff] %vm1202_vm7, %v1161_v55  ;;  %v1167_v1 = vpop.permute.xlu0 %1166 }
 0x192   : > { %1519 = vrot.lane.b32.xlu1 %v4565_v45, %s4174_s9  ;;  %1233 = vst.msk [vmem:[#allocation3 + $0xf0] sm:$0xff] %vm1202_vm7, %v1167_v1 }
 0x193   : > { %1710 = vrot.lane.b32.xlu0 %v1634_v20, %s4175_s10  ;;  %v1643_v20 = vld [vmem:[#allocation2 + $0x129] sm:$0xff] }
 0x194   : > { %v1165_v8 = vpop.permute.xlu1 %1164 }
 0x195   : > { %1232 = vst.msk [vmem:[#allocation3 + $0xe8] sm:$0xff] %vm1202_vm7, %v1165_v8  ;;  %v1300_v48 = vpop.permute.xlu0 %1299 }
 0x196   : > { %1523 = vrot.lane.b32.xlu1 %v4569_v38, %s4174_s9  ;;  %1396 = vst.msk [vmem:[#allocation3] sm:$0xff] %vm1395_vm8, %v1300_v48  ;;  %v1829_v38 = vld [vmem:[#allocation2 + $0xda] sm:$0xff] }
 0x197   : > { %1714 = vrot.lane.b32.xlu0 %v1636_v19, %s4175_s10  ;;  %v1645_v19 = vld [vmem:[#allocation2 + $0x141] sm:$0xff] }
 0x198   : > { %v1169_v16 = vpop.permute.xlu1 %1168 }
 0x199   : > { %1234 = vst.msk [vmem:[#allocation3 + $0xf8] sm:$0xff] %vm1202_vm7, %v1169_v16  ;;  %v1304_v45 = vpop.permute.xlu0 %1303  ;;  %vm2542_vm7 = vcmask 130113  }
 0x19a   : > { %1712 = vrot.lane.b32.xlu1 %v1635_v49, %s4175_s10  ;;  %1398 = vst.msk [vmem:[#allocation3 + $0x10] sm:$0xff] %vm1395_vm8, %v1304_v45  ;;  %v1837_v49 = vld [vmem:[#allocation2 + $0x13a] sm:$0xff] }
 0x19b   : > { %1903 = vrot.lane.b32.xlu0 %v1249_v56, %s4176_s15  ;;  %v1450_v56 = vld [vmem:[#allocation2 + $0x128] sm:$0xff] }
 0x19c   : > { %v1302_v15 = vpop.permute.xlu1 %1301 }
 0x19d   : > { %1397 = vst.msk [vmem:[#allocation3 + $0x8] sm:$0xff] %vm1395_vm8, %v1302_v15  ;;  %v1308_v6 = vpop.permute.xlu0 %1307 }
 0x19e   : > { %1716 = vrot.lane.b32.xlu1 %v1637_v5, %s4175_s10  ;;  %1400 = vst.msk [vmem:[#allocation3 + $0x20] sm:$0xff] %vm1395_vm8, %v1308_v6 }
 0x19f   : > { %1907 = vrot.lane.b32.xlu0 %v1829_v38, %s4176_s15 }
 0x1a0   : > { %v1306_v37 = vpop.permute.xlu1 %1305 }
 0x1a1   : > { %1399 = vst.msk [vmem:[#allocation3 + $0x18] sm:$0xff] %vm1395_vm8, %v1306_v37  ;;  %v1312_v9 = vpop.permute.xlu0 %1311 }
 0x1a2   : > { %1905 = vrot.lane.b32.xlu1 %v1250_v33, %s4176_s15  ;;  %1402 = vst.msk [vmem:[#allocation3 + $0x30] sm:$0xff] %vm1395_vm8, %v1312_v9  ;;  %v1452_v33 = vld [vmem:[#allocation2 + $0x140] sm:$0xff] }
 0x1a3   : > { %1331 = vrot.lane.b32.xlu0 %v1829_v38, %s4173_s8  ;;  %v1838_v9 = vld [vmem:[#allocation2 + $0x142] sm:$0xff] }
 0x1a4   : > { %v1310_v10 = vpop.permute.xlu1 %1309 }
 0x1a5   : > { %1401 = vst.msk [vmem:[#allocation3 + $0x28] sm:$0xff] %vm1395_vm8, %v1310_v10  ;;  %v1316_v59 = vpop.permute.xlu0 %1315 }
 0x1a6   : > { %1909 = vrot.lane.b32.xlu1 %v1830_v57, %s4176_s15  ;;  %1404 = vst.msk [vmem:[#allocation3 + $0x40] sm:$0xff] %vm1395_vm8, %v1316_v59  ;;  %v1261_v59 = vld [vmem:[#allocation2 + $0x152] sm:$0xff] }
 0x1a7   : > { %1335 = vrot.lane.b32.xlu0 %v1253_v11, %s4173_s8 }
 0x1a8   : > { %v1314_v29 = vpop.permute.xlu1 %1313 }
 0x1a9   : > { %1403 = vst.msk [vmem:[#allocation3 + $0x38] sm:$0xff] %vm1395_vm8, %v1314_v29  ;;  %v1494_v58 = vpop.permute.xlu0 %1493 }
 0x1aa   : > { %1333 = vrot.lane.b32.xlu1 %v1830_v57, %s4173_s8  ;;  %1590 = vst.msk [vmem:[#allocation3] sm:$0xff] %vm1589_vm9, %v1494_v58  ;;  %v1453_v58 = vld [vmem:[#allocation2 + $0x150] sm:$0xff] }
 0x1ab   : > { %1525 = vrot.lane.b32.xlu0 %v1445_v3, %s4174_s9 }
 0x1ac   : > { %v1318_v28 = vpop.permute.xlu1 %1317 }
 0x1ad   : > { %1405 = vst.msk [vmem:[#allocation3 + $0x48] sm:$0xff] %vm1395_vm8, %v1318_v28  ;;  %v1498_v4 = vpop.permute.xlu0 %1497  ;;  %v1262_v28 = vld [vmem:[#allocation2 + $0x15a] sm:$0xff] }
 0x1ae   : > { %1337 = vrot.lane.b32.xlu1 %v1254_v22, %s4173_s8  ;;  %1592 = vst.msk [vmem:[#allocation3 + $0x10] sm:$0xff] %vm1589_vm9, %v1498_v4 }
 0x1af   : > { %1529 = vrot.lane.b32.xlu0 %v4581_v35, %s4174_s9 }
 0x1b0   : > { %v1496_v60 = vpop.permute.xlu1 %1495 }
 0x1b1   : > { %1591 = vst.msk [vmem:[#allocation3 + $0x8] sm:$0xff] %vm1589_vm9, %v1496_v60  ;;  %v1687_v21 = vpop.permute.xlu0 %1686  ;;  %v1455_v60 = vld [vmem:[#allocation2 + $0x168] sm:$0xff] }
 0x1b2   : > { %1527 = vrot.lane.b32.xlu1 %v4579_v36, %s4174_s9  ;;  %1783 = vst.msk [vmem:[#allocation3] sm:$0xff] %vm1782_vm10, %v1687_v21  ;;  %v1454_v21 = vld [vmem:[#allocation2 + $0x158] sm:$0xff] }
 0x1b3   : > { %1718 = vrot.lane.b32.xlu0 %v1638_v18, %s4175_s10 }
 0x1b4   : > { %v1500_v12 = vpop.permute.xlu1 %1499 }
 0x1b5   : > { %1593 = vst.msk [vmem:[#allocation3 + $0x18] sm:$0xff] %vm1589_vm9, %v1500_v12  ;;  %v1691_v35 = vpop.permute.xlu0 %1690 }
 0x1b6   : > { %1531 = vrot.lane.b32.xlu1 %v4591_v34, %s4174_s9  ;;  %1785 = vst.msk [vmem:[#allocation3 + $0x10] sm:$0xff] %vm1782_vm10, %v1691_v35  ;;  %v1833_v34 = vld [vmem:[#allocation2 + $0x10a] sm:$0xff] }
 0x1b7   : > { %1722 = vrot.lane.b32.xlu0 %v1640_v14, %s4175_s10  ;;  %v1646_v14 = vld [vmem:[#allocation2 + $0x151] sm:$0xff] }
 0x1b8   : > { %v1689_v46 = vpop.permute.xlu1 %1688 }
 0x1b9   : > { %1784 = vst.msk [vmem:[#allocation3 + $0x8] sm:$0xff] %vm1782_vm10, %v1689_v46  ;;  %v1880_v36 = vpop.permute.xlu0 %1879 }
 0x1ba   : > { %1720 = vrot.lane.b32.xlu1 %v1639_v17, %s4175_s10  ;;  %1976 = vst.msk [vmem:[#allocation3] sm:$0xff] %vm1975_vm11, %v1880_v36  ;;  %v1456_v17 = vld [vmem:[#allocation2 + $0x170] sm:$0xff] }
 0x1bb   : > { %1911 = vrot.lane.b32.xlu0 %v1253_v11, %s4176_s15  ;;  %v1648_v36 = vld [vmem:[#allocation2 + $0x169] sm:$0xff] }
 0x1bc   : > { %v1693_v25 = vpop.permute.xlu1 %1692 }
 0x1bd   : > { %1786 = vst.msk [vmem:[#allocation3 + $0x18] sm:$0xff] %vm1782_vm10, %v1693_v25  ;;  %v1884_v2 = vpop.permute.xlu0 %1883  ;;  %v1647_v25 = vld [vmem:[#allocation2 + $0x159] sm:$0xff] }
 0x1be   : > { %1724 = vrot.lane.b32.xlu1 %v1641_v13, %s4175_s10  ;;  %1978 = vst.msk [vmem:[#allocation3 + $0x10] sm:$0xff] %vm1975_vm11, %v1884_v2 }
 0x1bf   : > { %1915 = vrot.lane.b32.xlu0 %v1833_v34, %s4176_s15 }
 0x1c0   : > { %v1882_v26 = vpop.permute.xlu1 %1881 }
 0x1c1   : > { %1977 = vst.msk [vmem:[#allocation3 + $0x8] sm:$0xff] %vm1975_vm11, %v1882_v26  ;;  %v1502_v27 = vpop.permute.xlu0 %1501  ;;  %v2008_v61 = vld [vmem:[#allocation3] sm:$0xff] }
 0x1c2   : > { %1913 = vrot.lane.b32.xlu1 %v1254_v22, %s4176_s15  ;;  %1594 = vst.msk [vmem:[#allocation3 + $0x20] sm:$0xff] %vm1589_vm9, %v1502_v27  ;;  %v1649_v27 = vld [vmem:[#allocation2 + $0x171] sm:$0xff] }
 0x1c3   : > { %1339 = vrot.lane.b32.xlu0 %v1833_v34, %s4173_s8 }
 0x1c4   : > { %v1886_v31 = vpop.permute.xlu1 %1885 }
 0x1c5   : > { %1979 = vst.msk [vmem:[#allocation3 + $0x18] sm:$0xff] %vm1975_vm11, %v1886_v31  ;;  %v1506_v39 = vpop.permute.xlu0 %1505  ;;  %v2010_v42 = vld [vmem:[#allocation3 + $0x10] sm:$0xff] }
 0x1c6   : > { %1917 = vrot.lane.b32.xlu1 %v1834_v30, %s4176_s15  ;;  %1596 = vst.msk [vmem:[#allocation3 + $0x30] sm:$0xff] %vm1589_vm9, %v1506_v39 }
 0x1c7   : > { %1343 = vrot.lane.b32.xlu0 %v1257_v32, %s4173_s8 }
 0x1c8   : > { %v1504_v40 = vpop.permute.xlu1 %1503  ;;  %v2009_v0 = vld [vmem:[#allocation3 + $0x8] sm:$0xff] }
 0x1c9   : > { %1595 = vst.msk [vmem:[#allocation3 + $0x28] sm:$0xff] %vm1589_vm9, %v1504_v40  ;;  %v2040_v41 = vpack.c.bf16 %v2009_v0, %v2008_v61  ;;  %v1695_v43 = vpop.permute.xlu0 %1694  ;;  %v1841_v61 = vld [vmem:[#allocation2 + $0x16a] sm:$0xff] }
 0x1ca   : > { %1341 = vrot.lane.b32.xlu1 %v1834_v30, %s4173_s8  ;;  %1787 = vst.msk [vmem:[#allocation3 + $0x20] sm:$0xff] %vm1782_vm10, %v1695_v43  ;;  %v1842_v43 = vld [vmem:[#allocation2 + $0x172] sm:$0xff] }
 0x1cb   : > { %4061 = vmatprep.mubr.msk.bf16.mxu0 %vm2076_vm12, %v2040_v41  ;;  %1533 = vrot.lane.b32.xlu0 %v1449_v62, %s4174_s9 }
 0x1cc   : > { %v1508_v44 = vpop.permute.xlu1 %1507  ;;  %v2011_v47 = vld [vmem:[#allocation3 + $0x18] sm:$0xff] }
 0x1cd   : > { %1597 = vst.msk [vmem:[#allocation3 + $0x38] sm:$0xff] %vm1589_vm9, %v1508_v44  ;;  %v2041_v50 = vpack.c.bf16 %v2011_v47, %v2010_v42  ;;  %v1699_v51 = vpop.permute.xlu0 %1698  ;;  %v1265_v44 = vld [vmem:[#allocation2 + $0x182] sm:$0xff] }
 0x1ce   : > { %1345 = vrot.lane.b32.xlu1 %v1258_v7, %s4173_s8  ;;  %1789 = vst.msk [vmem:[#allocation3 + $0x30] sm:$0xff] %vm1782_vm10, %v1699_v51 }
 0x1cf   : > { %4062 = vmatmul.mubr.msk.bf16.vlgmr.msra.gmra.mxu0 %vm2076_vm12, %v2041_v50  ;;  %1537 = vrot.lane.b32.xlu0 %v1451_v53, %s4174_s9  ;;  %v1457_v53 = vld [vmem:[#allocation2 + $0x180] sm:$0xff] }
 0x1d0   : > { %v1697_v54 = vpop.permute.xlu1 %1696 }
 0x1d1   : > { %1788 = vst.msk [vmem:[#allocation3 + $0x28] sm:$0xff] %vm1782_vm10, %v1697_v54  ;;  %v1888_v52 = vpop.permute.xlu0 %1887 }
 0x1d2   : > { %1535 = vrot.lane.b32.xlu1 %v1450_v56, %s4174_s9  ;;  %1980 = vst.msk [vmem:[#allocation3 + $0x20] sm:$0xff] %vm1975_vm11, %v1888_v52  ;;  %v1266_v56 = vld [vmem:[#allocation2 + $0x18a] sm:$0xff] }
 0x1d3   : > { %1726 = vrot.lane.b32.xlu0 %v1642_v63, %s4175_s10  ;;  %v1459_v63 = vld [vmem:[#allocation2 + $0x198] sm:$0xff] }
 0x1d4   : > { %v1701_v24 = vpop.permute.xlu1 %1700 }
 0x1d5   : > { %1790 = vst.msk [vmem:[#allocation3 + $0x38] sm:$0xff] %vm1782_vm10, %v1701_v24  ;;  %v1892_v55 = vpop.permute.xlu0 %1891 }
 0x1d6   : > { %1539 = vrot.lane.b32.xlu1 %v1452_v33, %s4174_s9  ;;  %1982 = vst.msk [vmem:[#allocation3 + $0x30] sm:$0xff] %vm1975_vm11, %v1892_v55  ;;  %v1458_v33 = vld [vmem:[#allocation2 + $0x188] sm:$0xff] }
 0x1d7   : > { %1730 = vrot.lane.b32.xlu0 %v1644_v23, %s4175_s10  ;;  %v1650_v23 = vld [vmem:[#allocation2 + $0x181] sm:$0xff] }
 0x1d8   : > { %v1890_v1 = vpop.permute.xlu1 %1889 }
 0x1d9   : > { %1981 = vst.msk [vmem:[#allocation3 + $0x28] sm:$0xff] %vm1975_vm11, %v1890_v1  ;;  %v1320_v8 = vpop.permute.xlu0 %1319  ;;  %v2012_v16 = vld [vmem:[#allocation3 + $0x20] sm:$0xff] }
 0x1da   : > { %1728 = vrot.lane.b32.xlu1 %v1643_v20, %s4175_s10  ;;  %1406 = vst.msk [vmem:[#allocation3 + $0x50] sm:$0xff] %vm1395_vm8, %v1320_v8  ;;  %v1460_v20 = vld [vmem:[#allocation2 + $0x1a0] sm:$0xff] }
 0x1db   : > { %1919 = vrot.lane.b32.xlu0 %v1257_v32, %s4176_s15  ;;  %v1652_v8 = vld [vmem:[#allocation2 + $0x199] sm:$0xff] }
 0x1dc   : > { %v1894_v48 = vpop.permute.xlu1 %1893 }
 0x1dd   : > { %1983 = vst.msk [vmem:[#allocation3 + $0x38] sm:$0xff] %vm1975_vm11, %v1894_v48  ;;  %v1510_v45 = vpop.permute.xlu0 %1509  ;;  %v2014_v6 = vld [vmem:[#allocation3 + $0x30] sm:$0xff]  ;;  %v1651_v48 = vld [vmem:[#allocation2 + $0x189] sm:$0xff] }
 0x1de   : > { %1732 = vrot.lane.b32.xlu1 %v1645_v19, %s4175_s10  ;;  %1598 = vst.msk [vmem:[#allocation3 + $0x40] sm:$0xff] %vm1589_vm9, %v1510_v45 }
 0x1df   : > { %1923 = vrot.lane.b32.xlu0 %v1837_v49, %s4176_s15 }
 0x1e0   : > { %v1322_v5 = vpop.permute.xlu1 %1321  ;;  %v2013_v15 = vld [vmem:[#allocation3 + $0x28] sm:$0xff] }
 0x1e1   : > { %1407 = vst.msk [vmem:[#allocation3 + $0x58] sm:$0xff] %vm1395_vm8, %v1322_v5  ;;  %v2042_v38 = vpack.c.bf16 %v2013_v15, %v2012_v16  ;;  %v1514_v37 = vpop.permute.xlu0 %1513  ;;  %v1653_v5 = vld [vmem:[#allocation2 + $0x1a1] sm:$0xff] }
 0x1e2   : > { %1921 = vrot.lane.b32.xlu1 %v1258_v7, %s4176_s15  ;;  %1600 = vst.msk [vmem:[#allocation3 + $0x50] sm:$0xff] %vm1589_vm9, %v1514_v37  ;;  %v1845_v37 = vld [vmem:[#allocation2 + $0x19a] sm:$0xff] }
 0x1e3   : > { %4065 = vmatprep.mubr.msk.bf16.mxu0 %vm2076_vm12, %v2042_v38  ;;  %1347 = vrot.lane.b32.xlu0 %v1837_v49, %s4173_s8 }
 0x1e4   : > { %v1512_v57 = vpop.permute.xlu1 %1511  ;;  %v2015_v10 = vld [vmem:[#allocation3 + $0x38] sm:$0xff] }
 0x1e5   : > { %1599 = vst.msk [vmem:[#allocation3 + $0x48] sm:$0xff] %vm1589_vm9, %v1512_v57  ;;  %v2043_v11 = vpack.c.bf16 %v2015_v10, %v2014_v6  ;;  %v1703_v29 = vpop.permute.xlu0 %1702  ;;  %v2981_v10 = vld [vmem:[%s7376_s2] sm:$0x3] }
 0x1e6   : > { %1925 = vrot.lane.b32.xlu1 %v1838_v9, %s4176_s15  ;;  %1791 = vst.msk [vmem:[#allocation3 + $0x40] sm:$0xff] %vm1782_vm10, %v1703_v29  ;;  %4128 = vmatprep.subr.msk.bf16.mxu1 %vm2125_vm6, %v2981_v10  ;;  %v7552_v29 = vld [vmem:[#allocation5_spill] sm:$0xff] }
 0x1e7   : > { %4066 = vmatmul.mubr.msk.bf16.gmra.mxu0 %vm2076_vm12, %v2043_v11  ;;  %1351 = vrot.lane.b32.xlu0 %v1261_v59, %s4173_s8  ;;  %v3031_v11 = vsel %vm2125_vm6, %v2981_v10, 0  ;;  %vm2463_vm6 = vcmask 58368  }
 0x1e8   : > { %v1516_v3 = vpop.permute.xlu1 %1515  ;;  %4094 = vmatpush3.bf16.msra.mxu1 %v3031_v11 }
 0x1e9   : > { %1601 = vst.msk [vmem:[#allocation3 + $0x58] sm:$0xff] %vm1589_vm9, %v1516_v3  ;;  %v1707_v22 = vpop.permute.xlu0 %1706 }
 0x1ea   : > { %1349 = vrot.lane.b32.xlu1 %v1838_v9, %s4173_s8  ;;  %1793 = vst.msk [vmem:[#allocation3 + $0x50] sm:$0xff] %vm1782_vm10, %v1707_v22 }
 0x1eb   : > { %1541 = vrot.lane.b32.xlu0 %v1453_v58, %s4174_s9 }
 0x1ec   : > { %v1705_v4 = vpop.permute.xlu1 %1704 }
 0x1ed   : > { %1792 = vst.msk [vmem:[#allocation3 + $0x48] sm:$0xff] %vm1782_vm10, %v1705_v4  ;;  %v1896_v18 = vpop.permute.xlu0 %1895  ;;  %v7553_v4 = vld [vmem:[#allocation6_spill] sm:$0xff] }
 0x1ee   : > { %1353 = vrot.lane.b32.xlu1 %v1262_v28, %s4173_s8  ;;  %1984 = vst.msk [vmem:[#allocation3 + $0x40] sm:$0xff] %vm1975_vm11, %v1896_v18 }
 0x1ef   : > { %1545 = vrot.lane.b32.xlu0 %v1455_v60, %s4174_s9  ;;  %v7554_v60 = vld [vmem:[#allocation7_spill] sm:$0xff] }
 0x1f0   : > { %v1709_v12 = vpop.permute.xlu1 %1708  ;;  %v2966_v18 = vpack.c.bf16 %v7554_v60, %v7553_v4  ;;  %v7576_v4 = vld [vmem:[#allocation29_spill] sm:$0xff] }
 0x1f1   : > { %1794 = vst.msk [vmem:[#allocation3 + $0x58] sm:$0xff] %vm1782_vm10, %v1709_v12  ;;  %v1900_v35 = vpop.permute.xlu0 %1899  ;;  %v1846_v12 = vld [vmem:[#allocation2 + $0x1a2] sm:$0xff] }
 0x1f2   : > { %1543 = vrot.lane.b32.xlu1 %v1454_v21, %s4174_s9  ;;  %1986 = vst.msk [vmem:[#allocation3 + $0x50] sm:$0xff] %vm1975_vm11, %v1900_v35 }
 0x1f3   : > { %1734 = vrot.lane.b32.xlu0 %v1646_v14, %s4175_s10 }
 0x1f4   : > { %v1898_v46 = vpop.permute.xlu1 %1897 }
 0x1f5   : > { %1985 = vst.msk [vmem:[#allocation3 + $0x48] sm:$0xff] %vm1975_vm11, %v1898_v46  ;;  %v1324_v13 = vpop.permute.xlu0 %1323  ;;  %v2016_v2 = vld [vmem:[#allocation3 + $0x40] sm:$0xff] }
 0x1f6   : > { %1547 = vrot.lane.b32.xlu1 %v1456_v17, %s4174_s9  ;;  %1408 = vst.msk [vmem:[#allocation3 + $0x60] sm:$0xff] %vm1395_vm8, %v1324_v13  ;;  %v7555_v46 = vld [vmem:[#allocation8_spill] sm:$0xff] }
 0x1f7   : > { %1738 = vrot.lane.b32.xlu0 %v1648_v36, %s4175_s10  ;;  %v7556_v36 = vld [vmem:[#allocation9_spill] sm:$0xff] }
 0x1f8   : > { %v1902_v34 = vpop.permute.xlu1 %1901  ;;  %v2967_v13 = vpack.c.bf16 %v7556_v36, %v7555_v46 }
 0x1f9   : > { %1987 = vst.msk [vmem:[#allocation3 + $0x58] sm:$0xff] %vm1975_vm11, %v1902_v34  ;;  %v1328_v26 = vpop.permute.xlu0 %1327  ;;  %v2018_v39 = vld [vmem:[#allocation3 + $0x50] sm:$0xff] }
 0x1fa   : > { %1736 = vrot.lane.b32.xlu1 %v1647_v25, %s4175_s10  ;;  %1410 = vst.msk [vmem:[#allocation3 + $0x70] sm:$0xff] %vm1395_vm8, %v1328_v26  ;;  %v7557_v34 = vld [vmem:[#allocation10_spill] sm:$0xff] }
 0x1fb   : > { %1927 = vrot.lane.b32.xlu0 %v1261_v59, %s4176_s15  ;;  %v7551_v59 = vld [vmem:[#allocation4_spill] sm:$0xff] }
 0x1fc   : > { %v1326_v30 = vpop.permute.xlu1 %1325  ;;  %v2017_v31 = vld [vmem:[#allocation3 + $0x48] sm:$0xff]  ;;  %v2965_v3 = vpack.c.bf16 %v7552_v29, %v7551_v59  ;;  %v7573_v59 = vld [vmem:[#allocation26_spill] sm:$0xff]  ;;  %v7574_v29 = vld [vmem:[#allocation27_spill] sm:$0xff] }
 0x1fd   : > { %1409 = vst.msk [vmem:[#allocation3 + $0x68] sm:$0xff] %vm1395_vm8, %v1326_v30  ;;  %v2044_v32 = vpack.c.bf16 %v2017_v31, %v2016_v2  ;;  %v1518_v40 = vpop.permute.xlu0 %1517  ;;  %v7558_v2 = vld [vmem:[#allocation11_spill] sm:$0xff] }
 0x1fe   : > { %1740 = vrot.lane.b32.xlu1 %v1649_v27, %s4175_s10  ;;  %1602 = vst.msk [vmem:[#allocation3 + $0x60] sm:$0xff] %vm1589_vm9, %v1518_v40  ;;  %4095 = vmatprep.mubr.msk.bf16.mxu1 %vm320_vm0, %v2965_v3  ;;  %v2968_v26 = vpack.c.bf16 %v7558_v2, %v7557_v34  ;;  %v2976_v3 = vpack.c.bf16 %v7574_v29, %v7573_v59  ;;  %v7581_v2 = vld [vmem:[#allocation38_spill] sm:$0xff] }
 0x1ff   : > { %4069 = vmatprep.mubr.msk.bf16.mxu0 %vm2076_vm12, %v2044_v32  ;;  %1931 = vrot.lane.b32.xlu0 %v1841_v61, %s4176_s15  ;;  %v7559_v32 = vld [vmem:[#allocation12_spill] sm:$0xff] }
 0x200   : > { %v1330_v0 = vpop.permute.xlu1 %1329  ;;  %v2019_v41 = vld [vmem:[#allocation3 + $0x58] sm:$0xff]  ;;  %4096 = vmatmul.mubr.msk.bf16.vlgmr.msra.gmra.mxu1 %vm320_vm0, %v2966_v18 }
 0x201   : > { %1411 = vst.msk [vmem:[#allocation3 + $0x78] sm:$0xff] %vm1395_vm8, %v1330_v0  ;;  %v2045_v62 = vpack.c.bf16 %v2019_v41, %v2018_v39  ;;  %v1522_v42 = vpop.permute.xlu0 %1521  ;;  %4099 = vmatprep.mubr.msk.bf16.mxu1 %vm320_vm0, %v2967_v13  ;;  %v7561_v0 = vld [vmem:[#allocation14_spill] sm:$0xff]  ;;  %v7562_v41 = vld [vmem:[#allocation15_spill] sm:$0xff] }
 0x202   : > { %1929 = vrot.lane.b32.xlu1 %v1262_v28, %s4176_s15  ;;  %1604 = vst.msk [vmem:[#allocation3 + $0x70] sm:$0xff] %vm1589_vm9, %v1522_v42  ;;  %v7563_v42 = vld [vmem:[#allocation16_spill] sm:$0xff] }
 0x203   : > { %4070 = vmatmul.mubr.msk.bf16.gmra.mxu0 %vm2076_vm12, %v2045_v62  ;;  %1355 = vrot.lane.b32.xlu0 %v1841_v61, %s4173_s8  ;;  %v7560_v61 = vld [vmem:[#allocation13_spill] sm:$0xff]  ;;  %v2970_v62 = vpack.c.bf16 %v7562_v41, %v7561_v0 }
 0x204   : > { %v1520_v7 = vpop.permute.xlu1 %1519  ;;  %v2969_v39 = vpack.c.bf16 %v7560_v61, %v7559_v32 }
 0x205   : > { %1603 = vst.msk [vmem:[#allocation3 + $0x68] sm:$0xff] %vm1589_vm9, %v1520_v7  ;;  %v1711_v47 = vpop.permute.xlu0 %1710 }
 0x206   : > { %1933 = vrot.lane.b32.xlu1 %v1842_v43, %s4176_s15  ;;  %1795 = vst.msk [vmem:[#allocation3 + $0x60] sm:$0xff] %vm1782_vm10, %v1711_v47 }
 0x207   : > { %1359 = vrot.lane.b32.xlu0 %v1265_v44, %s4173_s8 }
 0x208   : > { %v1524_v50 = vpop.permute.xlu1 %1523  ;;  %4100 = vmatmul.mubr.msk.bf16.gmra.mxu1 %vm320_vm0, %v2968_v26  ;;  %v7582_v26 = vld [vmem:[#allocation39_spill] sm:$0xff] }
 0x209   : > { %1605 = vst.msk [vmem:[#allocation3 + $0x78] sm:$0xff] %vm1589_vm9, %v1524_v50  ;;  %v1715_v51 = vpop.permute.xlu0 %1714  ;;  %4103 = vmatprep.mubr.msk.bf16.mxu1 %vm320_vm0, %v2969_v39 }
 0x20a   : > { %1357 = vrot.lane.b32.xlu1 %v1842_v43, %s4173_s8  ;;  %1797 = vst.msk [vmem:[#allocation3 + $0x70] sm:$0xff] %vm1782_vm10, %v1715_v51  ;;  %v7564_v43 = vld [vmem:[#allocation17_spill] sm:$0xff]  ;;  %v7566_v51 = vld [vmem:[#allocation19_spill] sm:$0xff] }
 0x20b   : > { %1549 = vrot.lane.b32.xlu0 %v1457_v53, %s4174_s9  ;;  %v2971_v7 = vpack.c.bf16 %v7564_v43, %v7563_v42  ;;  %v7565_v53 = vld [vmem:[#allocation18_spill] sm:$0xff] }
 0x20c   : > { %v1713_v54 = vpop.permute.xlu1 %1712 }
 0x20d   : > { %1796 = vst.msk [vmem:[#allocation3 + $0x68] sm:$0xff] %vm1782_vm10, %v1713_v54  ;;  %v1904_v52 = vpop.permute.xlu0 %1903  ;;  %v7567_v54 = vld [vmem:[#allocation20_spill] sm:$0xff] }
 0x20e   : > { %1361 = vrot.lane.b32.xlu1 %v1266_v56, %s4173_s8  ;;  %1988 = vst.msk [vmem:[#allocation3 + $0x60] sm:$0xff] %vm1975_vm11, %v1904_v52  ;;  %s4187_s8 = smov 120  }
 0x20f   : > { %1553 = vrot.lane.b32.xlu0 %v1459_v63, %s4174_s9  ;;  %v7568_v63 = vld [vmem:[#allocation21_spill] sm:$0xff] }
 0x210   : > { %v1717_v24 = vpop.permute.xlu1 %1716  ;;  %4104 = vmatmul.mubr.msk.bf16.gmra.mxu1 %vm320_vm0, %v2970_v62  ;;  %v2973_v52 = vpack.c.bf16 %v7568_v63, %v7567_v54 }
 0x211   : > { %1798 = vst.msk [vmem:[#allocation3 + $0x78] sm:$0xff] %vm1782_vm10, %v1717_v24  ;;  %v1908_v55 = vpop.permute.xlu0 %1907  ;;  %4107 = vmatprep.mubr.msk.bf16.mxu1 %vm320_vm0, %v2971_v7 }
 0x212   : > { %1551 = vrot.lane.b32.xlu1 %v1458_v33, %s4174_s9  ;;  %1990 = vst.msk [vmem:[#allocation3 + $0x70] sm:$0xff] %vm1975_vm11, %v1908_v55 }
 0x213   : > { %1742 = vrot.lane.b32.xlu0 %v1650_v23, %s4175_s10 }
 0x214   : > { %v1906_v1 = vpop.permute.xlu1 %1905 }
 0x215   : > { %1989 = vst.msk [vmem:[#allocation3 + $0x68] sm:$0xff] %vm1975_vm11, %v1906_v1  ;;  %v1332_v19 = vpop.permute.xlu0 %1331  ;;  %v2020_v16 = vld [vmem:[#allocation3 + $0x60] sm:$0xff] }
 0x216   : > { %1555 = vrot.lane.b32.xlu1 %v1460_v20, %s4174_s9  ;;  %1412 = vst.msk [vmem:[#allocation3 + $0x80] sm:$0xff] %vm1395_vm8, %v1332_v19 }
 0x217   : > { %1746 = vrot.lane.b32.xlu0 %v1652_v8, %s4175_s10 }
 0x218   : > { %v1910_v49 = vpop.permute.xlu1 %1909 }
 0x219   : > { %1991 = vst.msk [vmem:[#allocation3 + $0x78] sm:$0xff] %vm1975_vm11, %v1910_v49  ;;  %v1336_v45 = vpop.permute.xlu0 %1335  ;;  %v2022_v9 = vld [vmem:[#allocation3 + $0x70] sm:$0xff] }
 0x21a   : > { %1744 = vrot.lane.b32.xlu1 %v1651_v48, %s4175_s10  ;;  %1414 = vst.msk [vmem:[#allocation3 + $0x90] sm:$0xff] %vm1395_vm8, %v1336_v45  ;;  %v7569_v45 = vld [vmem:[#allocation22_spill] sm:$0xff] }
 0x21b   : > { %1935 = vrot.lane.b32.xlu0 %v1265_v44, %s4176_s15 }
 0x21c   : > { %v1334_v15 = vpop.permute.xlu1 %1333  ;;  %v2021_v38 = vld [vmem:[#allocation3 + $0x68] sm:$0xff] }
 0x21d   : > { %1413 = vst.msk [vmem:[#allocation3 + $0x88] sm:$0xff] %vm1395_vm8, %v1334_v15  ;;  %v2046_v6 = vpack.c.bf16 %v2021_v38, %v2020_v16  ;;  %v1526_v57 = vpop.permute.xlu0 %1525 }
 0x21e   : > { %1748 = vrot.lane.b32.xlu1 %v1653_v5, %s4175_s10  ;;  %1606 = vst.msk [vmem:[#allocation3 + $0x80] sm:$0xff] %vm1589_vm9, %v1526_v57  ;;  %v7570_v5 = vld [vmem:[#allocation23_spill] sm:$0xff]  ;;  %v7572_v57 = vld [vmem:[#allocation25_spill] sm:$0xff]  ;;  %s286_s10 = scalar_lea.vmem %s7380_s6, %s3977_s28  ;;  %s6929_s28 = scalar_lea.vmem %s7379_s5, %s3976_s22 }
 0x21f   : > { %4073 = vmatprep.mubr.msk.bf16.mxu0 %vm2076_vm12, %v2046_v6  ;;  %1939 = vrot.lane.b32.xlu0 %v1845_v37, %s4176_s15  ;;  %v2974_v15 = vpack.c.bf16 %v7570_v5, %v7569_v45  ;;  %s4185_s22 = smov 104  }
 0x220   : > { %v1338_v58 = vpop.permute.xlu1 %1337  ;;  %v2023_v22 = vld [vmem:[#allocation3 + $0x78] sm:$0xff] }
 0x221   : > { %1415 = vst.msk [vmem:[#allocation3 + $0x98] sm:$0xff] %vm1395_vm8, %v1338_v58  ;;  %v2047_v28 = vpack.c.bf16 %v2023_v22, %v2022_v9  ;;  %v1530_v21 = vpop.permute.xlu0 %1529  ;;  %v7571_v9 = vld [vmem:[#allocation24_spill] sm:$0xff] }
 0x222   : > { %1937 = vrot.lane.b32.xlu1 %v1266_v56, %s4176_s15  ;;  %1608 = vst.msk [vmem:[#allocation3 + $0x90] sm:$0xff] %vm1589_vm9, %v1530_v21  ;;  %v2972_v56 = vpack.c.bf16 %v7566_v51, %v7565_v53  ;;  %v2975_v10 = vpack.c.bf16 %v7572_v57, %v7571_v9  ;;  %v7577_v21 = vld [vmem:[#allocation30_spill] sm:$0xff] }
 0x223   : > { %4074 = vmatmul.mubr.msk.bf16.gmra.mxu0 %vm2076_vm12, %v2047_v28  ;;  %v7575_v28 = vld [vmem:[#allocation28_spill] sm:$0xff] }
 0x224   : > { %v1528_v14 = vpop.permute.xlu1 %1527  ;;  %4108 = vmatmul.mubr.msk.bf16.gmra.mxu1 %vm320_vm0, %v2972_v56  ;;  %v2977_v60 = vpack.c.bf16 %v7576_v4, %v7575_v28 }
 0x225   : > { %1607 = vst.msk [vmem:[#allocation3 + $0x88] sm:$0xff] %vm1589_vm9, %v1528_v14  ;;  %v1719_v35 = vpop.permute.xlu0 %1718  ;;  %4111 = vmatprep.mubr.msk.bf16.mxu1 %vm320_vm0, %v2973_v52 }
 0x226   : > { %1941 = vrot.lane.b32.xlu1 %v1846_v12, %s4176_s15  ;;  %1799 = vst.msk [vmem:[#allocation3 + $0x80] sm:$0xff] %vm1782_vm10, %v1719_v35  ;;  %v7578_v12 = vld [vmem:[#allocation31_spill] sm:$0xff]  ;;  %v7579_v35 = vld [vmem:[#allocation32_spill] sm:$0xff] }
 0x227   : > { %v2978_v14 = vpack.c.bf16 %v7578_v12, %v7577_v21 }
 0x228   : > { %v1532_v17 = vpop.permute.xlu1 %1531 }
 0x229   : > { %1609 = vst.msk [vmem:[#allocation3 + $0x98] sm:$0xff] %vm1589_vm9, %v1532_v17  ;;  %v1723_v25 = vpop.permute.xlu0 %1722  ;;  %v7580_v17 = vld [vmem:[#allocation33_spill] sm:$0xff] }
 0x22a   : > { %1801 = vst.msk [vmem:[#allocation3 + $0x90] sm:$0xff] %vm1782_vm10, %v1723_v25  ;;  %v2979_v46 = vpack.c.bf16 %v7580_v17, %v7579_v35 }
 0x22c   : > { %v1721_v27 = vpop.permute.xlu1 %1720  ;;  %4112 = vmatmul.mubr.msk.bf16.gmra.mxu1 %vm320_vm0, %v2974_v15 }
 0x22d   : > { %1800 = vst.msk [vmem:[#allocation3 + $0x88] sm:$0xff] %vm1782_vm10, %v1721_v27  ;;  %v1912_v30 = vpop.permute.xlu0 %1911  ;;  %4115 = vmatprep.mubr.msk.bf16.mxu1 %vm320_vm0, %v2975_v10  ;;  %v2980_v27 = vpack.c.bf16 %v7582_v26, %v7581_v2 }
 0x22e   : > { %1992 = vst.msk [vmem:[#allocation3 + $0x80] sm:$0xff] %vm1975_vm11, %v1912_v30 }
 0x230   : > { %v1725_v31 = vpop.permute.xlu1 %1724 }
 0x231   : > { %1802 = vst.msk [vmem:[#allocation3 + $0x98] sm:$0xff] %vm1782_vm10, %v1725_v31  ;;  %v1916_v40 = vpop.permute.xlu0 %1915 }
 0x232   : > { %1994 = vst.msk [vmem:[#allocation3 + $0x90] sm:$0xff] %vm1975_vm11, %v1916_v40 }
 0x234   : > { %v1914_v44 = vpop.permute.xlu1 %1913  ;;  %4116 = vmatmul.mubr.msk.bf16.gmra.mxu1 %vm320_vm0, %v2976_v3 }
 0x235   : > { %1993 = vst.msk [vmem:[#allocation3 + $0x88] sm:$0xff] %vm1975_vm11, %v1914_v44  ;;  %v1340_v47 = vpop.permute.xlu0 %1339  ;;  %v2024_v33 = vld [vmem:[#allocation3 + $0x80] sm:$0xff]  ;;  %4119 = vmatprep.mubr.msk.bf16.mxu1 %vm320_vm0, %v2977_v60 }
 0x236   : > { %1416 = vst.msk [vmem:[#allocation3 + $0xa0] sm:$0xff] %vm1395_vm8, %v1340_v47 }
 0x238   : > { %v1918_v50 = vpop.permute.xlu1 %1917 }
 0x239   : > { %1995 = vst.msk [vmem:[#allocation3 + $0x98] sm:$0xff] %vm1975_vm11, %v1918_v50  ;;  %v1344_v24 = vpop.permute.xlu0 %1343  ;;  %v2026_v1 = vld [vmem:[#allocation3 + $0x90] sm:$0xff] }
 0x23a   : > { %1418 = vst.msk [vmem:[#allocation3 + $0xb0] sm:$0xff] %vm1395_vm8, %v1344_v24 }
 0x23c   : > { %v1342_v23 = vpop.permute.xlu1 %1341  ;;  %v2025_v55 = vld [vmem:[#allocation3 + $0x88] sm:$0xff]  ;;  %4120 = vmatmul.mubr.msk.bf16.gmra.mxu1 %vm320_vm0, %v2978_v14 }
 0x23d   : > { %1417 = vst.msk [vmem:[#allocation3 + $0xa8] sm:$0xff] %vm1395_vm8, %v1342_v23  ;;  %v2048_v20 = vpack.c.bf16 %v2025_v55, %v2024_v33  ;;  %v1534_v8 = vpop.permute.xlu0 %1533  ;;  %4123 = vmatprep.mubr.msk.bf16.mxu1 %vm320_vm0, %v2979_v46 }
 0x23e   : > { %1610 = vst.msk [vmem:[#allocation3 + $0xa0] sm:$0xff] %vm1589_vm9, %v1534_v8 }
 0x23f   : > { %4077 = vmatprep.mubr.msk.bf16.mxu0 %vm2076_vm12, %v2048_v20 }
 0x240   : > { %v1346_v19 = vpop.permute.xlu1 %1345  ;;  %v2027_v48 = vld [vmem:[#allocation3 + $0x98] sm:$0xff] }
 0x241   : > { %1419 = vst.msk [vmem:[#allocation3 + $0xb8] sm:$0xff] %vm1395_vm8, %v1346_v19  ;;  %v2049_v49 = vpack.c.bf16 %v2027_v48, %v2026_v1  ;;  %v1538_v16 = vpop.permute.xlu0 %1537 }
 0x242   : > { %1612 = vst.msk [vmem:[#allocation3 + $0xb0] sm:$0xff] %vm1589_vm9, %v1538_v16 }
 0x243   : > { %4078 = vmatmul.mubr.msk.bf16.gmra.mxu0 %vm2076_vm12, %v2049_v49 }
 0x244   : > { %v1536_v38 = vpop.permute.xlu1 %1535  ;;  %4124 = vmatmul.mubr.msk.bf16.gmra.mxu1 %vm320_vm0, %v2980_v27  ;;  %vm2494_vm0 = vcmask 1045509  }
 0x245   : > { %1611 = vst.msk [vmem:[#allocation3 + $0xa8] sm:$0xff] %vm1589_vm9, %v1536_v38  ;;  %v1727_v6 = vpop.permute.xlu0 %1726 }
 0x246   : > { %1803 = vst.msk [vmem:[#allocation3 + $0xa0] sm:$0xff] %vm1782_vm10, %v1727_v6 }
 0x248   : > { %v1540_v37 = vpop.permute.xlu1 %1539 }
 0x249   : > { %1613 = vst.msk [vmem:[#allocation3 + $0xb8] sm:$0xff] %vm1589_vm9, %v1540_v37  ;;  %v1731_v11 = vpop.permute.xlu0 %1730 }
 0x24a   : > { %1805 = vst.msk [vmem:[#allocation3 + $0xb0] sm:$0xff] %vm1782_vm10, %v1731_v11 }
 0x24c   : > { %v1729_v58 = vpop.permute.xlu1 %1728 }
 0x24d   : > { %1804 = vst.msk [vmem:[#allocation3 + $0xa8] sm:$0xff] %vm1782_vm10, %v1729_v58  ;;  %v1920_v22 = vpop.permute.xlu0 %1919 }
 0x24e   : > { %1996 = vst.msk [vmem:[#allocation3 + $0xa0] sm:$0xff] %vm1975_vm11, %v1920_v22 }
 0x250   : > { %v1733_v18 = vpop.permute.xlu1 %1732 }
 0x251   : > { %1806 = vst.msk [vmem:[#allocation3 + $0xb8] sm:$0xff] %vm1782_vm10, %v1733_v18  ;;  %v1924_v36 = vpop.permute.xlu0 %1923 }
 0x252   : > { %1998 = vst.msk [vmem:[#allocation3 + $0xb0] sm:$0xff] %vm1975_vm11, %v1924_v36 }
 0x254   : > { %v1922_v13 = vpop.permute.xlu1 %1921 }
 0x255   : > { %1997 = vst.msk [vmem:[#allocation3 + $0xa8] sm:$0xff] %vm1975_vm11, %v1922_v13  ;;  %v1348_v25 = vpop.permute.xlu0 %1347  ;;  %v2028_v30 = vld [vmem:[#allocation3 + $0xa0] sm:$0xff] }
 0x256   : > { %1420 = vst.msk [vmem:[#allocation3 + $0xc0] sm:$0xff] %vm1395_vm8, %v1348_v25 }
 0x258   : > { %v1926_v34 = vpop.permute.xlu1 %1925 }
 0x259   : > { %1999 = vst.msk [vmem:[#allocation3 + $0xb8] sm:$0xff] %vm1975_vm11, %v1926_v34  ;;  %v1352_v31 = vpop.permute.xlu0 %1351  ;;  %v2030_v40 = vld [vmem:[#allocation3 + $0xb0] sm:$0xff] }
 0x25a   : > { %1422 = vst.msk [vmem:[#allocation3 + $0xd0] sm:$0xff] %vm1395_vm8, %v1352_v31 }
 0x25c   : > { %v1350_v32 = vpop.permute.xlu1 %1349  ;;  %v2029_v61 = vld [vmem:[#allocation3 + $0xa8] sm:$0xff] }
 0x25d   : > { %1421 = vst.msk [vmem:[#allocation3 + $0xc8] sm:$0xff] %vm1395_vm8, %v1350_v32  ;;  %v2050_v39 = vpack.c.bf16 %v2029_v61, %v2028_v30  ;;  %v1542_v0 = vpop.permute.xlu0 %1541 }
 0x25e   : > { %1614 = vst.msk [vmem:[#allocation3 + $0xc0] sm:$0xff] %vm1589_vm9, %v1542_v0 }
 0x25f   : > { %4081 = vmatprep.mubr.msk.bf16.mxu0 %vm2076_vm12, %v2050_v39 }
 0x260   : > { %v1354_v41 = vpop.permute.xlu1 %1353  ;;  %v2031_v62 = vld [vmem:[#allocation3 + $0xb8] sm:$0xff] }
 0x261   : > { %1423 = vst.msk [vmem:[#allocation3 + $0xd8] sm:$0xff] %vm1395_vm8, %v1354_v41  ;;  %v2051_v42 = vpack.c.bf16 %v2031_v62, %v2030_v40  ;;  %v1546_v43 = vpop.permute.xlu0 %1545 }
 0x262   : > { %1616 = vst.msk [vmem:[#allocation3 + $0xd0] sm:$0xff] %vm1589_vm9, %v1546_v43 }
 0x263   : > { %4082 = vmatmul.mubr.msk.bf16.gmra.mxu0 %vm2076_vm12, %v2051_v42 }
 0x264   : > { %v1544_v7 = vpop.permute.xlu1 %1543 }
 0x265   : > { %1615 = vst.msk [vmem:[#allocation3 + $0xc8] sm:$0xff] %vm1589_vm9, %v1544_v7  ;;  %v1735_v44 = vpop.permute.xlu0 %1734 }
 0x266   : > { %1807 = vst.msk [vmem:[#allocation3 + $0xc0] sm:$0xff] %vm1782_vm10, %v1735_v44 }
 0x268   : > { %v1548_v47 = vpop.permute.xlu1 %1547 }
 0x269   : > { %1617 = vst.msk [vmem:[#allocation3 + $0xd8] sm:$0xff] %vm1589_vm9, %v1548_v47  ;;  %v1739_v50 = vpop.permute.xlu0 %1738 }
 0x26a   : > { %1809 = vst.msk [vmem:[#allocation3 + $0xd0] sm:$0xff] %vm1782_vm10, %v1739_v50 }
 0x26c   : > { %v1737_v53 = vpop.permute.xlu1 %1736 }
 0x26d   : > { %1808 = vst.msk [vmem:[#allocation3 + $0xc8] sm:$0xff] %vm1782_vm10, %v1737_v53  ;;  %v1928_v51 = vpop.permute.xlu0 %1927 }
 0x26e   : > { %2000 = vst.msk [vmem:[#allocation3 + $0xc0] sm:$0xff] %vm1975_vm11, %v1928_v51 }
 0x270   : > { %v1741_v56 = vpop.permute.xlu1 %1740 }
 0x271   : > { %1810 = vst.msk [vmem:[#allocation3 + $0xd8] sm:$0xff] %vm1782_vm10, %v1741_v56  ;;  %v1932_v54 = vpop.permute.xlu0 %1931 }
 0x272   : > { %2002 = vst.msk [vmem:[#allocation3 + $0xd0] sm:$0xff] %vm1975_vm11, %v1932_v54 }
 0x274   : > { %v1930_v63 = vpop.permute.xlu1 %1929 }
 0x275   : > { %2001 = vst.msk [vmem:[#allocation3 + $0xc8] sm:$0xff] %vm1975_vm11, %v1930_v63  ;;  %v1356_v52 = vpop.permute.xlu0 %1355  ;;  %v2032_v24 = vld [vmem:[#allocation3 + $0xc0] sm:$0xff] }
 0x276   : > { %1424 = vst.msk [vmem:[#allocation3 + $0xe0] sm:$0xff] %vm1395_vm8, %v1356_v52 }
 0x278   : > { %v1934_v33 = vpop.permute.xlu1 %1933 }
 0x279   : > { %2003 = vst.msk [vmem:[#allocation3 + $0xd8] sm:$0xff] %vm1975_vm11, %v1934_v33  ;;  %v1360_v23 = vpop.permute.xlu0 %1359  ;;  %v2034_v8 = vld [vmem:[#allocation3 + $0xd0] sm:$0xff] }
 0x27a   : > { %1426 = vst.msk [vmem:[#allocation3 + $0xf0] sm:$0xff] %vm1395_vm8, %v1360_v23 }
 0x27c   : > { %v1358_v55 = vpop.permute.xlu1 %1357  ;;  %v2033_v20 = vld [vmem:[#allocation3 + $0xc8] sm:$0xff] }
 0x27d   : > { %1425 = vst.msk [vmem:[#allocation3 + $0xe8] sm:$0xff] %vm1395_vm8, %v1358_v55  ;;  %v2052_v1 = vpack.c.bf16 %v2033_v20, %v2032_v24  ;;  %v1550_v19 = vpop.permute.xlu0 %1549 }
 0x27e   : > { %1618 = vst.msk [vmem:[#allocation3 + $0xe0] sm:$0xff] %vm1589_vm9, %v1550_v19 }
 0x27f   : > { %4085 = vmatprep.mubr.msk.bf16.mxu0 %vm2076_vm12, %v2052_v1 }
 0x280   : > { %v1362_v48 = vpop.permute.xlu1 %1361  ;;  %v2035_v49 = vld [vmem:[#allocation3 + $0xd8] sm:$0xff] }
 0x281   : > { %1427 = vst.msk [vmem:[#allocation3 + $0xf8] sm:$0xff] %vm1395_vm8, %v1362_v48  ;;  %v2053_v16 = vpack.c.bf16 %v2035_v49, %v2034_v8  ;;  %v1554_v45 = vpop.permute.xlu0 %1553  ;;  %vm2544_vm8 = vcmask 130112  }
 0x282   : > { %1620 = vst.msk [vmem:[#allocation3 + $0xf0] sm:$0xff] %vm1589_vm9, %v1554_v45 }
 0x283   : > { %4086 = vmatmul.mubr.msk.bf16.gmra.mxu0 %vm2076_vm12, %v2053_v16 }
 0x284   : > { %v1552_v5 = vpop.permute.xlu1 %1551 }
 0x285   : > { %1619 = vst.msk [vmem:[#allocation3 + $0xe8] sm:$0xff] %vm1589_vm9, %v1552_v5  ;;  %v1743_v15 = vpop.permute.xlu0 %1742 }
 0x286   : > { %1811 = vst.msk [vmem:[#allocation3 + $0xe0] sm:$0xff] %vm1782_vm10, %v1743_v15 }
 0x288   : > { %v1556_v38 = vpop.permute.xlu1 %1555 }
 0x289   : > { %1621 = vst.msk [vmem:[#allocation3 + $0xf8] sm:$0xff] %vm1589_vm9, %v1556_v38  ;;  %v1747_v6 = vpop.permute.xlu0 %1746  ;;  %vm2546_vm9 = vcmask 122944  }
 0x28a   : > { %1813 = vst.msk [vmem:[#allocation3 + $0xf0] sm:$0xff] %vm1782_vm10, %v1747_v6 }
 0x28c   : > { %v1745_v37 = vpop.permute.xlu1 %1744 }
 0x28d   : > { %1812 = vst.msk [vmem:[#allocation3 + $0xe8] sm:$0xff] %vm1782_vm10, %v1745_v37  ;;  %v1936_v9 = vpop.permute.xlu0 %1935 }
 0x28e   : > { %2004 = vst.msk [vmem:[#allocation3 + $0xe0] sm:$0xff] %vm1975_vm11, %v1936_v9 }
 0x28f   : > { %v4063_v57 = vpop.f32.mrf.mxu0 }
 0x290   : > { %v1749_v10 = vpop.permute.xlu1 %1748  ;;  %v2362_v28 = vmul.f32 %v4063_v57, %v4063_v57  ;;  %v2294_v12 = vsel %vm2290_vm13, %v4063_v57, 0.0  ;;  %v5392_v41 = vrot.slane %v4063_v57, 7 }
 0x291   : > { %1814 = vst.msk [vmem:[#allocation3 + $0xf8] sm:$0xff] %vm1782_vm10, %v1749_v10  ;;  %v5369_v11 = vpop.f32.mrf.mxu0  ;;  %v1940_v59 = vpop.permute.xlu0 %1939  ;;  %vm2570_vm10 = vcmask 195714  }
 0x292   : > { %7583 = vst [vmem:[#allocation34_spill] sm:$0xff] %v5369_v11  ;;  %2006 = vst.msk [vmem:[#allocation3 + $0xf0] sm:$0xff] %vm1975_vm11, %v1940_v59  ;;  %v2360_v58 = vmul.f32 %v5369_v11, %v5369_v11  ;;  %v2291_v4 = vsel %vm2290_vm13, %v5369_v11, 0.0  ;;  %v2395_v25 = vsel %vm2290_vm13, %v2362_v28, 0.0  ;;  %v2548_v43 = vsel %vm2488_vm14, %v5392_v41, %v5369_v11 }
 0x293   : > { %v4064_v29 = vpop.f32.mrf.mxu0  ;;  %v2576_v7 = vsel %vm2491_vm15, %v5392_v41, %v5369_v11  ;;  %v2604_v44 = vsel %vm2494_vm0, %v5392_v41, %v5369_v11  ;;  %v2632_v53 = vsel %vm2497_vm1, %v5392_v41, %v5369_v11 }
 0x294   : > { %v1938_v3 = vpop.permute.xlu1 %1937  ;;  %v2363_v14 = vmul.f32 %v4064_v29, %v4064_v29  ;;  %v2392_v17 = vsel %vm2290_vm13, %v2360_v58, 0.0  ;;  %v2296_v34 = vsel %vm2290_vm13, %v4064_v29, 0.0  ;;  %v5394_v62 = vrot.slane %v4064_v29, 7 }
 0x295   : > { %2005 = vst.msk [vmem:[#allocation3 + $0xe8] sm:$0xff] %vm1975_vm11, %v1938_v3  ;;  %v5375_v22 = vpop.f32.mrf.mxu0  ;;  %v2036_v2 = vld [vmem:[#allocation3 + $0xe0] sm:$0xff] }
 0x296   : > { %7584 = vst [vmem:[#allocation35_spill] sm:$0xff] %v5375_v22  ;;  %v2292_v60 = vsel %vm2290_vm13, %v5375_v22, 0.0  ;;  %v2361_v18 = vmul.f32 %v5375_v22, %v5375_v22  ;;  %v2397_v30 = vsel %vm2290_vm13, %v2363_v14, 0.0  ;;  %7585 = vst [vmem:[#allocation36_spill] sm:$0xff] %v5394_v62  ;;  %v2733_v51 = vsel %vm2482_vm2, %v5394_v62, %v5375_v22 }
 0x297   : > { %v2293_v21 = vadd.f32 %v2292_v60, %v2291_v4  ;;  %v2769_v56 = vsel %vm2485_vm3, %v5394_v62, %v5375_v22  ;;  %v2797_v33 = vsel %vm2488_vm14, %v5394_v62, %v5375_v22  ;;  %v2825_v55 = vsel %vm2491_vm15, %v5394_v62, %v5375_v22 }
 0x298   : > { %v1942_v35 = vpop.permute.xlu1 %1941  ;;  %v2393_v46 = vsel %vm2290_vm13, %v2361_v18, 0.0  ;;  %v2853_v20 = vsel %vm2494_vm0, %v5394_v62, %v5375_v22  ;;  %v2881_v1 = vsel %vm2497_vm1, %v5394_v62, %v5375_v22 }
 0x299   : > { %2007 = vst.msk [vmem:[#allocation3 + $0xf8] sm:$0xff] %vm1975_vm11, %v1942_v35  ;;  %v2295_v36 = vadd.f32 %v2294_v12, %v2293_v21  ;;  %v2394_v13 = vadd.f32 %v2393_v46, %v2392_v17  ;;  %v2038_v39 = vld [vmem:[#allocation3 + $0xf0] sm:$0xff]  ;;  %vm2572_vm11 = vcmask 195712  }
 0x29b   : > { %v2297_v26 = vadd.f32 %v2296_v34, %v2295_v36  ;;  %v2396_v27 = vadd.f32 %v2395_v25, %v2394_v13 }
 0x29c   : > { %v2037_v31 = vld [vmem:[#allocation3 + $0xe8] sm:$0xff] }
 0x29d   : > { %v2054_v32 = vpack.c.bf16 %v2037_v31, %v2036_v2  ;;  %v2398_v61 = vadd.f32 %v2397_v30, %v2396_v27 }
 0x29f   : > { %4089 = vmatprep.mubr.msk.bf16.mxu0 %vm2076_vm12, %v2054_v32 }
 0x2a0   : > { %v2039_v40 = vld [vmem:[#allocation3 + $0xf8] sm:$0xff] }
 0x2a1   : > { %v2055_v0 = vpack.c.bf16 %v2039_v40, %v2038_v39 }
 0x2a3   : > { %4090 = vmatmul.mubr.msk.bf16.gmra.mxu0 %vm2076_vm12, %v2055_v0  ;;  %vm2598_vm12 = vcmask 261315  }
 0x2a7   : > { %v4067_v42 = vpop.f32.mrf.mxu0 }
 0x2a8   : > { %v2366_v47 = vmul.f32 %v4067_v42, %v4067_v42  ;;  %v2302_v8 = vsel %vm2290_vm13, %v4067_v42, 0.0  ;;  %v5430_v19 = vrot.slane %v4067_v42, 5 }
 0x2a9   : > { %v2179_v50 = vpop.f32.mrf.mxu0 }
 0x2aa   : > { %v2298_v54 = vsel %vm2290_vm13, %v2179_v50, 0.0  ;;  %v2364_v63 = vmul.f32 %v2179_v50, %v2179_v50  ;;  %v5415_v52 = vrot.slane %v2179_v50, 6  ;;  %v2403_v16 = vsel %vm2290_vm13, %v2366_v47, 0.0 }
 0x2ab   : > { %v2299_v24 = vadd.f32 %v2298_v54, %v2297_v26  ;;  %v4068_v23 = vpop.f32.mrf.mxu0 }
 0x2ac   : > { %v2399_v48 = vsel %vm2290_vm13, %v2364_v63, 0.0  ;;  %v2367_v49 = vmul.f32 %v4068_v23, %v4068_v23  ;;  %v2304_v5 = vsel %vm2290_vm13, %v4068_v23, 0.0  ;;  %v2549_v38 = vsel %vm2491_vm15, %v5415_v52, %v2548_v43 }
 0x2ad   : > { %v2400_v45 = vadd.f32 %v2399_v48, %v2398_v61  ;;  %v2182_v15 = vpop.f32.mrf.mxu0  ;;  %v5437_v6 = vrot.slane %v4068_v23, 5  ;;  %v2550_v29 = vsel %vm2494_vm0, %v5430_v19, %v2549_v38  ;;  %v2577_v3 = vsel %vm2494_vm0, %v5415_v52, %v2576_v7 }
 0x2ae   : > { %v2300_v37 = vsel %vm2290_vm13, %v2182_v15, 0.0  ;;  %v2365_v9 = vmul.f32 %v2182_v15, %v2182_v15  ;;  %v2734_v57 = vrot.slane %v2182_v15, 6  ;;  %v2405_v10 = vsel %vm2290_vm13, %v2367_v49, 0.0 }
 0x2af   : > { %v2301_v59 = vadd.f32 %v2300_v37, %v2299_v24  ;;  %v2578_v28 = vsel %vm2497_vm1, %v5430_v19, %v2577_v3  ;;  %v2605_v4 = vsel %vm2497_vm1, %v5415_v52, %v2604_v44  ;;  %v5452_v60 = vsel %vm2500_vm4, %v5415_v52, %v2632_v53 }
 0x2b0   : > { %v2401_v58 = vsel %vm2290_vm13, %v2365_v9, 0.0  ;;  %7586 = vst [vmem:[#allocation37_spill] sm:$0xff] %v5452_v60  ;;  %v5456_v12 = vsel %vm2500_vm4, %v5430_v19, %v2605_v4  ;;  %v2661_v14 = vsel %vm2482_vm2, %v5430_v19, %v5415_v52  ;;  %v2688_v35 = vsel %vm2482_vm2, %v5415_v52, %v5392_v41 }
 0x2b1   : > { %v2303_v18 = vadd.f32 %v2302_v8, %v2301_v59  ;;  %v2402_v21 = vadd.f32 %v2401_v58, %v2400_v45  ;;  %7587 = vst [vmem:[#allocation40_spill] sm:$0xff] %v5456_v12  ;;  %v2735_v17 = vsel %vm2485_vm3, %v2734_v57, %v2733_v51  ;;  %v2770_v46 = vsel %vm2488_vm14, %v2734_v57, %v2769_v56 }
 0x2b2   : > { %v2798_v36 = vsel %vm2491_vm15, %v2734_v57, %v2797_v33  ;;  %v2689_v34 = vsel %vm2485_vm3, %v5430_v19, %v2688_v35  ;;  %v2737_v2 = vsel %vm2488_vm14, %v5437_v6, %v2735_v17  ;;  %v2771_v26 = vsel %vm2491_vm15, %v5437_v6, %v2770_v46 }
 0x2b3   : > { %v2404_v13 = vadd.f32 %v2403_v16, %v2402_v21  ;;  %v2305_v25 = vadd.f32 %v2304_v5, %v2303_v18  ;;  %v2799_v27 = vsel %vm2494_vm0, %v5437_v6, %v2798_v36  ;;  %v2826_v30 = vsel %vm2494_vm0, %v2734_v57, %v2825_v55 }
 0x2b4   : > { %v2854_v31 = vsel %vm2497_vm1, %v2734_v57, %v2853_v20  ;;  %v2827_v61 = vsel %vm2497_vm1, %v5437_v6, %v2826_v30  ;;  %v5484_v40 = vsel %vm2500_vm4, %v2734_v57, %v2881_v1  ;;  %v2910_v0 = vsel %vm2482_vm2, %v5437_v6, %v2734_v57 }
 0x2b5   : > { %v2406_v32 = vadd.f32 %v2405_v10, %v2404_v13  ;;  %v5481_v39 = vsel %vm2500_vm4, %v5437_v6, %v2854_v31  ;;  %7589 = vst [vmem:[#allocation42_spill] sm:$0xff] %v5484_v40  ;;  %v2937_v42 = vsel %vm2482_vm2, %v2734_v57, %v5394_v62 }
 0x2b6   : > { %7588 = vst [vmem:[#allocation41_spill] sm:$0xff] %v5481_v39  ;;  %v2938_v43 = vsel %vm2485_vm3, %v5437_v6, %v2937_v42 }
 0x2c3   : > { %v4071_v7 = vpop.f32.mrf.mxu0 }
 0x2c4   : > { %v2370_v44 = vmul.f32 %v4071_v7, %v4071_v7  ;;  %v2310_v56 = vsel %vm2290_vm13, %v4071_v7, 0.0  ;;  %v5497_v24 = vrot.slane %v4071_v7, 3 }
 0x2c5   : > { %v2195_v47 = vpop.f32.mrf.mxu0 }
 0x2c6   : > { %v2306_v50 = vsel %vm2290_vm13, %v2195_v47, 0.0  ;;  %v2368_v53 = vmul.f32 %v2195_v47, %v2195_v47  ;;  %v5493_v51 = vrot.slane %v2195_v47, 4  ;;  %v2411_v33 = vsel %vm2290_vm13, %v2370_v44, 0.0 }
 0x2c7   : > { %v2307_v54 = vadd.f32 %v2306_v50, %v2305_v25  ;;  %v4072_v63 = vpop.f32.mrf.mxu0 }
 0x2c8   : > { %v2407_v23 = vsel %vm2290_vm13, %v2368_v53, 0.0  ;;  %v2371_v55 = vmul.f32 %v4072_v63, %v4072_v63  ;;  %v2312_v1 = vsel %vm2290_vm13, %v4072_v63, 0.0  ;;  %v2551_v48 = vsel %vm2497_vm1, %v5493_v51, %v2550_v29 }
 0x2c9   : > { %v2408_v20 = vadd.f32 %v2407_v23, %v2406_v32  ;;  %v2198_v8 = vpop.f32.mrf.mxu0  ;;  %v5505_v49 = vsel %vm2500_vm4, %v5493_v51, %v2578_v28  ;;  %v5507_v16 = vrot.slane %v4072_v63, 3  ;;  %v5513_v9 = vsel %vm2500_vm4, %v5497_v24, %v2551_v48 }
 0x2ca   : > { %7590 = vst [vmem:[#allocation43_spill] sm:$0xff] %v5505_v49  ;;  %v2308_v45 = vsel %vm2290_vm13, %v2198_v8, 0.0  ;;  %v2369_v5 = vmul.f32 %v2198_v8, %v2198_v8  ;;  %v2738_v15 = vrot.slane %v2198_v8, 4  ;;  %v2413_v38 = vsel %vm2290_vm13, %v2371_v55, 0.0  ;;  %7591 = vst [vmem:[#allocation44_spill] sm:$0xff] %v5513_v9 }
 0x2cb   : > { %v2309_v37 = vadd.f32 %v2308_v45, %v2307_v54  ;;  %v5518_v57 = vsel %vm2482_vm2, %v5497_v24, %v5493_v51  ;;  %v2634_v59 = vsel %vm2482_vm2, %v5493_v51, %v5430_v19  ;;  %v2662_v29 = vsel %vm2485_vm3, %v5493_v51, %v2661_v14 }
 0x2cc   : > { %v2409_v10 = vsel %vm2290_vm13, %v2369_v5, 0.0  ;;  %v2690_v3 = vsel %vm2488_vm14, %v5493_v51, %v2689_v34  ;;  %v5530_v4 = vsel %vm2485_vm3, %v5497_v24, %v2634_v59  ;;  %v5534_v18 = vsel %vm2488_vm14, %v5497_v24, %v2662_v29 }
 0x2cd   : > { %v2311_v58 = vadd.f32 %v2310_v56, %v2309_v37  ;;  %v2410_v28 = vadd.f32 %v2409_v10, %v2408_v20  ;;  %v5538_v21 = vsel %vm2491_vm15, %v5497_v24, %v2690_v3  ;;  %v2739_v35 = vsel %vm2491_vm15, %v2738_v15, %v2737_v2  ;;  %v5591_v56 = vpop.f32.mrf.mxu1 }
 0x2ce   : > { %v2772_v14 = vsel %vm2494_vm0, %v2738_v15, %v2771_v26  ;;  %v2800_v17 = vsel %vm2497_vm1, %v2738_v15, %v2799_v27  ;;  %v5545_v13 = vsel %vm2494_vm0, %v5507_v16, %v2739_v35  ;;  %v5556_v2 = vsel %vm2500_vm4, %v2738_v15, %v2827_v61 }
 0x2cf   : > { %v2412_v46 = vadd.f32 %v2411_v33, %v2410_v28  ;;  %v2313_v36 = vadd.f32 %v2312_v1, %v2311_v58  ;;  %v5549_v25 = vsel %vm2497_vm1, %v5507_v16, %v2772_v14  ;;  %v5553_v34 = vsel %vm2500_vm4, %v5507_v16, %v2800_v17  ;;  %7593 = vst [vmem:[#allocation46_spill] sm:$0xff] %v5556_v2  ;;  %v5598_v8 = vpop.f32.mrf.mxu1 }
 0x2d0   : > { %7592 = vst [vmem:[#allocation45_spill] sm:$0xff] %v5553_v34  ;;  %v5560_v26 = vsel %vm2482_vm2, %v5507_v16, %v2738_v15  ;;  %v2883_v27 = vsel %vm2482_vm2, %v2738_v15, %v5437_v6  ;;  %v2911_v32 = vsel %vm2485_vm3, %v2738_v15, %v2910_v0  ;;  %v2939_v42 = vsel %vm2488_vm14, %v2738_v15, %v2938_v43 }
 0x2d1   : > { %v2414_v30 = vadd.f32 %v2413_v38, %v2412_v46  ;;  %v5566_v31 = vsel %vm2485_vm3, %v5507_v16, %v2883_v27  ;;  %v5572_v61 = vsel %vm2488_vm14, %v5507_v16, %v2911_v32  ;;  %v5576_v7 = vsel %vm2491_vm15, %v5507_v16, %v2939_v42  ;;  %7594 = vst [vmem:[#allocation47_spill] sm:$0xff] %v5598_v8  ;;  %v5610_v38 = vpop.f32.mrf.mxu1 }
 0x2d2   : > { %v2520_v6 = vsel %vm2485_vm3, %v5392_v41, %v5369_v11  ;;  %v2483_v43 = vsel %vm2482_vm2, %v5392_v41, %v5369_v11 }
 0x2d3   : > { %v2521_v44 = vsel %vm2488_vm14, %v5415_v52, %v2520_v6  ;;  %v2486_v54 = vsel %vm2485_vm3, %v5415_v52, %v2483_v43  ;;  %v5622_v17 = vpop.f32.mrf.mxu1 }
 0x2d4   : > { %v2522_v0 = vsel %vm2491_vm15, %v5430_v19, %v2521_v44  ;;  %v2489_v37 = vsel %vm2488_vm14, %v5430_v19, %v2486_v54  ;;  %7596 = vst [vmem:[#allocation48_spill] sm:$0xff] %v5622_v17 }
 0x2d5   : > { %v2523_v53 = vsel %vm2494_vm0, %v5493_v51, %v2522_v0  ;;  %v2492_v3 = vsel %vm2491_vm15, %v5493_v51, %v2489_v37  ;;  %v5660_v43 = vpop.f32.mrf.mxu1 }
 0x2d6   : > { %v2524_v52 = vsel %vm2497_vm1, %v5497_v24, %v2523_v53 }
 0x2e3   : > { %v4075_v47 = vpop.f32.mrf.mxu0 }
 0x2e4   : > { %v2374_v55 = vmul.f32 %v4075_v47, %v4075_v47  ;;  %v5614_v10 = vrot.slane %v4075_v47, 1  ;;  %v2318_v58 = vsel %vm2290_vm13, %v4075_v47, 0.0 }
 0x2e5   : > { %v2211_v50 = vpop.f32.mrf.mxu0 }
 0x2e6   : > { %v2314_v63 = vsel %vm2290_vm13, %v2211_v50, 0.0  ;;  %v2372_v33 = vmul.f32 %v2211_v50, %v2211_v50  ;;  %v2496_v23 = vrot.slane %v2211_v50, 2  ;;  %v2419_v28 = vsel %vm2290_vm13, %v2374_v55, 0.0 }
 0x2e7   : > { %v2315_v20 = vadd.f32 %v2314_v63, %v2313_v36  ;;  %v5596_v1 = vpop.f32.mrf.mxu0  ;;  %v5685_v63 = vpop.f32.mrf.mxu1 }
 0x2e8   : > { %v2415_v48 = vsel %vm2290_vm13, %v2372_v33, 0.0  ;;  %v2525_v5 = vsel %vm2500_vm4, %v2496_v23, %v2524_v52  ;;  %v5633_v46 = vsel %vm2482_vm2, %v5614_v10, %v2496_v23  ;;  %v2580_v51 = vsel %vm2482_vm2, %v2496_v23, %v5497_v24 }
 0x2e9   : > { %v2416_v45 = vadd.f32 %v2415_v48, %v2414_v30  ;;  %v2214_v15 = vpop.f32.mrf.mxu0  ;;  %2533 = vrot.lane.b32.xlu0 %v2525_v5, %s4170_s29  ;;  %v2608_v36 = vsel %vm2485_vm3, %v2496_v23, %v5518_v57  ;;  %v5640_v27 = vrot.slane %v5596_v1, 1  ;;  %v5646_v42 = vsel %vm2485_vm3, %v5614_v10, %v2580_v51 }
 0x2ea   : > { %v2316_v59 = vsel %vm2290_vm13, %v2214_v15, 0.0  ;;  %v2373_v29 = vmul.f32 %v2214_v15, %v2214_v15  ;;  %v2742_v14 = vrot.slane %v2214_v15, 2  ;;  %v5650_v6 = vsel %vm2488_vm14, %v5614_v10, %v2608_v36 }
 0x2eb   : > { %v2317_v35 = vadd.f32 %v2316_v59, %v2315_v20  ;;  %7597 = vst [vmem:[#allocation49_spill] sm:$0xff] %v5640_v27  ;;  %v2636_v44 = vsel %vm2488_vm14, %v2496_v23, %v5530_v4  ;;  %v2664_v57 = vsel %vm2491_vm15, %v2496_v23, %v5534_v18  ;;  %v2692_v47 = vsel %vm2494_vm0, %v2496_v23, %v5538_v21 }
 0x2ec   : > { %v2417_v19 = vsel %vm2290_vm13, %v2373_v29, 0.0  ;;  %v5664_v50 = vsel %vm2491_vm15, %v5614_v10, %v2636_v44  ;;  %v5668_v53 = vsel %vm2494_vm0, %v5614_v10, %v2664_v57  ;;  %v5673_v4 = vsel %vm2497_vm1, %v5614_v10, %v2692_v47 }
 0x2ed   : > { %v5642_v30 = vadd.f32 %v2318_v58, %v2317_v35  ;;  %v2418_v32 = vadd.f32 %v2417_v19, %v2416_v45  ;;  %v2743_v18 = vsel %vm2497_vm1, %v2742_v14, %v5545_v13  ;;  %v5679_v21 = vsel %vm2500_vm4, %v2742_v14, %v5549_v25 }
 0x2ee   : > { %7598 = vst [vmem:[#allocation50_spill] sm:$0xff] %v5679_v21  ;;  %v5683_v54 = vsel %vm2482_vm2, %v5640_v27, %v2742_v14  ;;  %v5689_v33 = vsel %vm2500_vm4, %v5640_v27, %v2743_v18  ;;  %v2829_v55 = vsel %vm2482_vm2, %v2742_v14, %v5507_v16  ;;  %v2857_v13 = vsel %vm2485_vm3, %v2742_v14, %v5560_v26 }
 0x2ef   : > { %v5658_v0 = vadd.f32 %v2419_v28, %v2418_v32  ;;  %7599 = vst [vmem:[#allocation51_spill] sm:$0xff] %v5689_v33  ;;  %v2495_v25 = vsel %vm2494_vm0, %v5497_v24, %v2492_v3  ;;  %v5699_v20 = vsel %vm2485_vm3, %v5640_v27, %v2829_v55  ;;  %v5703_v48 = vsel %vm2488_vm14, %v5640_v27, %v2857_v13  ;;  %v5716_v24 = vpop.f32.mrf.mxu1 }
 0x2f0   : > { %v2885_v52 = vsel %vm2488_vm14, %v2742_v14, %v5566_v31  ;;  %v2913_v16 = vsel %vm2491_vm15, %v2742_v14, %v5572_v61  ;;  %v2941_v31 = vsel %vm2494_vm0, %v2742_v14, %v5576_v7  ;;  %v2498_v61 = vsel %vm2497_vm1, %v2496_v23, %v2495_v25 }
 0x2f1   : > { %v5720_v26 = vsel %vm2491_vm15, %v5640_v27, %v2885_v52  ;;  %v5724_v45 = vsel %vm2494_vm0, %v5640_v27, %v2913_v16  ;;  %v5731_v5 = vsel %vm2497_vm1, %v5640_v27, %v2941_v31  ;;  %v2501_v15 = vsel %vm2500_vm4, %v5614_v10, %v2498_v61  ;;  %v5735_v37 = vpop.f32.mrf.mxu1 }
 0x2f2   : > { %2518 = vst.msk [vmem:[%s5714_s27] sm:$0xff] %vm2290_vm13, %v2501_v15  ;;  %v3265_v29 = vmul.f32 %v5591_v56, %v5591_v56  ;;  %v3266_v7 = vmul.f32 %v5610_v38, %v5610_v38  ;;  %v3263_v23 = vmul.f32 %v5598_v8, %v5598_v8  ;;  %v3264_v3 = vmul.f32 %v5622_v17, %v5622_v17 }
 0x2f3   : > { %v5739_v59 = vpop.f32.mrf.mxu1  ;;  %v3197_v28 = vsel %vm2290_vm13, %v5591_v56, 0.0  ;;  %v3194_v14 = vsel %vm2290_vm13, %v5598_v8, 0.0  ;;  %v3195_v19 = vsel %vm2290_vm13, %v5622_v17, 0.0  ;;  %v3199_v57 = vsel %vm2290_vm13, %v5610_v38, 0.0 }
 0x2f4   : > { %v3298_v35 = vsel %vm2290_vm13, %v3265_v29, 0.0  ;;  %v3295_v51 = vsel %vm2290_vm13, %v3263_v23, 0.0  ;;  %v3296_v36 = vsel %vm2290_vm13, %v3264_v3, 0.0  ;;  %v3196_v32 = vadd.f32 %v3195_v19, %v3194_v14 }
 0x2f5   : > { %v5749_v58 = vpop.f32.mrf.mxu1  ;;  %v3297_v44 = vadd.f32 %v3296_v36, %v3295_v51  ;;  %v3300_v47 = vsel %vm2290_vm13, %v3266_v7, 0.0  ;;  %v3267_v13 = vmul.f32 %v5685_v63, %v5685_v63  ;;  %v3201_v52 = vsel %vm2290_vm13, %v5685_v63, 0.0 }
 0x2f6   : > { %v3198_v55 = vadd.f32 %v3197_v28, %v3196_v32  ;;  %v3203_v7 = vsel %vm2290_vm13, %v5735_v37, 0.0  ;;  %v3205_v3 = vsel %vm2290_vm13, %v5660_v43, 0.0  ;;  %v3269_v28 = vmul.f32 %v5660_v43, %v5660_v43 }
 0x2f7   : > { %v5763_v18 = vpop.f32.mrf.mxu1  ;;  %v3299_v25 = vadd.f32 %v3298_v35, %v3297_v44  ;;  %v3302_v15 = vsel %vm2290_vm13, %v3267_v13, 0.0  ;;  %v3268_v35 = vmul.f32 %v5735_v37, %v5735_v37  ;;  %v3270_v36 = vmul.f32 %v5716_v24, %v5716_v24 }
 0x2f8   : > { %v3200_v31 = vadd.f32 %v3199_v57, %v3198_v55  ;;  %v3207_v44 = vsel %vm2290_vm13, %v5716_v24, 0.0 }
 0x2f9   : > { %v5769_v16 = vpop.f32.mrf.mxu1  ;;  %v3301_v61 = vadd.f32 %v3300_v47, %v3299_v25  ;;  %v3306_v47 = vsel %vm2290_vm13, %v3269_v28, 0.0  ;;  %v3304_v55 = vsel %vm2290_vm13, %v3268_v35, 0.0  ;;  %v3273_v35 = vmul.f32 %v5739_v59, %v5739_v59 }
 0x2fa   : > { %v3202_v23 = vadd.f32 %v3201_v52, %v3200_v31  ;;  %v3308_v52 = vsel %vm2290_vm13, %v3270_v36, 0.0 }
 0x2fb   : > { %v5772_v29 = vpop.f32.mrf.mxu1  ;;  %v3303_v19 = vadd.f32 %v3302_v15, %v3301_v61 }
 0x2fc   : > { %v3204_v51 = vadd.f32 %v3203_v7, %v3202_v23  ;;  %v3209_v23 = vsel %vm2290_vm13, %v5749_v58, 0.0  ;;  %v3271_v7 = vmul.f32 %v5749_v58, %v5749_v58 }
 0x2fd   : > { %v5782_v14 = vpop.f32.mrf.mxu1  ;;  %v3305_v25 = vadd.f32 %v3304_v55, %v3303_v19  ;;  %v3211_v55 = vsel %vm2290_vm13, %v5769_v16, 0.0 }
 0x2fe   : > { %v3206_v57 = vadd.f32 %v3205_v3, %v3204_v51  ;;  %v3310_v19 = vsel %vm2290_vm13, %v3271_v7, 0.0  ;;  %v3217_v39 = vsel %vm2290_vm13, %v5782_v14, 0.0 }
 0x2ff   : > { %v5786_v32 = vpop.f32.mrf.mxu1  ;;  %v3307_v15 = vadd.f32 %v3306_v47, %v3305_v25  ;;  %v3274_v47 = vmul.f32 %v5763_v18, %v5763_v18  ;;  %v3272_v25 = vmul.f32 %v5769_v16, %v5769_v16 }
 0x300   : > { %v3208_v31 = vadd.f32 %v3207_v44, %v3206_v57  ;;  %v3213_v57 = vsel %vm2290_vm13, %v5739_v59, 0.0 }
 0x301   : > { %v5792_v13 = vpop.f32.mrf.mxu1  ;;  %v3309_v51 = vadd.f32 %v3308_v52, %v3307_v15  ;;  %v3314_v15 = vsel %vm2290_vm13, %v3273_v35, 0.0  ;;  %v3312_v7 = vsel %vm2290_vm13, %v3272_v25, 0.0  ;;  %v3316_v22 = vsel %vm2290_vm13, %v3274_v47, 0.0 }
 0x302   : > { %v3210_v28 = vadd.f32 %v3209_v23, %v3208_v31  ;;  %v3215_v23 = vsel %vm2290_vm13, %v5763_v18, 0.0  ;;  %v3276_v2 = vmul.f32 %v5792_v13, %v5792_v13  ;;  %v3277_v25 = vmul.f32 %v5772_v29, %v5772_v29 }
 0x303   : > { %v5795_v61 = vpop.f32.mrf.mxu1  ;;  %v3311_v44 = vadd.f32 %v3310_v19, %v3309_v51  ;;  %v3275_v51 = vmul.f32 %v5782_v14, %v5782_v14 }
 0x304   : > { %v3212_v31 = vadd.f32 %v3211_v55, %v3210_v28  ;;  %v3322_v21 = vsel %vm2290_vm13, %v3277_v25, 0.0 }
 0x305   : > { %v5801_v3 = vpop.f32.mrf.mxu1  ;;  %v3313_v62 = vadd.f32 %v3312_v7, %v3311_v44  ;;  %v3318_v34 = vsel %vm2290_vm13, %v3275_v51, 0.0  ;;  %v3219_v44 = vsel %vm2290_vm13, %v5792_v13, 0.0  ;;  %v3221_v7 = vsel %vm2290_vm13, %v5772_v29, 0.0 }
 0x306   : > { %7600 = vst [vmem:[#allocation4_spill] sm:$0xff] %v5801_v3  ;;  %v3214_v40 = vadd.f32 %v3213_v57, %v3212_v31  ;;  %v3223_v51 = vsel %vm2290_vm13, %v5786_v32, 0.0 }
 0x307   : > { %v5806_v36 = vpop.f32.mrf.mxu1  ;;  %v3315_v35 = vadd.f32 %v3314_v15, %v3313_v62  ;;  %v3278_v62 = vmul.f32 %v5786_v32, %v5786_v32 }
 0x308   : > { %v3216_v55 = vadd.f32 %v3215_v23, %v3214_v40  ;;  %v3320_v40 = vsel %vm2290_vm13, %v3276_v2, 0.0 }
 0x309   : > { %v5816_v52 = vpop.f32.mrf.mxu1  ;;  %v3317_v31 = vadd.f32 %v3316_v22, %v3315_v35  ;;  %v3324_v22 = vsel %vm2290_vm13, %v3278_v62, 0.0  ;;  %v3225_v35 = vsel %vm2290_vm13, %v5801_v3, 0.0  ;;  %v4079_v62 = vpop.f32.mrf.mxu0 }
 0x30a   : > { %7601 = vst [vmem:[#allocation5_spill] sm:$0xff] %v5816_v52  ;;  %v3218_v47 = vadd.f32 %v3217_v39, %v3216_v55  ;;  %v3280_v2 = vmul.f32 %v5816_v52, %v5816_v52  ;;  %v3227_v25 = vsel %vm2290_vm13, %v5816_v52, 0.0  ;;  %v5911_v52 = vrot.slane %v4079_v62, 7 }
 0x30b   : > { %v5824_v19 = vpop.f32.mrf.mxu1  ;;  %v3319_v15 = vadd.f32 %v3318_v34, %v3317_v31  ;;  %v3279_v34 = vmul.f32 %v5801_v3, %v5801_v3 }
 0x30c   : > { %v3220_v23 = vadd.f32 %v3219_v44, %v3218_v47 }
 0x30d   : > { %v5829_v28 = vpop.f32.mrf.mxu1  ;;  %v3321_v39 = vadd.f32 %v3320_v40, %v3319_v15 }
 0x30e   : > { %v3222_v17 = vadd.f32 %v3221_v7, %v3220_v23  ;;  %v3326_v7 = vsel %vm2290_vm13, %v3279_v34, 0.0  ;;  %v3328_v23 = vsel %vm2290_vm13, %v3280_v2, 0.0  ;;  %v3282_v2 = vmul.f32 %v5806_v36, %v5806_v36 }
 0x30f   : > { %v5838_v57 = vpop.f32.mrf.mxu1  ;;  %v3323_v60 = vadd.f32 %v3322_v21, %v3321_v39  ;;  %v3281_v21 = vmul.f32 %v5795_v61, %v5795_v61  ;;  %v2375_v39 = vmul.f32 %v5596_v1, %v5596_v1 }
 0x310   : > { %v3224_v55 = vadd.f32 %v3223_v51, %v3222_v17  ;;  %v3229_v17 = vsel %vm2290_vm13, %v5795_v61, 0.0 }
 0x311   : > { %v5848_v33 = vpop.f32.mrf.mxu1  ;;  %v3325_v47 = vadd.f32 %v3324_v22, %v3323_v60  ;;  %v5872_v60 = vrot.slane %v5591_v56, 7  ;;  %v5874_v22 = vpop.f32.mrf.mxu0  ;;  %v3330_v34 = vsel %vm2290_vm13, %v3281_v21, 0.0  ;;  %v5886_v56 = vsel %vm2500_vm4, %v5392_v41, %v5369_v11 }
 0x312   : > { %7602 = vst [vmem:[#allocation6_spill] sm:$0xff] %v5848_v33  ;;  %v3226_v31 = vadd.f32 %v3225_v35, %v3224_v55  ;;  %7605 = vst [vmem:[#allocation9_spill] sm:$0xff] %v5886_v56  ;;  %v5895_v21 = vrot.slane %v5685_v63, 6  ;;  %v5903_v41 = vrot.slane %v5610_v38, 7  ;;  %v3332_v56 = vsel %vm2290_vm13, %v3282_v2, 0.0 }
 0x313   : > { %v5859_v44 = vpop.f32.mrf.mxu1  ;;  %v3327_v15 = vadd.f32 %v3326_v7, %v3325_v47  ;;  %7604 = vst [vmem:[#allocation8_spill] sm:$0xff] %v5872_v60  ;;  %v2320_v47 = vsel %vm2290_vm13, %v5596_v1, 0.0  ;;  %v2421_v7 = vsel %vm2290_vm13, %v2375_v39, 0.0  ;;  %v3233_v63 = vsel %vm2290_vm13, %v5829_v28, 0.0 }
 0x314   : > { %v3228_v40 = vadd.f32 %v3227_v25, %v3226_v31  ;;  %v3231_v25 = vsel %vm2290_vm13, %v5806_v36, 0.0  ;;  %7606 = vst [vmem:[#allocation10_spill] sm:$0xff] %v5895_v21  ;;  %v2321_v1 = vadd.f32 %v2320_v47, %v5642_v30  ;;  %7607 = vst [vmem:[#allocation11_spill] sm:$0xff] %v5903_v41  ;;  %v2422_v39 = vadd.f32 %v2421_v7, %v5658_v0 }
 0x315   : > { %v5867_v51 = vpop.f32.mrf.mxu1  ;;  %v3329_v55 = vadd.f32 %v3328_v23, %v3327_v15  ;;  %v5900_v15 = vpop.f32.mrf.mxu0  ;;  %v5914_v30 = vrot.slane %v5660_v43, 5  ;;  %v5917_v38 = vrot.slane %v5716_v24, 5  ;;  %v5931_v43 = vsel %vm2290_vm13, %v4079_v62, 0.0 }
 0x316   : > { %7603 = vst [vmem:[#allocation7_spill] sm:$0xff] %v5867_v51  ;;  %v3230_v35 = vadd.f32 %v3229_v17, %v3228_v40  ;;  %v3383_v17 = vsel %vm2482_vm2, %v5872_v60, %v5598_v8  ;;  %v3283_v40 = vmul.f32 %v5829_v28, %v5829_v28  ;;  %v3284_v60 = vmul.f32 %v5848_v33, %v5848_v33 }
 0x317   : > { %v5888_v31 = vpop.f32.mrf.mxu1  ;;  %v3331_v11 = vadd.f32 %v3330_v34, %v3329_v55  ;;  %v2378_v8 = vmul.f32 %v4079_v62, %v4079_v62  ;;  %7608 = vst [vmem:[#allocation12_spill] sm:$0xff] %v5914_v30  ;;  %7609 = vst [vmem:[#allocation13_spill] sm:$0xff] %v5917_v38  ;;  %v5923_v0 = vsel %vm2485_vm3, %v5895_v21, %v3383_v17  ;;  %v5933_v2 = vpop.f32.mrf.mxu0  ;;  %v2322_v24 = vsel %vm2290_vm13, %v5874_v22, 0.0 }
 0x318   : > { %v3232_v23 = vadd.f32 %v3231_v25, %v3230_v35  ;;  %7611 = vst [vmem:[#allocation15_spill] sm:$0xff] %v5923_v0  ;;  %v3285_v55 = vmul.f32 %v5824_v19, %v5824_v19  ;;  %v3334_v34 = vsel %vm2290_vm13, %v3283_v40, 0.0  ;;  %v3235_v25 = vsel %vm2290_vm13, %v5848_v33, 0.0 }
 0x319   : > { %v5919_v35 = vpop.f32.mrf.mxu1  ;;  %v3333_v7 = vadd.f32 %v3332_v56, %v3331_v11  ;;  %v2376_v17 = vmul.f32 %v5874_v22, %v5874_v22  ;;  %v3237_v21 = vsel %vm2290_vm13, %v5824_v19, 0.0  ;;  %v3286_v40 = vmul.f32 %v5838_v57, %v5838_v57 }
 0x31a   : > { %7610 = vst [vmem:[#allocation14_spill] sm:$0xff] %v5919_v35  ;;  %v3234_v47 = vadd.f32 %v3233_v63, %v3232_v23  ;;  %v3336_v0 = vsel %vm2290_vm13, %v3284_v60, 0.0  ;;  %v2427_v62 = vsel %vm2290_vm13, %v2378_v8, 0.0  ;;  %v5948_v38 = vsel %vm2482_vm2, %v5911_v52, %v5874_v22 }
 0x31b   : > { %7612 = vst [vmem:[#allocation16_spill] sm:$0xff] %v5948_v38  ;;  %v3335_v23 = vadd.f32 %v3334_v34, %v3333_v7  ;;  %v5950_v56 = vpop.f32.mrf.mxu1  ;;  %v2323_v63 = vadd.f32 %v2322_v24, %v2321_v1  ;;  %v2377_v41 = vmul.f32 %v5933_v2, %v5933_v2  ;;  %v3338_v12 = vsel %vm2290_vm13, %v3285_v55, 0.0 }
 0x31c   : > { %v3236_v11 = vadd.f32 %v3235_v25, %v3234_v47  ;;  %v3239_v60 = vsel %vm2290_vm13, %v5838_v57, 0.0  ;;  %v2526_v8 = vsel %vm2482_vm2, %v5874_v22, %v5614_v10  ;;  %v3287_v34 = vmul.f32 %v5867_v51, %v5867_v51 }
 0x31d   : > { %v3337_v9 = vadd.f32 %v3336_v0, %v3335_v23  ;;  %v2423_v25 = vsel %vm2290_vm13, %v2376_v17, 0.0  ;;  %v2554_v1 = vsel %vm2485_vm3, %v5874_v22, %v5633_v46  ;;  %v3340_v55 = vsel %vm2290_vm13, %v3286_v40, 0.0  ;;  %v5973_v7 = vpop.f32.mrf.mxu1 }
 0x31e   : > { %v3238_v49 = vadd.f32 %v3237_v21, %v3236_v11  ;;  %v3241_v24 = vsel %vm2290_vm13, %v5867_v51, 0.0  ;;  %v2324_v47 = vsel %vm2290_vm13, %v5933_v2, 0.0  ;;  %v3289_v21 = vmul.f32 %v5859_v44, %v5859_v44 }
 0x31f   : > { %v3339_v10 = vadd.f32 %v3338_v12, %v3337_v9  ;;  %v2425_v17 = vsel %vm2290_vm13, %v2377_v41, 0.0  ;;  %v3342_v23 = vsel %vm2290_vm13, %v3287_v34, 0.0  ;;  %v3243_v46 = vsel %vm2290_vm13, %v5919_v35, 0.0  ;;  %v5991_v33 = vpop.f32.mrf.mxu1 }
 0x320   : > { %v3240_v0 = vadd.f32 %v3239_v60, %v3238_v49  ;;  %v3288_v40 = vmul.f32 %v5919_v35, %v5919_v35  ;;  %v2379_v11 = vmul.f32 %v5900_v15, %v5900_v15  ;;  %v2424_v12 = vadd.f32 %v2423_v25, %v2422_v39 }
 0x321   : > { %v3341_v38 = vadd.f32 %v3340_v55, %v3339_v10  ;;  %v2325_v30 = vadd.f32 %v2324_v47, %v2323_v63  ;;  %v3245_v49 = vsel %vm2290_vm13, %v5859_v44, 0.0  ;;  %v3290_v41 = vmul.f32 %v5888_v31, %v5888_v31 }
 0x322   : > { %v3242_v9 = vadd.f32 %v3241_v24, %v3240_v0  ;;  %v3344_v60 = vsel %vm2290_vm13, %v3288_v40, 0.0  ;;  %v2426_v51 = vadd.f32 %v2425_v17, %v2424_v12  ;;  %v3346_v35 = vsel %vm2290_vm13, %v3289_v21, 0.0 }
 0x323   : > { %v5988_v34 = vpop.f32.mrf.mxu0  ;;  %v3343_v27 = vadd.f32 %v3342_v23, %v3341_v38  ;;  %v3247_v39 = vsel %vm2290_vm13, %v5888_v31, 0.0  ;;  %v3291_v63 = vmul.f32 %v5973_v7, %v5973_v7  ;;  %v6000_v25 = vsel %vm2485_vm3, %v5933_v2, %v5683_v54 }
 0x324   : > { %v3244_v3 = vadd.f32 %v3243_v46, %v3242_v9  ;;  %v6005_v55 = vsel %vm2488_vm14, %v5933_v2, %v5699_v20  ;;  %v2328_v38 = vsel %vm2290_vm13, %v5900_v15, 0.0  ;;  %v6010_v24 = vrot.slane %v5900_v15, 7  ;;  %v6025_v46 = vpop.f32.mrf.mxu1 }
 0x325   : > { %v3345_v10 = vadd.f32 %v3344_v60, %v3343_v27  ;;  %v6014_v21 = vsel %vm2485_vm3, %v5911_v52, %v2526_v8  ;;  %v6018_v54 = vsel %vm2488_vm14, %v5911_v52, %v2554_v1  ;;  %v3348_v0 = vsel %vm2290_vm13, %v3290_v41, 0.0  ;;  %v2243_v23 = vpop.f32.mrf.mxu0 }
 0x326   : > { %v3246_v47 = vadd.f32 %v3245_v49, %v3244_v3  ;;  %v3249_v20 = vsel %vm2290_vm13, %v5973_v7, 0.0  ;;  %v2429_v17 = vsel %vm2290_vm13, %v2379_v11, 0.0  ;;  %v2327_v15 = vadd.f32 %v5931_v43, %v2325_v30 }
 0x327   : > { %v3347_v3 = vadd.f32 %v3346_v35, %v3345_v10  ;;  %v2428_v8 = vadd.f32 %v2427_v62, %v2426_v51  ;;  %v3350_v40 = vsel %vm2290_vm13, %v3291_v63, 0.0  ;;  %v3251_v1 = vsel %vm2290_vm13, %v6025_v46, 0.0  ;;  %v6054_v62 = vpop.f32.mrf.mxu0 }
 0x328   : > { %v3248_v27 = vadd.f32 %v3247_v39, %v3246_v47  ;;  %v3292_v12 = vmul.f32 %v6025_v46, %v6025_v46  ;;  %v6035_v11 = vsel %vm2491_vm15, %v5933_v2, %v5703_v48  ;;  %v6040_v30 = vsel %vm2494_vm0, %v5933_v2, %v5720_v26 }
 0x329   : > { %v3349_v49 = vadd.f32 %v3348_v0, %v3347_v3  ;;  %7613 = vst [vmem:[#allocation17_spill] sm:$0xff] %v6035_v11  ;;  %7614 = vst [vmem:[#allocation18_spill] sm:$0xff] %v6040_v30  ;;  %v6043_v51 = vrot.slane %v5735_v37, 6  ;;  %v6046_v35 = vrot.slane %v5739_v59, 3  ;;  %v2582_v43 = vsel %vm2488_vm14, %v5874_v22, %v5646_v42 }
 0x32a   : > { %v3250_v9 = vadd.f32 %v3249_v20, %v3248_v27  ;;  %v2610_v48 = vsel %vm2491_vm15, %v5874_v22, %v5650_v6  ;;  %v6057_v41 = vrot.slane %v5749_v58, 4  ;;  %v3253_v26 = vsel %vm2290_vm13, %v5950_v56, 0.0 }
 0x32b   : > { %7615 = vst [vmem:[#allocation19_spill] sm:$0xff] %v6046_v35  ;;  %v3351_v37 = vadd.f32 %v3350_v40, %v3349_v49  ;;  %v3293_v59 = vmul.f32 %v5950_v56, %v5950_v56  ;;  %v3352_v39 = vsel %vm2290_vm13, %v3292_v12, 0.0  ;;  %v6067_v42 = vsel %vm2497_vm1, %v5933_v2, %v5724_v45 }
 0x32c   : > { %v3252_v60 = vadd.f32 %v3251_v1, %v3250_v9  ;;  %7616 = vst [vmem:[#allocation20_spill] sm:$0xff] %v6067_v42  ;;  %v6072_v6 = vsel %vm2500_vm4, %v5933_v2, %v5731_v5  ;;  %v2329_v58 = vadd.f32 %v2328_v38, %v2327_v15  ;;  %v2430_v63 = vadd.f32 %v2429_v17, %v2428_v8  ;;  %v2246_v38 = vpop.f32.mrf.mxu0 }
 0x32d   : > { %7617 = vst [vmem:[#allocation21_spill] sm:$0xff] %v6072_v6  ;;  %v2583_v47 = vsel %vm2491_vm15, %v5911_v52, %v2582_v43  ;;  %v6078_v10 = vsel %vm2494_vm0, %v5911_v52, %v2610_v48  ;;  %v6081_v0 = vrot.slane %v5763_v18, 3  ;;  %v6084_v45 = vrot.slane %v5769_v16, 4  ;;  %v7622_v6 = vld [vmem:[#allocation7_spill] sm:$0xff] }
 0x32e   : > { %v6087_v20 = vrot.slane %v5772_v29, 1  ;;  %v2638_v5 = vsel %vm2494_vm0, %v5874_v22, %v5664_v50  ;;  %v6093_v17 = vrot.slane %v5782_v14, 2  ;;  %v2666_v15 = vsel %vm2497_vm1, %v5874_v22, %v5668_v53 }
 0x32f   : > { %v3254_v18 = vadd.f32 %v3253_v26, %v3252_v60  ;;  %v3353_v3 = vadd.f32 %v3352_v39, %v3351_v37  ;;  %v2380_v27 = vmul.f32 %v2243_v23, %v2243_v23  ;;  %v3354_v16 = vsel %vm2290_vm13, %v3293_v59, 0.0 }
 0x330   : > { %7618 = vst [vmem:[#allocation22_spill] sm:$0xff] %v6093_v17  ;;  %v3255_v29 = vsel %vm2290_vm13, %v5991_v33, 0.0  ;;  %v3294_v8 = vmul.f32 %v5991_v33, %v5991_v33  ;;  %v2330_v50 = vsel %vm2290_vm13, %v2243_v23, 0.0  ;;  %v6105_v14 = vrot.slane %v5786_v32, 1 }
 0x331   : > { %v6108_v40 = vrot.slane %v5792_v13, 2  ;;  %v6112_v53 = vsel %vm2497_vm1, %v5911_v52, %v2638_v5  ;;  %v2381_v1 = vmul.f32 %v2246_v38, %v2246_v38  ;;  %v6116_v12 = vsel %vm2500_vm4, %v5911_v52, %v2666_v15 }
 0x332   : > { %v6119_v9 = vrot.slane %v5795_v61, 7  ;;  %v6122_v49 = vrot.slane %v5806_v36, 7  ;;  %v2332_v32 = vsel %vm2290_vm13, %v2246_v38, 0.0  ;;  %v6128_v13 = vrot.slane %v5824_v19, 5 }
 0x333   : > { %v3256_v48 = vadd.f32 %v3255_v29, %v3254_v18  ;;  %v3355_v26 = vadd.f32 %v3354_v16, %v3353_v3  ;;  %v2382_v37 = vmul.f32 %v5988_v34, %v5988_v34  ;;  %v2331_v60 = vadd.f32 %v2330_v50, %v2329_v58 }
 0x334   : > { %v2431_v59 = vsel %vm2290_vm13, %v2380_v27, 0.0  ;;  %v3356_v61 = vsel %vm2290_vm13, %v3294_v8, 0.0  ;;  %v6134_v39 = vrot.slane %v2243_v23, 6  ;;  %v6137_v36 = vrot.slane %v5829_v28, 6  ;;  %v7619_v8 = vld [vmem:[#allocation6_spill] sm:$0xff] }
 0x335   : > { %v6142_v19 = vsel %vm2500_vm4, %v5874_v22, %v5673_v4  ;;  %v6147_v5 = vsel %vm2482_vm2, %v6010_v24, %v5933_v2  ;;  %v2334_v58 = vsel %vm2290_vm13, %v5988_v34, 0.0  ;;  %v2333_v15 = vadd.f32 %v2332_v32, %v2331_v60 }
 0x336   : > { %v2433_v23 = vsel %vm2290_vm13, %v2381_v1, 0.0  ;;  %v6153_v18 = vrot.slane %v5838_v57, 5  ;;  %v6156_v28 = vrot.slane %v5988_v34, 5  ;;  %v2432_v3 = vadd.f32 %v2431_v59, %v2430_v63  ;;  %v7620_v1 = vld [vmem:[#allocation4_spill] sm:$0xff] }
 0x337   : > { %v3257_v22 = vrot.slane %v3256_v48, 4  ;;  %v3357_v27 = vadd.f32 %v3356_v61, %v3355_v26  ;;  %v2435_v16 = vsel %vm2290_vm13, %v2382_v37, 0.0  ;;  %v2383_v29 = vmul.f32 %v6054_v62, %v6054_v62  ;;  %v7621_v26 = vld [vmem:[#allocation49_spill] sm:$0xff] }
 0x338   : > { %v6164_v50 = vrot.slane %v7619_v8, 6  ;;  %v3420_v57 = vsel %vm2482_vm2, %v7620_v1, %v6087_v20  ;;  %v2336_v34 = vsel %vm2290_vm13, %v6054_v62, 0.0  ;;  %v2434_v63 = vadd.f32 %v2433_v23, %v2432_v3 }
 0x339   : > { %v2528_v32 = vsel %vm2488_vm14, %v6134_v39, %v6014_v21  ;;  %v6177_v37 = vsel %vm2482_vm2, %v5933_v2, %v7621_v26  ;;  %v6180_v60 = vrot.slane %v6054_v62, 5  ;;  %v2335_v59 = vadd.f32 %v2334_v58, %v2333_v15 }
 0x33a   : > { %v6185_v61 = vsel %vm2491_vm15, %v6134_v39, %v6018_v54  ;;  %v6189_v23 = vsel %vm2494_vm0, %v6134_v39, %v2583_v47  ;;  %v3258_v21 = vadd.f32 %v3257_v22, %v3256_v48  ;;  %v3358_v8 = vrot.slane %v3357_v27, 4 }
 0x33b   : > { %v3421_v2 = vsel %vm2485_vm3, %v6119_v9, %v3420_v57  ;;  %v3444_v62 = vsel %vm2482_vm2, %v6087_v20, %v6093_v17  ;;  %v2437_v58 = vsel %vm2290_vm13, %v2383_v29, 0.0  ;;  %v6199_v15 = vrot.slane %v2246_v38, 6 }
 0x33c   : > { %v6203_v54 = vsel %vm2491_vm15, %v6156_v28, %v2528_v32  ;;  %v6208_v47 = vsel %vm2497_vm1, %v6134_v39, %v6078_v10  ;;  %v2436_v48 = vadd.f32 %v2435_v16, %v2434_v63  ;;  %v6211_v22 = vrot.slane %v5859_v44, 3 }
 0x33d   : > { %v3259_v57 = vrot.slane %v3258_v21, 2  ;;  %v3359_v26 = vadd.f32 %v3358_v8, %v3357_v27  ;;  %v6214_v29 = vrot.slane %v7622_v6, 4  ;;  %v6217_v38 = vrot.slane %v5973_v7, 2 }
 0x33e   : > { %v3422_v32 = vsel %vm2488_vm14, %v6137_v36, %v3421_v2  ;;  %v3445_v10 = vsel %vm2485_vm3, %v7620_v1, %v3444_v62  ;;  %v2337_v42 = vadd.f32 %v2336_v34, %v2335_v59  ;;  %v6230_v7 = vrot.slane %v5950_v56, 1 }
 0x33f   : > { %v3260_v44 = vadd.f32 %v3259_v57, %v3258_v21  ;;  %v3360_v63 = vrot.slane %v3359_v26, 2  ;;  %v3423_v27 = vsel %vm2491_vm15, %v6128_v13, %v3422_v32  ;;  %v3446_v34 = vsel %vm2488_vm14, %v6119_v9, %v3445_v10 }
 0x340   : > { %v3424_v8 = vsel %vm2494_vm0, %v6214_v29, %v3423_v27  ;;  %v3447_v62 = vsel %vm2491_vm15, %v6137_v36, %v3446_v34  ;;  %v2438_v10 = vadd.f32 %v2437_v58, %v2436_v48 }
 0x341   : > { %v3261_v59 = vrot.slane %v3260_v44, 1  ;;  %v3361_v2 = vadd.f32 %v3360_v63, %v3359_v26  ;;  %v3425_v21 = vsel %vm2497_vm1, %v6211_v22, %v3424_v8  ;;  %v3448_v26 = vsel %vm2494_vm0, %v6128_v13, %v3447_v62 }
 0x342   : > { %v6246_v32 = vsel %vm2500_vm4, %v6217_v38, %v3425_v21  ;;  %v3449_v8 = vsel %vm2497_vm1, %v6214_v29, %v3448_v26  ;;  %v6263_v21 = vsel %vm2482_vm2, %v6230_v7, %v6217_v38 }
 0x343   : > { %v6125_v43 = vpop.f32.mrf.mxu0  ;;  %7623 = vst [vmem:[#allocation23_spill] sm:$0xff] %v6246_v32  ;;  %v3262_v63 = vadd.f32 %v3261_v59, %v3260_v44  ;;  %v3362_v27 = vrot.slane %v3361_v2, 1  ;;  %v6258_v11 = vsel %vm2500_vm4, %v6211_v22, %v3449_v8  ;;  %7625 = vst [vmem:[#allocation25_spill] sm:$0xff] %v6263_v21 }
 0x344   : > { %v2386_v34 = vmul.f32 %v6125_v43, %v6125_v43  ;;  %7624 = vst [vmem:[#allocation24_spill] sm:$0xff] %v6258_v11 }
 0x345   : > { %v6158_v4 = vpop.f32.mrf.mxu0  ;;  %v3363_v44 = vadd.f32 %v3362_v27, %v3361_v2 }
 0x346   : > { %v2384_v6 = vmul.f32 %v6158_v4, %v6158_v4  ;;  %v2338_v56 = vsel %vm2290_vm13, %v6158_v4, 0.0  ;;  %v6292_v8 = vrot.slane %v6158_v4, 4  ;;  %v3499_v4 = vsel %vm2482_vm2, %v6211_v22, %v6214_v29 }
 0x347   : > { %v6191_v3 = vpop.f32.mrf.mxu0  ;;  %v2339_v58 = vadd.f32 %v2338_v56, %v2337_v42  ;;  %v3468_v42 = vsel %vm2482_vm2, %v6093_v17, %v6046_v35  ;;  %v3492_v56 = vsel %vm2482_vm2, %v6046_v35, %v6057_v41  ;;  %v3364_v2 = vsel %vm2461_vm5, %v3262_v63, %v3363_v44 }
 0x348   : > { %v2439_v30 = vsel %vm2290_vm13, %v2384_v6, 0.0  ;;  %v3475_v6 = vsel %vm2482_vm2, %v6217_v38, %v6211_v22  ;;  %v3469_v27 = vsel %vm2485_vm3, %v6087_v20, %v3468_v42  ;;  %3365 = vst.msk [vmem:[%s286_s10] sm:$0x3] %vm2463_vm6, %v3364_v2  ;;  %v3500_v42 = vsel %vm2485_vm3, %v6217_v38, %v3499_v4 }
 0x349   : > { %v6223_v16 = vpop.f32.mrf.mxu0  ;;  %v6278_v62 = vsel %vm2485_vm3, %v6230_v7, %v3475_v6  ;;  %v2440_v26 = vadd.f32 %v2439_v30, %v2438_v10  ;;  %v2342_v4 = vsel %vm2290_vm13, %v6125_v43, 0.0 }
 0x34a   : > { %v2385_v57 = vmul.f32 %v6223_v16, %v6223_v16  ;;  %v2340_v48 = vsel %vm2290_vm13, %v6223_v16, 0.0  ;;  %7626 = vst [vmem:[#allocation26_spill] sm:$0xff] %v6278_v62  ;;  %v3470_v62 = vsel %vm2488_vm14, %v7620_v1, %v3469_v27 }
 0x34b   : > { %v2341_v6 = vadd.f32 %v2340_v48, %v2339_v58  ;;  %v3471_v63 = vsel %vm2491_vm15, %v6119_v9, %v3470_v62 }
 0x34c   : > { %v2441_v59 = vsel %vm2290_vm13, %v2385_v57, 0.0  ;;  %v3493_v57 = vsel %vm2485_vm3, %v6093_v17, %v3492_v56  ;;  %v3472_v58 = vsel %vm2494_vm0, %v6137_v36, %v3471_v63  ;;  %v7630_v63 = vld [vmem:[#allocation12_spill] sm:$0xff] }
 0x34d   : > { %v3494_v30 = vsel %vm2488_vm14, %v6087_v20, %v3493_v57  ;;  %v2442_v10 = vadd.f32 %v2441_v59, %v2440_v26  ;;  %v3523_v59 = vsel %vm2482_vm2, %v6214_v29, %v6128_v13  ;;  %v3473_v62 = vsel %vm2497_vm1, %v6128_v13, %v3472_v58 }
 0x34e   : > { %v3495_v44 = vsel %vm2491_vm15, %v7620_v1, %v3494_v30  ;;  %v6321_v26 = vsel %vm2488_vm14, %v6230_v7, %v3500_v42  ;;  %v3524_v2 = vsel %vm2485_vm3, %v6211_v22, %v3523_v59  ;;  %v6327_v27 = vsel %vm2500_vm4, %v6214_v29, %v3473_v62 }
 0x34f   : > { %v3496_v48 = vsel %vm2494_vm0, %v6119_v9, %v3495_v44  ;;  %7627 = vst [vmem:[#allocation27_spill] sm:$0xff] %v6321_v26  ;;  %7628 = vst [vmem:[#allocation28_spill] sm:$0xff] %v6327_v27  ;;  %v3525_v30 = vsel %vm2488_vm14, %v6217_v38, %v3524_v2  ;;  %v3516_v44 = vsel %vm2482_vm2, %v6057_v41, %v7630_v63  ;;  %v2443_v2 = vsel %vm2290_vm13, %v2386_v34, 0.0 }
 0x350   : > { %v3497_v56 = vsel %vm2497_vm1, %v6137_v36, %v3496_v48  ;;  %v2557_v58 = vsel %vm2494_vm0, %v6156_v28, %v6185_v61  ;;  %v6346_v48 = vsel %vm2497_vm1, %v6156_v28, %v6189_v23  ;;  %v6350_v42 = vsel %vm2491_vm15, %v6230_v7, %v3525_v30 }
 0x351   : > { %v6331_v57 = vsel %vm2500_vm4, %v6128_v13, %v3497_v56  ;;  %7631 = vst [vmem:[#allocation30_spill] sm:$0xff] %v6350_v42  ;;  %v2343_v59 = vadd.f32 %v2342_v4, %v2341_v6  ;;  %v6355_v56 = vsel %vm2500_vm4, %v6156_v28, %v6208_v47  ;;  %v6360_v61 = vsel %vm2500_vm4, %v6134_v39, %v6112_v53 }
 0x352   : > { %7629 = vst [vmem:[#allocation29_spill] sm:$0xff] %v6331_v57  ;;  %v6365_v23 = vsel %vm2482_vm2, %v6156_v28, %v6134_v39  ;;  %v2387_v6 = vmul.f32 %v6191_v3, %v6191_v3  ;;  %v3517_v47 = vsel %vm2485_vm3, %v6046_v35, %v3516_v44  ;;  %v6375_v4 = vrot.slane %v6125_v43, 3 }
 0x353   : > { %v2344_v53 = vsel %vm2290_vm13, %v6191_v3, 0.0  ;;  %v2444_v42 = vadd.f32 %v2443_v2, %v2442_v10  ;;  %v2530_v34 = vsel %vm2494_vm0, %v6292_v8, %v6203_v54  ;;  %v2558_v43 = vsel %vm2497_vm1, %v6292_v8, %v2557_v58 }
 0x354   : > { %v2345_v44 = vadd.f32 %v2344_v53, %v2343_v59  ;;  %v2695_v10 = vsel %vm2482_vm2, %v6134_v39, %v5911_v52  ;;  %v2749_v54 = vsel %vm2485_vm3, %v6199_v15, %v6147_v5  ;;  %v2445_v2 = vsel %vm2290_vm13, %v2387_v6, 0.0 }
 0x355   : > { %v2531_v58 = vsel %vm2497_vm1, %v6375_v4, %v2530_v34  ;;  %v2776_v59 = vsel %vm2485_vm3, %v6010_v24, %v6177_v37  ;;  %v2446_v52 = vadd.f32 %v2445_v2, %v2444_v42 }
 0x363   : > { %v4091_v62 = vpop.f32.mrf.mxu0 }
 0x364   : > { %v6370_v30 = vrot.slane %v4091_v62, 1  ;;  %v2390_v6 = vmul.f32 %v4091_v62, %v4091_v62 }
 0x365   : > { %v2275_v26 = vpop.f32.mrf.mxu0 }
 0x366   : > { %v2346_v57 = vsel %vm2290_vm13, %v2275_v26, 0.0  ;;  %v2388_v27 = vmul.f32 %v2275_v26, %v2275_v26  ;;  %v6383_v21 = vrot.slane %v2275_v26, 2  ;;  %2537 = vrot.lane.b32.xlu0 %v6370_v30, %s4170_s29  ;;  %v3518_v26 = vsel %vm2488_vm14, %v6093_v17, %v3517_v47  ;;  %v7632_v17 = vld [vmem:[#allocation16_spill] sm:$0xff] }
 0x367   : > { %v6389_v11 = vpop.f32.mrf.mxu0  ;;  %v2347_v53 = vadd.f32 %v2346_v57, %v2345_v44  ;;  %v2559_v47 = vsel %vm2500_vm4, %v6375_v4, %v2558_v43  ;;  %v3519_v37 = vsel %vm2491_vm15, %v6087_v20, %v3518_v26  ;;  %v2696_v44 = vsel %vm2485_vm3, %v6156_v28, %v2695_v10 }
 0x368   : > { %v2447_v32 = vsel %vm2290_vm13, %v2388_v27, 0.0  ;;  %v2532_v35 = vsel %vm2500_vm4, %v6383_v21, %v2531_v58  ;;  %v2777_v43 = vsel %vm2488_vm14, %v6199_v15, %v2776_v59  ;;  %v2391_v2 = vmul.f32 %v6389_v11, %v6389_v11 }
 0x369   : > { %v6408_v5 = vpop.f32.mrf.mxu0  ;;  %2535 = vrot.lane.b32.xlu1 %v2532_v35, %s4170_s29  ;;  %v2448_v57 = vadd.f32 %v2447_v32, %v2446_v52  ;;  %v2350_v35 = vsel %vm2290_vm13, %v4091_v62, 0.0  ;;  %v3520_v10 = vsel %vm2494_vm0, %v7620_v1, %v3519_v37  ;;  %v2451_v62 = vsel %vm2290_vm13, %v2390_v6, 0.0  ;;  %v7633_v52 = vld [vmem:[#allocation44_spill] sm:$0xff] }
 0x36a   : > { %v2348_v27 = vsel %vm2290_vm13, %v6408_v5, 0.0  ;;  %v2389_v34 = vmul.f32 %v6408_v5, %v6408_v5  ;;  %2563 = vrot.lane.b32.xlu0 %v2559_v47, %s4172_s7  ;;  %v2505_v47 = vsel %vm2485_vm3, %v6134_v39, %v7632_v17  ;;  %v2352_v59 = vsel %vm2290_vm13, %v6389_v11, 0.0 }
 0x36b   : > { %v2349_v42 = vadd.f32 %v2348_v27, %v2347_v53  ;;  %v6433_v53 = vsel %vm2488_vm14, %v6180_v60, %v2749_v54  ;;  %v7634_v27 = vld [vmem:[#allocation43_spill] sm:$0xff]  ;;  %v2587_v17 = vsel %vm2482_vm2, %v6383_v21, %v6375_v4  ;;  %v6449_v39 = vsel %vm2491_vm15, %v6180_v60, %v2777_v43 }
 0x36c   : > { %v2449_v58 = vsel %vm2290_vm13, %v2389_v34, 0.0  ;;  %v6452_v6 = vrot.slane %v5888_v31, 3  ;;  %v2507_v37 = vsel %vm2488_vm14, %v6156_v28, %v2505_v47  ;;  %v2560_v31 = vsel %vm2482_vm2, %v6370_v30, %v6383_v21 }
 0x36d   : > { %v2351_v26 = vadd.f32 %v2350_v35, %v2349_v42  ;;  %v2450_v32 = vadd.f32 %v2449_v58, %v2448_v57  ;;  %2561 = vrot.lane.b32.xlu1 %v7633_v52, %s4172_s7  ;;  %v2453_v57 = vsel %vm2290_vm13, %v2391_v2, 0.0  ;;  %v7635_v42 = vld [vmem:[#allocation14_spill] sm:$0xff]  ;;  %v3521_v58 = vsel %vm2497_vm1, %v6119_v9, %v3520_v10 }
 0x36e   : > { %2589 = vrot.lane.b32.xlu0 %v7634_v27, %s4174_s9  ;;  %v6458_v35 = vrot.slane %v7635_v42, 4  ;;  %v2509_v43 = vsel %vm2491_vm15, %v6292_v8, %v2507_v37  ;;  %v2588_v47 = vsel %vm2485_vm3, %v6370_v30, %v2587_v17  ;;  %v2586_v2 = vsel %vm2500_vm4, %v6292_v8, %v6346_v48 }
 0x36f   : > { %v2353_v54 = vadd.f32 %v2352_v59, %v2351_v26  ;;  %v2452_v34 = vadd.f32 %v2451_v62, %v2450_v32  ;;  %v2641_v32 = vsel %vm2482_vm2, %v6292_v8, %v6156_v28  ;;  %v2669_v10 = vsel %vm2485_vm3, %v6292_v8, %v6365_v23 }
 0x370   : > { %v6481_v62 = vrot.slane %v5991_v33, 1  ;;  %v6485_v17 = vsel %vm2500_vm4, %v6137_v36, %v3521_v58  ;;  %v2511_v48 = vsel %vm2494_vm0, %v6375_v4, %v2509_v43  ;;  %v2614_v28 = vsel %vm2482_vm2, %v6375_v4, %v6292_v8  ;;  %v2534_v58 = vpop.permute.xlu0 %2533 }
 0x371   : > { %v2354_v52 = vrot.slane %v2353_v54, 4  ;;  %v2454_v26 = vadd.f32 %v2453_v57, %v2452_v34  ;;  %2565 = vrot.lane.b32.xlu1 %v2560_v31, %s4172_s7  ;;  %v2697_v23 = vsel %vm2488_vm14, %v6292_v8, %v2696_v44  ;;  %v2513_v33 = vsel %vm2497_vm1, %v6383_v21, %v2511_v48  ;;  %2543 = vst.msk [vmem:[%s5714_s27 - $0x1] sm:$0xfe] %vm2542_vm7, %v2534_v58 }
 0x372   : > { %2593 = vrot.lane.b32.xlu0 %v2588_v47, %s4174_s9  ;;  %v2642_v37 = vsel %vm2485_vm3, %v6375_v4, %v2641_v32  ;;  %v2515_v57 = vsel %vm2500_vm4, %v6370_v30, %v2513_v33  ;;  %v6501_v42 = vrot.slane %v6223_v16, 4  ;;  %v2670_v8 = vsel %vm2488_vm14, %v6375_v4, %v2669_v10  ;;  %v7636_v33 = vld [vmem:[#allocation40_spill] sm:$0xff] }
 0x373   : > { %v2355_v59 = vadd.f32 %v2354_v52, %v2353_v54  ;;  %v2455_v27 = vrot.slane %v2454_v26, 4  ;;  %2519 = vst.msk [vmem:[%s5714_s27 + $0x8] sm:$0xff] %vm2290_vm13, %v2515_v57  ;;  %v3547_v44 = vsel %vm2482_vm2, %v6128_v13, %v6137_v36  ;;  %v3571_v16 = vsel %vm2482_vm2, %v6137_v36, %v6119_v9 }
 0x374   : > { %v2615_v31 = vsel %vm2485_vm3, %v6383_v21, %v2614_v28  ;;  %v2643_v47 = vsel %vm2488_vm14, %v6383_v21, %v2642_v37  ;;  %v6535_v28 = vrot.slane %v6191_v3, 3 }
 0x375   : > { %v2356_v54 = vrot.slane %v2355_v59, 2  ;;  %v2456_v34 = vadd.f32 %v2455_v27, %v2454_v26  ;;  %2591 = vrot.lane.b32.xlu1 %v2586_v2, %s4174_s9  ;;  %v3572_v26 = vsel %vm2485_vm3, %v6128_v13, %v3571_v16  ;;  %v2616_v3 = vsel %vm2488_vm14, %v6370_v30, %v2615_v31 }
 0x376   : > { %2619 = vrot.lane.b32.xlu0 %v6355_v56, %s4176_s15  ;;  %v3548_v56 = vsel %vm2485_vm3, %v6214_v29, %v3547_v44  ;;  %v3573_v32 = vsel %vm2488_vm14, %v6214_v29, %v3572_v26  ;;  %v2753_v44 = vsel %vm2491_vm15, %v6501_v42, %v6433_v53  ;;  %v7639_v26 = vld [vmem:[#allocation48_spill] sm:$0xff] }
 0x377   : > { %v2357_v43 = vadd.f32 %v2356_v54, %v2355_v59  ;;  %v2457_v52 = vrot.slane %v2456_v34, 2  ;;  %v3549_v2 = vsel %vm2488_vm14, %v6211_v22, %v3548_v56  ;;  %v3574_v48 = vsel %vm2491_vm15, %v6211_v22, %v3573_v32  ;;  %v7637_v54 = vld [vmem:[#allocation37_spill] sm:$0xff] }
 0x378   : > { %v3550_v27 = vsel %vm2491_vm15, %v6217_v38, %v3549_v2  ;;  %v3575_v57 = vsel %vm2494_vm0, %v6217_v38, %v3574_v48  ;;  %v7640_v2 = vld [vmem:[#allocation11_spill] sm:$0xff]  ;;  %v7641_v48 = vld [vmem:[#allocation13_spill] sm:$0xff] }
 0x379   : > { %v2358_v10 = vrot.slane %v2357_v43, 1  ;;  %v2458_v59 = vadd.f32 %v2457_v52, %v2456_v34  ;;  %2617 = vrot.lane.b32.xlu1 %v7636_v33, %s4176_s15  ;;  %v2698_v34 = vsel %vm2491_vm15, %v6375_v4, %v2697_v23  ;;  %v6545_v37 = vsel %vm2494_vm0, %v6230_v7, %v3550_v27  ;;  %v7638_v52 = vld [vmem:[#allocation5_spill] sm:$0xff] }
 0x37a   : > { %2645 = vrot.lane.b32.xlu0 %v7637_v54, %s4177_s11  ;;  %v6556_v16 = vsel %vm2497_vm1, %v6230_v7, %v3575_v57  ;;  %v2644_v23 = vsel %vm2491_vm15, %v6370_v30, %v2643_v47  ;;  %v3620_v56 = vsel %vm2482_vm2, %v6122_v49, %v7638_v52  ;;  %v3606_v31 = vsel %vm2482_vm2, %v7640_v2, %v7639_v26 }
 0x37b   : > { %v2459_v58 = vrot.slane %v2458_v59, 1  ;;  %v2359_v4 = vadd.f32 %v2358_v10, %v2357_v43  ;;  %v3622_v43 = vsel %vm2485_vm3, %v6164_v50, %v3620_v56  ;;  %v3608_v47 = vsel %vm2485_vm3, %v6043_v51, %v3606_v31 }
 0x37c   : > { %v3647_v32 = vsel %vm2482_vm2, %v7638_v52, %v6105_v14  ;;  %v6583_v10 = vsel %vm2494_vm0, %v6501_v42, %v6449_v39  ;;  %v3624_v27 = vsel %vm2488_vm14, %v6153_v18, %v3622_v43  ;;  %v3610_v33 = vsel %vm2488_vm14, %v7641_v48, %v3608_v47 }
 0x37d   : > { %v2460_v53 = vadd.f32 %v2459_v58, %v2458_v59  ;;  %2621 = vrot.lane.b32.xlu1 %v2616_v3, %s4176_s15  ;;  %v6586_v59 = vrot.slane %v6025_v46, 2  ;;  %v2755_v57 = vsel %vm2494_vm0, %v6535_v28, %v2753_v44  ;;  %v3626_v58 = vsel %vm2491_vm15, %v6458_v35, %v3624_v27 }
 0x37e   : > { %2649 = vrot.lane.b32.xlu0 %v2644_v23, %s4177_s11  ;;  %v3612_v39 = vsel %vm2491_vm15, %v6084_v45, %v3610_v33  ;;  %v6601_v46 = vrot.slane %v6408_v5, 2  ;;  %v3628_v3 = vsel %vm2494_vm0, %v6452_v6, %v3626_v58  ;;  %v3648_v44 = vsel %vm2485_vm3, %v6122_v49, %v3647_v32 }
 0x37f   : > { %v2462_v54 = vsel %vm2461_vm5, %v2359_v4, %v2460_v53  ;;  %v3614_v4 = vsel %vm2494_vm0, %v6081_v0, %v3612_v39  ;;  %v2671_v23 = vsel %vm2491_vm15, %v6383_v21, %v2670_v8  ;;  %v3630_v56 = vsel %vm2497_vm1, %v6586_v59, %v3628_v3 }
 0x380   : > { %2464 = vst.msk [vmem:[%s276_s14] sm:$0x3] %vm2463_vm6, %v2462_v54  ;;  %v3616_v31 = vsel %vm2497_vm1, %v6108_v40, %v3614_v4  ;;  %v3649_v5 = vsel %vm2488_vm14, %v6164_v50, %v3648_v44  ;;  %v6623_v53 = vsel %vm2500_vm4, %v6481_v62, %v3630_v56  ;;  %v2699_v47 = vsel %vm2494_vm0, %v6383_v21, %v2698_v34  ;;  %v7642_v44 = vld [vmem:[#allocation9_spill] sm:$0xff]  ;;  %v7643_v56 = vld [vmem:[#allocation34_spill] sm:$0xff] }
 0x381   : > { %2647 = vrot.lane.b32.xlu1 %v6360_v61, %s4177_s11  ;;  %v6627_v8 = vsel %vm2500_vm4, %v6105_v14, %v3616_v31  ;;  %v3650_v43 = vsel %vm2491_vm15, %v6153_v18, %v3649_v5  ;;  %v3666_v32 = vsel %vm2488_vm14, %v7640_v2, %v7639_v26  ;;  %v6650_v34 = vsel %vm2482_vm2, %v6481_v62, %v6586_v59 }
 0x382   : > { %2675 = vrot.lane.b32.xlu0 %v6116_v12, %s4178_s23  ;;  %v3651_v61 = vsel %vm2494_vm0, %v6458_v35, %v3650_v43  ;;  %v3641_v12 = vsel %vm2485_vm3, %v7640_v2, %v7639_v26  ;;  %v3667_v21 = vsel %vm2491_vm15, %v6043_v51, %v3666_v32  ;;  %v2757_v54 = vsel %vm2497_vm1, %v6601_v46, %v2755_v57 }
 0x383   : > { %v3652_v27 = vsel %vm2497_vm1, %v6452_v6, %v3651_v61  ;;  %v3642_v33 = vsel %vm2488_vm14, %v6043_v51, %v3641_v12  ;;  %v3668_v3 = vsel %vm2494_vm0, %v7641_v48, %v3667_v21  ;;  %v6663_v4 = vrot.slane %v6389_v11, 1 }
 0x384   : > { %v6656_v58 = vsel %vm2500_vm4, %v6586_v59, %v3652_v27  ;;  %v3643_v39 = vsel %vm2491_vm15, %v7641_v48, %v3642_v33  ;;  %v3669_v31 = vsel %vm2497_vm1, %v6084_v45, %v3668_v3  ;;  %v3671_v5 = vsel %vm2482_vm2, %v6105_v14, %v6108_v40 }
 0x385   : > { %2673 = vrot.lane.b32.xlu1 %v7642_v44, %s4178_s23  ;;  %v3644_v57 = vsel %vm2494_vm0, %v6084_v45, %v3643_v39  ;;  %v6680_v43 = vsel %vm2500_vm4, %v6081_v0, %v3669_v31  ;;  %v3672_v61 = vsel %vm2485_vm3, %v7638_v52, %v3671_v5  ;;  %v3695_v12 = vsel %vm2482_vm2, %v6108_v40, %v6081_v0 }
 0x386   : > { %2701 = vrot.lane.b32.xlu0 %v7643_v56, %s4179_s16  ;;  %v3645_v11 = vsel %vm2497_vm1, %v6081_v0, %v3644_v57  ;;  %v2672_v32 = vsel %vm2494_vm0, %v6370_v30, %v2671_v23  ;;  %v3673_v33 = vsel %vm2488_vm14, %v6122_v49, %v3672_v61  ;;  %v3696_v21 = vsel %vm2485_vm3, %v6105_v14, %v3695_v12 }
 0x387   : > { %v6691_v27 = vsel %vm2500_vm4, %v6108_v40, %v3645_v11  ;;  %v2700_v39 = vsel %vm2497_vm1, %v6370_v30, %v2699_v47  ;;  %v2759_v3 = vsel %vm2500_vm4, %v6663_v4, %v2757_v54  ;;  %v3674_v44 = vsel %vm2491_vm15, %v6164_v50, %v3673_v33 }
 0x388   : > { %v3697_v23 = vsel %vm2488_vm14, %v7638_v52, %v3696_v21  ;;  %v3675_v56 = vsel %vm2494_vm0, %v6153_v18, %v3674_v44  ;;  %v3691_v30 = vsel %vm2491_vm15, %v7640_v2, %v7639_v26  ;;  %v3716_v5 = vsel %vm2494_vm0, %v7640_v2, %v7639_v26 }
 0x389   : > { %2677 = vrot.lane.b32.xlu1 %v2672_v32, %s4178_s23  ;;  %v3698_v57 = vsel %vm2491_vm15, %v6122_v49, %v3697_v23  ;;  %v3676_v47 = vsel %vm2497_vm1, %v6458_v35, %v3675_v56  ;;  %v3692_v31 = vsel %vm2494_vm0, %v6043_v51, %v3691_v30  ;;  %v3717_v32 = vsel %vm2497_vm1, %v6043_v51, %v3716_v5 }
 0x38a   : > { %2705 = vrot.lane.b32.xlu0 %v2700_v39, %s4179_s16  ;;  %v3699_v54 = vsel %vm2494_vm0, %v6164_v50, %v3698_v57  ;;  %v6725_v11 = vsel %vm2500_vm4, %v6452_v6, %v3676_v47  ;;  %v3693_v12 = vsel %vm2497_vm1, %v7641_v48, %v3692_v31  ;;  %v6743_v39 = vsel %vm2500_vm4, %v7641_v48, %v3717_v32 }
 0x38b   : > { %v3700_v61 = vsel %vm2497_vm1, %v6153_v18, %v3699_v54  ;;  %v6739_v21 = vsel %vm2500_vm4, %v6084_v45, %v3693_v12  ;;  %v3702_v44 = vsel %vm2482_vm2, %v6586_v59, %v6452_v6  ;;  %v3726_v56 = vsel %vm2482_vm2, %v6452_v6, %v6458_v35 }
 0x38c   : > { %v6735_v33 = vsel %vm2500_vm4, %v6458_v35, %v3700_v61  ;;  %v6753_v23 = vsel %vm2485_vm3, %v6481_v62, %v3702_v44  ;;  %v3719_v57 = vsel %vm2482_vm2, %v6081_v0, %v6084_v45  ;;  %v2804_v30 = vsel %vm2488_vm14, %v6010_v24, %v6000_v25  ;;  %v7644_v44 = vld [vmem:[#allocation51_spill] sm:$0xff] }
 0x38d   : > { %2703 = vrot.lane.b32.xlu1 %v6142_v19, %s4179_s16  ;;  %v3727_v19 = vsel %vm2485_vm3, %v6586_v59, %v3726_v56  ;;  %v3743_v47 = vsel %vm2482_vm2, %v6084_v45, %v7641_v48  ;;  %v2780_v54 = vsel %vm2497_vm1, %v6535_v28, %v6583_v10  ;;  %v3741_v10 = vsel %vm2497_vm1, %v7640_v2, %v7639_v26 }
 0x38e   : > { %2762 = vrot.lane.b32.xlu0 %v2759_v3, %s4180_s17  ;;  %v3720_v3 = vsel %vm2485_vm3, %v6108_v40, %v3719_v57  ;;  %v6776_v31 = vsel %vm2488_vm14, %v6481_v62, %v3727_v19  ;;  %v3744_v5 = vsel %vm2485_vm3, %v6081_v0, %v3743_v47  ;;  %v2781_v61 = vsel %vm2500_vm4, %v6601_v46, %v2780_v54 }
 0x38f   : > { %v3721_v25 = vsel %vm2488_vm14, %v6105_v14, %v3720_v3  ;;  %v3745_v32 = vsel %vm2488_vm14, %v6108_v40, %v3744_v5  ;;  %v6800_v19 = vsel %vm2500_vm4, %v6043_v51, %v3741_v10  ;;  %v2805_v3 = vsel %vm2491_vm15, %v6199_v15, %v2804_v30 }
 0x390   : > { %v3722_v12 = vsel %vm2491_vm15, %v7638_v52, %v3721_v25  ;;  %v3746_v57 = vsel %vm2491_vm15, %v6105_v14, %v3745_v32  ;;  %v2832_v47 = vsel %vm2491_vm15, %v6010_v24, %v6005_v55  ;;  %v3750_v30 = vsel %vm2482_vm2, %v6458_v35, %v6153_v18 }
 0x391   : > { %2760 = vrot.lane.b32.xlu1 %v7644_v44, %s4180_s17  ;;  %v3723_v56 = vsel %vm2494_vm0, %v6122_v49, %v3722_v12  ;;  %v3747_v25 = vsel %vm2494_vm0, %v7638_v52, %v3746_v57  ;;  %v3774_v55 = vsel %vm2482_vm2, %v6153_v18, %v6164_v50  ;;  %v2833_v12 = vsel %vm2494_vm0, %v6199_v15, %v2832_v47  ;;  %v7646_v57 = vld [vmem:[#allocation45_spill] sm:$0xff] }
 0x392   : > { %2784 = vrot.lane.b32.xlu0 %v2781_v61, %s4181_s18  ;;  %v3724_v54 = vsel %vm2497_vm1, %v6164_v50, %v3723_v56  ;;  %v3748_v61 = vsel %vm2497_vm1, %v6122_v49, %v3747_v25  ;;  %v3751_v10 = vsel %vm2485_vm3, %v6452_v6, %v3750_v30  ;;  %v3775_v44 = vsel %vm2485_vm3, %v6458_v35, %v3774_v55  ;;  %v7645_v56 = vld [vmem:[#allocation50_spill] sm:$0xff] }
 0x393   : > { %v6813_v5 = vsel %vm2500_vm4, %v6153_v18, %v3724_v54  ;;  %v6827_v32 = vsel %vm2500_vm4, %v6164_v50, %v3748_v61  ;;  %v3752_v47 = vsel %vm2488_vm14, %v6586_v59, %v3751_v10  ;;  %v3776_v54 = vsel %vm2488_vm14, %v6452_v6, %v3775_v44 }
 0x394   : > { %v3767_v25 = vsel %vm2482_vm2, %v7641_v48, %v6043_v51  ;;  %v6846_v61 = vsel %vm2491_vm15, %v6481_v62, %v3752_v47  ;;  %v3777_v30 = vsel %vm2491_vm15, %v6586_v59, %v3776_v54  ;;  %v3791_v10 = vsel %vm2482_vm2, %v6043_v51, %v7640_v2 }
 0x395   : > { %2782 = vrot.lane.b32.xlu1 %v7645_v56, %s4181_s18  ;;  %v3768_v55 = vsel %vm2485_vm3, %v6084_v45, %v3767_v25  ;;  %v2806_v44 = vsel %vm2494_vm0, %v6180_v60, %v2805_v3  ;;  %v6859_v56 = vsel %vm2494_vm0, %v6481_v62, %v3777_v30  ;;  %v3792_v47 = vsel %vm2485_vm3, %v7641_v48, %v3791_v10 }
 0x396   : > { %2810 = vrot.lane.b32.xlu0 %v7646_v57, %s4182_s19  ;;  %v3769_v57 = vsel %vm2488_vm14, %v6081_v0, %v3768_v55  ;;  %v2809_v54 = vsel %vm2482_vm2, %v6663_v4, %v6601_v46  ;;  %v2807_v51 = vsel %vm2497_vm1, %v6501_v42, %v2806_v44  ;;  %v3793_v25 = vsel %vm2488_vm14, %v6084_v45, %v3792_v47 }
 0x397   : > { %v3770_v3 = vsel %vm2491_vm15, %v6108_v40, %v3769_v57  ;;  %v3794_v30 = vsel %vm2491_vm15, %v6081_v0, %v3793_v25  ;;  %v3798_v55 = vsel %vm2482_vm2, %v6164_v50, %v6122_v49  ;;  %v2834_v57 = vsel %vm2497_vm1, %v6180_v60, %v2833_v12 }
 0x398   : > { %v3771_v48 = vsel %vm2494_vm0, %v6105_v14, %v3770_v3  ;;  %v3795_v45 = vsel %vm2494_vm0, %v6108_v40, %v3794_v30  ;;  %v3799_v44 = vsel %vm2485_vm3, %v6153_v18, %v3798_v55  ;;  %v2808_v40 = vsel %vm2500_vm4, %v6535_v28, %v2807_v51  ;;  %v7648_v3 = vld [vmem:[#allocation19_spill] sm:$0xff] }
 0x399   : > { %2786 = vrot.lane.b32.xlu1 %v6663_v4, %s4181_s18  ;;  %v3772_v10 = vsel %vm2497_vm1, %v7638_v52, %v3771_v48  ;;  %v6898_v50 = vsel %vm2497_vm1, %v6105_v14, %v3795_v45  ;;  %v3800_v47 = vsel %vm2488_vm14, %v6458_v35, %v3799_v44  ;;  %v2835_v18 = vsel %vm2500_vm4, %v6501_v42, %v2834_v57  ;;  %v7649_v48 = vld [vmem:[#allocation22_spill] sm:$0xff] }
 0x39a   : > { %2814 = vrot.lane.b32.xlu0 %v2809_v54, %s4182_s19  ;;  %v6894_v0 = vsel %vm2500_vm4, %v6122_v49, %v3772_v10  ;;  %v3801_v12 = vsel %vm2491_vm15, %v6452_v6, %v3800_v47  ;;  %v7647_v54 = vld [vmem:[#allocation15_spill] sm:$0xff]  ;;  %v3397_v51 = vsel %vm2482_vm2, %v6119_v9, %v7620_v1  ;;  %v2863_v10 = vsel %vm2482_vm2, %v6535_v28, %v6501_v42  ;;  %v7650_v57 = vld [vmem:[#allocation46_spill] sm:$0xff] }
 0x39b   : > { %v3387_v49 = vsel %vm2488_vm14, %v7630_v63, %v7647_v54  ;;  %v3802_v14 = vsel %vm2494_vm0, %v6586_v59, %v3801_v12  ;;  %v3399_v25 = vsel %vm2485_vm3, %v6137_v36, %v3397_v51  ;;  %v7651_v36 = vld [vmem:[#allocation41_spill] sm:$0xff]  ;;  %v2864_v47 = vsel %vm2485_vm3, %v6601_v46, %v2863_v10  ;;  %v7654_v10 = vld [vmem:[#allocation47_spill] sm:$0xff] }
 0x39c   : > { %v3389_v35 = vsel %vm2491_vm15, %v6057_v41, %v3387_v49  ;;  %v6922_v6 = vsel %vm2497_vm1, %v6481_v62, %v3802_v14  ;;  %v3401_v55 = vsel %vm2488_vm14, %v6128_v13, %v3399_v25  ;;  %v2836_v13 = vsel %vm2482_vm2, %v6601_v46, %v6535_v28  ;;  %v7652_v49 = vld [vmem:[#allocation17_spill] sm:$0xff] }
 0x39d   : > { %2812 = vrot.lane.b32.xlu1 %v2808_v40, %s4182_s19  ;;  %v3391_v59 = vsel %vm2494_vm0, %v7648_v3, %v3389_v35  ;;  %v3403_v44 = vsel %vm2491_vm15, %v6214_v29, %v3401_v55  ;;  %v2837_v12 = vsel %vm2485_vm3, %v6663_v4, %v2836_v13  ;;  %v2865_v54 = vsel %vm2488_vm14, %v6663_v4, %v2864_v47 }
 0x39e   : > { %2840 = vrot.lane.b32.xlu0 %v2835_v18, %s4183_s24  ;;  %v3393_v30 = vsel %vm2497_vm1, %v7649_v48, %v3391_v59  ;;  %v3405_v40 = vsel %vm2494_vm0, %v6211_v22, %v3403_v44  ;;  %v2860_v14 = vsel %vm2494_vm0, %v6010_v24, %v7652_v49  ;;  %v2917_v25 = vsel %vm2482_vm2, %v6180_v60, %v6199_v15 }
 0x39f   : > { %v3395_v45 = vsel %vm2500_vm4, %v6087_v20, %v3393_v30  ;;  %v3407_v29 = vsel %vm2497_vm1, %v6217_v38, %v3405_v40  ;;  %v2861_v22 = vsel %vm2497_vm1, %v6199_v15, %v2860_v14  ;;  %v7653_v38 = vld [vmem:[#allocation18_spill] sm:$0xff]  ;;  %v2890_v30 = vsel %vm2482_vm2, %v6501_v42, %v6180_v60 }
 0x3a0   : > { %3412 = vst.msk [vmem:[%s6929_s28] sm:$0xff] %vm2290_vm13, %v3395_v45  ;;  %v3409_v18 = vsel %vm2500_vm4, %v6230_v7, %v3407_v29  ;;  %v2888_v35 = vsel %vm2497_vm1, %v6010_v24, %v7653_v38  ;;  %v2862_v51 = vsel %vm2500_vm4, %v6180_v60, %v2861_v22  ;;  %v2918_v55 = vsel %vm2485_vm3, %v6501_v42, %v2917_v25  ;;  %v7655_v45 = vld [vmem:[#allocation8_spill] sm:$0xff]  ;;  %v7658_v29 = vld [vmem:[#allocation10_spill] sm:$0xff] }
 0x3a1   : > { %2838 = vrot.lane.b32.xlu1 %v7650_v57, %s4183_s24  ;;  %3413 = vst.msk [vmem:[%s6929_s28 + $0x8] sm:$0xff] %vm2290_vm13, %v3409_v18  ;;  %v2889_v59 = vsel %vm2500_vm4, %v6199_v15, %v2888_v35  ;;  %v3414_v44 = vsel %vm2485_vm3, %v7655_v45, %v7654_v10  ;;  %v7656_v57 = vld [vmem:[#allocation35_spill] sm:$0xff]  ;;  %v2891_v47 = vsel %vm2485_vm3, %v6535_v28, %v2890_v30  ;;  %vm2574_vm13 = vcmask 189568  }
 0x3a2   : > { %2866 = vrot.lane.b32.xlu0 %v7651_v36, %s4184_s20  ;;  %v7657_v36 = vld [vmem:[#allocation36_spill] sm:$0xff]  ;;  %v2919_v40 = vsel %vm2488_vm14, %v6535_v28, %v2918_v55  ;;  %v3415_v18 = vsel %vm2488_vm14, %v7658_v29, %v3414_v44  ;;  %v2944_v35 = vsel %vm2482_vm2, %v6199_v15, %v6010_v24  ;;  %v7661_v55 = vld [vmem:[#allocation21_spill] sm:$0xff]  ;;  %vm7463_vm5 = vcmask 392512  }
 0x3a3   : > { %v2909_v13 = vsel %vm2500_vm4, %v7657_v36, %v7656_v57  ;;  %v2920_v49 = vsel %vm2491_vm15, %v6601_v46, %v2919_v40  ;;  %v3416_v14 = vsel %vm2491_vm15, %v7630_v63, %v3415_v18  ;;  %v2945_v30 = vsel %vm2485_vm3, %v6180_v60, %v2944_v35  ;;  %v7662_v40 = vld [vmem:[#allocation23_spill] sm:$0xff]  ;;  %v7663_v18 = vld [vmem:[#allocation24_spill] sm:$0xff] }
 0x3a4   : > { %v2921_v38 = vsel %vm2494_vm0, %v6663_v4, %v2920_v49  ;;  %v2946_v15 = vsel %vm2488_vm14, %v6501_v42, %v2945_v30  ;;  %v3439_v60 = vsel %vm2488_vm14, %v7655_v45, %v7654_v10  ;;  %v3540_v49 = vsel %vm2482_vm2, %v7630_v63, %v7658_v29 }
 0x3a5   : > { %2842 = vrot.lane.b32.xlu1 %v2837_v12, %s4183_s24  ;;  %v7659_v12 = vld [vmem:[#allocation42_spill] sm:$0xff]  ;;  %v3440_v42 = vsel %vm2491_vm15, %v7658_v29, %v3439_v60  ;;  %v3489_v35 = vsel %vm2494_vm0, %v7655_v45, %v7654_v10  ;;  %v3564_v60 = vsel %vm2482_vm2, %v7658_v29, %v7655_v45  ;;  %vm7461_vm2 = vcmask 392517  }
 0x3a6   : > { %2870 = vrot.lane.b32.xlu0 %v2865_v54, %s4184_s20  ;;  %v2892_v54 = vsel %vm2488_vm14, %v6601_v46, %v2891_v47  ;;  %v3464_v47 = vsel %vm2491_vm15, %v7655_v45, %v7654_v10  ;;  %v3490_v30 = vsel %vm2497_vm1, %v7658_v29, %v3489_v35  ;;  %vm7477_vm6 = vcmask 389440  }
 0x3a7   : > { %v2893_v22 = vsel %vm2491_vm15, %v6663_v4, %v2892_v54 }
 0x3a9   : > { %2868 = vrot.lane.b32.xlu1 %v2862_v51, %s4184_s20  ;;  %v3417_v51 = vsel %vm2494_vm0, %v6057_v41, %v3416_v14  ;;  %v7664_v14 = vld [vmem:[#allocation25_spill] sm:$0xff] }
 0x3aa   : > { %2896 = vrot.lane.b32.xlu0 %v2889_v59, %s4185_s22  ;;  %v7660_v59 = vld [vmem:[#allocation20_spill] sm:$0xff]  ;;  %v3418_v44 = vsel %vm2497_vm1, %v7648_v3, %v3417_v51 }
 0x3ab   : > { %v2916_v25 = vsel %vm2500_vm4, %v6010_v24, %v7660_v59  ;;  %v3419_v36 = vsel %vm2500_vm4, %v7649_v48, %v3418_v44  ;;  %v2947_v24 = vsel %vm2491_vm15, %v6535_v28, %v2946_v15  ;;  %v7666_v59 = vld [vmem:[#allocation28_spill] sm:$0xff]  ;;  %v3491_v15 = vsel %vm2500_vm4, %v7630_v63, %v3490_v30 }
 0x3ad   : > { %2894 = vrot.lane.b32.xlu1 %v7659_v12, %s4185_s22 }
 0x3ae   : > { %2922 = vrot.lane.b32.xlu0 %v2909_v13, %s4186_s30  ;;  %v2948_v13 = vsel %vm2494_vm0, %v6601_v46, %v2947_v24  ;;  %v3465_v46 = vsel %vm2494_vm0, %v7658_v29, %v3464_v47 }
 0x3af   : > { %v2949_v28 = vsel %vm2497_vm1, %v6663_v4, %v2948_v13  ;;  %v3466_v12 = vsel %vm2497_vm1, %v7630_v63, %v3465_v46  ;;  %v7668_v13 = vld [vmem:[#allocation27_spill] sm:$0xff] }
 0x3b0   : > { %v3467_v54 = vsel %vm2500_vm4, %v6057_v41, %v3466_v12  ;;  %v3797_v12 = vsel %vm2500_vm4, %v7638_v52, %v6898_v50 }
 0x3b1   : > { %2898 = vrot.lane.b32.xlu1 %v2893_v22, %s4185_s22  ;;  %v7665_v22 = vld [vmem:[#allocation26_spill] sm:$0xff] }
 0x3b2   : > { %2926 = vrot.lane.b32.xlu0 %v2921_v38, %s4186_s30  ;;  %v3541_v38 = vsel %vm2485_vm3, %v6057_v41, %v3540_v49 }
 0x3b3   : > { %v3542_v51 = vsel %vm2488_vm14, %v7648_v3, %v3541_v38 }
 0x3b4   : > { %v3543_v44 = vsel %vm2491_vm15, %v7649_v48, %v3542_v51 }
 0x3b5   : > { %2924 = vrot.lane.b32.xlu1 %v2916_v25, %s4186_s30  ;;  %v7667_v25 = vld [vmem:[#allocation29_spill] sm:$0xff]  ;;  %v3544_v24 = vsel %vm2494_vm0, %v6087_v20, %v3543_v44 }
 0x3b6   : > { %2952 = vrot.lane.b32.xlu0 %v7661_v55, %s4187_s8  ;;  %v3514_v55 = vsel %vm2497_vm1, %v7655_v45, %v7654_v10  ;;  %v3545_v47 = vsel %vm2497_vm1, %v7620_v1, %v3544_v24 }
 0x3b7   : > { %v3546_v46 = vsel %vm2500_vm4, %v6119_v9, %v3545_v47 }
 0x3b9   : > { %2950 = vrot.lane.b32.xlu1 %v7656_v57, %s4187_s8  ;;  %v3441_v57 = vsel %vm2494_vm0, %v7630_v63, %v3440_v42  ;;  %v7669_v42 = vld [vmem:[#allocation30_spill] sm:$0xff] }
 0x3ba   : > { %3427 = vrot.lane.b32.xlu0 %v3419_v36, %s4170_s29  ;;  %v3442_v4 = vsel %vm2497_vm1, %v6057_v41, %v3441_v57  ;;  %v3515_v36 = vsel %vm2500_vm4, %v7658_v29, %v3514_v55 }
 0x3bd   : > { %2954 = vrot.lane.b32.xlu1 %v2949_v28, %s4187_s8  ;;  %v3565_v28 = vsel %vm2485_vm3, %v7630_v63, %v3564_v60  ;;  %vm7460_vm3 = vcmask 322816  }
 0x3be   : > { %3431 = vrot.lane.b32.xlu0 %v6230_v7, %s4170_s29  ;;  %v3443_v7 = vsel %vm2500_vm4, %v7648_v3, %v3442_v4  ;;  %v3566_v29 = vsel %vm2488_vm14, %v6057_v41, %v3565_v28  ;;  %v3539_v41 = vsel %vm2500_vm4, %v7655_v45, %v7654_v10  ;;  %vm2600_vm14 = vcmask 261312  }
 0x3bf   : > { %v3567_v63 = vsel %vm2491_vm15, %v7648_v3, %v3566_v29  ;;  %vm2602_vm15 = vcmask 256192  }
 0x3c0   : > { %v3568_v9 = vsel %vm2494_vm0, %v7649_v48, %v3567_v63  ;;  %vm2626_vm0 = vcmask 326916  }
 0x3c1   : > { %3429 = vrot.lane.b32.xlu1 %v7662_v40, %s4170_s29 }
 0x3c2   : > { %3454 = vrot.lane.b32.xlu0 %v7663_v18, %s4172_s7 }
 0x3c5   : > { %3452 = vrot.lane.b32.xlu1 %v3443_v7, %s4172_s7 }
 0x3c6   : > { %3477 = vrot.lane.b32.xlu0 %v3467_v54, %s4174_s9 }
 0x3c9   : > { %3456 = vrot.lane.b32.xlu1 %v7664_v14, %s4172_s7 }
 0x3ca   : > { %3481 = vrot.lane.b32.xlu0 %v7665_v22, %s4174_s9 }
 0x3cd   : > { %3479 = vrot.lane.b32.xlu1 %v7666_v59, %s4174_s9 }
 0x3ce   : > { %3504 = vrot.lane.b32.xlu0 %v7667_v25, %s4176_s15 }
 0x3d1   : > { %3502 = vrot.lane.b32.xlu1 %v3491_v15, %s4176_s15 }
 0x3d2   : > { %3527 = vrot.lane.b32.xlu0 %v3515_v36, %s4177_s11 }
 0x3d5   : > { %3506 = vrot.lane.b32.xlu1 %v7668_v13, %s4176_s15 }
 0x3d6   : > { %3531 = vrot.lane.b32.xlu0 %v7669_v42, %s4177_s11 }
 0x3d8   : > { %v2538_v57 = vpop.permute.xlu0 %2537 }
 0x3d9   : > { %3529 = vrot.lane.b32.xlu1 %v6485_v17, %s4177_s11  ;;  %2547 = vst.msk [vmem:[%s5714_s27 + $0xf] sm:$0x1] %vm2546_vm9, %v2538_v57 }
 0x3da   : > { %3554 = vrot.lane.b32.xlu0 %v3546_v46, %s4178_s23 }
 0x3db   : > { %v2536_v40 = vpop.permute.xlu1 %2535 }
 0x3dc   : > { %v2564_v18 = vpop.permute.xlu0 %2563  ;;  %2545 = vst.msk [vmem:[%s5714_s27 + $0x7] sm:$0xff] %vm2544_vm8, %v2536_v40 }
 0x3dd   : > { %3552 = vrot.lane.b32.xlu1 %v3539_v41, %s4178_s23  ;;  %2573 = vst.msk [vmem:[%s5714_s27 + $0x6] sm:$0xff] %vm2572_vm11, %v2564_v18 }
 0x3de   : > { %3577 = vrot.lane.b32.xlu0 %v7654_v10, %s4179_s16  ;;  %v3569_v10 = vsel %vm2497_vm1, %v6087_v20, %v3568_v9  ;;  %vm7462_vm1 = vcmask 326912  }
 0x3df   : > { %v2562_v17 = vpop.permute.xlu1 %2561  ;;  %v3570_v4 = vsel %vm2500_vm4, %v7620_v1, %v3569_v10 }
 0x3e0   : > { %v2590_v3 = vpop.permute.xlu0 %2589  ;;  %2571 = vst.msk [vmem:[%s5714_s27 - $0x2] sm:$0xfc] %vm2570_vm10, %v2562_v17 }
 0x3e1   : > { %3556 = vrot.lane.b32.xlu1 %v6545_v37, %s4178_s23  ;;  %2599 = vst.msk [vmem:[%s5714_s27 - $0x3] sm:$0xf8] %vm2598_vm12, %v2590_v3 }
 0x3e2   : > { %3581 = vrot.lane.b32.xlu0 %v6556_v16, %s4179_s16 }
 0x3e3   : > { %v2566_v48 = vpop.permute.xlu1 %2565 }
 0x3e4   : > { %v2594_v45 = vpop.permute.xlu0 %2593  ;;  %2575 = vst.msk [vmem:[%s5714_s27 + $0xe] sm:$0x3] %vm2574_vm13, %v2566_v48 }
 0x3e5   : > { %3579 = vrot.lane.b32.xlu1 %v3570_v4, %s4179_s16  ;;  %2603 = vst.msk [vmem:[%s5714_s27 + $0xd] sm:$0x7] %vm2602_vm15, %v2594_v45 }
 0x3e6   : > { %3635 = vrot.lane.b32.xlu0 %v6623_v53, %s4180_s17 }
 0x3e7   : > { %v2592_v20 = vpop.permute.xlu1 %2591 }
 0x3e8   : > { %v2620_v37 = vpop.permute.xlu0 %2619  ;;  %2601 = vst.msk [vmem:[%s5714_s27 + $0x5] sm:$0xff] %vm2600_vm14, %v2592_v20 }
 0x3e9   : > { %3633 = vrot.lane.b32.xlu1 %v6627_v8, %s4180_s17  ;;  %2629 = vst.msk [vmem:[%s5714_s27 + $0x4] sm:$0xff] %vm7462_vm1, %v2620_v37  ;;  %vm7468_vm1 = vcmask 523719  }
 0x3ea   : > { %3656 = vrot.lane.b32.xlu0 %v6656_v58, %s4181_s18 }
 0x3eb   : > { %v2618_v1 = vpop.permute.xlu1 %2617 }
 0x3ec   : > { %v2646_v16 = vpop.permute.xlu0 %2645  ;;  %2627 = vst.msk [vmem:[%s5714_s27 - $0x4] sm:$0xf0] %vm2626_vm0, %v2618_v1 }
 0x3ed   : > { %3654 = vrot.lane.b32.xlu1 %v6691_v27, %s4181_s18  ;;  %2655 = vst.msk [vmem:[%s5714_s27 - $0x5] sm:$0xe0] %vm7461_vm2, %v2646_v16  ;;  %vm7464_vm2 = vcmask 458112  }
 0x3ee   : > { %3679 = vrot.lane.b32.xlu0 %v6680_v43, %s4182_s19 }
 0x3ef   : > { %v2622_v53 = vpop.permute.xlu1 %2621 }
 0x3f0   : > { %v2650_v8 = vpop.permute.xlu0 %2649  ;;  %2631 = vst.msk [vmem:[%s5714_s27 + $0xc] sm:$0xf] %vm7460_vm3, %v2622_v53  ;;  %vm7465_vm3 = vcmask 458118  }
 0x3f1   : > { %3658 = vrot.lane.b32.xlu1 %v6481_v62, %s4181_s18  ;;  %2659 = vst.msk [vmem:[%s5714_s27 + $0xb] sm:$0x1f] %vm7477_vm6, %v2650_v8  ;;  %vm7482_vm6 = vcmask 847616  }
 0x3f2   : > { %3683 = vrot.lane.b32.xlu0 %v6650_v34, %s4182_s19 }
 0x3f3   : > { %v2648_v58 = vpop.permute.xlu1 %2647 }
 0x3f4   : > { %v2676_v43 = vpop.permute.xlu0 %2675  ;;  %2657 = vst.msk [vmem:[%s5714_s27 + $0x3] sm:$0xff] %vm7463_vm5, %v2648_v58  ;;  %vm7466_vm5 = vcmask 456064  }
 0x3f5   : > { %3681 = vrot.lane.b32.xlu1 %v6725_v11, %s4182_s19  ;;  %2685 = vst.msk [vmem:[%s5714_s27 + $0x2] sm:$0xff] %vm7464_vm2, %v2676_v43  ;;  %vm7467_vm2 = vcmask 523712  }
 0x3f6   : > { %3706 = vrot.lane.b32.xlu0 %v6735_v33, %s4183_s24 }
 0x3f7   : > { %v2674_v62 = vpop.permute.xlu1 %2673 }
 0x3f8   : > { %v2702_v34 = vpop.permute.xlu0 %2701  ;;  %2683 = vst.msk [vmem:[%s5714_s27 - $0x6] sm:$0xc0] %vm7465_vm3, %v2674_v62  ;;  %vm7469_vm3 = vcmask 522688  }
 0x3f9   : > { %3704 = vrot.lane.b32.xlu1 %v6739_v21, %s4183_s24  ;;  %2711 = vst.msk [vmem:[%s5714_s27 - $0x7] sm:$0x80] %vm7468_vm1, %v2702_v34  ;;  %vm7471_vm1 = vcmask 654912  }
 0x3fa   : > { %3729 = vrot.lane.b32.xlu0 %v6743_v39, %s4184_s20 }
 0x3fb   : > { %v2678_v27 = vpop.permute.xlu1 %2677 }
 0x3fc   : > { %v2706_v11 = vpop.permute.xlu0 %2705  ;;  %2687 = vst.msk [vmem:[%s5714_s27 + $0xa] sm:$0x3f] %vm7466_vm5, %v2678_v27  ;;  %vm7470_vm5 = vcmask 589312  }
 0x3fd   : > { %3708 = vrot.lane.b32.xlu1 %v6753_v23, %s4183_s24  ;;  %2715 = vst.msk [vmem:[%s5714_s27 + $0x9] sm:$0x7f] %vm7469_vm3, %v2706_v11  ;;  %vm7474_vm3 = vcmask 720514  }
 0x3fe   : > { %3733 = vrot.lane.b32.xlu0 %v6776_v31, %s4184_s20  ;;  %v3766_v31 = vsel %vm2500_vm4, %v7640_v2, %v7639_v26  ;;  %vm7479_vm4 = vcmask 786115  }
 0x3ff   : > { %v2704_v33 = vpop.permute.xlu1 %2703 }
 0x400   : > { %v2763_v21 = vpop.permute.xlu0 %2762  ;;  %2713 = vst.msk [vmem:[%s5714_s27 + $0x1] sm:$0xff] %vm7467_vm2, %v2704_v33  ;;  %vm7472_vm2 = vcmask 654913  }
 0x401   : > { %3731 = vrot.lane.b32.xlu1 %v6813_v5, %s4184_s20  ;;  %2768 = vst.msk [vmem:[%s5714_s27 + $0x8] sm:$0xff] %vm7470_vm5, %v2763_v21 }
 0x402   : > { %3756 = vrot.lane.b32.xlu0 %v6827_v32, %s4185_s22 }
 0x403   : > { %v2761_v39 = vpop.permute.xlu1 %2760 }
 0x404   : > { %v2785_v23 = vpop.permute.xlu0 %2784  ;;  %2767 = vst.msk [vmem:[%s5714_s27] sm:$0xff] %vm7470_vm5, %v2761_v39  ;;  %vm7473_vm5 = vcmask 647744  }
 0x405   : > { %3754 = vrot.lane.b32.xlu1 %v6800_v19, %s4185_s22  ;;  %2794 = vst.msk [vmem:[%s5714_s27 + $0x7] sm:$0xff] %vm7471_vm1, %v2785_v23  ;;  %vm7475_vm1 = vcmask 720512  }
 0x406   : > { %3779 = vrot.lane.b32.xlu0 %v3766_v31, %s4186_s30 }
 0x407   : > { %v2783_v5 = vpop.permute.xlu1 %2782 }
 0x408   : > { %v2811_v32 = vpop.permute.xlu0 %2810  ;;  %2792 = vst.msk [vmem:[%s5714_s27 - $0x1] sm:$0xfe] %vm7472_vm2, %v2783_v5  ;;  %vm7476_vm2 = vcmask 714368  }
 0x409   : > { %3758 = vrot.lane.b32.xlu1 %v6846_v61, %s4185_s22  ;;  %2820 = vst.msk [vmem:[%s5714_s27 - $0x2] sm:$0xfc] %vm7474_vm3, %v2811_v32  ;;  %vm7480_vm3 = vcmask 851716  }
 0x40a   : > { %3783 = vrot.lane.b32.xlu0 %v6859_v56, %s4186_s30 }
 0x40b   : > { %v2787_v2 = vpop.permute.xlu1 %2786 }
 0x40c   : > { %v2815_v19 = vpop.permute.xlu0 %2814  ;;  %2796 = vst.msk [vmem:[%s5714_s27 + $0xf] sm:$0x1] %vm7473_vm5, %v2787_v2  ;;  %vm7478_vm5 = vcmask 786112  }
 0x40d   : > { %3781 = vrot.lane.b32.xlu1 %v6894_v0, %s4186_s30  ;;  %2824 = vst.msk [vmem:[%s5714_s27 + $0xe] sm:$0x3] %vm7476_vm2, %v2815_v19  ;;  %vm7483_vm2 = vcmask 851712  }
 0x40e   : > { %3806 = vrot.lane.b32.xlu0 %v3797_v12, %s4187_s8 }
 0x40f   : > { %v2813_v61 = vpop.permute.xlu1 %2812 }
 0x410   : > { %v2841_v56 = vpop.permute.xlu0 %2840  ;;  %2822 = vst.msk [vmem:[%s5714_s27 + $0x6] sm:$0xff] %vm7475_vm1, %v2813_v61  ;;  %vm7481_vm1 = vcmask 780992  }
 0x411   : > { %3804 = vrot.lane.b32.xlu1 %v7639_v26, %s4187_s8  ;;  %2850 = vst.msk [vmem:[%s5714_s27 + $0x5] sm:$0xff] %vm7478_vm5, %v2841_v56  ;;  %vm7485_vm5 = vcmask 917317  }
 0x413   : > { %v2839_v52 = vpop.permute.xlu1 %2838 }
 0x414   : > { %v2867_v0 = vpop.permute.xlu0 %2866  ;;  %2848 = vst.msk [vmem:[%s5714_s27 - $0x3] sm:$0xf8] %vm7479_vm4, %v2839_v52  ;;  %vm7484_vm4 = vcmask 917312  }
 0x415   : > { %3808 = vrot.lane.b32.xlu1 %v6922_v6, %s4187_s8  ;;  %2876 = vst.msk [vmem:[%s5714_s27 - $0x4] sm:$0xf0] %vm7480_vm3, %v2867_v0  ;;  %vm2931_vm3 = vcmask 982918  }
 0x417   : > { %v2843_v26 = vpop.permute.xlu1 %2842 }
 0x418   : > { %v2871_v50 = vpop.permute.xlu0 %2870  ;;  %2852 = vst.msk [vmem:[%s5714_s27 + $0xd] sm:$0x7] %vm7481_vm1, %v2843_v26  ;;  %vm7486_vm1 = vcmask 914240  }
 0x419   : > { %2880 = vst.msk [vmem:[%s5714_s27 + $0xc] sm:$0xf] %vm7482_vm6, %v2871_v50  ;;  %vm2933_vm6 = vcmask 982912  }
 0x41b   : > { %v2869_v7 = vpop.permute.xlu1 %2868 }
 0x41c   : > { %v2897_v54 = vpop.permute.xlu0 %2896  ;;  %2878 = vst.msk [vmem:[%s5714_s27 + $0x4] sm:$0xff] %vm7483_vm2, %v2869_v7  ;;  %vm2935_vm2 = vcmask 980864  }
 0x41d   : > { %2906 = vst.msk [vmem:[%s5714_s27 + $0x3] sm:$0xff] %vm7484_vm4, %v2897_v54  ;;  %vm2959_vm4 = vcmask 1048519  }
 0x41f   : > { %v2895_v6 = vpop.permute.xlu1 %2894 }
 0x420   : > { %v2923_v49 = vpop.permute.xlu0 %2922  ;;  %2904 = vst.msk [vmem:[%s5714_s27 - $0x5] sm:$0xe0] %vm7485_vm5, %v2895_v6  ;;  %vm2961_vm5 = vcmask 1048512  }
 0x421   : > { %2932 = vst.msk [vmem:[%s5714_s27 - $0x6] sm:$0xc0] %vm2931_vm3, %v2923_v49 }
 0x423   : > { %v2899_v14 = vpop.permute.xlu1 %2898 }
 0x424   : > { %v2927_v22 = vpop.permute.xlu0 %2926  ;;  %2908 = vst.msk [vmem:[%s5714_s27 + $0xb] sm:$0x1f] %vm7486_vm1, %v2899_v14  ;;  %vm2963_vm1 = vcmask 1047488  }
 0x425   : > { %2936 = vst.msk [vmem:[%s5714_s27 + $0xa] sm:$0x3f] %vm2935_vm2, %v2927_v22 }
 0x427   : > { %v2925_v38 = vpop.permute.xlu1 %2924 }
 0x428   : > { %v2953_v35 = vpop.permute.xlu0 %2952  ;;  %2934 = vst.msk [vmem:[%s5714_s27 + $0x2] sm:$0xff] %vm2933_vm6, %v2925_v38 }
 0x429   : > { %2962 = vst.msk [vmem:[%s5714_s27 + $0x1] sm:$0xff] %vm2961_vm5, %v2953_v35 }
 0x42b   : > { %v2951_v51 = vpop.permute.xlu1 %2950 }
 0x42c   : > { %v3428_v59 = vpop.permute.xlu0 %3427  ;;  %2960 = vst.msk [vmem:[%s5714_s27 - $0x7] sm:$0x80] %vm2959_vm4, %v2951_v51 }
 0x42d   : > { %3436 = vst.msk [vmem:[%s6929_s28 - $0x1] sm:$0xfe] %vm2542_vm7, %v3428_v59  ;;  %vm7670_vm7 = vcmask 326912  }
 0x42f   : > { %v2955_v25 = vpop.permute.xlu1 %2954 }
 0x430   : > { %v3432_v30 = vpop.permute.xlu0 %3431  ;;  %2964 = vst.msk [vmem:[%s5714_s27 + $0x9] sm:$0x7f] %vm2963_vm1, %v2955_v25 }
 0x431   : > { %3438 = vst.msk [vmem:[%s6929_s28 + $0xf] sm:$0x1] %vm2546_vm9, %v3432_v30  ;;  %vm7672_vm9 = vcmask 322816  }
 0x433   : > { %v3430_v55 = vpop.permute.xlu1 %3429 }
 0x434   : > { %v3455_v44 = vpop.permute.xlu0 %3454  ;;  %3437 = vst.msk [vmem:[%s6929_s28 + $0x7] sm:$0xff] %vm2544_vm8, %v3430_v55  ;;  %vm7671_vm8 = vcmask 392517  }
 0x435   : > { %3462 = vst.msk [vmem:[%s6929_s28 + $0x6] sm:$0xff] %vm2572_vm11, %v3455_v44  ;;  %vm7674_vm11 = vcmask 389440  }
 0x437   : > { %v3453_v15 = vpop.permute.xlu1 %3452 }
 0x438   : > { %v3478_v36 = vpop.permute.xlu0 %3477  ;;  %3461 = vst.msk [vmem:[%s6929_s28 - $0x2] sm:$0xfc] %vm2570_vm10, %v3453_v15  ;;  %vm7673_vm10 = vcmask 392512  }
 0x439   : > { %3486 = vst.msk [vmem:[%s6929_s28 - $0x3] sm:$0xf8] %vm2598_vm12, %v3478_v36  ;;  %vm7675_vm12 = vcmask 458118  }
 0x43b   : > { %v3457_v24 = vpop.permute.xlu1 %3456 }
 0x43c   : > { %v3482_v60 = vpop.permute.xlu0 %3481  ;;  %3463 = vst.msk [vmem:[%s6929_s28 + $0xe] sm:$0x3] %vm2574_vm13, %v3457_v24  ;;  %vm7676_vm13 = vcmask 458112  }
 0x43d   : > { %3488 = vst.msk [vmem:[%s6929_s28 + $0xd] sm:$0x7] %vm2602_vm15, %v3482_v60  ;;  %vm7678_vm15 = vcmask 456064  }
 0x43f   : > { %v3480_v13 = vpop.permute.xlu1 %3479 }
 0x440   : > { %v3505_v42 = vpop.permute.xlu0 %3504  ;;  %3487 = vst.msk [vmem:[%s6929_s28 + $0x5] sm:$0xff] %vm2600_vm14, %v3480_v13  ;;  %vm7677_vm14 = vcmask 523719  }
 0x441   : > { %3512 = vst.msk [vmem:[%s6929_s28 + $0x4] sm:$0xff] %vm7670_vm7, %v3505_v42  ;;  %vm7680_vm7 = vcmask 522688  }
 0x443   : > { %v3503_v47 = vpop.permute.xlu1 %3502 }
 0x444   : > { %v3528_v28 = vpop.permute.xlu0 %3527  ;;  %3511 = vst.msk [vmem:[%s6929_s28 - $0x4] sm:$0xf0] %vm2626_vm0, %v3503_v47  ;;  %vm7679_vm0 = vcmask 523712  }
 0x445   : > { %3536 = vst.msk [vmem:[%s6929_s28 - $0x5] sm:$0xe0] %vm7671_vm8, %v3528_v28  ;;  %vm7681_vm8 = vcmask 589312  }
 0x447   : > { %v3507_v57 = vpop.permute.xlu1 %3506 }
 0x448   : > { %v3532_v46 = vpop.permute.xlu0 %3531  ;;  %3513 = vst.msk [vmem:[%s6929_s28 + $0xc] sm:$0xf] %vm7672_vm9, %v3507_v57  ;;  %vm7682_vm9 = vmmov %vm7681_vm8 }
 0x449   : > { %3538 = vst.msk [vmem:[%s6929_s28 + $0xb] sm:$0x1f] %vm7674_vm11, %v3532_v46  ;;  %vm7684_vm11 = vcmask 654912  }
 0x44b   : > { %v3530_v29 = vpop.permute.xlu1 %3529 }
 0x44c   : > { %v3555_v40 = vpop.permute.xlu0 %3554  ;;  %3537 = vst.msk [vmem:[%s6929_s28 + $0x3] sm:$0xff] %vm7673_vm10, %v3530_v29  ;;  %vm7683_vm10 = vcmask 654913  }
 0x44d   : > { %3562 = vst.msk [vmem:[%s6929_s28 + $0x2] sm:$0xff] %vm7676_vm13, %v3555_v40  ;;  %vm7686_vm13 = vcmask 647744  }
 0x44f   : > { %v3553_v18 = vpop.permute.xlu1 %3552 }
 0x450   : > { %v3578_v63 = vpop.permute.xlu0 %3577  ;;  %3561 = vst.msk [vmem:[%s6929_s28 - $0x6] sm:$0xc0] %vm7675_vm12, %v3553_v18  ;;  %vm7685_vm12 = vcmask 720514  }
 0x451   : > { %3586 = vst.msk [vmem:[%s6929_s28 - $0x7] sm:$0x80] %vm7677_vm14, %v3578_v63  ;;  %vm7687_vm14 = vcmask 720512  }
 0x453   : > { %v3557_v41 = vpop.permute.xlu1 %3556 }
 0x454   : > { %v3582_v9 = vpop.permute.xlu0 %3581  ;;  %3563 = vst.msk [vmem:[%s6929_s28 + $0xa] sm:$0x3f] %vm7678_vm15, %v3557_v41  ;;  %vm7688_vm15 = vcmask 714368  }
 0x455   : > { %3588 = vst.msk [vmem:[%s6929_s28 + $0x9] sm:$0x7f] %vm7680_vm7, %v3582_v9  ;;  %vm7690_vm7 = vcmask 786112  }
 0x457   : > { %v3580_v17 = vpop.permute.xlu1 %3579 }
 0x458   : > { %v3636_v3 = vpop.permute.xlu0 %3635  ;;  %3587 = vst.msk [vmem:[%s6929_s28 + $0x1] sm:$0xff] %vm7679_vm0, %v3580_v17  ;;  %vm7689_vm0 = vcmask 786115  }
 0x459   : > { %3640 = vst.msk [vmem:[%s6929_s28 + $0x8] sm:$0xff] %vm7682_vm9, %v3636_v3  ;;  %vm7692_vm9 = vcmask 780992  }
 0x45b   : > { %v3634_v10 = vpop.permute.xlu1 %3633 }
 0x45c   : > { %v3657_v48 = vpop.permute.xlu0 %3656  ;;  %3639 = vst.msk [vmem:[%s6929_s28] sm:$0xff] %vm7681_vm8, %v3634_v10  ;;  %vm7691_vm8 = vcmask 851716  }
 0x45d   : > { %3664 = vst.msk [vmem:[%s6929_s28 + $0x7] sm:$0xff] %vm7684_vm11, %v3657_v48  ;;  %vm7694_vm11 = vcmask 847616  }
 0x45f   : > { %v3655_v45 = vpop.permute.xlu1 %3654 }
 0x460   : > { %v3680_v4 = vpop.permute.xlu0 %3679  ;;  %3663 = vst.msk [vmem:[%s6929_s28 - $0x1] sm:$0xfe] %vm7683_vm10, %v3655_v45  ;;  %vm7693_vm10 = vcmask 851712  }
 0x461   : > { %3688 = vst.msk [vmem:[%s6929_s28 - $0x2] sm:$0xfc] %vm7685_vm12, %v3680_v4  ;;  %vm7695_vm12 = vcmask 917317  }
 0x463   : > { %v3659_v20 = vpop.permute.xlu1 %3658 }
 0x464   : > { %v3684_v37 = vpop.permute.xlu0 %3683  ;;  %3665 = vst.msk [vmem:[%s6929_s28 + $0xf] sm:$0x1] %vm7686_vm13, %v3659_v20  ;;  %vm7696_vm13 = vcmask 917312  }
 0x465   : > { %3690 = vst.msk [vmem:[%s6929_s28 + $0xe] sm:$0x3] %vm7688_vm15, %v3684_v37 }
 0x467   : > { %v3682_v1 = vpop.permute.xlu1 %3681 }
 0x468   : > { %v3707_v16 = vpop.permute.xlu0 %3706  ;;  %3689 = vst.msk [vmem:[%s6929_s28 + $0x6] sm:$0xff] %vm7687_vm14, %v3682_v1  ;;  %vm7697_vm14 = vcmask 914240  }
 0x469   : > { %3714 = vst.msk [vmem:[%s6929_s28 + $0x5] sm:$0xff] %vm7690_vm7, %v3707_v16 }
 0x46b   : > { %v3705_v53 = vpop.permute.xlu1 %3704 }
 0x46c   : > { %v3730_v8 = vpop.permute.xlu0 %3729  ;;  %3713 = vst.msk [vmem:[%s6929_s28 - $0x3] sm:$0xf8] %vm7689_vm0, %v3705_v53 }
 0x46d   : > { %3738 = vst.msk [vmem:[%s6929_s28 - $0x4] sm:$0xf0] %vm7691_vm8, %v3730_v8 }
 0x46f   : > { %v3709_v58 = vpop.permute.xlu1 %3708 }
 0x470   : > { %v3734_v43 = vpop.permute.xlu0 %3733  ;;  %3715 = vst.msk [vmem:[%s6929_s28 + $0xd] sm:$0x7] %vm7692_vm9, %v3709_v58 }
 0x471   : > { %3740 = vst.msk [vmem:[%s6929_s28 + $0xc] sm:$0xf] %vm7694_vm11, %v3734_v43 }
 0x473   : > { %v3732_v62 = vpop.permute.xlu1 %3731 }
 0x474   : > { %v3757_v34 = vpop.permute.xlu0 %3756  ;;  %3739 = vst.msk [vmem:[%s6929_s28 + $0x4] sm:$0xff] %vm7693_vm10, %v3732_v62 }
 0x475   : > { %3764 = vst.msk [vmem:[%s6929_s28 + $0x3] sm:$0xff] %vm7696_vm13, %v3757_v34 }
 0x477   : > { %v3755_v27 = vpop.permute.xlu1 %3754 }
 0x478   : > { %v3780_v11 = vpop.permute.xlu0 %3779  ;;  %3763 = vst.msk [vmem:[%s6929_s28 - $0x5] sm:$0xe0] %vm7695_vm12, %v3755_v27 }
 0x479   : > { %3788 = vst.msk [vmem:[%s6929_s28 - $0x6] sm:$0xc0] %vm2931_vm3, %v3780_v11 }
 0x47b   : > { %v3759_v33 = vpop.permute.xlu1 %3758 }
 0x47c   : > { %3765 = vst.msk [vmem:[%s6929_s28 + $0xb] sm:$0x1f] %vm7697_vm14, %v3759_v33  ;;  %v3784_v21 = vpop.permute.xlu0 %3783 }
 0x47d   : > { %3790 = vst.msk [vmem:[%s6929_s28 + $0xa] sm:$0x3f] %vm2935_vm2, %v3784_v21 }
 0x47f   : > { %v3782_v39 = vpop.permute.xlu1 %3781 }
 0x480   : > { %3789 = vst.msk [vmem:[%s6929_s28 + $0x2] sm:$0xff] %vm2933_vm6, %v3782_v39  ;;  %v3807_v31 = vpop.permute.xlu0 %3806 }
 0x481   : > { %3814 = vst.msk [vmem:[%s6929_s28 + $0x1] sm:$0xff] %vm2961_vm5, %v3807_v31 }
 0x483   : > { %v3805_v23 = vpop.permute.xlu1 %3804 }
 0x484   : > { %3813 = vst.msk [vmem:[%s6929_s28 - $0x7] sm:$0x80] %vm2959_vm4, %v3805_v23 }
 0x487   : > { %v3809_v5 = vpop.permute.xlu1 %3808 }
 0x488   : > { %3815 = vst.msk [vmem:[%s6929_s28 + $0x9] sm:$0x7f] %vm2963_vm1, %v3809_v5 }
 0x489 PF: > { %s17_s21 = sadd.s32 1, %s4166_s21  }
 0x48a   : > { %p14_p5 = scmp.ge.s32.totalorder %s17_s21, 4  }
 0x48c   :  { %16 = sbr.rel (!%p14_p5) target bundleno = 1 (0x1), region = 101 }

// kernel: basic_residual_block.4
= control target key start
LH: loop header
LB: loop body
LE: loop exit
PB: predicated region body
PF: predicated region fallthrough
CT: control target
= control target key end

     0   :  { %s4319_s18 = smov 0   ;;  %s7054_s0 = inlined_call_operand.vmem [shape: f32[32,128], index: 0, kind: input, shape index: {}]   ;;  %s7055_s1 = inlined_call_operand.vmem [shape: f32[1,128], index: 1, kind: input, shape index: {}]   ;;  %s7056_s2 = inlined_call_operand.vmem [shape: f32[1,128], index: 2, kind: input, shape index: {}]   ;;  %s7057_s3 = inlined_call_operand.vmem [shape: bf16[72,8], index: 3, kind: input, shape index: {}]   ;;  %s7058_s4 = inlined_call_operand.vmem [shape: f32[32,128], index: 4, kind: output, shape index: {0}]   ;;  %s7059_s5 = inlined_call_operand.vmem [shape: f32[2,2,8], index: 5, kind: output, shape index: {1}]  }
   0x1 LB: > { %s4325_s19 = sadd.s32 4294967295, %s4270_s18   ;;  %p4128_p0 = scmp.ge.s32.totalorder %s4270_s18, 1  ;;  %s4270_s18 = sphi %s4319_s18, %s16_s18  }
   0x2   : > { %p191_p1 = scmp.lt.s32.totalorder %s4270_s18, 3 }
   0x4   : > { %p192_p2 = pnand %p4128_p0, %p191_p1 }
   0x6   : > { %195 = sbr.rel (%p192_p2) target bundleno = 1628 (0x65c), region = 36 }
   0xb   : > { %s4129_s20 = sshll.u32 %s4325_s19, 1  ;;  %v4272_v0 = vmov 1966171168   ;;  %v314_v2 = vlaneseq  ;;  %v4134_v3 = vld [vmem:[%s7055_s1] ss:$0 sm:$0xff]  ;;  %vm271_vm0 = vcmask 57344  }
   0xc   : > { %p224_p3 = scmp.lt.s32.totalorder %s4129_s20, 3  ;;  %v312_v1 = vunpack.c.l.s4 %v4272_v0  ;;  %v4135_v7 = vld [vmem:[%s7056_s2] ss:$0 sm:$0xff]  ;;  %s4273_s29 = smov 120   ;;  %vm262_vm1 = vcmask 64512   ;;  %vm265_vm2 = vcmask 58368  }
   0xd   : > { %v315_v5 = vshrl.u32 %v314_v2, 7  ;;  %s4274_s30 = smov 112   ;;  %s4275_s6 = smov 104   ;;  %vm1689_vm3 = vcmask 130112   ;;  %vm1882_vm4 = vcmask 195712   ;;  %vm2075_vm5 = vcmask 261312  }
   0xe   : > { %s7082_s20 = smov (!%p224_p3, %s4129_s20), 3  ;;  %v313_v4 = vunpack.c.0.s8 %v312_v1  ;;  %s4276_s7 = smov 96   ;;  %vm2268_vm6 = vcmask 326912   ;;  %vm3207_vm7 = vcmask 1043456   ;;  %vm2461_vm8 = vcmask 392512  }
   0xf   : > { %s4130_s23 = sshll.u32 %s7082_s20, 3  ;;  %v4344_v16 = vsub.s32 0, %v315_v5  ;;  %s4277_s8 = smov 88   ;;  %vm2655_vm9 = vcmask 458112   ;;  %vm2848_vm10 = vcmask 523712   ;;  %vm7060_vm11 = vcmask 589312  }
  0x10   : > { %s227_s26 = scalar_lea.vmem %s7054_s0, %s4130_s23  ;;  %v316_v12 = vsub.s32 %v313_v4, %v315_v5  ;;  %s4279_s9 = smov 80   ;;  %vm3158_vm12 = vcmask 588800   ;;  %vm3562_vm13 = vcmask 1041409   ;;  %vm3565_vm14 = vcmask 1042434  }
  0x11   : > { %v240_v6 = vld [vmem:[%s227_s26] sm:$0xff]  ;;  %v241_v8 = vld [vmem:[%s227_s26 + $0x8] sm:$0xff]  ;;  %s4280_s10 = smov 72   ;;  %s4281_s11 = smov 64   ;;  %vm3568_vm15 = vcmask 1043459  }
  0x12   : > { %v249_v9 = vmul.f32 %v4134_v3, %v240_v6  ;;  %v250_v10 = vmul.f32 %v4134_v3, %v241_v8  ;;  %s4282_s12 = smov 56   ;;  %s4283_s13 = smov 48  }
  0x13   : > { %s4284_s14 = smov 40   ;;  %s4285_s15 = smov 32  }
  0x14   : > { %v258_v11 = vadd.f32 %v4135_v7, %v249_v9  ;;  %v259_v13 = vadd.f32 %v4135_v7, %v250_v10  ;;  %s4286_s16 = smov 24   ;;  %s4287_s17 = smov 16  }
  0x15   : > { %s4288_s21 = smov 8   ;;  %s6677_s27 = scalar_lea.vmem %s7058_s4, %s4130_s23 }
  0x16   : > { %v260_v14 = vmax.f32 %v258_v11, 0.0  ;;  %v261_v15 = vmax.f32 %v259_v13, 0.0  ;;  %p235_p4 = scmp.lt.s32.totalorder %s4325_s19, 1 }
  0x18   : > { %v317_v17 = vrot.slane %v260_v14, %v316_v12  ;;  %v366_v18 = vrot.slane %v261_v15, %v316_v12  ;;  %v310_v19 = vcombine.high %v260_v14, %v260_v14  ;;  %v359_v20 = vcombine.high %v261_v15, %v261_v15  ;;  %s7084_s19 = smov (!%p235_p4, %s4325_s19), 1 }
  0x19   : > { %s4133_s20 = sshll.u32 %s7084_s19, 1 }
  0x1a   : > { %v333_v21 = vrot.slane %v317_v17, %v316_v12  ;;  %v382_v22 = vrot.slane %v366_v18, %v316_v12  ;;  %v374_v23 = vcombine.high %v366_v18, %v366_v18  ;;  %v325_v24 = vcombine.high %v317_v17, %v317_v17 }
  0x1b   : > { %v324_v25 = vrot.slane %v310_v19, %v316_v12  ;;  %v373_v26 = vrot.slane %v359_v20, %v316_v12 }
  0x1c   : > { %v4347_v27 = vrot.slane %v333_v21, %v4344_v16  ;;  %v355_v28 = vcombine.high %v333_v21, %v333_v21  ;;  %v396_v29 = vrot.slane %v374_v23, %v316_v12  ;;  %425 = vst.msk [vmem:[#allocation2 + $0x19] sm:$0x1] %vm271_vm0, %v333_v21  ;;  %433 = vst.msk [vmem:[#allocation2 + $0xd9] sm:$0x1] %vm271_vm0, %v382_v22 }
  0x1d   : > { %v347_v30 = vrot.slane %v325_v24, %v316_v12  ;;  %v340_v31 = vrot.slane %v324_v25, %v316_v12  ;;  %v326_v32 = vcombine.high %v324_v25, %v324_v25  ;;  %v404_v33 = vcombine.high %v382_v22, %v382_v22 }
  0x1e   : > { %505 = vrot.lane.b32.xlu0 %v4347_v27, %s4273_s29  ;;  %v4354_v34 = vrot.slane %v355_v28, %v4344_v16  ;;  %v4357_v35 = vrot.slane %v382_v22, %v4344_v16  ;;  %v406_v36 = vcombine.high %v396_v29, %v396_v29  ;;  %v389_v37 = vrot.slane %v373_v26, %v316_v12 }
  0x1f   : > { %427 = vst.msk [vmem:[#allocation2 + $0x49] sm:$0x1] %vm271_vm0, %v355_v28  ;;  %434 = vst.msk [vmem:[#allocation2 + $0xf1] sm:$0x1] %vm271_vm0, %v396_v29  ;;  %v357_v38 = vcombine.high %v347_v30, %v347_v30  ;;  %v354_v39 = vrot.slane %v326_v32, %v316_v12  ;;  %v4367_v40 = vrot.slane %v396_v29, %v4344_v16 }
  0x20   : > { %426 = vst.msk [vmem:[#allocation2 + $0x31] sm:$0x1] %vm271_vm0, %v347_v30  ;;  %429 = vst.msk [vmem:[#allocation2 + $0x79] sm:$0x1] %vm271_vm0, %v340_v31  ;;  %509 = vrot.lane.b32.xlu1 %v4354_v34, %s4273_s29  ;;  %v375_v41 = vcombine.high %v373_v26, %v373_v26  ;;  %v356_v42 = vcombine.high %v340_v31, %v340_v31  ;;  %v4376_v44 = vrot.slane %v347_v30, %v4344_v16 }
  0x21   : > { %435 = vst.msk [vmem:[#allocation2 + $0x109] sm:$0x1] %vm271_vm0, %v404_v33  ;;  %436 = vst.msk [vmem:[#allocation2 + $0x121] sm:$0x1] %vm271_vm0, %v406_v36  ;;  %v358_v43 = vcombine.high %v354_v39, %v354_v39  ;;  %v405_v46 = vcombine.high %v389_v37, %v389_v37  ;;  %v4383_v47 = vrot.slane %v357_v38, %v4344_v16 }
  0x22   : > { %437 = vst.msk [vmem:[#allocation2 + $0x139] sm:$0x1] %vm271_vm0, %v389_v37  ;;  %428 = vst.msk [vmem:[#allocation2 + $0x61] sm:$0x1] %vm271_vm0, %v357_v38  ;;  %521 = vrot.lane.b32.xlu0 %v4357_v35, %s4273_s29  ;;  %v403_v45 = vrot.slane %v375_v41, %v316_v12  ;;  %v4390_v49 = vrot.slane %v340_v31, %v4344_v16  ;;  %v4396_v50 = vrot.slane %v354_v39, %v4344_v16  ;;  %v4278_v12 = vmov 0.0  }
  0x23   : > { %430 = vst.msk [vmem:[#allocation2 + $0x91] sm:$0x1] %vm271_vm0, %v354_v39  ;;  %431 = vst.msk [vmem:[#allocation2 + $0xa9] sm:$0x1] %vm271_vm0, %v356_v42  ;;  %v4401_v51 = vrot.slane %v404_v33, %v4344_v16  ;;  %v4406_v52 = vrot.slane %v406_v36, %v4344_v16  ;;  %v4411_v53 = vrot.slane %v389_v37, %v4344_v16 }
  0x24   : > { %432 = vst.msk [vmem:[#allocation2 + $0xc1] sm:$0x1] %vm271_vm0, %v358_v43  ;;  %523 = vrot.lane.b32.xlu1 %v4367_v40, %s4273_s29  ;;  %v407_v48 = vcombine.high %v403_v45, %v403_v45  ;;  %438 = vst.msk [vmem:[#allocation2 + $0x151] sm:$0x1] %vm271_vm0, %v403_v45  ;;  %v4416_v54 = vrot.slane %v403_v45, %v4344_v16  ;;  %v4421_v55 = vrot.slane %v356_v42, %v4344_v16 }
  0x25   : > { %439 = vst.msk [vmem:[#allocation2 + $0x169] sm:$0x1] %vm271_vm0, %v405_v46  ;;  %v4426_v56 = vrot.slane %v358_v43, %v4344_v16  ;;  %v4431_v57 = vrot.slane %v405_v46, %v4344_v16  ;;  %273 = vst.msk [vmem:[#allocation2 + $0x18] sm:$0x1] %vm271_vm0, %v4278_v12 }
  0x26   : > { %507 = vrot.lane.b32.xlu0 %v4376_v44, %s4273_s29  ;;  %440 = vst.msk [vmem:[#allocation2 + $0x181] sm:$0x1] %vm271_vm0, %v407_v48  ;;  %v4436_v58 = vrot.slane %v407_v48, %v4344_v16  ;;  %274 = vst.msk [vmem:[#allocation2 + $0x30] sm:$0x1] %vm271_vm0, %v4278_v12 }
  0x27   : > { %275 = vst.msk [vmem:[#allocation2 + $0x48] sm:$0x1] %vm271_vm0, %v4278_v12  ;;  %276 = vst.msk [vmem:[#allocation2 + $0x60] sm:$0x1] %vm271_vm0, %v4278_v12 }
  0x28   : > { %511 = vrot.lane.b32.xlu1 %v4383_v47, %s4273_s29  ;;  %277 = vst.msk [vmem:[#allocation2 + $0x78] sm:$0x1] %vm271_vm0, %v4278_v12  ;;  %278 = vst.msk [vmem:[#allocation2 + $0x90] sm:$0x1] %vm271_vm0, %v4278_v12 }
  0x29   : > { %279 = vst.msk [vmem:[#allocation2 + $0xa8] sm:$0x1] %vm271_vm0, %v4278_v12  ;;  %280 = vst.msk [vmem:[#allocation2 + $0xc0] sm:$0x1] %vm271_vm0, %v4278_v12 }
  0x2a   : > { %513 = vrot.lane.b32.xlu0 %v4390_v49, %s4273_s29  ;;  %281 = vst.msk [vmem:[#allocation2 + $0xd8] sm:$0x1] %vm271_vm0, %v4278_v12  ;;  %282 = vst.msk [vmem:[#allocation2 + $0xf0] sm:$0x1] %vm271_vm0, %v4278_v12 }
  0x2b   : > { %283 = vst.msk [vmem:[#allocation2 + $0x108] sm:$0x1] %vm271_vm0, %v4278_v12  ;;  %284 = vst.msk [vmem:[#allocation2 + $0x120] sm:$0x1] %vm271_vm0, %v4278_v12 }
  0x2c   : > { %515 = vrot.lane.b32.xlu1 %v4396_v50, %s4273_s29  ;;  %285 = vst.msk [vmem:[#allocation2 + $0x138] sm:$0x1] %vm271_vm0, %v4278_v12  ;;  %286 = vst.msk [vmem:[#allocation2 + $0x150] sm:$0x1] %vm271_vm0, %v4278_v12 }
  0x2d   : > { %287 = vst.msk [vmem:[#allocation2 + $0x168] sm:$0x1] %vm271_vm0, %v4278_v12  ;;  %288 = vst.msk [vmem:[#allocation2 + $0x180] sm:$0x1] %vm271_vm0, %v4278_v12 }
  0x2e   : > { %525 = vrot.lane.b32.xlu0 %v4401_v51, %s4273_s29  ;;  %291 = vst.msk [vmem:[#allocation2 + $0x29] sm:$0x1] %vm271_vm0, %v4278_v12  ;;  %292 = vst.msk [vmem:[#allocation2 + $0x41] sm:$0x1] %vm271_vm0, %v4278_v12 }
  0x2f   : > { %293 = vst.msk [vmem:[#allocation2 + $0x59] sm:$0x1] %vm271_vm0, %v4278_v12  ;;  %294 = vst.msk [vmem:[#allocation2 + $0x71] sm:$0x1] %vm271_vm0, %v4278_v12 }
  0x30   : > { %527 = vrot.lane.b32.xlu1 %v4406_v52, %s4273_s29  ;;  %295 = vst.msk [vmem:[#allocation2 + $0x89] sm:$0x1] %vm271_vm0, %v4278_v12  ;;  %296 = vst.msk [vmem:[#allocation2 + $0xa1] sm:$0x1] %vm271_vm0, %v4278_v12 }
  0x31   : > { %297 = vst.msk [vmem:[#allocation2 + $0xb9] sm:$0x1] %vm271_vm0, %v4278_v12  ;;  %298 = vst.msk [vmem:[#allocation2 + $0xd1] sm:$0x1] %vm271_vm0, %v4278_v12 }
  0x32   : > { %529 = vrot.lane.b32.xlu0 %v4411_v53, %s4273_s29  ;;  %299 = vst.msk [vmem:[#allocation2 + $0xe9] sm:$0x1] %vm271_vm0, %v4278_v12  ;;  %300 = vst.msk [vmem:[#allocation2 + $0x101] sm:$0x1] %vm271_vm0, %v4278_v12 }
  0x33   : > { %301 = vst.msk [vmem:[#allocation2 + $0x119] sm:$0x1] %vm271_vm0, %v4278_v12  ;;  %302 = vst.msk [vmem:[#allocation2 + $0x131] sm:$0x1] %vm271_vm0, %v4278_v12 }
  0x34   : > { %531 = vrot.lane.b32.xlu1 %v4416_v54, %s4273_s29  ;;  %303 = vst.msk [vmem:[#allocation2 + $0x149] sm:$0x1] %vm271_vm0, %v4278_v12  ;;  %304 = vst.msk [vmem:[#allocation2 + $0x161] sm:$0x1] %vm271_vm0, %v4278_v12 }
  0x35   : > { %305 = vst.msk [vmem:[#allocation2 + $0x179] sm:$0x1] %vm271_vm0, %v4278_v12  ;;  %306 = vst.msk [vmem:[#allocation2 + $0x191] sm:$0x1] %vm271_vm0, %v4278_v12 }
  0x36   : > { %517 = vrot.lane.b32.xlu0 %v4421_v55, %s4273_s29  ;;  %263 = vst.msk [vmem:[#allocation2] sm:$0xff] %vm262_vm1, %v4278_v12  ;;  %264 = vst.msk [vmem:[#allocation2 + $0x8] sm:$0xff] %vm262_vm1, %v4278_v12 }
  0x37   : > { %268 = vst.msk [vmem:[#allocation2 + $0x198] sm:$0xff] %vm262_vm1, %v4278_v12  ;;  %269 = vst.msk [vmem:[#allocation2 + $0x1a0] sm:$0xff] %vm262_vm1, %v4278_v12 }
  0x38   : > { %519 = vrot.lane.b32.xlu1 %v4426_v56, %s4273_s29  ;;  %272 = vst.msk [vmem:[#allocation2] sm:$0x1] %vm271_vm0, %v4278_v12  ;;  %289 = vst.msk [vmem:[#allocation2 + $0x198] sm:$0x1] %vm271_vm0, %v4278_v12 }
  0x39   : > { %266 = vst.msk [vmem:[#allocation2 + $0x10] sm:$0x3] %vm265_vm2, %v4278_v12  ;;  %270 = vst.msk [vmem:[#allocation2 + $0x1a8] sm:$0x3] %vm265_vm2, %v4278_v12 }
  0x3a   : > { %533 = vrot.lane.b32.xlu0 %v4431_v57, %s4273_s29  ;;  %290 = vst.msk [vmem:[#allocation2 + $0x11] sm:$0x1] %vm271_vm0, %v4278_v12  ;;  %307 = vst.msk [vmem:[#allocation2 + $0x1a9] sm:$0x1] %vm271_vm0, %v4278_v12 }
  0x3c   : > { %535 = vrot.lane.b32.xlu1 %v4436_v58, %s4273_s29 }
  0x3e   : > { %569 = vrot.lane.b32.xlu0 %v4347_v27, %s4274_s30 }
  0x40   : > { %571 = vrot.lane.b32.xlu1 %v4376_v44, %s4274_s30 }
  0x42   : > { %573 = vrot.lane.b32.xlu0 %v4354_v34, %s4274_s30 }
  0x44   : > { %575 = vrot.lane.b32.xlu1 %v4383_v47, %s4274_s30 }
  0x46   : > { %577 = vrot.lane.b32.xlu0 %v4390_v49, %s4274_s30 }
  0x48   : > { %579 = vrot.lane.b32.xlu1 %v4396_v50, %s4274_s30 }
  0x4a   : > { %581 = vrot.lane.b32.xlu0 %v4421_v55, %s4274_s30 }
  0x4c   : > { %583 = vrot.lane.b32.xlu1 %v4426_v56, %s4274_s30 }
  0x4e   : > { %585 = vrot.lane.b32.xlu0 %v4357_v35, %s4274_s30 }
  0x50   : > { %587 = vrot.lane.b32.xlu1 %v4367_v40, %s4274_s30 }
  0x52   : > { %589 = vrot.lane.b32.xlu0 %v4401_v51, %s4274_s30 }
  0x54   : > { %591 = vrot.lane.b32.xlu1 %v4406_v52, %s4274_s30 }
  0x56   : > { %593 = vrot.lane.b32.xlu0 %v4411_v53, %s4274_s30 }
  0x58   : > { %595 = vrot.lane.b32.xlu1 %v4416_v54, %s4274_s30 }
  0x5a   : > { %597 = vrot.lane.b32.xlu0 %v4431_v57, %s4274_s30 }
  0x5c   : > { %599 = vrot.lane.b32.xlu1 %v4436_v58, %s4274_s30 }
  0x5e   : > { %633 = vrot.lane.b32.xlu0 %v4347_v27, %s4275_s6 }
  0x60   : > { %635 = vrot.lane.b32.xlu1 %v4376_v44, %s4275_s6 }
  0x62   : > { %637 = vrot.lane.b32.xlu0 %v4354_v34, %s4275_s6 }
  0x64   : > { %639 = vrot.lane.b32.xlu1 %v4383_v47, %s4275_s6 }
  0x66   : > { %641 = vrot.lane.b32.xlu0 %v4390_v49, %s4275_s6 }
  0x68   : > { %643 = vrot.lane.b32.xlu1 %v4396_v50, %s4275_s6 }
  0x6a   : > { %645 = vrot.lane.b32.xlu0 %v4421_v55, %s4275_s6 }
  0x6c   : > { %647 = vrot.lane.b32.xlu1 %v4426_v56, %s4275_s6 }
  0x6e   : > { %649 = vrot.lane.b32.xlu0 %v4357_v35, %s4275_s6 }
  0x70   : > { %651 = vrot.lane.b32.xlu1 %v4367_v40, %s4275_s6 }
  0x72   : > { %653 = vrot.lane.b32.xlu0 %v4401_v51, %s4275_s6 }
  0x74   : > { %655 = vrot.lane.b32.xlu1 %v4406_v52, %s4275_s6 }
  0x76   : > { %657 = vrot.lane.b32.xlu0 %v4411_v53, %s4275_s6 }
  0x78   : > { %659 = vrot.lane.b32.xlu1 %v4416_v54, %s4275_s6 }
  0x7a   : > { %661 = vrot.lane.b32.xlu0 %v4431_v57, %s4275_s6 }
  0x7c   : > { %663 = vrot.lane.b32.xlu1 %v4436_v58, %s4275_s6 }
  0x7e   : > { %697 = vrot.lane.b32.xlu0 %v4347_v27, %s4276_s7 }
  0x80   : > { %699 = vrot.lane.b32.xlu1 %v4376_v44, %s4276_s7 }
  0x82   : > { %701 = vrot.lane.b32.xlu0 %v4354_v34, %s4276_s7 }
  0x84   : > { %703 = vrot.lane.b32.xlu1 %v4383_v47, %s4276_s7 }
  0x86   : > { %705 = vrot.lane.b32.xlu0 %v4390_v49, %s4276_s7 }
  0x88   : > { %707 = vrot.lane.b32.xlu1 %v4396_v50, %s4276_s7 }
  0x8a   : > { %709 = vrot.lane.b32.xlu0 %v4421_v55, %s4276_s7 }
  0x8c   : > { %711 = vrot.lane.b32.xlu1 %v4426_v56, %s4276_s7 }
  0x8e   : > { %713 = vrot.lane.b32.xlu0 %v4357_v35, %s4276_s7 }
  0x90   : > { %v506_v59 = vpop.permute.xlu0 %505  ;;  %715 = vrot.lane.b32.xlu1 %v4367_v40, %s4276_s7 }
  0x91   : > { %553 = vst.msk [vmem:[#allocation2 + $0x1a] sm:$0x1] %vm271_vm0, %v506_v59 }
  0x92   : > { %v510_v60 = vpop.permute.xlu1 %509  ;;  %717 = vrot.lane.b32.xlu0 %v4401_v51, %s4276_s7 }
  0x93   : > { %555 = vst.msk [vmem:[#allocation2 + $0x4a] sm:$0x1] %vm271_vm0, %v510_v60 }
  0x94   : > { %v522_v61 = vpop.permute.xlu0 %521  ;;  %719 = vrot.lane.b32.xlu1 %v4406_v52, %s4276_s7 }
  0x95   : > { %561 = vst.msk [vmem:[#allocation2 + $0xda] sm:$0x1] %vm271_vm0, %v522_v61 }
  0x96   : > { %v524_v62 = vpop.permute.xlu1 %523  ;;  %721 = vrot.lane.b32.xlu0 %v4411_v53, %s4276_s7 }
  0x97   : > { %562 = vst.msk [vmem:[#allocation2 + $0xf2] sm:$0x1] %vm271_vm0, %v524_v62 }
  0x98   : > { %v508_v63 = vpop.permute.xlu0 %507  ;;  %723 = vrot.lane.b32.xlu1 %v4416_v54, %s4276_s7 }
  0x99   : > { %554 = vst.msk [vmem:[#allocation2 + $0x32] sm:$0x1] %vm271_vm0, %v508_v63 }
  0x9a   : > { %v512_v0 = vpop.permute.xlu1 %511  ;;  %725 = vrot.lane.b32.xlu0 %v4431_v57, %s4276_s7 }
  0x9b   : > { %556 = vst.msk [vmem:[#allocation2 + $0x62] sm:$0x1] %vm271_vm0, %v512_v0 }
  0x9c   : > { %v514_v1 = vpop.permute.xlu0 %513  ;;  %727 = vrot.lane.b32.xlu1 %v4436_v58, %s4276_s7 }
  0x9d   : > { %557 = vst.msk [vmem:[#allocation2 + $0x7a] sm:$0x1] %vm271_vm0, %v514_v1 }
  0x9e   : > { %761 = vrot.lane.b32.xlu0 %v4347_v27, %s4277_s8  ;;  %v516_v2 = vpop.permute.xlu1 %515 }
  0x9f   : > { %558 = vst.msk [vmem:[#allocation2 + $0x92] sm:$0x1] %vm271_vm0, %v516_v2 }
  0xa0   : > { %v526_v3 = vpop.permute.xlu0 %525  ;;  %763 = vrot.lane.b32.xlu1 %v4376_v44, %s4277_s8 }
  0xa1   : > { %563 = vst.msk [vmem:[#allocation2 + $0x10a] sm:$0x1] %vm271_vm0, %v526_v3 }
  0xa2   : > { %765 = vrot.lane.b32.xlu0 %v4354_v34, %s4277_s8  ;;  %v528_v4 = vpop.permute.xlu1 %527 }
  0xa3   : > { %564 = vst.msk [vmem:[#allocation2 + $0x122] sm:$0x1] %vm271_vm0, %v528_v4 }
  0xa4   : > { %v530_v5 = vpop.permute.xlu0 %529  ;;  %767 = vrot.lane.b32.xlu1 %v4383_v47, %s4277_s8 }
  0xa5   : > { %565 = vst.msk [vmem:[#allocation2 + $0x13a] sm:$0x1] %vm271_vm0, %v530_v5 }
  0xa6   : > { %769 = vrot.lane.b32.xlu0 %v4390_v49, %s4277_s8  ;;  %v532_v6 = vpop.permute.xlu1 %531 }
  0xa7   : > { %566 = vst.msk [vmem:[#allocation2 + $0x152] sm:$0x1] %vm271_vm0, %v532_v6 }
  0xa8   : > { %v518_v7 = vpop.permute.xlu0 %517  ;;  %771 = vrot.lane.b32.xlu1 %v4396_v50, %s4277_s8 }
  0xa9   : > { %559 = vst.msk [vmem:[#allocation2 + $0xaa] sm:$0x1] %vm271_vm0, %v518_v7 }
  0xaa   : > { %773 = vrot.lane.b32.xlu0 %v4421_v55, %s4277_s8  ;;  %v520_v8 = vpop.permute.xlu1 %519 }
  0xab   : > { %560 = vst.msk [vmem:[#allocation2 + $0xc2] sm:$0x1] %vm271_vm0, %v520_v8 }
  0xac   : > { %v534_v9 = vpop.permute.xlu0 %533  ;;  %775 = vrot.lane.b32.xlu1 %v4426_v56, %s4277_s8 }
  0xad   : > { %567 = vst.msk [vmem:[#allocation2 + $0x16a] sm:$0x1] %vm271_vm0, %v534_v9 }
  0xae   : > { %777 = vrot.lane.b32.xlu0 %v4357_v35, %s4277_s8  ;;  %v536_v10 = vpop.permute.xlu1 %535 }
  0xaf   : > { %568 = vst.msk [vmem:[#allocation2 + $0x182] sm:$0x1] %vm271_vm0, %v536_v10 }
  0xb0   : > { %v570_v11 = vpop.permute.xlu0 %569  ;;  %779 = vrot.lane.b32.xlu1 %v4367_v40, %s4277_s8 }
  0xb1   : > { %617 = vst.msk [vmem:[#allocation2 + $0x1b] sm:$0x1] %vm271_vm0, %v570_v11 }
  0xb2   : > { %781 = vrot.lane.b32.xlu0 %v4401_v51, %s4277_s8  ;;  %v572_v13 = vpop.permute.xlu1 %571 }
  0xb3   : > { %618 = vst.msk [vmem:[#allocation2 + $0x33] sm:$0x1] %vm271_vm0, %v572_v13 }
  0xb4   : > { %v574_v14 = vpop.permute.xlu0 %573  ;;  %783 = vrot.lane.b32.xlu1 %v4406_v52, %s4277_s8 }
  0xb5   : > { %619 = vst.msk [vmem:[#allocation2 + $0x4b] sm:$0x1] %vm271_vm0, %v574_v14 }
  0xb6   : > { %785 = vrot.lane.b32.xlu0 %v4411_v53, %s4277_s8  ;;  %v576_v15 = vpop.permute.xlu1 %575 }
  0xb7   : > { %620 = vst.msk [vmem:[#allocation2 + $0x63] sm:$0x1] %vm271_vm0, %v576_v15 }
  0xb8   : > { %v578_v16 = vpop.permute.xlu0 %577  ;;  %787 = vrot.lane.b32.xlu1 %v4416_v54, %s4277_s8 }
  0xb9   : > { %621 = vst.msk [vmem:[#allocation2 + $0x7b] sm:$0x1] %vm271_vm0, %v578_v16 }
  0xba   : > { %789 = vrot.lane.b32.xlu0 %v4431_v57, %s4277_s8  ;;  %v580_v17 = vpop.permute.xlu1 %579 }
  0xbb   : > { %622 = vst.msk [vmem:[#allocation2 + $0x93] sm:$0x1] %vm271_vm0, %v580_v17 }
  0xbc   : > { %v582_v18 = vpop.permute.xlu0 %581  ;;  %791 = vrot.lane.b32.xlu1 %v4436_v58, %s4277_s8 }
  0xbd   : > { %623 = vst.msk [vmem:[#allocation2 + $0xab] sm:$0x1] %vm271_vm0, %v582_v18 }
  0xbe   : > { %825 = vrot.lane.b32.xlu0 %v4347_v27, %s4279_s9  ;;  %v584_v19 = vpop.permute.xlu1 %583 }
  0xbf   : > { %624 = vst.msk [vmem:[#allocation2 + $0xc3] sm:$0x1] %vm271_vm0, %v584_v19 }
  0xc0   : > { %v586_v20 = vpop.permute.xlu0 %585  ;;  %827 = vrot.lane.b32.xlu1 %v4376_v44, %s4279_s9 }
  0xc1   : > { %625 = vst.msk [vmem:[#allocation2 + $0xdb] sm:$0x1] %vm271_vm0, %v586_v20 }
  0xc2   : > { %829 = vrot.lane.b32.xlu0 %v4354_v34, %s4279_s9  ;;  %v588_v21 = vpop.permute.xlu1 %587 }
  0xc3   : > { %626 = vst.msk [vmem:[#allocation2 + $0xf3] sm:$0x1] %vm271_vm0, %v588_v21 }
  0xc4   : > { %v590_v22 = vpop.permute.xlu0 %589  ;;  %831 = vrot.lane.b32.xlu1 %v4383_v47, %s4279_s9 }
  0xc5   : > { %627 = vst.msk [vmem:[#allocation2 + $0x10b] sm:$0x1] %vm271_vm0, %v590_v22 }
  0xc6   : > { %833 = vrot.lane.b32.xlu0 %v4390_v49, %s4279_s9  ;;  %v592_v23 = vpop.permute.xlu1 %591 }
  0xc7   : > { %628 = vst.msk [vmem:[#allocation2 + $0x123] sm:$0x1] %vm271_vm0, %v592_v23 }
  0xc8   : > { %v594_v24 = vpop.permute.xlu0 %593  ;;  %835 = vrot.lane.b32.xlu1 %v4396_v50, %s4279_s9 }
  0xc9   : > { %629 = vst.msk [vmem:[#allocation2 + $0x13b] sm:$0x1] %vm271_vm0, %v594_v24 }
  0xca   : > { %837 = vrot.lane.b32.xlu0 %v4421_v55, %s4279_s9  ;;  %v596_v25 = vpop.permute.xlu1 %595 }
  0xcb   : > { %630 = vst.msk [vmem:[#allocation2 + $0x153] sm:$0x1] %vm271_vm0, %v596_v25 }
  0xcc   : > { %v598_v26 = vpop.permute.xlu0 %597  ;;  %839 = vrot.lane.b32.xlu1 %v4426_v56, %s4279_s9 }
  0xcd   : > { %631 = vst.msk [vmem:[#allocation2 + $0x16b] sm:$0x1] %vm271_vm0, %v598_v26 }
  0xce   : > { %841 = vrot.lane.b32.xlu0 %v4357_v35, %s4279_s9  ;;  %v600_v28 = vpop.permute.xlu1 %599 }
  0xcf   : > { %632 = vst.msk [vmem:[#allocation2 + $0x183] sm:$0x1] %vm271_vm0, %v600_v28 }
  0xd0   : > { %v634_v29 = vpop.permute.xlu0 %633  ;;  %843 = vrot.lane.b32.xlu1 %v4367_v40, %s4279_s9 }
  0xd1   : > { %681 = vst.msk [vmem:[#allocation2 + $0x1c] sm:$0x1] %vm271_vm0, %v634_v29 }
  0xd2   : > { %845 = vrot.lane.b32.xlu0 %v4401_v51, %s4279_s9  ;;  %v636_v30 = vpop.permute.xlu1 %635 }
  0xd3   : > { %682 = vst.msk [vmem:[#allocation2 + $0x34] sm:$0x1] %vm271_vm0, %v636_v30 }
  0xd4   : > { %v638_v31 = vpop.permute.xlu0 %637  ;;  %847 = vrot.lane.b32.xlu1 %v4406_v52, %s4279_s9 }
  0xd5   : > { %683 = vst.msk [vmem:[#allocation2 + $0x4c] sm:$0x1] %vm271_vm0, %v638_v31 }
  0xd6   : > { %849 = vrot.lane.b32.xlu0 %v4411_v53, %s4279_s9  ;;  %v640_v32 = vpop.permute.xlu1 %639 }
  0xd7   : > { %684 = vst.msk [vmem:[#allocation2 + $0x64] sm:$0x1] %vm271_vm0, %v640_v32 }
  0xd8   : > { %v642_v33 = vpop.permute.xlu0 %641  ;;  %851 = vrot.lane.b32.xlu1 %v4416_v54, %s4279_s9 }
  0xd9   : > { %685 = vst.msk [vmem:[#allocation2 + $0x7c] sm:$0x1] %vm271_vm0, %v642_v33 }
  0xda   : > { %853 = vrot.lane.b32.xlu0 %v4431_v57, %s4279_s9  ;;  %v644_v36 = vpop.permute.xlu1 %643 }
  0xdb   : > { %686 = vst.msk [vmem:[#allocation2 + $0x94] sm:$0x1] %vm271_vm0, %v644_v36 }
  0xdc   : > { %v646_v37 = vpop.permute.xlu0 %645  ;;  %855 = vrot.lane.b32.xlu1 %v4436_v58, %s4279_s9 }
  0xdd   : > { %687 = vst.msk [vmem:[#allocation2 + $0xac] sm:$0x1] %vm271_vm0, %v646_v37 }
  0xde   : > { %889 = vrot.lane.b32.xlu0 %v4347_v27, %s4280_s10  ;;  %v648_v38 = vpop.permute.xlu1 %647 }
  0xdf   : > { %688 = vst.msk [vmem:[#allocation2 + $0xc4] sm:$0x1] %vm271_vm0, %v648_v38 }
  0xe0   : > { %v650_v39 = vpop.permute.xlu0 %649  ;;  %891 = vrot.lane.b32.xlu1 %v4376_v44, %s4280_s10 }
  0xe1   : > { %689 = vst.msk [vmem:[#allocation2 + $0xdc] sm:$0x1] %vm271_vm0, %v650_v39 }
  0xe2   : > { %893 = vrot.lane.b32.xlu0 %v4354_v34, %s4280_s10  ;;  %v652_v41 = vpop.permute.xlu1 %651 }
  0xe3   : > { %690 = vst.msk [vmem:[#allocation2 + $0xf4] sm:$0x1] %vm271_vm0, %v652_v41 }
  0xe4   : > { %v654_v42 = vpop.permute.xlu0 %653  ;;  %895 = vrot.lane.b32.xlu1 %v4383_v47, %s4280_s10 }
  0xe5   : > { %691 = vst.msk [vmem:[#allocation2 + $0x10c] sm:$0x1] %vm271_vm0, %v654_v42 }
  0xe6   : > { %897 = vrot.lane.b32.xlu0 %v4390_v49, %s4280_s10  ;;  %v656_v43 = vpop.permute.xlu1 %655 }
  0xe7   : > { %692 = vst.msk [vmem:[#allocation2 + $0x124] sm:$0x1] %vm271_vm0, %v656_v43 }
  0xe8   : > { %v658_v45 = vpop.permute.xlu0 %657  ;;  %899 = vrot.lane.b32.xlu1 %v4396_v50, %s4280_s10 }
  0xe9   : > { %693 = vst.msk [vmem:[#allocation2 + $0x13c] sm:$0x1] %vm271_vm0, %v658_v45 }
  0xea   : > { %901 = vrot.lane.b32.xlu0 %v4421_v55, %s4280_s10  ;;  %v660_v46 = vpop.permute.xlu1 %659 }
  0xeb   : > { %694 = vst.msk [vmem:[#allocation2 + $0x154] sm:$0x1] %vm271_vm0, %v660_v46 }
  0xec   : > { %v662_v48 = vpop.permute.xlu0 %661  ;;  %903 = vrot.lane.b32.xlu1 %v4426_v56, %s4280_s10 }
  0xed   : > { %695 = vst.msk [vmem:[#allocation2 + $0x16c] sm:$0x1] %vm271_vm0, %v662_v48 }
  0xee   : > { %905 = vrot.lane.b32.xlu0 %v4357_v35, %s4280_s10  ;;  %v664_v59 = vpop.permute.xlu1 %663 }
  0xef   : > { %696 = vst.msk [vmem:[#allocation2 + $0x184] sm:$0x1] %vm271_vm0, %v664_v59 }
  0xf0   : > { %v698_v60 = vpop.permute.xlu0 %697  ;;  %907 = vrot.lane.b32.xlu1 %v4367_v40, %s4280_s10 }
  0xf1   : > { %745 = vst.msk [vmem:[#allocation2 + $0x1d] sm:$0x1] %vm271_vm0, %v698_v60 }
  0xf2   : > { %909 = vrot.lane.b32.xlu0 %v4401_v51, %s4280_s10  ;;  %v700_v61 = vpop.permute.xlu1 %699 }
  0xf3   : > { %746 = vst.msk [vmem:[#allocation2 + $0x35] sm:$0x1] %vm271_vm0, %v700_v61 }
  0xf4   : > { %v702_v62 = vpop.permute.xlu0 %701  ;;  %911 = vrot.lane.b32.xlu1 %v4406_v52, %s4280_s10 }
  0xf5   : > { %747 = vst.msk [vmem:[#allocation2 + $0x4d] sm:$0x1] %vm271_vm0, %v702_v62 }
  0xf6   : > { %913 = vrot.lane.b32.xlu0 %v4411_v53, %s4280_s10  ;;  %v704_v63 = vpop.permute.xlu1 %703 }
  0xf7   : > { %748 = vst.msk [vmem:[#allocation2 + $0x65] sm:$0x1] %vm271_vm0, %v704_v63 }
  0xf8   : > { %v706_v0 = vpop.permute.xlu0 %705  ;;  %915 = vrot.lane.b32.xlu1 %v4416_v54, %s4280_s10 }
  0xf9   : > { %749 = vst.msk [vmem:[#allocation2 + $0x7d] sm:$0x1] %vm271_vm0, %v706_v0 }
  0xfa   : > { %917 = vrot.lane.b32.xlu0 %v4431_v57, %s4280_s10  ;;  %v708_v1 = vpop.permute.xlu1 %707 }
  0xfb   : > { %750 = vst.msk [vmem:[#allocation2 + $0x95] sm:$0x1] %vm271_vm0, %v708_v1 }
  0xfc   : > { %v710_v2 = vpop.permute.xlu0 %709  ;;  %919 = vrot.lane.b32.xlu1 %v4436_v58, %s4280_s10 }
  0xfd   : > { %751 = vst.msk [vmem:[#allocation2 + $0xad] sm:$0x1] %vm271_vm0, %v710_v2 }
  0xfe   : > { %953 = vrot.lane.b32.xlu0 %v4347_v27, %s4281_s11  ;;  %v712_v3 = vpop.permute.xlu1 %711 }
  0xff   : > { %752 = vst.msk [vmem:[#allocation2 + $0xc5] sm:$0x1] %vm271_vm0, %v712_v3 }
 0x100   : > { %v714_v4 = vpop.permute.xlu0 %713  ;;  %955 = vrot.lane.b32.xlu1 %v4376_v44, %s4281_s11 }
 0x101   : > { %753 = vst.msk [vmem:[#allocation2 + $0xdd] sm:$0x1] %vm271_vm0, %v714_v4 }
 0x102   : > { %957 = vrot.lane.b32.xlu0 %v4354_v34, %s4281_s11  ;;  %v716_v5 = vpop.permute.xlu1 %715 }
 0x103   : > { %754 = vst.msk [vmem:[#allocation2 + $0xf5] sm:$0x1] %vm271_vm0, %v716_v5 }
 0x104   : > { %v718_v6 = vpop.permute.xlu0 %717  ;;  %959 = vrot.lane.b32.xlu1 %v4383_v47, %s4281_s11 }
 0x105   : > { %755 = vst.msk [vmem:[#allocation2 + $0x10d] sm:$0x1] %vm271_vm0, %v718_v6 }
 0x106   : > { %961 = vrot.lane.b32.xlu0 %v4390_v49, %s4281_s11  ;;  %v720_v7 = vpop.permute.xlu1 %719 }
 0x107   : > { %756 = vst.msk [vmem:[#allocation2 + $0x125] sm:$0x1] %vm271_vm0, %v720_v7 }
 0x108   : > { %v722_v8 = vpop.permute.xlu0 %721  ;;  %963 = vrot.lane.b32.xlu1 %v4396_v50, %s4281_s11 }
 0x109   : > { %757 = vst.msk [vmem:[#allocation2 + $0x13d] sm:$0x1] %vm271_vm0, %v722_v8 }
 0x10a   : > { %965 = vrot.lane.b32.xlu0 %v4421_v55, %s4281_s11  ;;  %v724_v9 = vpop.permute.xlu1 %723 }
 0x10b   : > { %758 = vst.msk [vmem:[#allocation2 + $0x155] sm:$0x1] %vm271_vm0, %v724_v9 }
 0x10c   : > { %v726_v10 = vpop.permute.xlu0 %725  ;;  %967 = vrot.lane.b32.xlu1 %v4426_v56, %s4281_s11 }
 0x10d   : > { %759 = vst.msk [vmem:[#allocation2 + $0x16d] sm:$0x1] %vm271_vm0, %v726_v10 }
 0x10e   : > { %969 = vrot.lane.b32.xlu0 %v4357_v35, %s4281_s11  ;;  %v728_v11 = vpop.permute.xlu1 %727 }
 0x10f   : > { %760 = vst.msk [vmem:[#allocation2 + $0x185] sm:$0x1] %vm271_vm0, %v728_v11 }
 0x110   : > { %v762_v13 = vpop.permute.xlu0 %761  ;;  %971 = vrot.lane.b32.xlu1 %v4367_v40, %s4281_s11 }
 0x111   : > { %809 = vst.msk [vmem:[#allocation2 + $0x1e] sm:$0x1] %vm271_vm0, %v762_v13 }
 0x112   : > { %973 = vrot.lane.b32.xlu0 %v4401_v51, %s4281_s11  ;;  %v764_v14 = vpop.permute.xlu1 %763 }
 0x113   : > { %810 = vst.msk [vmem:[#allocation2 + $0x36] sm:$0x1] %vm271_vm0, %v764_v14 }
 0x114   : > { %v766_v15 = vpop.permute.xlu0 %765  ;;  %975 = vrot.lane.b32.xlu1 %v4406_v52, %s4281_s11 }
 0x115   : > { %811 = vst.msk [vmem:[#allocation2 + $0x4e] sm:$0x1] %vm271_vm0, %v766_v15 }
 0x116   : > { %977 = vrot.lane.b32.xlu0 %v4411_v53, %s4281_s11  ;;  %v768_v16 = vpop.permute.xlu1 %767 }
 0x117   : > { %812 = vst.msk [vmem:[#allocation2 + $0x66] sm:$0x1] %vm271_vm0, %v768_v16 }
 0x118   : > { %v770_v17 = vpop.permute.xlu0 %769  ;;  %979 = vrot.lane.b32.xlu1 %v4416_v54, %s4281_s11 }
 0x119   : > { %813 = vst.msk [vmem:[#allocation2 + $0x7e] sm:$0x1] %vm271_vm0, %v770_v17 }
 0x11a   : > { %981 = vrot.lane.b32.xlu0 %v4431_v57, %s4281_s11  ;;  %v772_v18 = vpop.permute.xlu1 %771 }
 0x11b   : > { %814 = vst.msk [vmem:[#allocation2 + $0x96] sm:$0x1] %vm271_vm0, %v772_v18 }
 0x11c   : > { %v774_v19 = vpop.permute.xlu0 %773  ;;  %983 = vrot.lane.b32.xlu1 %v4436_v58, %s4281_s11 }
 0x11d   : > { %815 = vst.msk [vmem:[#allocation2 + $0xae] sm:$0x1] %vm271_vm0, %v774_v19 }
 0x11e   : > { %1017 = vrot.lane.b32.xlu0 %v4347_v27, %s4282_s12  ;;  %v776_v20 = vpop.permute.xlu1 %775 }
 0x11f   : > { %816 = vst.msk [vmem:[#allocation2 + $0xc6] sm:$0x1] %vm271_vm0, %v776_v20 }
 0x120   : > { %v778_v21 = vpop.permute.xlu0 %777  ;;  %1019 = vrot.lane.b32.xlu1 %v4376_v44, %s4282_s12 }
 0x121   : > { %817 = vst.msk [vmem:[#allocation2 + $0xde] sm:$0x1] %vm271_vm0, %v778_v21 }
 0x122   : > { %1021 = vrot.lane.b32.xlu0 %v4354_v34, %s4282_s12  ;;  %v780_v22 = vpop.permute.xlu1 %779 }
 0x123   : > { %818 = vst.msk [vmem:[#allocation2 + $0xf6] sm:$0x1] %vm271_vm0, %v780_v22 }
 0x124   : > { %v782_v23 = vpop.permute.xlu0 %781  ;;  %1023 = vrot.lane.b32.xlu1 %v4383_v47, %s4282_s12 }
 0x125   : > { %819 = vst.msk [vmem:[#allocation2 + $0x10e] sm:$0x1] %vm271_vm0, %v782_v23 }
 0x126   : > { %1025 = vrot.lane.b32.xlu0 %v4390_v49, %s4282_s12  ;;  %v784_v24 = vpop.permute.xlu1 %783 }
 0x127   : > { %820 = vst.msk [vmem:[#allocation2 + $0x126] sm:$0x1] %vm271_vm0, %v784_v24 }
 0x128   : > { %v786_v25 = vpop.permute.xlu0 %785  ;;  %1027 = vrot.lane.b32.xlu1 %v4396_v50, %s4282_s12 }
 0x129   : > { %821 = vst.msk [vmem:[#allocation2 + $0x13e] sm:$0x1] %vm271_vm0, %v786_v25 }
 0x12a   : > { %1029 = vrot.lane.b32.xlu0 %v4421_v55, %s4282_s12  ;;  %v788_v26 = vpop.permute.xlu1 %787 }
 0x12b   : > { %822 = vst.msk [vmem:[#allocation2 + $0x156] sm:$0x1] %vm271_vm0, %v788_v26 }
 0x12c   : > { %v790_v28 = vpop.permute.xlu0 %789  ;;  %1031 = vrot.lane.b32.xlu1 %v4426_v56, %s4282_s12 }
 0x12d   : > { %823 = vst.msk [vmem:[#allocation2 + $0x16e] sm:$0x1] %vm271_vm0, %v790_v28 }
 0x12e   : > { %1033 = vrot.lane.b32.xlu0 %v4357_v35, %s4282_s12  ;;  %v792_v29 = vpop.permute.xlu1 %791 }
 0x12f   : > { %824 = vst.msk [vmem:[#allocation2 + $0x186] sm:$0x1] %vm271_vm0, %v792_v29 }
 0x130   : > { %v826_v30 = vpop.permute.xlu0 %825  ;;  %1035 = vrot.lane.b32.xlu1 %v4367_v40, %s4282_s12 }
 0x131   : > { %873 = vst.msk [vmem:[#allocation2 + $0x1f] sm:$0x1] %vm271_vm0, %v826_v30 }
 0x132   : > { %1037 = vrot.lane.b32.xlu0 %v4401_v51, %s4282_s12  ;;  %v828_v31 = vpop.permute.xlu1 %827 }
 0x133   : > { %874 = vst.msk [vmem:[#allocation2 + $0x37] sm:$0x1] %vm271_vm0, %v828_v31 }
 0x134   : > { %v830_v32 = vpop.permute.xlu0 %829  ;;  %1039 = vrot.lane.b32.xlu1 %v4406_v52, %s4282_s12 }
 0x135   : > { %875 = vst.msk [vmem:[#allocation2 + $0x4f] sm:$0x1] %vm271_vm0, %v830_v32 }
 0x136   : > { %1041 = vrot.lane.b32.xlu0 %v4411_v53, %s4282_s12  ;;  %v832_v33 = vpop.permute.xlu1 %831 }
 0x137   : > { %876 = vst.msk [vmem:[#allocation2 + $0x67] sm:$0x1] %vm271_vm0, %v832_v33 }
 0x138   : > { %v834_v36 = vpop.permute.xlu0 %833  ;;  %1043 = vrot.lane.b32.xlu1 %v4416_v54, %s4282_s12  ;;  %v4854_v37 = vld [vmem:[#allocation2 + $0x18] sm:$0xff] }
 0x139   : > { %877 = vst.msk [vmem:[#allocation2 + $0x7f] sm:$0x1] %vm271_vm0, %v834_v36 }
 0x13a   : > { %1499 = vst.msk [vmem:[#allocation3 + $0x10] sm:$0xff] %vm262_vm1, %v4854_v37  ;;  %1045 = vrot.lane.b32.xlu0 %v4431_v57, %s4282_s12  ;;  %v836_v38 = vpop.permute.xlu1 %835  ;;  %v4861_v39 = vld [vmem:[#allocation2 + $0x30] sm:$0xff] }
 0x13b   : > { %878 = vst.msk [vmem:[#allocation2 + $0x97] sm:$0x1] %vm271_vm0, %v836_v38 }
 0x13c   : > { %1501 = vst.msk [vmem:[#allocation3 + $0x20] sm:$0xff] %vm262_vm1, %v4861_v39  ;;  %v838_v41 = vpop.permute.xlu0 %837  ;;  %1047 = vrot.lane.b32.xlu1 %v4436_v58, %s4282_s12  ;;  %v4868_v42 = vld [vmem:[#allocation2 + $0x48] sm:$0xff] }
 0x13d   : > { %879 = vst.msk [vmem:[#allocation2 + $0xaf] sm:$0x1] %vm271_vm0, %v838_v41 }
 0x13e   : > { %1503 = vst.msk [vmem:[#allocation3 + $0x30] sm:$0xff] %vm262_vm1, %v4868_v42  ;;  %1081 = vrot.lane.b32.xlu0 %v4347_v27, %s4283_s13  ;;  %v840_v43 = vpop.permute.xlu1 %839  ;;  %v4875_v45 = vld [vmem:[#allocation2 + $0x60] sm:$0xff] }
 0x13f   : > { %880 = vst.msk [vmem:[#allocation2 + $0xc7] sm:$0x1] %vm271_vm0, %v840_v43 }
 0x140   : > { %1505 = vst.msk [vmem:[#allocation3 + $0x40] sm:$0xff] %vm262_vm1, %v4875_v45  ;;  %v842_v46 = vpop.permute.xlu0 %841  ;;  %1083 = vrot.lane.b32.xlu1 %v4376_v44, %s4283_s13  ;;  %v4882_v48 = vld [vmem:[#allocation2 + $0x78] sm:$0xff] }
 0x141   : > { %881 = vst.msk [vmem:[#allocation2 + $0xdf] sm:$0x1] %vm271_vm0, %v842_v46 }
 0x142   : > { %1507 = vst.msk [vmem:[#allocation3 + $0x50] sm:$0xff] %vm262_vm1, %v4882_v48  ;;  %1085 = vrot.lane.b32.xlu0 %v4354_v34, %s4283_s13  ;;  %v844_v59 = vpop.permute.xlu1 %843  ;;  %v4889_v60 = vld [vmem:[#allocation2 + $0x90] sm:$0xff] }
 0x143   : > { %882 = vst.msk [vmem:[#allocation2 + $0xf7] sm:$0x1] %vm271_vm0, %v844_v59 }
 0x144   : > { %1509 = vst.msk [vmem:[#allocation3 + $0x60] sm:$0xff] %vm262_vm1, %v4889_v60  ;;  %v846_v61 = vpop.permute.xlu0 %845  ;;  %1087 = vrot.lane.b32.xlu1 %v4383_v47, %s4283_s13  ;;  %v4896_v62 = vld [vmem:[#allocation2 + $0xa8] sm:$0xff] }
 0x145   : > { %883 = vst.msk [vmem:[#allocation2 + $0x10f] sm:$0x1] %vm271_vm0, %v846_v61 }
 0x146   : > { %1511 = vst.msk [vmem:[#allocation3 + $0x70] sm:$0xff] %vm262_vm1, %v4896_v62  ;;  %1089 = vrot.lane.b32.xlu0 %v4390_v49, %s4283_s13  ;;  %v848_v63 = vpop.permute.xlu1 %847  ;;  %v4903_v0 = vld [vmem:[#allocation2 + $0xc0] sm:$0xff] }
 0x147   : > { %884 = vst.msk [vmem:[#allocation2 + $0x127] sm:$0x1] %vm271_vm0, %v848_v63 }
 0x148   : > { %1513 = vst.msk [vmem:[#allocation3 + $0x80] sm:$0xff] %vm262_vm1, %v4903_v0  ;;  %v850_v1 = vpop.permute.xlu0 %849  ;;  %1091 = vrot.lane.b32.xlu1 %v4396_v50, %s4283_s13  ;;  %v4910_v2 = vld [vmem:[#allocation2 + $0xd8] sm:$0xff] }
 0x149   : > { %885 = vst.msk [vmem:[#allocation2 + $0x13f] sm:$0x1] %vm271_vm0, %v850_v1 }
 0x14a   : > { %1515 = vst.msk [vmem:[#allocation3 + $0x90] sm:$0xff] %vm262_vm1, %v4910_v2  ;;  %1093 = vrot.lane.b32.xlu0 %v4421_v55, %s4283_s13  ;;  %v852_v3 = vpop.permute.xlu1 %851  ;;  %v4917_v4 = vld [vmem:[#allocation2 + $0xf0] sm:$0xff] }
 0x14b   : > { %886 = vst.msk [vmem:[#allocation2 + $0x157] sm:$0x1] %vm271_vm0, %v852_v3 }
 0x14c   : > { %1517 = vst.msk [vmem:[#allocation3 + $0xa0] sm:$0xff] %vm262_vm1, %v4917_v4  ;;  %v854_v5 = vpop.permute.xlu0 %853  ;;  %1095 = vrot.lane.b32.xlu1 %v4426_v56, %s4283_s13  ;;  %v4924_v6 = vld [vmem:[#allocation2 + $0x108] sm:$0xff] }
 0x14d   : > { %887 = vst.msk [vmem:[#allocation2 + $0x16f] sm:$0x1] %vm271_vm0, %v854_v5 }
 0x14e   : > { %1519 = vst.msk [vmem:[#allocation3 + $0xb0] sm:$0xff] %vm262_vm1, %v4924_v6  ;;  %1097 = vrot.lane.b32.xlu0 %v4357_v35, %s4283_s13  ;;  %v856_v7 = vpop.permute.xlu1 %855  ;;  %v4931_v8 = vld [vmem:[#allocation2 + $0x120] sm:$0xff] }
 0x14f   : > { %888 = vst.msk [vmem:[#allocation2 + $0x187] sm:$0x1] %vm271_vm0, %v856_v7 }
 0x150   : > { %1521 = vst.msk [vmem:[#allocation3 + $0xc0] sm:$0xff] %vm262_vm1, %v4931_v8  ;;  %v890_v9 = vpop.permute.xlu0 %889  ;;  %1099 = vrot.lane.b32.xlu1 %v4367_v40, %s4283_s13  ;;  %v4938_v10 = vld [vmem:[#allocation2 + $0x138] sm:$0xff] }
 0x151   : > { %937 = vst.msk [vmem:[#allocation2 + $0x20] sm:$0x1] %vm271_vm0, %v890_v9 }
 0x152   : > { %1523 = vst.msk [vmem:[#allocation3 + $0xd0] sm:$0xff] %vm262_vm1, %v4938_v10  ;;  %1101 = vrot.lane.b32.xlu0 %v4401_v51, %s4283_s13  ;;  %v892_v11 = vpop.permute.xlu1 %891  ;;  %v4945_v13 = vld [vmem:[#allocation2 + $0x150] sm:$0xff] }
 0x153   : > { %938 = vst.msk [vmem:[#allocation2 + $0x38] sm:$0x1] %vm271_vm0, %v892_v11 }
 0x154   : > { %1525 = vst.msk [vmem:[#allocation3 + $0xe0] sm:$0xff] %vm262_vm1, %v4945_v13  ;;  %v894_v14 = vpop.permute.xlu0 %893  ;;  %1103 = vrot.lane.b32.xlu1 %v4406_v52, %s4283_s13  ;;  %v4952_v15 = vld [vmem:[#allocation2 + $0x168] sm:$0xff] }
 0x155   : > { %939 = vst.msk [vmem:[#allocation2 + $0x50] sm:$0x1] %vm271_vm0, %v894_v14 }
 0x156   : > { %1527 = vst.msk [vmem:[#allocation3 + $0xf0] sm:$0xff] %vm262_vm1, %v4952_v15  ;;  %1105 = vrot.lane.b32.xlu0 %v4411_v53, %s4283_s13  ;;  %v896_v16 = vpop.permute.xlu1 %895 }
 0x157   : > { %940 = vst.msk [vmem:[#allocation2 + $0x68] sm:$0x1] %vm271_vm0, %v896_v16 }
 0x158   : > { %v898_v17 = vpop.permute.xlu0 %897  ;;  %1107 = vrot.lane.b32.xlu1 %v4416_v54, %s4283_s13 }
 0x159   : > { %941 = vst.msk [vmem:[#allocation2 + $0x80] sm:$0x1] %vm271_vm0, %v898_v17 }
 0x15a   : > { %1109 = vrot.lane.b32.xlu0 %v4431_v57, %s4283_s13  ;;  %v900_v18 = vpop.permute.xlu1 %899 }
 0x15b   : > { %942 = vst.msk [vmem:[#allocation2 + $0x98] sm:$0x1] %vm271_vm0, %v900_v18 }
 0x15c   : > { %v902_v19 = vpop.permute.xlu0 %901  ;;  %1111 = vrot.lane.b32.xlu1 %v4436_v58, %s4283_s13 }
 0x15d   : > { %943 = vst.msk [vmem:[#allocation2 + $0xb0] sm:$0x1] %vm271_vm0, %v902_v19 }
 0x15e   : > { %1145 = vrot.lane.b32.xlu0 %v4347_v27, %s4284_s14  ;;  %v904_v20 = vpop.permute.xlu1 %903 }
 0x15f   : > { %944 = vst.msk [vmem:[#allocation2 + $0xc8] sm:$0x1] %vm271_vm0, %v904_v20 }
 0x160   : > { %v906_v21 = vpop.permute.xlu0 %905  ;;  %1147 = vrot.lane.b32.xlu1 %v4376_v44, %s4284_s14 }
 0x161   : > { %945 = vst.msk [vmem:[#allocation2 + $0xe0] sm:$0x1] %vm271_vm0, %v906_v21 }
 0x162   : > { %1149 = vrot.lane.b32.xlu0 %v4354_v34, %s4284_s14  ;;  %v908_v22 = vpop.permute.xlu1 %907 }
 0x163   : > { %946 = vst.msk [vmem:[#allocation2 + $0xf8] sm:$0x1] %vm271_vm0, %v908_v22 }
 0x164   : > { %v910_v23 = vpop.permute.xlu0 %909  ;;  %1151 = vrot.lane.b32.xlu1 %v4383_v47, %s4284_s14 }
 0x165   : > { %947 = vst.msk [vmem:[#allocation2 + $0x110] sm:$0x1] %vm271_vm0, %v910_v23 }
 0x166   : > { %1153 = vrot.lane.b32.xlu0 %v4390_v49, %s4284_s14  ;;  %v912_v24 = vpop.permute.xlu1 %911 }
 0x167   : > { %948 = vst.msk [vmem:[#allocation2 + $0x128] sm:$0x1] %vm271_vm0, %v912_v24 }
 0x168   : > { %v914_v25 = vpop.permute.xlu0 %913  ;;  %1155 = vrot.lane.b32.xlu1 %v4396_v50, %s4284_s14 }
 0x169   : > { %949 = vst.msk [vmem:[#allocation2 + $0x140] sm:$0x1] %vm271_vm0, %v914_v25 }
 0x16a   : > { %1157 = vrot.lane.b32.xlu0 %v4421_v55, %s4284_s14  ;;  %v916_v26 = vpop.permute.xlu1 %915 }
 0x16b   : > { %950 = vst.msk [vmem:[#allocation2 + $0x158] sm:$0x1] %vm271_vm0, %v916_v26 }
 0x16c   : > { %v918_v28 = vpop.permute.xlu0 %917  ;;  %1159 = vrot.lane.b32.xlu1 %v4426_v56, %s4284_s14 }
 0x16d   : > { %951 = vst.msk [vmem:[#allocation2 + $0x170] sm:$0x1] %vm271_vm0, %v918_v28 }
 0x16e   : > { %1161 = vrot.lane.b32.xlu0 %v4357_v35, %s4284_s14  ;;  %v920_v29 = vpop.permute.xlu1 %919 }
 0x16f   : > { %952 = vst.msk [vmem:[#allocation2 + $0x188] sm:$0x1] %vm271_vm0, %v920_v29 }
 0x170   : > { %v954_v30 = vpop.permute.xlu0 %953  ;;  %1163 = vrot.lane.b32.xlu1 %v4367_v40, %s4284_s14 }
 0x171   : > { %1001 = vst.msk [vmem:[#allocation2 + $0x21] sm:$0x1] %vm271_vm0, %v954_v30 }
 0x172   : > { %1165 = vrot.lane.b32.xlu0 %v4401_v51, %s4284_s14  ;;  %v956_v31 = vpop.permute.xlu1 %955 }
 0x173   : > { %1002 = vst.msk [vmem:[#allocation2 + $0x39] sm:$0x1] %vm271_vm0, %v956_v31 }
 0x174   : > { %v958_v32 = vpop.permute.xlu0 %957  ;;  %1167 = vrot.lane.b32.xlu1 %v4406_v52, %s4284_s14 }
 0x175   : > { %1003 = vst.msk [vmem:[#allocation2 + $0x51] sm:$0x1] %vm271_vm0, %v958_v32 }
 0x176   : > { %1169 = vrot.lane.b32.xlu0 %v4411_v53, %s4284_s14  ;;  %v960_v33 = vpop.permute.xlu1 %959 }
 0x177   : > { %1004 = vst.msk [vmem:[#allocation2 + $0x69] sm:$0x1] %vm271_vm0, %v960_v33 }
 0x178   : > { %v962_v36 = vpop.permute.xlu0 %961  ;;  %1171 = vrot.lane.b32.xlu1 %v4416_v54, %s4284_s14 }
 0x179   : > { %1005 = vst.msk [vmem:[#allocation2 + $0x81] sm:$0x1] %vm271_vm0, %v962_v36 }
 0x17a   : > { %1173 = vrot.lane.b32.xlu0 %v4431_v57, %s4284_s14  ;;  %v964_v38 = vpop.permute.xlu1 %963 }
 0x17b   : > { %1006 = vst.msk [vmem:[#allocation2 + $0x99] sm:$0x1] %vm271_vm0, %v964_v38 }
 0x17c   : > { %v966_v41 = vpop.permute.xlu0 %965  ;;  %1175 = vrot.lane.b32.xlu1 %v4436_v58, %s4284_s14 }
 0x17d   : > { %1007 = vst.msk [vmem:[#allocation2 + $0xb1] sm:$0x1] %vm271_vm0, %v966_v41 }
 0x17e   : > { %1209 = vrot.lane.b32.xlu0 %v4347_v27, %s4285_s15  ;;  %v968_v43 = vpop.permute.xlu1 %967 }
 0x17f   : > { %1008 = vst.msk [vmem:[#allocation2 + $0xc9] sm:$0x1] %vm271_vm0, %v968_v43 }
 0x180   : > { %v970_v46 = vpop.permute.xlu0 %969  ;;  %1211 = vrot.lane.b32.xlu1 %v4376_v44, %s4285_s15 }
 0x181   : > { %1009 = vst.msk [vmem:[#allocation2 + $0xe1] sm:$0x1] %vm271_vm0, %v970_v46 }
 0x182   : > { %1213 = vrot.lane.b32.xlu0 %v4354_v34, %s4285_s15  ;;  %v972_v59 = vpop.permute.xlu1 %971 }
 0x183   : > { %1010 = vst.msk [vmem:[#allocation2 + $0xf9] sm:$0x1] %vm271_vm0, %v972_v59 }
 0x184   : > { %v974_v61 = vpop.permute.xlu0 %973  ;;  %1215 = vrot.lane.b32.xlu1 %v4383_v47, %s4285_s15 }
 0x185   : > { %1011 = vst.msk [vmem:[#allocation2 + $0x111] sm:$0x1] %vm271_vm0, %v974_v61 }
 0x186   : > { %1217 = vrot.lane.b32.xlu0 %v4390_v49, %s4285_s15  ;;  %v976_v63 = vpop.permute.xlu1 %975 }
 0x187   : > { %1012 = vst.msk [vmem:[#allocation2 + $0x129] sm:$0x1] %vm271_vm0, %v976_v63 }
 0x188   : > { %v978_v1 = vpop.permute.xlu0 %977  ;;  %1219 = vrot.lane.b32.xlu1 %v4396_v50, %s4285_s15 }
 0x189   : > { %1013 = vst.msk [vmem:[#allocation2 + $0x141] sm:$0x1] %vm271_vm0, %v978_v1 }
 0x18a   : > { %1221 = vrot.lane.b32.xlu0 %v4421_v55, %s4285_s15  ;;  %v980_v3 = vpop.permute.xlu1 %979 }
 0x18b   : > { %1014 = vst.msk [vmem:[#allocation2 + $0x159] sm:$0x1] %vm271_vm0, %v980_v3 }
 0x18c   : > { %v982_v5 = vpop.permute.xlu0 %981  ;;  %1223 = vrot.lane.b32.xlu1 %v4426_v56, %s4285_s15 }
 0x18d   : > { %1015 = vst.msk [vmem:[#allocation2 + $0x171] sm:$0x1] %vm271_vm0, %v982_v5 }
 0x18e   : > { %1225 = vrot.lane.b32.xlu0 %v4357_v35, %s4285_s15  ;;  %v984_v7 = vpop.permute.xlu1 %983 }
 0x18f   : > { %1016 = vst.msk [vmem:[#allocation2 + $0x189] sm:$0x1] %vm271_vm0, %v984_v7 }
 0x190   : > { %v1018_v9 = vpop.permute.xlu0 %1017  ;;  %1227 = vrot.lane.b32.xlu1 %v4367_v40, %s4285_s15 }
 0x191   : > { %1065 = vst.msk [vmem:[#allocation2 + $0x22] sm:$0x1] %vm271_vm0, %v1018_v9 }
 0x192   : > { %1229 = vrot.lane.b32.xlu0 %v4401_v51, %s4285_s15  ;;  %v1020_v11 = vpop.permute.xlu1 %1019 }
 0x193   : > { %1066 = vst.msk [vmem:[#allocation2 + $0x3a] sm:$0x1] %vm271_vm0, %v1020_v11 }
 0x194   : > { %v1022_v14 = vpop.permute.xlu0 %1021  ;;  %1231 = vrot.lane.b32.xlu1 %v4406_v52, %s4285_s15 }
 0x195   : > { %1067 = vst.msk [vmem:[#allocation2 + $0x52] sm:$0x1] %vm271_vm0, %v1022_v14 }
 0x196   : > { %1233 = vrot.lane.b32.xlu0 %v4411_v53, %s4285_s15  ;;  %v1024_v16 = vpop.permute.xlu1 %1023 }
 0x197   : > { %1068 = vst.msk [vmem:[#allocation2 + $0x6a] sm:$0x1] %vm271_vm0, %v1024_v16 }
 0x198   : > { %v1026_v17 = vpop.permute.xlu0 %1025  ;;  %1235 = vrot.lane.b32.xlu1 %v4416_v54, %s4285_s15 }
 0x199   : > { %1069 = vst.msk [vmem:[#allocation2 + $0x82] sm:$0x1] %vm271_vm0, %v1026_v17 }
 0x19a   : > { %1237 = vrot.lane.b32.xlu0 %v4431_v57, %s4285_s15  ;;  %v1028_v18 = vpop.permute.xlu1 %1027 }
 0x19b   : > { %1070 = vst.msk [vmem:[#allocation2 + $0x9a] sm:$0x1] %vm271_vm0, %v1028_v18 }
 0x19c   : > { %v1030_v19 = vpop.permute.xlu0 %1029  ;;  %1239 = vrot.lane.b32.xlu1 %v4436_v58, %s4285_s15 }
 0x19d   : > { %1071 = vst.msk [vmem:[#allocation2 + $0xb2] sm:$0x1] %vm271_vm0, %v1030_v19 }
 0x19e   : > { %1273 = vrot.lane.b32.xlu0 %v4347_v27, %s4286_s16  ;;  %v1032_v20 = vpop.permute.xlu1 %1031 }
 0x19f   : > { %1072 = vst.msk [vmem:[#allocation2 + $0xca] sm:$0x1] %vm271_vm0, %v1032_v20 }
 0x1a0   : > { %v1034_v21 = vpop.permute.xlu0 %1033  ;;  %1275 = vrot.lane.b32.xlu1 %v4376_v44, %s4286_s16 }
 0x1a1   : > { %1073 = vst.msk [vmem:[#allocation2 + $0xe2] sm:$0x1] %vm271_vm0, %v1034_v21 }
 0x1a2   : > { %1277 = vrot.lane.b32.xlu0 %v4354_v34, %s4286_s16  ;;  %v1036_v22 = vpop.permute.xlu1 %1035 }
 0x1a3   : > { %1074 = vst.msk [vmem:[#allocation2 + $0xfa] sm:$0x1] %vm271_vm0, %v1036_v22 }
 0x1a4   : > { %v1038_v23 = vpop.permute.xlu0 %1037  ;;  %1279 = vrot.lane.b32.xlu1 %v4383_v47, %s4286_s16 }
 0x1a5   : > { %1075 = vst.msk [vmem:[#allocation2 + $0x112] sm:$0x1] %vm271_vm0, %v1038_v23 }
 0x1a6   : > { %1281 = vrot.lane.b32.xlu0 %v4390_v49, %s4286_s16  ;;  %v1040_v24 = vpop.permute.xlu1 %1039 }
 0x1a7   : > { %1076 = vst.msk [vmem:[#allocation2 + $0x12a] sm:$0x1] %vm271_vm0, %v1040_v24 }
 0x1a8   : > { %v1042_v25 = vpop.permute.xlu0 %1041  ;;  %1283 = vrot.lane.b32.xlu1 %v4396_v50, %s4286_s16 }
 0x1a9   : > { %1077 = vst.msk [vmem:[#allocation2 + $0x142] sm:$0x1] %vm271_vm0, %v1042_v25 }
 0x1aa   : > { %1285 = vrot.lane.b32.xlu0 %v4421_v55, %s4286_s16  ;;  %v1044_v26 = vpop.permute.xlu1 %1043 }
 0x1ab   : > { %1078 = vst.msk [vmem:[#allocation2 + $0x15a] sm:$0x1] %vm271_vm0, %v1044_v26 }
 0x1ac   : > { %v1046_v28 = vpop.permute.xlu0 %1045  ;;  %1287 = vrot.lane.b32.xlu1 %v4426_v56, %s4286_s16 }
 0x1ad   : > { %1079 = vst.msk [vmem:[#allocation2 + $0x172] sm:$0x1] %vm271_vm0, %v1046_v28  ;;  %v5228_v28 = vld [vmem:[#allocation2 + $0x31] sm:$0xff] }
 0x1ae   : > { %1289 = vrot.lane.b32.xlu0 %v4357_v35, %s4286_s16  ;;  %v1048_v29 = vpop.permute.xlu1 %1047 }
 0x1af   : > { %1080 = vst.msk [vmem:[#allocation2 + $0x18a] sm:$0x1] %vm271_vm0, %v1048_v29 }
 0x1b0   : > { %v1082_v30 = vpop.permute.xlu0 %1081  ;;  %1291 = vrot.lane.b32.xlu1 %v4367_v40, %s4286_s16 }
 0x1b1   : > { %1129 = vst.msk [vmem:[#allocation2 + $0x23] sm:$0x1] %vm271_vm0, %v1082_v30 }
 0x1b2   : > { %1293 = vrot.lane.b32.xlu0 %v4401_v51, %s4286_s16  ;;  %v1084_v31 = vpop.permute.xlu1 %1083 }
 0x1b3   : > { %1130 = vst.msk [vmem:[#allocation2 + $0x3b] sm:$0x1] %vm271_vm0, %v1084_v31  ;;  %v5234_v31 = vld [vmem:[#allocation2 + $0x49] sm:$0xff] }
 0x1b4   : > { %v1086_v32 = vpop.permute.xlu0 %1085  ;;  %1295 = vrot.lane.b32.xlu1 %v4406_v52, %s4286_s16 }
 0x1b5   : > { %1131 = vst.msk [vmem:[#allocation2 + $0x53] sm:$0x1] %vm271_vm0, %v1086_v32 }
 0x1b6   : > { %1297 = vrot.lane.b32.xlu0 %v4411_v53, %s4286_s16  ;;  %v1088_v33 = vpop.permute.xlu1 %1087 }
 0x1b7   : > { %1132 = vst.msk [vmem:[#allocation2 + $0x6b] sm:$0x1] %vm271_vm0, %v1088_v33 }
 0x1b8   : > { %v1090_v36 = vpop.permute.xlu0 %1089  ;;  %1299 = vrot.lane.b32.xlu1 %v4416_v54, %s4286_s16 }
 0x1b9   : > { %1133 = vst.msk [vmem:[#allocation2 + $0x83] sm:$0x1] %vm271_vm0, %v1090_v36  ;;  %v5240_v36 = vld [vmem:[#allocation2 + $0x61] sm:$0xff] }
 0x1ba   : > { %1301 = vrot.lane.b32.xlu0 %v4431_v57, %s4286_s16  ;;  %v1092_v38 = vpop.permute.xlu1 %1091 }
 0x1bb   : > { %1134 = vst.msk [vmem:[#allocation2 + $0x9b] sm:$0x1] %vm271_vm0, %v1092_v38 }
 0x1bc   : > { %v1094_v41 = vpop.permute.xlu0 %1093  ;;  %1303 = vrot.lane.b32.xlu1 %v4436_v58, %s4286_s16 }
 0x1bd   : > { %1135 = vst.msk [vmem:[#allocation2 + $0xb3] sm:$0x1] %vm271_vm0, %v1094_v41 }
 0x1be   : > { %1337 = vrot.lane.b32.xlu0 %v4347_v27, %s4287_s17  ;;  %v1096_v43 = vpop.permute.xlu1 %1095 }
 0x1bf   : > { %1136 = vst.msk [vmem:[#allocation2 + $0xcb] sm:$0x1] %vm271_vm0, %v1096_v43  ;;  %v5246_v43 = vld [vmem:[#allocation2 + $0x79] sm:$0xff] }
 0x1c0   : > { %v1098_v46 = vpop.permute.xlu0 %1097  ;;  %1339 = vrot.lane.b32.xlu1 %v4376_v44, %s4287_s17 }
 0x1c1   : > { %1137 = vst.msk [vmem:[#allocation2 + $0xe3] sm:$0x1] %vm271_vm0, %v1098_v46 }
 0x1c2   : > { %1341 = vrot.lane.b32.xlu0 %v4354_v34, %s4287_s17  ;;  %v1100_v59 = vpop.permute.xlu1 %1099 }
 0x1c3   : > { %1138 = vst.msk [vmem:[#allocation2 + $0xfb] sm:$0x1] %vm271_vm0, %v1100_v59 }
 0x1c4   : > { %v1102_v61 = vpop.permute.xlu0 %1101  ;;  %1343 = vrot.lane.b32.xlu1 %v4383_v47, %s4287_s17 }
 0x1c5   : > { %1139 = vst.msk [vmem:[#allocation2 + $0x113] sm:$0x1] %vm271_vm0, %v1102_v61  ;;  %v5252_v61 = vld [vmem:[#allocation2 + $0x91] sm:$0xff] }
 0x1c6   : > { %1345 = vrot.lane.b32.xlu0 %v4390_v49, %s4287_s17  ;;  %v1104_v63 = vpop.permute.xlu1 %1103 }
 0x1c7   : > { %1140 = vst.msk [vmem:[#allocation2 + $0x12b] sm:$0x1] %vm271_vm0, %v1104_v63 }
 0x1c8   : > { %v1106_v1 = vpop.permute.xlu0 %1105  ;;  %1347 = vrot.lane.b32.xlu1 %v4396_v50, %s4287_s17 }
 0x1c9   : > { %1141 = vst.msk [vmem:[#allocation2 + $0x143] sm:$0x1] %vm271_vm0, %v1106_v1 }
 0x1ca   : > { %1349 = vrot.lane.b32.xlu0 %v4421_v55, %s4287_s17  ;;  %v1108_v3 = vpop.permute.xlu1 %1107 }
 0x1cb   : > { %1142 = vst.msk [vmem:[#allocation2 + $0x15b] sm:$0x1] %vm271_vm0, %v1108_v3  ;;  %v1543_v3 = vld [vmem:[#allocation2 + $0xa9] sm:$0xff] }
 0x1cc   : > { %v1110_v5 = vpop.permute.xlu0 %1109  ;;  %1351 = vrot.lane.b32.xlu1 %v4426_v56, %s4287_s17 }
 0x1cd   : > { %1143 = vst.msk [vmem:[#allocation2 + $0x173] sm:$0x1] %vm271_vm0, %v1110_v5 }
 0x1ce   : > { %1353 = vrot.lane.b32.xlu0 %v4357_v35, %s4287_s17  ;;  %v1112_v7 = vpop.permute.xlu1 %1111 }
 0x1cf   : > { %1144 = vst.msk [vmem:[#allocation2 + $0x18b] sm:$0x1] %vm271_vm0, %v1112_v7 }
 0x1d0   : > { %v1146_v9 = vpop.permute.xlu0 %1145  ;;  %1355 = vrot.lane.b32.xlu1 %v4367_v40, %s4287_s17 }
 0x1d1   : > { %1193 = vst.msk [vmem:[#allocation2 + $0x24] sm:$0x1] %vm271_vm0, %v1146_v9  ;;  %v1545_v9 = vld [vmem:[#allocation2 + $0xc1] sm:$0xff] }
 0x1d2   : > { %1357 = vrot.lane.b32.xlu0 %v4401_v51, %s4287_s17  ;;  %v1148_v11 = vpop.permute.xlu1 %1147 }
 0x1d3   : > { %1194 = vst.msk [vmem:[#allocation2 + $0x3c] sm:$0x1] %vm271_vm0, %v1148_v11 }
 0x1d4   : > { %v1150_v14 = vpop.permute.xlu0 %1149  ;;  %1359 = vrot.lane.b32.xlu1 %v4406_v52, %s4287_s17 }
 0x1d5   : > { %1195 = vst.msk [vmem:[#allocation2 + $0x54] sm:$0x1] %vm271_vm0, %v1150_v14 }
 0x1d6   : > { %1361 = vrot.lane.b32.xlu0 %v4411_v53, %s4287_s17  ;;  %v1152_v12 = vpop.permute.xlu1 %1151 }
 0x1d7   : > { %1196 = vst.msk [vmem:[#allocation2 + $0x6c] sm:$0x1] %vm271_vm0, %v1152_v12  ;;  %v1547_v12 = vld [vmem:[#allocation2 + $0xd9] sm:$0xff] }
 0x1d8   : > { %v1154_v16 = vpop.permute.xlu0 %1153  ;;  %1363 = vrot.lane.b32.xlu1 %v4416_v54, %s4287_s17 }
 0x1d9   : > { %1197 = vst.msk [vmem:[#allocation2 + $0x84] sm:$0x1] %vm271_vm0, %v1154_v16 }
 0x1da   : > { %1365 = vrot.lane.b32.xlu0 %v4431_v57, %s4287_s17  ;;  %v1156_v17 = vpop.permute.xlu1 %1155 }
 0x1db   : > { %1198 = vst.msk [vmem:[#allocation2 + $0x9c] sm:$0x1] %vm271_vm0, %v1156_v17 }
 0x1dc   : > { %v1158_v18 = vpop.permute.xlu0 %1157  ;;  %1367 = vrot.lane.b32.xlu1 %v4436_v58, %s4287_s17 }
 0x1dd   : > { %1199 = vst.msk [vmem:[#allocation2 + $0xb4] sm:$0x1] %vm271_vm0, %v1158_v18  ;;  %v1549_v18 = vld [vmem:[#allocation2 + $0xf1] sm:$0xff] }
 0x1de   : > { %1401 = vrot.lane.b32.xlu0 %v4347_v27, %s4288_s21  ;;  %v1160_v19 = vpop.permute.xlu1 %1159 }
 0x1df   : > { %1200 = vst.msk [vmem:[#allocation2 + $0xcc] sm:$0x1] %vm271_vm0, %v1160_v19 }
 0x1e0   : > { %v1162_v20 = vpop.permute.xlu0 %1161  ;;  %1403 = vrot.lane.b32.xlu1 %v4376_v44, %s4288_s21 }
 0x1e1   : > { %1201 = vst.msk [vmem:[#allocation2 + $0xe4] sm:$0x1] %vm271_vm0, %v1162_v20 }
 0x1e2   : > { %1405 = vrot.lane.b32.xlu0 %v4354_v34, %s4288_s21  ;;  %v1164_v21 = vpop.permute.xlu1 %1163 }
 0x1e3   : > { %1202 = vst.msk [vmem:[#allocation2 + $0xfc] sm:$0x1] %vm271_vm0, %v1164_v21  ;;  %v1551_v21 = vld [vmem:[#allocation2 + $0x109] sm:$0xff] }
 0x1e4   : > { %v1166_v22 = vpop.permute.xlu0 %1165  ;;  %1407 = vrot.lane.b32.xlu1 %v4383_v47, %s4288_s21 }
 0x1e5   : > { %1203 = vst.msk [vmem:[#allocation2 + $0x114] sm:$0x1] %vm271_vm0, %v1166_v22 }
 0x1e6   : > { %1409 = vrot.lane.b32.xlu0 %v4390_v49, %s4288_s21  ;;  %v1168_v27 = vpop.permute.xlu1 %1167 }
 0x1e7   : > { %1204 = vst.msk [vmem:[#allocation2 + $0x12c] sm:$0x1] %vm271_vm0, %v1168_v27 }
 0x1e8   : > { %v1170_v44 = vpop.permute.xlu0 %1169  ;;  %1411 = vrot.lane.b32.xlu1 %v4396_v50, %s4288_s21  ;;  %v1465_v50 = vld [vmem:[#allocation2] sm:$0xff] }
 0x1e9   : > { %1205 = vst.msk [vmem:[#allocation2 + $0x144] sm:$0x1] %vm271_vm0, %v1170_v44  ;;  %v1553_v44 = vld [vmem:[#allocation2 + $0x121] sm:$0xff] }
 0x1ea   : > { %1413 = vrot.lane.b32.xlu0 %v4421_v55, %s4288_s21  ;;  %v1172_v34 = vpop.permute.xlu1 %1171  ;;  %1497 = vst.msk [vmem:[#allocation3] sm:$0xff] %vm262_vm1, %v1465_v50 }
 0x1eb   : > { %1206 = vst.msk [vmem:[#allocation2 + $0x15c] sm:$0x1] %vm271_vm0, %v1172_v34 }
 0x1ec   : > { %v1174_v47 = vpop.permute.xlu0 %1173  ;;  %1415 = vrot.lane.b32.xlu1 %v4426_v56, %s4288_s21 }
 0x1ed   : > { %1207 = vst.msk [vmem:[#allocation2 + $0x174] sm:$0x1] %vm271_vm0, %v1174_v47 }
 0x1ee   : > { %1417 = vrot.lane.b32.xlu0 %v4357_v35, %s4288_s21  ;;  %v1176_v49 = vpop.permute.xlu1 %1175 }
 0x1ef   : > { %1208 = vst.msk [vmem:[#allocation2 + $0x18c] sm:$0x1] %vm271_vm0, %v1176_v49  ;;  %v1555_v49 = vld [vmem:[#allocation2 + $0x139] sm:$0xff] }
 0x1f0   : > { %v1210_v23 = vpop.permute.xlu0 %1209  ;;  %1419 = vrot.lane.b32.xlu1 %v4367_v40, %s4288_s21 }
 0x1f1   : > { %1257 = vst.msk [vmem:[#allocation2 + $0x25] sm:$0x1] %vm271_vm0, %v1210_v23 }
 0x1f2   : > { %1421 = vrot.lane.b32.xlu0 %v4401_v51, %s4288_s21  ;;  %v1212_v55 = vpop.permute.xlu1 %1211 }
 0x1f3   : > { %1258 = vst.msk [vmem:[#allocation2 + $0x3d] sm:$0x1] %vm271_vm0, %v1212_v55  ;;  %v1557_v55 = vld [vmem:[#allocation2 + $0x151] sm:$0xff] }
 0x1f4   : > { %v1214_v56 = vpop.permute.xlu0 %1213  ;;  %1423 = vrot.lane.b32.xlu1 %v4406_v52, %s4288_s21  ;;  %v1529_v52 = vld [vmem:[#allocation2 + $0x1] sm:$0xff] }
 0x1f5   : > { %1259 = vst.msk [vmem:[#allocation2 + $0x55] sm:$0x1] %vm271_vm0, %v1214_v56 }
 0x1f6   : > { %1425 = vrot.lane.b32.xlu0 %v4411_v53, %s4288_s21  ;;  %v1216_v35 = vpop.permute.xlu1 %1215  ;;  %v1530_v53 = vld [vmem:[#allocation2 + $0x9] sm:$0xff] }
 0x1f7   : > { %1260 = vst.msk [vmem:[#allocation2 + $0x6d] sm:$0x1] %vm271_vm0, %v1216_v35 }
 0x1f8   : > { %v1218_v40 = vpop.permute.xlu0 %1217  ;;  %1427 = vrot.lane.b32.xlu1 %v4416_v54, %s4288_s21 }
 0x1f9   : > { %1261 = vst.msk [vmem:[#allocation2 + $0x85] sm:$0x1] %vm271_vm0, %v1218_v40 }
 0x1fa   : > { %1429 = vrot.lane.b32.xlu0 %v4431_v57, %s4288_s21  ;;  %v1220_v51 = vpop.permute.xlu1 %1219  ;;  %v5222_v57 = vld [vmem:[#allocation2 + $0x19] sm:$0xff] }
 0x1fb   : > { %1262 = vst.msk [vmem:[#allocation2 + $0x9d] sm:$0x1] %vm271_vm0, %v1220_v51  ;;  %v1559_v51 = vld [vmem:[#allocation2 + $0x169] sm:$0xff] }
 0x1fc   : > { %v1222_v24 = vpop.permute.xlu0 %1221  ;;  %1431 = vrot.lane.b32.xlu1 %v4436_v58, %s4288_s21 }
 0x1fd   : > { %1263 = vst.msk [vmem:[#allocation2 + $0xb5] sm:$0x1] %vm271_vm0, %v1222_v24 }
 0x1fe   : > { %1593 = vrot.lane.b32.xlu0 %v1529_v52, %s4288_s21  ;;  %v1224_v25 = vpop.permute.xlu1 %1223 }
 0x1ff   : > { %1264 = vst.msk [vmem:[#allocation2 + $0xcd] sm:$0x1] %vm271_vm0, %v1224_v25 }
 0x200   : > { %v1226_v54 = vpop.permute.xlu0 %1225  ;;  %1595 = vrot.lane.b32.xlu1 %v1530_v53, %s4288_s21  ;;  %v1722_v53 = vld [vmem:[#allocation2 + $0x2] sm:$0xff] }
 0x201   : > { %1265 = vst.msk [vmem:[#allocation2 + $0xe5] sm:$0x1] %vm271_vm0, %v1226_v54 }
 0x202   : > { %1597 = vrot.lane.b32.xlu0 %v5222_v57, %s4288_s21  ;;  %v1228_v26 = vpop.permute.xlu1 %1227 }
 0x203   : > { %1266 = vst.msk [vmem:[#allocation2 + $0xfd] sm:$0x1] %vm271_vm0, %v1228_v26 }
 0x204   : > { %v1230_v58 = vpop.permute.xlu0 %1229 }
 0x205   : > { %1267 = vst.msk [vmem:[#allocation2 + $0x115] sm:$0x1] %vm271_vm0, %v1230_v58 }
 0x206   : > { %1601 = vrot.lane.b32.xlu0 %v5228_v28, %s4288_s21  ;;  %v1232_v29 = vpop.permute.xlu1 %1231 }
 0x207   : > { %1268 = vst.msk [vmem:[#allocation2 + $0x12d] sm:$0x1] %vm271_vm0, %v1232_v29 }
 0x208   : > { %v1234_v30 = vpop.permute.xlu0 %1233 }
 0x209   : > { %1269 = vst.msk [vmem:[#allocation2 + $0x145] sm:$0x1] %vm271_vm0, %v1234_v30 }
 0x20a   : > { %1605 = vrot.lane.b32.xlu0 %v5234_v31, %s4288_s21  ;;  %v1236_v32 = vpop.permute.xlu1 %1235 }
 0x20b   : > { %1270 = vst.msk [vmem:[#allocation2 + $0x15d] sm:$0x1] %vm271_vm0, %v1236_v32  ;;  %v5306_v32 = vld [vmem:[#allocation2 + $0x1a] sm:$0xff] }
 0x20c   : > { %v1238_v33 = vpop.permute.xlu0 %1237 }
 0x20d   : > { %1271 = vst.msk [vmem:[#allocation2 + $0x175] sm:$0x1] %vm271_vm0, %v1238_v33 }
 0x20e   : > { %1609 = vrot.lane.b32.xlu0 %v5240_v36, %s4288_s21  ;;  %v1240_v38 = vpop.permute.xlu1 %1239 }
 0x20f   : > { %1272 = vst.msk [vmem:[#allocation2 + $0x18d] sm:$0x1] %vm271_vm0, %v1240_v38 }
 0x210   : > { %v1274_v41 = vpop.permute.xlu0 %1273 }
 0x211   : > { %1321 = vst.msk [vmem:[#allocation2 + $0x26] sm:$0x1] %vm271_vm0, %v1274_v41 }
 0x212   : > { %1613 = vrot.lane.b32.xlu0 %v5246_v43, %s4288_s21  ;;  %v1276_v46 = vpop.permute.xlu1 %1275 }
 0x213   : > { %1322 = vst.msk [vmem:[#allocation2 + $0x3e] sm:$0x1] %vm271_vm0, %v1276_v46 }
 0x214   : > { %v1278_v59 = vpop.permute.xlu0 %1277 }
 0x215   : > { %1323 = vst.msk [vmem:[#allocation2 + $0x56] sm:$0x1] %vm271_vm0, %v1278_v59  ;;  %v5320_v59 = vld [vmem:[#allocation2 + $0x32] sm:$0xff] }
 0x216   : > { %1617 = vrot.lane.b32.xlu0 %v5252_v61, %s4288_s21  ;;  %v1280_v63 = vpop.permute.xlu1 %1279 }
 0x217   : > { %1324 = vst.msk [vmem:[#allocation2 + $0x6e] sm:$0x1] %vm271_vm0, %v1280_v63 }
 0x218   : > { %v1282_v1 = vpop.permute.xlu0 %1281 }
 0x219   : > { %1325 = vst.msk [vmem:[#allocation2 + $0x86] sm:$0x1] %vm271_vm0, %v1282_v1  ;;  %v1466_v1 = vld [vmem:[#allocation2 + $0x8] sm:$0xff] }
 0x21a   : > { %1621 = vrot.lane.b32.xlu0 %v1543_v3, %s4288_s21  ;;  %v1284_v5 = vpop.permute.xlu1 %1283  ;;  %1498 = vst.msk [vmem:[#allocation3 + $0x8] sm:$0xff] %vm262_vm1, %v1466_v1 }
 0x21b   : > { %1326 = vst.msk [vmem:[#allocation2 + $0x9e] sm:$0x1] %vm271_vm0, %v1284_v5 }
 0x21c   : > { %v1286_v7 = vpop.permute.xlu0 %1285 }
 0x21d   : > { %1327 = vst.msk [vmem:[#allocation2 + $0xb6] sm:$0x1] %vm271_vm0, %v1286_v7 }
 0x21e   : > { %v1288_v11 = vpop.permute.xlu1 %1287  ;;  %1625 = vrot.lane.b32.xlu0 %v1545_v9, %s4288_s21  ;;  %v1728_v9 = vld [vmem:[#allocation2 + $0x4a] sm:$0xff] }
 0x21f   : > { %1328 = vst.msk [vmem:[#allocation2 + $0xce] sm:$0x1] %vm271_vm0, %v1288_v11 }
 0x220   : > { %v1290_v14 = vpop.permute.xlu0 %1289 }
 0x221   : > { %1329 = vst.msk [vmem:[#allocation2 + $0xe6] sm:$0x1] %vm271_vm0, %v1290_v14 }
 0x222   : > { %v1292_v16 = vpop.permute.xlu1 %1291  ;;  %1629 = vrot.lane.b32.xlu0 %v1547_v12, %s4288_s21 }
 0x223   : > { %1330 = vst.msk [vmem:[#allocation2 + $0xfe] sm:$0x1] %vm271_vm0, %v1292_v16 }
 0x224   : > { %v1294_v17 = vpop.permute.xlu0 %1293 }
 0x225   : > { %1331 = vst.msk [vmem:[#allocation2 + $0x116] sm:$0x1] %vm271_vm0, %v1294_v17  ;;  %v1730_v17 = vld [vmem:[#allocation2 + $0x62] sm:$0xff] }
 0x226   : > { %v1296_v19 = vpop.permute.xlu1 %1295  ;;  %1633 = vrot.lane.b32.xlu0 %v1549_v18, %s4288_s21 }
 0x227   : > { %1332 = vst.msk [vmem:[#allocation2 + $0x12e] sm:$0x1] %vm271_vm0, %v1296_v19 }
 0x228   : > { %v1298_v20 = vpop.permute.xlu0 %1297 }
 0x229   : > { %1333 = vst.msk [vmem:[#allocation2 + $0x146] sm:$0x1] %vm271_vm0, %v1298_v20 }
 0x22a   : > { %v1300_v22 = vpop.permute.xlu1 %1299  ;;  %1637 = vrot.lane.b32.xlu0 %v1551_v21, %s4288_s21 }
 0x22b   : > { %1334 = vst.msk [vmem:[#allocation2 + $0x15e] sm:$0x1] %vm271_vm0, %v1300_v22  ;;  %v1732_v22 = vld [vmem:[#allocation2 + $0x7a] sm:$0xff] }
 0x22c   : > { %v1302_v27 = vpop.permute.xlu0 %1301 }
 0x22d   : > { %1335 = vst.msk [vmem:[#allocation2 + $0x176] sm:$0x1] %vm271_vm0, %v1302_v27 }
 0x22e   : > { %v1304_v34 = vpop.permute.xlu1 %1303  ;;  %1641 = vrot.lane.b32.xlu0 %v1553_v44, %s4288_s21 }
 0x22f   : > { %1336 = vst.msk [vmem:[#allocation2 + $0x18e] sm:$0x1] %vm271_vm0, %v1304_v34 }
 0x230   : > { %v1338_v47 = vpop.permute.xlu0 %1337 }
 0x231   : > { %1385 = vst.msk [vmem:[#allocation2 + $0x27] sm:$0x1] %vm271_vm0, %v1338_v47 }
 0x232   : > { %v1340_v50 = vpop.permute.xlu1 %1339  ;;  %1645 = vrot.lane.b32.xlu0 %v1555_v49, %s4288_s21  ;;  %v1734_v49 = vld [vmem:[#allocation2 + $0x92] sm:$0xff] }
 0x233   : > { %1386 = vst.msk [vmem:[#allocation2 + $0x3f] sm:$0x1] %vm271_vm0, %v1340_v50 }
 0x234   : > { %v1342_v23 = vpop.permute.xlu0 %1341 }
 0x235   : > { %1387 = vst.msk [vmem:[#allocation2 + $0x57] sm:$0x1] %vm271_vm0, %v1342_v23 }
 0x236   : > { %v1344_v56 = vpop.permute.xlu1 %1343  ;;  %1649 = vrot.lane.b32.xlu0 %v1557_v55, %s4288_s21 }
 0x237   : > { %1388 = vst.msk [vmem:[#allocation2 + $0x6f] sm:$0x1] %vm271_vm0, %v1344_v56  ;;  %v1736_v56 = vld [vmem:[#allocation2 + $0xaa] sm:$0xff] }
 0x238   : > { %v1346_v35 = vpop.permute.xlu0 %1345  ;;  %v5281_v40 = vld [vmem:[#allocation2 + $0x20] sm:$0xff] }
 0x239   : > { %1389 = vst.msk [vmem:[#allocation2 + $0x87] sm:$0x1] %vm271_vm0, %v1346_v35 }
 0x23a   : > { %1500 = vst.msk [vmem:[#allocation3 + $0x18] sm:$0xff] %vm262_vm1, %v5281_v40  ;;  %v1348_v52 = vpop.permute.xlu1 %1347  ;;  %1653 = vrot.lane.b32.xlu0 %v1559_v51, %s4288_s21  ;;  %v5287_v24 = vld [vmem:[#allocation2 + $0x38] sm:$0xff] }
 0x23b   : > { %1390 = vst.msk [vmem:[#allocation2 + $0x9f] sm:$0x1] %vm271_vm0, %v1348_v52 }
 0x23c   : > { %1502 = vst.msk [vmem:[#allocation3 + $0x28] sm:$0xff] %vm262_vm1, %v5287_v24  ;;  %v1350_v25 = vpop.permute.xlu0 %1349  ;;  %v5292_v54 = vld [vmem:[#allocation2 + $0x50] sm:$0xff] }
 0x23d   : > { %1391 = vst.msk [vmem:[#allocation2 + $0xb7] sm:$0x1] %vm271_vm0, %v1350_v25 }
 0x23e   : > { %1504 = vst.msk [vmem:[#allocation3 + $0x38] sm:$0xff] %vm262_vm1, %v5292_v54  ;;  %v1352_v26 = vpop.permute.xlu1 %1351  ;;  %1786 = vrot.lane.b32.xlu0 %v1722_v53, %s4287_s17  ;;  %v5298_v58 = vld [vmem:[#allocation2 + $0x68] sm:$0xff] }
 0x23f   : > { %1392 = vst.msk [vmem:[#allocation2 + $0xcf] sm:$0x1] %vm271_vm0, %v1352_v26  ;;  %v1738_v53 = vld [vmem:[#allocation2 + $0xc2] sm:$0xff] }
 0x240   : > { %1506 = vst.msk [vmem:[#allocation3 + $0x48] sm:$0xff] %vm262_vm1, %v5298_v58  ;;  %v1354_v29 = vpop.permute.xlu0 %1353  ;;  %v5303_v30 = vld [vmem:[#allocation2 + $0x80] sm:$0xff] }
 0x241   : > { %1393 = vst.msk [vmem:[#allocation2 + $0xe7] sm:$0x1] %vm271_vm0, %v1354_v29 }
 0x242   : > { %1508 = vst.msk [vmem:[#allocation3 + $0x58] sm:$0xff] %vm262_vm1, %v5303_v30  ;;  %v1356_v33 = vpop.permute.xlu1 %1355  ;;  %1790 = vrot.lane.b32.xlu0 %v5306_v32, %s4287_s17  ;;  %v5312_v38 = vld [vmem:[#allocation2 + $0x98] sm:$0xff] }
 0x243   : > { %1394 = vst.msk [vmem:[#allocation2 + $0xff] sm:$0x1] %vm271_vm0, %v1356_v33  ;;  %v5391_v33 = vld [vmem:[#allocation2 + $0xda] sm:$0xff] }
 0x244   : > { %1510 = vst.msk [vmem:[#allocation3 + $0x68] sm:$0xff] %vm262_vm1, %v5312_v38  ;;  %v1358_v41 = vpop.permute.xlu0 %1357  ;;  %v5317_v46 = vld [vmem:[#allocation2 + $0xb0] sm:$0xff] }
 0x245   : > { %1395 = vst.msk [vmem:[#allocation2 + $0x117] sm:$0x1] %vm271_vm0, %v1358_v41 }
 0x246   : > { %1512 = vst.msk [vmem:[#allocation3 + $0x78] sm:$0xff] %vm262_vm1, %v5317_v46  ;;  %v1360_v63 = vpop.permute.xlu1 %1359  ;;  %1794 = vrot.lane.b32.xlu0 %v5320_v59, %s4287_s17  ;;  %v5326_v3 = vld [vmem:[#allocation2 + $0xc8] sm:$0xff] }
 0x247   : > { %1396 = vst.msk [vmem:[#allocation2 + $0x12f] sm:$0x1] %vm271_vm0, %v1360_v63 }
 0x248   : > { %1514 = vst.msk [vmem:[#allocation3 + $0x88] sm:$0xff] %vm262_vm1, %v5326_v3  ;;  %v1362_v5 = vpop.permute.xlu0 %1361  ;;  %v5332_v7 = vld [vmem:[#allocation2 + $0xe0] sm:$0xff] }
 0x249   : > { %1397 = vst.msk [vmem:[#allocation2 + $0x147] sm:$0x1] %vm271_vm0, %v1362_v5  ;;  %v5401_v5 = vld [vmem:[#allocation2 + $0xf2] sm:$0xff] }
 0x24a   : > { %1516 = vst.msk [vmem:[#allocation3 + $0x98] sm:$0xff] %vm262_vm1, %v5332_v7  ;;  %v1364_v11 = vpop.permute.xlu1 %1363  ;;  %1798 = vrot.lane.b32.xlu0 %v1728_v9, %s4287_s17  ;;  %v5338_v14 = vld [vmem:[#allocation2 + $0xf8] sm:$0xff] }
 0x24b   : > { %1398 = vst.msk [vmem:[#allocation2 + $0x15f] sm:$0x1] %vm271_vm0, %v1364_v11 }
 0x24c   : > { %1518 = vst.msk [vmem:[#allocation3 + $0xa8] sm:$0xff] %vm262_vm1, %v5338_v14  ;;  %v1366_v12 = vpop.permute.xlu0 %1365  ;;  %v5343_v16 = vld [vmem:[#allocation2 + $0x110] sm:$0xff] }
 0x24d   : > { %1399 = vst.msk [vmem:[#allocation2 + $0x177] sm:$0x1] %vm271_vm0, %v1366_v12 }
 0x24e   : > { %1520 = vst.msk [vmem:[#allocation3 + $0xb8] sm:$0xff] %vm262_vm1, %v5343_v16  ;;  %v1368_v18 = vpop.permute.xlu1 %1367  ;;  %1802 = vrot.lane.b32.xlu0 %v1730_v17, %s4287_s17  ;;  %v5349_v19 = vld [vmem:[#allocation2 + $0x128] sm:$0xff] }
 0x24f   : > { %1400 = vst.msk [vmem:[#allocation2 + $0x18f] sm:$0x1] %vm271_vm0, %v1368_v18  ;;  %v1744_v17 = vld [vmem:[#allocation2 + $0x10a] sm:$0xff] }
 0x250   : > { %1522 = vst.msk [vmem:[#allocation3 + $0xc8] sm:$0xff] %vm262_vm1, %v5349_v19  ;;  %v1402_v20 = vpop.permute.xlu0 %1401  ;;  %v5354_v21 = vld [vmem:[#allocation2 + $0x140] sm:$0xff] }
 0x251   : > { %1449 = vst.msk [vmem:[#allocation2 + $0x28] sm:$0x1] %vm271_vm0, %v1402_v20 }
 0x252   : > { %1524 = vst.msk [vmem:[#allocation3 + $0xd8] sm:$0xff] %vm262_vm1, %v5354_v21  ;;  %v1404_v27 = vpop.permute.xlu1 %1403  ;;  %1806 = vrot.lane.b32.xlu0 %v1732_v22, %s4287_s17  ;;  %v5360_v44 = vld [vmem:[#allocation2 + $0x158] sm:$0xff] }
 0x253   : > { %1450 = vst.msk [vmem:[#allocation2 + $0x40] sm:$0x1] %vm271_vm0, %v1404_v27  ;;  %v1746_v27 = vld [vmem:[#allocation2 + $0x122] sm:$0xff] }
 0x254   : > { %1526 = vst.msk [vmem:[#allocation3 + $0xe8] sm:$0xff] %vm262_vm1, %v5360_v44  ;;  %v1406_v34 = vpop.permute.xlu0 %1405  ;;  %v5365_v47 = vld [vmem:[#allocation2 + $0x170] sm:$0xff] }
 0x255   : > { %1451 = vst.msk [vmem:[#allocation2 + $0x58] sm:$0x1] %vm271_vm0, %v1406_v34 }
 0x256   : > { %1528 = vst.msk [vmem:[#allocation3 + $0xf8] sm:$0xff] %vm262_vm1, %v5365_v47  ;;  %v1408_v50 = vpop.permute.xlu1 %1407  ;;  %1810 = vrot.lane.b32.xlu0 %v1734_v49, %s4287_s17 }
 0x257   : > { %1452 = vst.msk [vmem:[#allocation2 + $0x70] sm:$0x1] %vm271_vm0, %v1408_v50 }
 0x258   : > { %v1410_v23 = vpop.permute.xlu0 %1409  ;;  %v5372_v55 = vld [vmem:[#allocation2 + $0x21] sm:$0xff] }
 0x259   : > { %1453 = vst.msk [vmem:[#allocation2 + $0x88] sm:$0x1] %vm271_vm0, %v1410_v23  ;;  %1599 = vrot.lane.b32.xlu1 %v5372_v55, %s4288_s21  ;;  %v5419_v23 = vld [vmem:[#allocation2 + $0x13a] sm:$0xff] }
 0x25a   : > { %v1412_v35 = vpop.permute.xlu1 %1411  ;;  %1814 = vrot.lane.b32.xlu0 %v1736_v56, %s4287_s17  ;;  %v5379_v52 = vld [vmem:[#allocation2 + $0x39] sm:$0xff] }
 0x25b   : > { %1454 = vst.msk [vmem:[#allocation2 + $0xa0] sm:$0x1] %vm271_vm0, %v1412_v35 }
 0x25c   : > { %v1414_v51 = vpop.permute.xlu0 %1413  ;;  %v5386_v29 = vld [vmem:[#allocation2 + $0x51] sm:$0xff] }
 0x25d   : > { %1455 = vst.msk [vmem:[#allocation2 + $0xb8] sm:$0x1] %vm271_vm0, %v1414_v51  ;;  %1603 = vrot.lane.b32.xlu1 %v5379_v52, %s4288_s21 }
 0x25e   : > { %v1416_v25 = vpop.permute.xlu1 %1415  ;;  %1818 = vrot.lane.b32.xlu0 %v1738_v53, %s4287_s17  ;;  %v5396_v1 = vld [vmem:[#allocation2 + $0x69] sm:$0xff]  ;;  %v1750_v53 = vld [vmem:[#allocation2 + $0x152] sm:$0xff] }
 0x25f   : > { %1456 = vst.msk [vmem:[#allocation2 + $0xd0] sm:$0x1] %vm271_vm0, %v1416_v25 }
 0x260   : > { %v1418_v26 = vpop.permute.xlu0 %1417  ;;  %v5406_v12 = vld [vmem:[#allocation2 + $0x81] sm:$0xff] }
 0x261   : > { %1457 = vst.msk [vmem:[#allocation2 + $0xe8] sm:$0x1] %vm271_vm0, %v1418_v26  ;;  %1607 = vrot.lane.b32.xlu1 %v5386_v29, %s4288_s21 }
 0x262   : > { %v1420_v41 = vpop.permute.xlu1 %1419  ;;  %1822 = vrot.lane.b32.xlu0 %v5391_v33, %s4287_s17  ;;  %v1542_v22 = vld [vmem:[#allocation2 + $0x99] sm:$0xff] }
 0x263   : > { %1458 = vst.msk [vmem:[#allocation2 + $0x100] sm:$0x1] %vm271_vm0, %v1420_v41  ;;  %v1752_v41 = vld [vmem:[#allocation2 + $0x16a] sm:$0xff] }
 0x264   : > { %v1422_v63 = vpop.permute.xlu0 %1421  ;;  %v1544_v50 = vld [vmem:[#allocation2 + $0xb1] sm:$0xff] }
 0x265   : > { %1459 = vst.msk [vmem:[#allocation2 + $0x118] sm:$0x1] %vm271_vm0, %v1422_v63  ;;  %1611 = vrot.lane.b32.xlu1 %v5396_v1, %s4288_s21 }
 0x266   : > { %v1424_v9 = vpop.permute.xlu1 %1423  ;;  %1826 = vrot.lane.b32.xlu0 %v5401_v5, %s4287_s17  ;;  %v1546_v51 = vld [vmem:[#allocation2 + $0xc9] sm:$0xff] }
 0x267   : > { %1460 = vst.msk [vmem:[#allocation2 + $0x130] sm:$0x1] %vm271_vm0, %v1424_v9 }
 0x268   : > { %v1426_v11 = vpop.permute.xlu0 %1425  ;;  %v5427_v26 = vld [vmem:[#allocation2 + $0xe1] sm:$0xff] }
 0x269   : > { %1461 = vst.msk [vmem:[#allocation2 + $0x148] sm:$0x1] %vm271_vm0, %v1426_v11  ;;  %1615 = vrot.lane.b32.xlu1 %v5406_v12, %s4288_s21 }
 0x26a   : > { %v1428_v18 = vpop.permute.xlu1 %1427  ;;  %1830 = vrot.lane.b32.xlu0 %v1744_v17, %s4287_s17  ;;  %v5433_v9 = vld [vmem:[#allocation2 + $0xf9] sm:$0xff] }
 0x26b   : > { %1462 = vst.msk [vmem:[#allocation2 + $0x160] sm:$0x1] %vm271_vm0, %v1428_v18 }
 0x26c   : > { %v1430_v20 = vpop.permute.xlu0 %1429  ;;  %v5440_v17 = vld [vmem:[#allocation2 + $0x111] sm:$0xff] }
 0x26d   : > { %1463 = vst.msk [vmem:[#allocation2 + $0x178] sm:$0x1] %vm271_vm0, %v1430_v20  ;;  %1619 = vrot.lane.b32.xlu1 %v1542_v22, %s4288_s21 }
 0x26e   : > { %v1432_v34 = vpop.permute.xlu1 %1431  ;;  %1834 = vrot.lane.b32.xlu0 %v1746_v27, %s4287_s17  ;;  %v5447_v20 = vld [vmem:[#allocation2 + $0x129] sm:$0xff] }
 0x26f   : > { %1464 = vst.msk [vmem:[#allocation2 + $0x190] sm:$0x1] %vm271_vm0, %v1432_v34  ;;  %vm3571_vm0 = vcmask 1044484  }
 0x270   : > { %v1594_v49 = vpop.permute.xlu0 %1593  ;;  %v5454_v22 = vld [vmem:[#allocation2 + $0x141] sm:$0xff] }
 0x271   : > { %1690 = vst.msk [vmem:[#allocation3] sm:$0xff] %vm1689_vm3, %v1594_v49  ;;  %1623 = vrot.lane.b32.xlu1 %v1544_v50, %s4288_s21 }
 0x272   : > { %1838 = vrot.lane.b32.xlu0 %v5419_v23, %s4287_s17  ;;  %v1596_v56 = vpop.permute.xlu1 %1595  ;;  %v1558_v34 = vld [vmem:[#allocation2 + $0x159] sm:$0xff] }
 0x273   : > { %1691 = vst.msk [vmem:[#allocation3 + $0x8] sm:$0xff] %vm1689_vm3, %v1596_v56  ;;  %v1723_v56 = vld [vmem:[#allocation2 + $0xa] sm:$0xff] }
 0x274   : > { %v1598_v35 = vpop.permute.xlu0 %1597  ;;  %v1560_v50 = vld [vmem:[#allocation2 + $0x171] sm:$0xff] }
 0x275   : > { %1692 = vst.msk [vmem:[#allocation3 + $0x10] sm:$0xff] %vm1689_vm3, %v1598_v35  ;;  %1627 = vrot.lane.b32.xlu1 %v1546_v51, %s4288_s21 }
 0x276   : > { %1842 = vrot.lane.b32.xlu0 %v1750_v53, %s4287_s17  ;;  %v5480_v53 = vld [vmem:[#allocation2 + $0x3a] sm:$0xff] }
 0x278   : > { %v1602_v25 = vpop.permute.xlu0 %1601 }
 0x279   : > { %1694 = vst.msk [vmem:[#allocation3 + $0x20] sm:$0xff] %vm1689_vm3, %v1602_v25  ;;  %1631 = vrot.lane.b32.xlu1 %v5427_v26, %s4288_s21 }
 0x27a   : > { %1846 = vrot.lane.b32.xlu0 %v1752_v41, %s4287_s17  ;;  %v5487_v41 = vld [vmem:[#allocation2 + $0x52] sm:$0xff] }
 0x27c   : > { %v1606_v63 = vpop.permute.xlu0 %1605 }
 0x27d   : > { %1696 = vst.msk [vmem:[#allocation3 + $0x30] sm:$0xff] %vm1689_vm3, %v1606_v63  ;;  %1635 = vrot.lane.b32.xlu1 %v5433_v9, %s4288_s21  ;;  %v5494_v63 = vld [vmem:[#allocation2 + $0x6a] sm:$0xff] }
 0x27e   : > { %1979 = vrot.lane.b32.xlu0 %v4854_v37, %s4286_s16 }
 0x280   : > { %v1610_v11 = vpop.permute.xlu0 %1609 }
 0x281   : > { %1698 = vst.msk [vmem:[#allocation3 + $0x40] sm:$0xff] %vm1689_vm3, %v1610_v11  ;;  %1639 = vrot.lane.b32.xlu1 %v5440_v17, %s4288_s21  ;;  %v5501_v11 = vld [vmem:[#allocation2 + $0x82] sm:$0xff] }
 0x282   : > { %1983 = vrot.lane.b32.xlu0 %v4861_v39, %s4286_s16 }
 0x284   : > { %v1614_v18 = vpop.permute.xlu0 %1613 }
 0x285   : > { %1700 = vst.msk [vmem:[#allocation3 + $0x50] sm:$0xff] %vm1689_vm3, %v1614_v18  ;;  %1643 = vrot.lane.b32.xlu1 %v5447_v20, %s4288_s21 }
 0x286   : > { %1987 = vrot.lane.b32.xlu0 %v4868_v42, %s4286_s16 }
 0x288   : > { %v1618_v37 = vpop.permute.xlu0 %1617 }
 0x289   : > { %1702 = vst.msk [vmem:[#allocation3 + $0x60] sm:$0xff] %vm1689_vm3, %v1618_v37  ;;  %1647 = vrot.lane.b32.xlu1 %v5454_v22, %s4288_s21  ;;  %v1735_v37 = vld [vmem:[#allocation2 + $0x9a] sm:$0xff] }
 0x28a   : > { %1991 = vrot.lane.b32.xlu0 %v4875_v45, %s4286_s16 }
 0x28c   : > { %v1622_v27 = vpop.permute.xlu0 %1621 }
 0x28d   : > { %1704 = vst.msk [vmem:[#allocation3 + $0x70] sm:$0xff] %vm1689_vm3, %v1622_v27  ;;  %1651 = vrot.lane.b32.xlu1 %v1558_v34, %s4288_s21  ;;  %v1737_v34 = vld [vmem:[#allocation2 + $0xb2] sm:$0xff] }
 0x28e   : > { %1995 = vrot.lane.b32.xlu0 %v4882_v48, %s4286_s16  ;;  %v5473_v48 = vld [vmem:[#allocation2 + $0x22] sm:$0xff] }
 0x290   : > { %v1626_v49 = vpop.permute.xlu0 %1625 }
 0x291   : > { %1706 = vst.msk [vmem:[#allocation3 + $0x80] sm:$0xff] %vm1689_vm3, %v1626_v49  ;;  %1655 = vrot.lane.b32.xlu1 %v1560_v50, %s4288_s21  ;;  %v1739_v49 = vld [vmem:[#allocation2 + $0xca] sm:$0xff]  ;;  %v5520_v50 = vld [vmem:[#allocation2 + $0xe2] sm:$0xff] }
 0x292   : > { %1999 = vrot.lane.b32.xlu0 %v4889_v60, %s4286_s16 }
 0x294   : > { %v1630_v45 = vpop.permute.xlu0 %1629 }
 0x295   : > { %1708 = vst.msk [vmem:[#allocation3 + $0x90] sm:$0xff] %vm1689_vm3, %v1630_v45  ;;  %1788 = vrot.lane.b32.xlu1 %v1723_v56, %s4287_s17  ;;  %v1945_v56 = vld [vmem:[#allocation2 + $0x180] sm:$0xff] }
 0x296   : > { %2003 = vrot.lane.b32.xlu0 %v4896_v62, %s4286_s16 }
 0x298   : > { %v1634_v35 = vpop.permute.xlu0 %1633 }
 0x299   : > { %1710 = vst.msk [vmem:[#allocation3 + $0xa0] sm:$0xff] %vm1689_vm3, %v1634_v35  ;;  %1792 = vrot.lane.b32.xlu1 %v5473_v48, %s4287_s17  ;;  %v5526_v35 = vld [vmem:[#allocation2 + $0xfa] sm:$0xff] }
 0x29a   : > { %2007 = vrot.lane.b32.xlu0 %v4903_v0, %s4286_s16 }
 0x29c   : > { %v1638_v51 = vpop.permute.xlu0 %1637 }
 0x29d   : > { %1712 = vst.msk [vmem:[#allocation3 + $0xb0] sm:$0xff] %vm1689_vm3, %v1638_v51  ;;  %1796 = vrot.lane.b32.xlu1 %v5480_v53, %s4287_s17 }
 0x29e   : > { %2011 = vrot.lane.b32.xlu0 %v4910_v2, %s4286_s16 }
 0x2a0   : > { %v1642_v25 = vpop.permute.xlu0 %1641 }
 0x2a1   : > { %1714 = vst.msk [vmem:[#allocation3 + $0xc0] sm:$0xff] %vm1689_vm3, %v1642_v25  ;;  %1800 = vrot.lane.b32.xlu1 %v5487_v41, %s4287_s17  ;;  %v5533_v25 = vld [vmem:[#allocation2 + $0x112] sm:$0xff] }
 0x2a2   : > { %2015 = vrot.lane.b32.xlu0 %v4917_v4, %s4286_s16 }
 0x2a4   : > { %v1646_v0 = vpop.permute.xlu0 %1645 }
 0x2a5   : > { %1716 = vst.msk [vmem:[#allocation3 + $0xd0] sm:$0xff] %vm1689_vm3, %v1646_v0  ;;  %1804 = vrot.lane.b32.xlu1 %v5494_v63, %s4287_s17 }
 0x2a6   : > { %2019 = vrot.lane.b32.xlu0 %v4924_v6, %s4286_s16 }
 0x2a8   : > { %v1650_v2 = vpop.permute.xlu0 %1649 }
 0x2a9   : > { %1718 = vst.msk [vmem:[#allocation3 + $0xe0] sm:$0xff] %vm1689_vm3, %v1650_v2  ;;  %1808 = vrot.lane.b32.xlu1 %v5501_v11, %s4287_s17  ;;  %v5540_v2 = vld [vmem:[#allocation2 + $0x12a] sm:$0xff] }
 0x2aa   : > { %2023 = vrot.lane.b32.xlu0 %v4931_v8, %s4286_s16 }
 0x2ac   : > { %v1654_v18 = vpop.permute.xlu0 %1653 }
 0x2ad   : > { %1720 = vst.msk [vmem:[#allocation3 + $0xf0] sm:$0xff] %vm1689_vm3, %v1654_v18  ;;  %1812 = vrot.lane.b32.xlu1 %v1735_v37, %s4287_s17  ;;  %v1749_v18 = vld [vmem:[#allocation2 + $0x142] sm:$0xff] }
 0x2ae   : > { %2027 = vrot.lane.b32.xlu0 %v4938_v10, %s4286_s16 }
 0x2b0   : > { %v1787_v27 = vpop.permute.xlu0 %1786 }
 0x2b1   : > { %1883 = vst.msk [vmem:[#allocation3] sm:$0xff] %vm1882_vm4, %v1787_v27  ;;  %1816 = vrot.lane.b32.xlu1 %v1737_v34, %s4287_s17  ;;  %v1751_v27 = vld [vmem:[#allocation2 + $0x15a] sm:$0xff] }
 0x2b2   : > { %2031 = vrot.lane.b32.xlu0 %v4945_v13, %s4286_s16 }
 0x2b4   : > { %v1791_v8 = vpop.permute.xlu0 %1790 }
 0x2b5   : > { %1885 = vst.msk [vmem:[#allocation3 + $0x10] sm:$0xff] %vm1882_vm4, %v1791_v8  ;;  %1820 = vrot.lane.b32.xlu1 %v1739_v49, %s4287_s17  ;;  %v1753_v8 = vld [vmem:[#allocation2 + $0x172] sm:$0xff] }
 0x2b6   : > { %2035 = vrot.lane.b32.xlu0 %v4952_v15, %s4286_s16 }
 0x2b8   : > { %v1795_v10 = vpop.permute.xlu0 %1794 }
 0x2b9   : > { %1887 = vst.msk [vmem:[#allocation3 + $0x20] sm:$0xff] %vm1882_vm4, %v1795_v10  ;;  %1824 = vrot.lane.b32.xlu1 %v5520_v50, %s4287_s17 }
 0x2ba   : > { %2039 = vrot.lane.b32.xlu0 %v1945_v56, %s4286_s16 }
 0x2bc   : > { %v1799_v45 = vpop.permute.xlu0 %1798 }
 0x2bd   : > { %1889 = vst.msk [vmem:[#allocation3 + $0x30] sm:$0xff] %vm1882_vm4, %v1799_v45  ;;  %1828 = vrot.lane.b32.xlu1 %v5526_v35, %s4287_s17 }
 0x2be   : > { %2172 = vrot.lane.b32.xlu0 %v5222_v57, %s4285_s15 }
 0x2c0   : > { %v1803_v51 = vpop.permute.xlu0 %1802 }
 0x2c1   : > { %1891 = vst.msk [vmem:[#allocation3 + $0x40] sm:$0xff] %vm1882_vm4, %v1803_v51  ;;  %1832 = vrot.lane.b32.xlu1 %v5533_v25, %s4287_s17 }
 0x2c2   : > { %2176 = vrot.lane.b32.xlu0 %v5228_v28, %s4285_s15 }
 0x2c4   : > { %v1807_v0 = vpop.permute.xlu0 %1806 }
 0x2c5   : > { %1893 = vst.msk [vmem:[#allocation3 + $0x50] sm:$0xff] %vm1882_vm4, %v1807_v0  ;;  %1836 = vrot.lane.b32.xlu1 %v5540_v2, %s4287_s17 }
 0x2c6   : > { %2180 = vrot.lane.b32.xlu0 %v5234_v31, %s4285_s15 }
 0x2c8   : > { %v1811_v57 = vpop.permute.xlu0 %1810 }
 0x2c9   : > { %1895 = vst.msk [vmem:[#allocation3 + $0x60] sm:$0xff] %vm1882_vm4, %v1811_v57  ;;  %1840 = vrot.lane.b32.xlu1 %v1749_v18, %s4287_s17 }
 0x2ca   : > { %2184 = vrot.lane.b32.xlu0 %v5240_v36, %s4285_s15 }
 0x2cb   : > { %v1600_v28 = vpop.permute.xlu1 %1599 }
 0x2cc   : > { %1693 = vst.msk [vmem:[#allocation3 + $0x18] sm:$0xff] %vm1689_vm3, %v1600_v28  ;;  %v1815_v37 = vpop.permute.xlu0 %1814 }
 0x2cd   : > { %1897 = vst.msk [vmem:[#allocation3 + $0x70] sm:$0xff] %vm1882_vm4, %v1815_v37  ;;  %1844 = vrot.lane.b32.xlu1 %v1751_v27, %s4287_s17 }
 0x2ce   : > { %2188 = vrot.lane.b32.xlu0 %v5246_v43, %s4285_s15 }
 0x2cf   : > { %v1604_v31 = vpop.permute.xlu1 %1603 }
 0x2d0   : > { %1695 = vst.msk [vmem:[#allocation3 + $0x28] sm:$0xff] %vm1689_vm3, %v1604_v31  ;;  %v1819_v34 = vpop.permute.xlu0 %1818 }
 0x2d1   : > { %1899 = vst.msk [vmem:[#allocation3 + $0x80] sm:$0xff] %vm1882_vm4, %v1819_v34  ;;  %1848 = vrot.lane.b32.xlu1 %v1753_v8, %s4287_s17 }
 0x2d2   : > { %2192 = vrot.lane.b32.xlu0 %v5252_v61, %s4285_s15 }
 0x2d3   : > { %v1608_v36 = vpop.permute.xlu1 %1607 }
 0x2d4   : > { %1697 = vst.msk [vmem:[#allocation3 + $0x38] sm:$0xff] %vm1689_vm3, %v1608_v36  ;;  %v1823_v49 = vpop.permute.xlu0 %1822 }
 0x2d5   : > { %1901 = vst.msk [vmem:[#allocation3 + $0x90] sm:$0xff] %vm1882_vm4, %v1823_v49  ;;  %1981 = vrot.lane.b32.xlu1 %v5281_v40, %s4286_s16 }
 0x2d6   : > { %2367 = vrot.lane.b32.xlu0 %v5473_v48, %s4284_s14 }
 0x2d7   : > { %v1612_v43 = vpop.permute.xlu1 %1611 }
 0x2d8   : > { %1699 = vst.msk [vmem:[#allocation3 + $0x48] sm:$0xff] %vm1689_vm3, %v1612_v43  ;;  %v1827_v10 = vpop.permute.xlu0 %1826 }
 0x2d9   : > { %1903 = vst.msk [vmem:[#allocation3 + $0xa0] sm:$0xff] %vm1882_vm4, %v1827_v10  ;;  %1985 = vrot.lane.b32.xlu1 %v5287_v24, %s4286_s16 }
 0x2da   : > { %2371 = vrot.lane.b32.xlu0 %v5480_v53, %s4284_s14 }
 0x2db   : > { %v1616_v61 = vpop.permute.xlu1 %1615 }
 0x2dc   : > { %1701 = vst.msk [vmem:[#allocation3 + $0x58] sm:$0xff] %vm1689_vm3, %v1616_v61  ;;  %v1831_v56 = vpop.permute.xlu0 %1830 }
 0x2dd   : > { %1905 = vst.msk [vmem:[#allocation3 + $0xb0] sm:$0xff] %vm1882_vm4, %v1831_v56  ;;  %1989 = vrot.lane.b32.xlu1 %v5292_v54, %s4286_s16 }
 0x2de   : > { %2561 = vrot.lane.b32.xlu0 %v5287_v24, %s4283_s13 }
 0x2df   : > { %v1620_v40 = vpop.permute.xlu1 %1619 }
 0x2e0   : > { %1703 = vst.msk [vmem:[#allocation3 + $0x68] sm:$0xff] %vm1689_vm3, %v1620_v40  ;;  %v1835_v48 = vpop.permute.xlu0 %1834 }
 0x2e1   : > { %1907 = vst.msk [vmem:[#allocation3 + $0xc0] sm:$0xff] %vm1882_vm4, %v1835_v48  ;;  %1993 = vrot.lane.b32.xlu1 %v5298_v58, %s4286_s16 }
 0x2e2   : > { %2565 = vrot.lane.b32.xlu0 %v5292_v54, %s4283_s13 }
 0x2e3   : > { %v1624_v45 = vpop.permute.xlu1 %1623 }
 0x2e4   : > { %1705 = vst.msk [vmem:[#allocation3 + $0x78] sm:$0xff] %vm1689_vm3, %v1624_v45  ;;  %v1839_v51 = vpop.permute.xlu0 %1838 }
 0x2e5   : > { %1909 = vst.msk [vmem:[#allocation3 + $0xd0] sm:$0xff] %vm1882_vm4, %v1839_v51  ;;  %1997 = vrot.lane.b32.xlu1 %v5303_v30, %s4286_s16 }
 0x2e6   : > { %2754 = vrot.lane.b32.xlu0 %v5379_v52, %s4282_s12 }
 0x2e7   : > { %v1628_v24 = vpop.permute.xlu1 %1627 }
 0x2e8   : > { %1707 = vst.msk [vmem:[#allocation3 + $0x88] sm:$0xff] %vm1689_vm3, %v1628_v24  ;;  %v1843_v0 = vpop.permute.xlu0 %1842 }
 0x2e9   : > { %1911 = vst.msk [vmem:[#allocation3 + $0xe0] sm:$0xff] %vm1882_vm4, %v1843_v0  ;;  %2001 = vrot.lane.b32.xlu1 %v5312_v38, %s4286_s16 }
 0x2ea   : > { %2206 = vrot.lane.b32.xlu0 %v5427_v26, %s4285_s15 }
 0x2eb   : > { %v1632_v54 = vpop.permute.xlu1 %1631 }
 0x2ec   : > { %1709 = vst.msk [vmem:[#allocation3 + $0x98] sm:$0xff] %vm1689_vm3, %v1632_v54  ;;  %v1847_v57 = vpop.permute.xlu0 %1846 }
 0x2ed   : > { %1913 = vst.msk [vmem:[#allocation3 + $0xf0] sm:$0xff] %vm1882_vm4, %v1847_v57  ;;  %2005 = vrot.lane.b32.xlu1 %v5317_v46, %s4286_s16  ;;  %v5719_v57 = vld [vmem:[#allocation2 + $0xd9] sm:$0xff] }
 0x2ee   : > { %2758 = vrot.lane.b32.xlu0 %v5386_v29, %s4282_s12 }
 0x2ef   : > { %v1636_v18 = vpop.permute.xlu1 %1635 }
 0x2f0   : > { %1711 = vst.msk [vmem:[#allocation3 + $0xa8] sm:$0xff] %vm1689_vm3, %v1636_v18  ;;  %v1980_v28 = vpop.permute.xlu0 %1979  ;;  %v4260_v18 = vld [vmem:[%s7057_s3 + $0x18] sm:$0xff]  }
 0x2f1   : > { %2076 = vst.msk [vmem:[#allocation3] sm:$0xff] %vm2075_vm5, %v1980_v28  ;;  %2009 = vrot.lane.b32.xlu1 %v5326_v3, %s4286_s16 }
 0x2f2   : > { %2947 = vrot.lane.b32.xlu0 %v5480_v53, %s4281_s11 }
 0x2f3   : > { %v1640_v26 = vpop.permute.xlu1 %1639 }
 0x2f4   : > { %1713 = vst.msk [vmem:[#allocation3 + $0xb8] sm:$0xff] %vm1689_vm3, %v1640_v26  ;;  %v1984_v37 = vpop.permute.xlu0 %1983  ;;  %v2690_v26 = vld [vmem:[#allocation2 + $0x49] sm:$0xff] }
 0x2f5   : > { %2078 = vst.msk [vmem:[#allocation3 + $0x10] sm:$0xff] %vm2075_vm5, %v1984_v37  ;;  %2013 = vrot.lane.b32.xlu1 %v5332_v7, %s4286_s16  ;;  %v4261_v37 = vld [vmem:[%s7057_s3 + $0x10] sm:$0xff]  }
 0x2f6   : > { %2210 = vrot.lane.b32.xlu0 %v5433_v9, %s4285_s15 }
 0x2f7   : > { %v1644_v27 = vpop.permute.xlu1 %1643 }
 0x2f8   : > { %1715 = vst.msk [vmem:[#allocation3 + $0xc8] sm:$0xff] %vm1689_vm3, %v1644_v27  ;;  %v1988_v31 = vpop.permute.xlu0 %1987 }
 0x2f9   : > { %2080 = vst.msk [vmem:[#allocation3 + $0x20] sm:$0xff] %vm2075_vm5, %v1988_v31  ;;  %2017 = vrot.lane.b32.xlu1 %v5338_v14, %s4286_s16 }
 0x2fa   : > { %2399 = vrot.lane.b32.xlu0 %v5520_v50, %s4284_s14 }
 0x2fb   : > { %v1648_v3 = vpop.permute.xlu1 %1647 }
 0x2fc   : > { %1717 = vst.msk [vmem:[#allocation3 + $0xd8] sm:$0xff] %vm1689_vm3, %v1648_v3  ;;  %v1992_v53 = vpop.permute.xlu0 %1991  ;;  %v2881_v3 = vld [vmem:[#allocation2 + $0x32] sm:$0xff] }
 0x2fd   : > { %2082 = vst.msk [vmem:[#allocation3 + $0x30] sm:$0xff] %vm2075_vm5, %v1992_v53  ;;  %2021 = vrot.lane.b32.xlu1 %v5343_v16, %s4286_s16  ;;  %v4262_v53 = vld [vmem:[%s7057_s3 + $0x8] sm:$0xff]  }
 0x2fe   : > { %2951 = vrot.lane.b32.xlu0 %v5487_v41, %s4281_s11 }
 0x2ff   : > { %v1652_v7 = vpop.permute.xlu1 %1651 }
 0x300   : > { %1719 = vst.msk [vmem:[#allocation3 + $0xe8] sm:$0xff] %vm1689_vm3, %v1652_v7  ;;  %v1996_v34 = vpop.permute.xlu0 %1995 }
 0x301   : > { %2084 = vst.msk [vmem:[#allocation3 + $0x40] sm:$0xff] %vm2075_vm5, %v1996_v34  ;;  %2025 = vrot.lane.b32.xlu1 %v5349_v19, %s4286_s16  ;;  %v2126_v34 = vld [vmem:[#allocation2 + $0xf1] sm:$0xff] }
 0x302   : > { %2403 = vrot.lane.b32.xlu0 %v5526_v35, %s4284_s14 }
 0x303   : > { %v1656_v50 = vpop.permute.xlu1 %1655 }
 0x304   : > { %1721 = vst.msk [vmem:[#allocation3 + $0xf8] sm:$0xff] %vm1689_vm3, %v1656_v50  ;;  %v2000_v8 = vpop.permute.xlu0 %1999  ;;  %v4263_v50 = vld [vmem:[%s7057_s3] sm:$0xff]  }
 0x305   : > { %2086 = vst.msk [vmem:[#allocation3 + $0x50] sm:$0xff] %vm2075_vm5, %v2000_v8  ;;  %2029 = vrot.lane.b32.xlu1 %v5354_v21, %s4286_s16 }
 0x306   : > { %2593 = vrot.lane.b32.xlu0 %v5338_v14, %s4283_s13 }
 0x307   : > { %v1789_v36 = vpop.permute.xlu1 %1788 }
 0x308   : > { %1884 = vst.msk [vmem:[#allocation3 + $0x8] sm:$0xff] %vm1882_vm4, %v1789_v36  ;;  %v2004_v49 = vpop.permute.xlu0 %2003 }
 0x309   : > { %2088 = vst.msk [vmem:[#allocation3 + $0x60] sm:$0xff] %vm2075_vm5, %v2004_v49  ;;  %2033 = vrot.lane.b32.xlu1 %v5360_v44, %s4286_s16  ;;  %v1946_v44 = vld [vmem:[#allocation2 + $0x188] sm:$0xff] }
 0x30a   : > { %2597 = vrot.lane.b32.xlu0 %v5343_v16, %s4283_s13 }
 0x30b   : > { %v1793_v43 = vpop.permute.xlu1 %1792 }
 0x30c   : > { %1886 = vst.msk [vmem:[#allocation3 + $0x18] sm:$0xff] %vm1882_vm4, %v1793_v43  ;;  %v2008_v10 = vpop.permute.xlu0 %2007  ;;  %v2883_v43 = vld [vmem:[#allocation2 + $0x4a] sm:$0xff] }
 0x30d   : > { %2090 = vst.msk [vmem:[#allocation3 + $0x70] sm:$0xff] %vm2075_vm5, %v2008_v10  ;;  %2037 = vrot.lane.b32.xlu1 %v5365_v47, %s4286_s16 }
 0x30e   : > { %2786 = vrot.lane.b32.xlu0 %v5433_v9, %s4282_s12 }
 0x30f   : > { %v1797_v14 = vpop.permute.xlu1 %1796 }
 0x310   : > { %1888 = vst.msk [vmem:[#allocation3 + $0x28] sm:$0xff] %vm1882_vm4, %v1797_v14  ;;  %v2012_v61 = vpop.permute.xlu0 %2011 }
 0x311   : > { %2092 = vst.msk [vmem:[#allocation3 + $0x80] sm:$0xff] %vm2075_vm5, %v2012_v61  ;;  %2041 = vrot.lane.b32.xlu1 %v1946_v44, %s4286_s16 }
 0x312   : > { %2790 = vrot.lane.b32.xlu0 %v5440_v17, %s4282_s12 }
 0x313   : > { %v1801_v16 = vpop.permute.xlu1 %1800 }
 0x314   : > { %1890 = vst.msk [vmem:[#allocation3 + $0x38] sm:$0xff] %vm1882_vm4, %v1801_v16  ;;  %v2016_v56 = vpop.permute.xlu0 %2015 }
 0x315   : > { %2094 = vst.msk [vmem:[#allocation3 + $0x90] sm:$0xff] %vm2075_vm5, %v2016_v56  ;;  %2174 = vrot.lane.b32.xlu1 %v5372_v55, %s4285_s15  ;;  %v2897_v56 = vld [vmem:[#allocation2 + $0xf2] sm:$0xff] }
 0x316   : > { %2979 = vrot.lane.b32.xlu0 %v5526_v35, %s4281_s11 }
 0x317   : > { %v1805_v47 = vpop.permute.xlu1 %1804 }
 0x318   : > { %1892 = vst.msk [vmem:[#allocation3 + $0x48] sm:$0xff] %vm1882_vm4, %v1805_v47  ;;  %v2020_v9 = vpop.permute.xlu0 %2019  ;;  %v2311_v47 = vld [vmem:[#allocation2 + $0x92] sm:$0xff] }
 0x319   : > { %2096 = vst.msk [vmem:[#allocation3 + $0xa0] sm:$0xff] %vm2075_vm5, %v2020_v9  ;;  %2178 = vrot.lane.b32.xlu1 %v5379_v52, %s4285_s15 }
 0x31a   : > { %2375 = vrot.lane.b32.xlu0 %v5487_v41, %s4284_s14 }
 0x31b   : > { %v1809_v40 = vpop.permute.xlu1 %1808 }
 0x31c   : > { %1894 = vst.msk [vmem:[#allocation3 + $0x58] sm:$0xff] %vm1882_vm4, %v1809_v40  ;;  %v2024_v48 = vpop.permute.xlu0 %2023 }
 0x31d   : > { %2098 = vst.msk [vmem:[#allocation3 + $0xb0] sm:$0xff] %vm2075_vm5, %v2024_v48  ;;  %2182 = vrot.lane.b32.xlu1 %v5386_v29, %s4285_s15 }
 0x31e   : > { %2983 = vrot.lane.b32.xlu0 %v5533_v25, %s4281_s11 }
 0x31f   : > { %v1813_v55 = vpop.permute.xlu1 %1812 }
 0x320   : > { %1896 = vst.msk [vmem:[#allocation3 + $0x68] sm:$0xff] %vm1882_vm4, %v1813_v55  ;;  %v2028_v35 = vpop.permute.xlu0 %2027  ;;  %v5813_v55 = vld [vmem:[#allocation2 + $0x10a] sm:$0xff] }
 0x321   : > { %2100 = vst.msk [vmem:[#allocation3 + $0xc0] sm:$0xff] %vm2075_vm5, %v2028_v35  ;;  %2186 = vrot.lane.b32.xlu1 %v5396_v1, %s4285_s15 }
 0x322   : > { %2379 = vrot.lane.b32.xlu0 %v5494_v63, %s4284_s14 }
 0x323   : > { %v1817_v52 = vpop.permute.xlu1 %1816 }
 0x324   : > { %1898 = vst.msk [vmem:[#allocation3 + $0x78] sm:$0xff] %vm1882_vm4, %v1817_v52  ;;  %v2032_v41 = vpop.permute.xlu0 %2031 }
 0x325   : > { %2102 = vst.msk [vmem:[#allocation3 + $0xd0] sm:$0xff] %vm2075_vm5, %v2032_v41  ;;  %2190 = vrot.lane.b32.xlu1 %v5406_v12, %s4285_s15  ;;  %v2307_v41 = vld [vmem:[#allocation2 + $0x62] sm:$0xff] }
 0x326   : > { %2569 = vrot.lane.b32.xlu0 %v5298_v58, %s4283_s13 }
 0x327   : > { %v1821_v29 = vpop.permute.xlu1 %1820 }
 0x328   : > { %1900 = vst.msk [vmem:[#allocation3 + $0x88] sm:$0xff] %vm1882_vm4, %v1821_v29  ;;  %v2036_v45 = vpop.permute.xlu0 %2035 }
 0x329   : > { %2104 = vst.msk [vmem:[#allocation3 + $0xe0] sm:$0xff] %vm2075_vm5, %v2036_v45  ;;  %2365 = vrot.lane.b32.xlu1 %v5306_v32, %s4284_s14 }
 0x32a   : > { %2573 = vrot.lane.b32.xlu0 %v5303_v30, %s4283_s13 }
 0x32b   : > { %v1825_v51 = vpop.permute.xlu1 %1824 }
 0x32c   : > { %1902 = vst.msk [vmem:[#allocation3 + $0x98] sm:$0xff] %vm1882_vm4, %v1825_v51  ;;  %v2040_v24 = vpop.permute.xlu0 %2039  ;;  %v2499_v51 = vld [vmem:[#allocation2 + $0x60] sm:$0xff] }
 0x32d   : > { %2106 = vst.msk [vmem:[#allocation3 + $0xf0] sm:$0xff] %vm2075_vm5, %v2040_v24  ;;  %2369 = vrot.lane.b32.xlu1 %v5320_v59, %s4284_s14 }
 0x32e   : > { %2762 = vrot.lane.b32.xlu0 %v5396_v1, %s4282_s12 }
 0x32f   : > { %v1829_v58 = vpop.permute.xlu1 %1828 }
 0x330   : > { %1904 = vst.msk [vmem:[#allocation3 + $0xa8] sm:$0xff] %vm1882_vm4, %v1829_v58  ;;  %v2173_v32 = vpop.permute.xlu0 %2172 }
 0x331   : > { %2269 = vst.msk [vmem:[#allocation3] sm:$0xff] %vm2268_vm6, %v2173_v32  ;;  %2559 = vrot.lane.b32.xlu1 %v4861_v39, %s4283_s13  ;;  %v2688_v39 = vld [vmem:[#allocation2 + $0x31] sm:$0xff] }
 0x332   : > { %2214 = vrot.lane.b32.xlu0 %v5440_v17, %s4285_s15  ;;  %v4259_v17 = vld [vmem:[%s7057_s3 + $0x20] ss:$0 sps:$4 sm:$0xff]   ;;  %v2501_v32 = vld [vmem:[#allocation2 + $0x78] sm:$0xff] }
 0x333   : > { %v1833_v30 = vpop.permute.xlu1 %1832  ;;  %4232 = vmatprep.subr.msk.bf16.mxu0 %vm3207_vm7, %v4259_v17  ;;  %4233 = vmatprep.subr.msk.bf16.mxu1 %vm3207_vm7, %v4259_v17 }
 0x334   : > { %1906 = vst.msk [vmem:[#allocation3 + $0xb8] sm:$0xff] %vm1882_vm4, %v1833_v30  ;;  %v2177_v59 = vpop.permute.xlu0 %2176  ;;  %v5833_v30 = vld [vmem:[#allocation2 + $0xa9] sm:$0xff] }
 0x335   : > { %2271 = vst.msk [vmem:[#allocation3 + $0x10] sm:$0xff] %vm2268_vm6, %v2177_v59  ;;  %2563 = vrot.lane.b32.xlu1 %v4868_v42, %s4283_s13  ;;  %v3209_v42 = vsel %vm3207_vm7, %v4259_v17, 0  ;;  %vm3574_vm7 = vcmask 1045509  }
 0x336   : > { %2766 = vrot.lane.b32.xlu0 %v5406_v12, %s4282_s12  ;;  %4181 = vmatpush3.bf16.msra.mxu0 %v3209_v42 }
 0x337   : > { %v1837_v1 = vpop.permute.xlu1 %1836  ;;  %4227 = vmatpush3.bf16.msra.mxu1 %v3209_v42  ;;  %4182 = vmatprep.subr.bf16.mxu0 %v4260_v18  ;;  %v2134_v42 = vld [vmem:[#allocation2 + $0x151] sm:$0xff] }
 0x338   : > { %1908 = vst.msk [vmem:[#allocation3 + $0xc8] sm:$0xff] %vm1882_vm4, %v1837_v1  ;;  %v2181_v0 = vpop.permute.xlu0 %2180  ;;  %4223 = vmatprep.subr.bf16.mxu1 %v4260_v18 }
 0x339   : > { %2273 = vst.msk [vmem:[#allocation3 + $0x20] sm:$0xff] %vm2268_vm6, %v2181_v0  ;;  %2752 = vrot.lane.b32.xlu1 %v2688_v39, %s4282_s12  ;;  %v2692_v0 = vld [vmem:[#allocation2 + $0x61] sm:$0xff] }
 0x33a   : > { %2955 = vrot.lane.b32.xlu0 %v5494_v63, %s4281_s11  ;;  %4183 = vmatpush3.bf16.msra.mxu0 %v4260_v18 }
 0x33b   : > { %v1841_v12 = vpop.permute.xlu1 %1840  ;;  %4228 = vmatpush3.bf16.msra.mxu1 %v4260_v18  ;;  %4184 = vmatprep.subr.bf16.mxu0 %v4261_v37  ;;  %v2694_v18 = vld [vmem:[#allocation2 + $0x79] sm:$0xff] }
 0x33c   : > { %1910 = vst.msk [vmem:[#allocation3 + $0xd8] sm:$0xff] %vm1882_vm4, %v1841_v12  ;;  %v2185_v54 = vpop.permute.xlu0 %2184  ;;  %4224 = vmatprep.subr.bf16.mxu1 %v4261_v37 }
 0x33d   : > { %2275 = vst.msk [vmem:[#allocation3 + $0x30] sm:$0xff] %vm2268_vm6, %v2185_v54  ;;  %2204 = vrot.lane.b32.xlu1 %v5719_v57, %s4285_s15 }
 0x33e   : > { %2218 = vrot.lane.b32.xlu0 %v5447_v20, %s4285_s15  ;;  %4185 = vmatpush3.bf16.msra.mxu0 %v4261_v37 }
 0x33f   : > { %v1845_v63 = vpop.permute.xlu1 %1844  ;;  %4229 = vmatpush3.bf16.msra.mxu1 %v4261_v37  ;;  %4186 = vmatprep.subr.bf16.mxu0 %v4262_v53  ;;  %v5861_v37 = vld [vmem:[#allocation2 + $0xaa] sm:$0xff] }
 0x340   : > { %1912 = vst.msk [vmem:[#allocation3 + $0xe8] sm:$0xff] %vm1882_vm4, %v1845_v63  ;;  %v2189_v28 = vpop.permute.xlu0 %2188  ;;  %4225 = vmatprep.subr.bf16.mxu1 %v4262_v53  ;;  %v2325_v63 = vld [vmem:[#allocation2 + $0x13a] sm:$0xff] }
 0x341   : > { %2277 = vst.msk [vmem:[#allocation3 + $0x40] sm:$0xff] %vm2268_vm6, %v2189_v28  ;;  %2756 = vrot.lane.b32.xlu1 %v2690_v26, %s4282_s12 }
 0x342   : > { %2407 = vrot.lane.b32.xlu0 %v5533_v25, %s4284_s14  ;;  %4187 = vmatpush3.bf16.msra.mxu0 %v4262_v53 }
 0x343   : > { %v1849_v27 = vpop.permute.xlu1 %1848  ;;  %4230 = vmatpush3.bf16.msra.mxu1 %v4262_v53  ;;  %4188 = vmatprep.subr.bf16.mxu0 %v4263_v50  ;;  %v2327_v53 = vld [vmem:[#allocation2 + $0x152] sm:$0xff] }
 0x344   : > { %1914 = vst.msk [vmem:[#allocation3 + $0xf8] sm:$0xff] %vm1882_vm4, %v1849_v27  ;;  %v2193_v31 = vpop.permute.xlu0 %2192  ;;  %4226 = vmatprep.subr.bf16.mxu1 %v4263_v50 }
 0x345   : > { %2279 = vst.msk [vmem:[#allocation3 + $0x50] sm:$0xff] %vm2268_vm6, %v2193_v31  ;;  %2945 = vrot.lane.b32.xlu1 %v2881_v3, %s4281_s11  ;;  %v2130_v3 = vld [vmem:[#allocation2 + $0x121] sm:$0xff] }
 0x346   : > { %2959 = vrot.lane.b32.xlu0 %v5501_v11, %s4281_s11  ;;  %4189 = vmatpush3.bf16.msra.mxu0 %v4263_v50 }
 0x347   : > { %v1982_v25 = vpop.permute.xlu1 %1981  ;;  %4231 = vmatpush3.bf16.msra.mxu1 %v4263_v50 }
 0x348   : > { %2077 = vst.msk [vmem:[#allocation3 + $0x8] sm:$0xff] %vm2075_vm5, %v1982_v25  ;;  %v5746_v7 = vpop.permute.xlu0 %2367 }
 0x349   : > { %2208 = vrot.lane.b32.xlu1 %v2126_v34, %s4285_s15 }
 0x34a   : > { %2411 = vrot.lane.b32.xlu0 %v5540_v2, %s4284_s14 }
 0x34b   : > { %v1986_v11 = vpop.permute.xlu1 %1985 }
 0x34c   : > { %2079 = vst.msk [vmem:[#allocation3 + $0x18] sm:$0xff] %vm2075_vm5, %v1986_v11  ;;  %v5755_v8 = vpop.permute.xlu0 %2371 }
 0x34d   : > { %2397 = vrot.lane.b32.xlu1 %v5391_v33, %s4284_s14 }
 0x34e   : > { %2601 = vrot.lane.b32.xlu0 %v5349_v19, %s4283_s13 }
 0x34f   : > { %v1990_v36 = vpop.permute.xlu1 %1989 }
 0x350   : > { %2081 = vst.msk [vmem:[#allocation3 + $0x28] sm:$0xff] %vm2075_vm5, %v1990_v36  ;;  %v5762_v49 = vpop.permute.xlu0 %2561  ;;  %v2323_v36 = vld [vmem:[#allocation2 + $0x122] sm:$0xff] }
 0x351   : > { %2949 = vrot.lane.b32.xlu1 %v2883_v43, %s4281_s11 }
 0x352   : > { %2605 = vrot.lane.b32.xlu0 %v5354_v21, %s4283_s13 }
 0x353   : > { %v1994_v10 = vpop.permute.xlu1 %1993 }
 0x354   : > { %2083 = vst.msk [vmem:[#allocation3 + $0x38] sm:$0xff] %vm2075_vm5, %v1994_v10  ;;  %v5768_v14 = vpop.permute.xlu0 %2565 }
 0x355   : > { %2401 = vrot.lane.b32.xlu1 %v5401_v5, %s4284_s14 }
 0x356   : > { %2794 = vrot.lane.b32.xlu0 %v5447_v20, %s4282_s12 }
 0x357   : > { %v1998_v19 = vpop.permute.xlu1 %1997 }
 0x358   : > { %2085 = vst.msk [vmem:[#allocation3 + $0x48] sm:$0xff] %vm2075_vm5, %v1998_v19  ;;  %v5775_v33 = vpop.permute.xlu0 %2754  ;;  %v5900_v19 = vld [vmem:[#allocation2 + $0x169] sm:$0xff] }
 0x359   : > { %2591 = vrot.lane.b32.xlu1 %v4917_v4, %s4283_s13  ;;  %v5790_v4 = vld [vmem:[#allocation2 + $0x7a] sm:$0xff] }
 0x35a   : > { %2798 = vrot.lane.b32.xlu0 %v5454_v22, %s4282_s12 }
 0x35b   : > { %v2002_v21 = vpop.permute.xlu1 %2001 }
 0x35c   : > { %2087 = vst.msk [vmem:[#allocation3 + $0x58] sm:$0xff] %vm2075_vm5, %v2002_v21  ;;  %v2207_v61 = vpop.permute.xlu0 %2206 }
 0x35d   : > { %2595 = vrot.lane.b32.xlu1 %v4924_v6, %s4283_s13  ;;  %v2706_v6 = vld [vmem:[#allocation2 + $0x109] sm:$0xff] }
 0x35e   : > { %2987 = vrot.lane.b32.xlu0 %v5540_v2, %s4281_s11 }
 0x35f   : > { %v2006_v5 = vpop.permute.xlu1 %2005 }
 0x360   : > { %2089 = vst.msk [vmem:[#allocation3 + $0x68] sm:$0xff] %vm2075_vm5, %v2006_v5  ;;  %v5787_v20 = vpop.permute.xlu0 %2758 }
 0x361   : > { %2784 = vrot.lane.b32.xlu1 %v2126_v34, %s4282_s12 }
 0x362   : > { %2381 = vrot.lane.b32.xlu0 %v5790_v4, %s4284_s14 }
 0x363   : > { %v2010_v22 = vpop.permute.xlu1 %2009 }
 0x364   : > { %2091 = vst.msk [vmem:[#allocation3 + $0x78] sm:$0xff] %vm2075_vm5, %v2010_v22  ;;  %v5795_v44 = vpop.permute.xlu0 %2947 }
 0x365   : > { %2788 = vrot.lane.b32.xlu1 %v2706_v6, %s4282_s12 }
 0x366   : > { %2989 = vrot.lane.b32.xlu0 %v5419_v23, %s4281_s11 }
 0x367   : > { %v2014_v2 = vpop.permute.xlu1 %2013 }
 0x368   : > { %2093 = vst.msk [vmem:[#allocation3 + $0x88] sm:$0xff] %vm2075_vm5, %v2014_v2  ;;  %v2211_v16 = vpop.permute.xlu0 %2210  ;;  %v2119_v2 = vld [vmem:[#allocation2 + $0x99] sm:$0xff] }
 0x369   : > { %2286 = vst.msk [vmem:[#allocation3 + $0x88] sm:$0xff] %vm2268_vm6, %v2207_v61  ;;  %2977 = vrot.lane.b32.xlu1 %v2897_v56, %s4281_s11 }
 0x36a   : > { %2385 = vrot.lane.b32.xlu0 %v2311_v47, %s4284_s14 }
 0x36b   : > { %v2018_v9 = vpop.permute.xlu1 %2017 }
 0x36c   : > { %2095 = vst.msk [vmem:[#allocation3 + $0x98] sm:$0xff] %vm2075_vm5, %v2018_v9  ;;  %v2400_v40 = vpop.permute.xlu0 %2399  ;;  %v2310_v9 = vld [vmem:[#allocation2 + $0x82] sm:$0xff] }
 0x36d   : > { %2288 = vst.msk [vmem:[#allocation3 + $0x98] sm:$0xff] %vm2268_vm6, %v2211_v16  ;;  %2373 = vrot.lane.b32.xlu1 %v2883_v43, %s4284_s14  ;;  %v2515_v43 = vld [vmem:[#allocation2 + $0x120] sm:$0xff]  ;;  %v5921_v16 = vld [vmem:[#allocation2 + $0x16a] sm:$0xff] }
 0x36e   : > { %2479 = vst.msk [vmem:[#allocation3 + $0x88] sm:$0xff] %vm2461_vm8, %v2400_v40  ;;  %2575 = vrot.lane.b32.xlu0 %v4889_v60, %s4283_s13  ;;  %v2696_v60 = vld [vmem:[#allocation2 + $0x91] sm:$0xff]  ;;  %v2315_v40 = vld [vmem:[#allocation2 + $0xc2] sm:$0xff] }
 0x36f   : > { %v2022_v23 = vpop.permute.xlu1 %2021 }
 0x370   : > { %2097 = vst.msk [vmem:[#allocation3 + $0xa8] sm:$0xff] %vm2075_vm5, %v2022_v23  ;;  %v5811_v48 = vpop.permute.xlu0 %2951 }
 0x371   : > { %2981 = vrot.lane.b32.xlu1 %v5813_v55, %s4281_s11 }
 0x372   : > { %2579 = vrot.lane.b32.xlu0 %v4896_v62, %s4283_s13  ;;  %v5826_v62 = vld [vmem:[#allocation2 + $0x139] sm:$0xff] }
 0x373   : > { %v2026_v35 = vpop.permute.xlu1 %2025 }
 0x374   : > { %2099 = vst.msk [vmem:[#allocation3 + $0xb8] sm:$0xff] %vm2075_vm5, %v2026_v35  ;;  %v2404_v52 = vpop.permute.xlu0 %2403  ;;  %v2507_v35 = vld [vmem:[#allocation2 + $0xc0] sm:$0xff] }
 0x375   : > { %2481 = vst.msk [vmem:[#allocation3 + $0x98] sm:$0xff] %vm2461_vm8, %v2404_v52  ;;  %2377 = vrot.lane.b32.xlu1 %v2307_v41, %s4284_s14 }
 0x376   : > { %2768 = vrot.lane.b32.xlu0 %v2696_v60, %s4282_s12 }
 0x377   : > { %v2030_v29 = vpop.permute.xlu1 %2029 }
 0x378   : > { %2101 = vst.msk [vmem:[#allocation3 + $0xc8] sm:$0xff] %vm2075_vm5, %v2030_v29  ;;  %v2594_v45 = vpop.permute.xlu0 %2593 }
 0x379   : > { %2673 = vst.msk [vmem:[#allocation3 + $0x88] sm:$0xff] %vm2655_vm9, %v2594_v45  ;;  %2567 = vrot.lane.b32.xlu1 %v2499_v51, %s4283_s13  ;;  %v2312_v45 = vld [vmem:[#allocation2 + $0x9a] sm:$0xff] }
 0x37a   : > { %2220 = vrot.lane.b32.xlu0 %v5826_v62, %s4285_s15 }
 0x37b   : > { %v2034_v24 = vpop.permute.xlu1 %2033 }
 0x37c   : > { %2103 = vst.msk [vmem:[#allocation3 + $0xd8] sm:$0xff] %vm2075_vm5, %v2034_v24  ;;  %v2598_v58 = vpop.permute.xlu0 %2597 }
 0x37d   : > { %2675 = vst.msk [vmem:[#allocation3 + $0x98] sm:$0xff] %vm2655_vm9, %v2598_v58  ;;  %2571 = vrot.lane.b32.xlu1 %v2501_v32, %s4283_s13 }
 0x37e   : > { %2772 = vrot.lane.b32.xlu0 %v5833_v30, %s4282_s12 }
 0x37f   : > { %v2038_v59 = vpop.permute.xlu1 %2037 }
 0x380   : > { %2105 = vst.msk [vmem:[#allocation3 + $0xe8] sm:$0xff] %vm2075_vm5, %v2038_v59  ;;  %v2787_v1 = vpop.permute.xlu0 %2786 }
 0x381   : > { %2866 = vst.msk [vmem:[#allocation3 + $0x88] sm:$0xff] %vm2848_vm10, %v2787_v1  ;;  %2760 = vrot.lane.b32.xlu1 %v2692_v0, %s4282_s12 }
 0x382   : > { %2961 = vrot.lane.b32.xlu0 %v2311_v47, %s4281_s11 }
 0x383   : > { %v2042_v39 = vpop.permute.xlu1 %2041 }
 0x384   : > { %2107 = vst.msk [vmem:[#allocation3 + $0xf8] sm:$0xff] %vm2075_vm5, %v2042_v39  ;;  %v2791_v17 = vpop.permute.xlu0 %2790 }
 0x385   : > { %2868 = vst.msk [vmem:[#allocation3 + $0x98] sm:$0xff] %vm2848_vm10, %v2791_v17  ;;  %2212 = vrot.lane.b32.xlu1 %v2706_v6, %s4285_s15 }
 0x386   : > { %2224 = vrot.lane.b32.xlu0 %v2134_v42, %s4285_s15 }
 0x387   : > { %v2175_v12 = vpop.permute.xlu1 %2174 }
 0x388   : > { %2270 = vst.msk [vmem:[#allocation3 + $0x8] sm:$0xff] %vm2268_vm6, %v2175_v12  ;;  %v2980_v54 = vpop.permute.xlu0 %2979 }
 0x389   : > { %2463 = vst.msk [vmem:[#allocation3 + $0x8] sm:$0xff] %vm2461_vm8, %v5746_v7  ;;  %2764 = vrot.lane.b32.xlu1 %v2694_v18, %s4282_s12  ;;  %v5963_v18 = vld [vmem:[#allocation2 + $0xb1] sm:$0xff] }
 0x38a   : > { %3059 = vst.msk [vmem:[#allocation3 + $0x88] sm:$0xff] %vm7060_vm11, %v2980_v54  ;;  %2413 = vrot.lane.b32.xlu0 %v2325_v63, %s4284_s14 }
 0x38b   : > { %2657 = vst.msk [vmem:[#allocation3 + $0x8] sm:$0xff] %vm2655_vm9, %v5762_v49  ;;  %v2179_v28 = vpop.permute.xlu1 %2178 }
 0x38c   : > { %2850 = vst.msk [vmem:[#allocation3 + $0x8] sm:$0xff] %vm2848_vm10, %v5775_v33  ;;  %v2376_v26 = vpop.permute.xlu0 %2375 }
 0x38d   : > { %3043 = vst.msk [vmem:[#allocation3 + $0x8] sm:$0xff] %vm7060_vm11, %v5795_v44  ;;  %2953 = vrot.lane.b32.xlu1 %v2307_v41, %s4281_s11 }
 0x38e   : > { %2272 = vst.msk [vmem:[#allocation3 + $0x18] sm:$0xff] %vm2268_vm6, %v2179_v28  ;;  %2965 = vrot.lane.b32.xlu0 %v5861_v37, %s4281_s11 }
 0x38f   : > { %2465 = vst.msk [vmem:[#allocation3 + $0x18] sm:$0xff] %vm2461_vm8, %v5755_v8  ;;  %v2183_v27 = vpop.permute.xlu1 %2182 }
 0x390   : > { %2659 = vst.msk [vmem:[#allocation3 + $0x18] sm:$0xff] %vm2655_vm9, %v5768_v14  ;;  %v2984_v31 = vpop.permute.xlu0 %2983  ;;  %v2517_v14 = vld [vmem:[#allocation2 + $0x138] sm:$0xff] }
 0x391   : > { %2852 = vst.msk [vmem:[#allocation3 + $0x18] sm:$0xff] %vm2848_vm10, %v5787_v20  ;;  %2216 = vrot.lane.b32.xlu1 %v2130_v3, %s4285_s15  ;;  %v2122_v20 = vld [vmem:[#allocation2 + $0xc1] sm:$0xff] }
 0x392   : > { %3045 = vst.msk [vmem:[#allocation3 + $0x18] sm:$0xff] %vm7060_vm11, %v5811_v48  ;;  %3061 = vst.msk [vmem:[#allocation3 + $0x98] sm:$0xff] %vm7060_vm11, %v2984_v31  ;;  %2417 = vrot.lane.b32.xlu0 %v2327_v53, %s4284_s14  ;;  %v2895_v31 = vld [vmem:[#allocation2 + $0xda] sm:$0xff] }
 0x393   : > { %2274 = vst.msk [vmem:[#allocation3 + $0x28] sm:$0xff] %vm2268_vm6, %v2183_v27  ;;  %v2187_v25 = vpop.permute.xlu1 %2186  ;;  %v2135_v27 = vld [vmem:[#allocation2 + $0x159] sm:$0xff] }
 0x394   : > { %2467 = vst.msk [vmem:[#allocation3 + $0x28] sm:$0xff] %vm2461_vm8, %v2376_v26  ;;  %v2380_v7 = vpop.permute.xlu0 %2379  ;;  %v3075_v60 = vld [vmem:[#allocation3 + $0x8] sm:$0xff] }
 0x395   : > { %2276 = vst.msk [vmem:[#allocation3 + $0x38] sm:$0xff] %vm2268_vm6, %v2187_v25  ;;  %2405 = vrot.lane.b32.xlu1 %v5813_v55, %s4284_s14  ;;  %v5930_v55 = vld [vmem:[#allocation2 + $0x142] sm:$0xff] }
 0x396   : > { %2469 = vst.msk [vmem:[#allocation3 + $0x38] sm:$0xff] %vm2461_vm8, %v2380_v7  ;;  %2607 = vrot.lane.b32.xlu0 %v4945_v13, %s4283_s13  ;;  %v2331_v25 = vld [vmem:[#allocation2 + $0x182] sm:$0xff] }
 0x397   : > { %v2191_v34 = vpop.permute.xlu1 %2190 }
 0x398   : > { %2278 = vst.msk [vmem:[#allocation3 + $0x48] sm:$0xff] %vm2268_vm6, %v2191_v34  ;;  %v2570_v50 = vpop.permute.xlu0 %2569 }
 0x399   : > { %2661 = vst.msk [vmem:[#allocation3 + $0x28] sm:$0xff] %vm2655_vm9, %v2570_v50  ;;  %2957 = vrot.lane.b32.xlu1 %v5790_v4, %s4281_s11  ;;  %v3077_v0 = vld [vmem:[#allocation3 + $0x18] sm:$0xff]  ;;  %v3091_v50 = vld [vmem:[#allocation3 + $0x88] sm:$0xff] }
 0x39a   : > { %2611 = vrot.lane.b32.xlu0 %v4952_v15, %s4283_s13 }
 0x39b   : > { %v2366_v11 = vpop.permute.xlu1 %2365 }
 0x39c   : > { %2462 = vst.msk [vmem:[#allocation3] sm:$0xff] %vm2461_vm8, %v2366_v11  ;;  %v2574_v8 = vpop.permute.xlu0 %2573 }
 0x39d   : > { %2663 = vst.msk [vmem:[#allocation3 + $0x38] sm:$0xff] %vm2655_vm9, %v2574_v8  ;;  %2409 = vrot.lane.b32.xlu1 %v2323_v36, %s4284_s14  ;;  %v5985_v8 = vld [vmem:[#allocation2 + $0xb2] sm:$0xff] }
 0x39e   : > { %2800 = vrot.lane.b32.xlu0 %v2134_v42, %s4282_s12  ;;  %v2133_v42 = vld [vmem:[#allocation2 + $0x141] sm:$0xff] }
 0x39f   : > { %v2370_v13 = vpop.permute.xlu1 %2369 }
 0x3a0   : > { %2464 = vst.msk [vmem:[#allocation3 + $0x10] sm:$0xff] %vm2461_vm8, %v2370_v13  ;;  %v2763_v49 = vpop.permute.xlu0 %2762  ;;  %v2523_v13 = vld [vmem:[#allocation2 + $0x180] sm:$0xff] }
 0x3a1   : > { %2854 = vst.msk [vmem:[#allocation3 + $0x28] sm:$0xff] %vm2848_vm10, %v2763_v49  ;;  %2599 = vrot.lane.b32.xlu1 %v2515_v43, %s4283_s13  ;;  %v2525_v43 = vld [vmem:[#allocation2 + $0x198] sm:$0xff] }
 0x3a2   : > { %2196 = vrot.lane.b32.xlu0 %v5833_v30, %s4285_s15 }
 0x3a3   : > { %v2560_v15 = vpop.permute.xlu1 %2559 }
 0x3a4   : > { %2656 = vst.msk [vmem:[#allocation3] sm:$0xff] %vm2655_vm9, %v2560_v15  ;;  %v2215_v10 = vpop.permute.xlu0 %2214 }
 0x3a5   : > { %2290 = vst.msk [vmem:[#allocation3 + $0xa8] sm:$0xff] %vm2268_vm6, %v2215_v10  ;;  %2603 = vrot.lane.b32.xlu1 %v2517_v14, %s4283_s13  ;;  %v2328_v10 = vld [vmem:[#allocation2 + $0x15a] sm:$0xff] }
 0x3a6   : > { %2804 = vrot.lane.b32.xlu0 %v5900_v19, %s4282_s12 }
 0x3a7   : > { %v2564_v33 = vpop.permute.xlu1 %2563 }
 0x3a8   : > { %2658 = vst.msk [vmem:[#allocation3 + $0x10] sm:$0xff] %vm2655_vm9, %v2564_v33  ;;  %v2767_v21 = vpop.permute.xlu0 %2766  ;;  %v3093_v33 = vld [vmem:[#allocation3 + $0x98] sm:$0xff] }
 0x3a9   : > { %2856 = vst.msk [vmem:[#allocation3 + $0x38] sm:$0xff] %vm2848_vm10, %v2767_v21  ;;  %2792 = vrot.lane.b32.xlu1 %v2130_v3, %s4282_s12 }
 0x3aa   : > { %2993 = vrot.lane.b32.xlu0 %v2327_v53, %s4281_s11 }
 0x3ab   : > { %v2753_v61 = vpop.permute.xlu1 %2752 }
 0x3ac   : > { %2849 = vst.msk [vmem:[#allocation3] sm:$0xff] %vm2848_vm10, %v2753_v61  ;;  %v2956_v5 = vpop.permute.xlu0 %2955  ;;  %v2520_v61 = vld [vmem:[#allocation2 + $0x158] sm:$0xff] }
 0x3ad   : > { %3047 = vst.msk [vmem:[#allocation3 + $0x28] sm:$0xff] %vm7060_vm11, %v2956_v5  ;;  %2796 = vrot.lane.b32.xlu1 %v5826_v62, %s4282_s12  ;;  %v2509_v62 = vld [vmem:[#allocation2 + $0xd8] sm:$0xff] }
 0x3ae   : > { %2200 = vrot.lane.b32.xlu0 %v2122_v20, %s4285_s15 }
 0x3af   : > { %v2205_v4 = vpop.permute.xlu1 %2204 }
 0x3b0   : > { %2285 = vst.msk [vmem:[#allocation3 + $0x80] sm:$0xff] %vm2268_vm6, %v2205_v4  ;;  %v2219_v22 = vpop.permute.xlu0 %2218  ;;  %v2718_v4 = vld [vmem:[#allocation2 + $0x199] sm:$0xff] }
 0x3b1   : > { %2292 = vst.msk [vmem:[#allocation3 + $0xb8] sm:$0xff] %vm2268_vm6, %v2219_v22  ;;  %2985 = vrot.lane.b32.xlu1 %v2323_v36, %s4281_s11 }
 0x3b2   : > { %2389 = vrot.lane.b32.xlu0 %v5861_v37, %s4284_s14 }
 0x3b3   : > { %v2757_v44 = vpop.permute.xlu1 %2756 }
 0x3b4   : > { %2851 = vst.msk [vmem:[#allocation3 + $0x10] sm:$0xff] %vm2848_vm10, %v2757_v44  ;;  %v2408_v6 = vpop.permute.xlu0 %2407  ;;  %v2522_v44 = vld [vmem:[#allocation2 + $0x170] sm:$0xff] }
 0x3b5   : > { %2483 = vst.msk [vmem:[#allocation3 + $0xa8] sm:$0xff] %vm2461_vm8, %v2408_v6  ;;  %2194 = vrot.lane.b32.xlu1 %v2119_v2, %s4285_s15 }
 0x3b6   : > { %2997 = vrot.lane.b32.xlu0 %v5921_v16, %s4281_s11 }
 0x3b7   : > { %v2946_v56 = vpop.permute.xlu1 %2945 }
 0x3b8   : > { %3042 = vst.msk [vmem:[#allocation3] sm:$0xff] %vm7060_vm11, %v2946_v56  ;;  %v2960_v47 = vpop.permute.xlu0 %2959  ;;  %v2911_v56 = vld [vmem:[#allocation2 + $0x19a] sm:$0xff] }
 0x3b9   : > { %3049 = vst.msk [vmem:[#allocation3 + $0x38] sm:$0xff] %vm7060_vm11, %v2960_v47  ;;  %2383 = vrot.lane.b32.xlu1 %v2310_v9, %s4284_s14 }
 0x3ba   : > { %2393 = vrot.lane.b32.xlu0 %v2315_v40, %s4284_s14 }
 0x3bb   : > { %v2209_v23 = vpop.permute.xlu1 %2208 }
 0x3bc   : > { %2287 = vst.msk [vmem:[#allocation3 + $0x90] sm:$0xff] %vm2268_vm6, %v2209_v23  ;;  %v2412_v48 = vpop.permute.xlu0 %2411  ;;  %v2715_v23 = vld [vmem:[#allocation2 + $0x171] sm:$0xff] }
 0x3bd   : > { %2485 = vst.msk [vmem:[#allocation3 + $0xb8] sm:$0xff] %vm2461_vm8, %v2412_v48  ;;  %2991 = vrot.lane.b32.xlu1 %v5930_v55, %s4281_s11 }
 0x3be   : > { %2583 = vrot.lane.b32.xlu0 %v2507_v35, %s4283_s13 }
 0x3bf   : > { %v2398_v52 = vpop.permute.xlu1 %2397  ;;  %v3074_v41 = vld [vmem:[#allocation3] sm:$0xff] }
 0x3c0   : > { %2478 = vst.msk [vmem:[#allocation3 + $0x80] sm:$0xff] %vm2461_vm8, %v2398_v52  ;;  %v2602_v29 = vpop.permute.xlu0 %2601  ;;  %v3106_v51 = vpack.c.bf16 %v3075_v60, %v3074_v41  ;;  %v2123_v41 = vld [vmem:[#allocation2 + $0xc9] sm:$0xff] }
 0x3c1   : > { %2677 = vst.msk [vmem:[#allocation3 + $0xa8] sm:$0xff] %vm2655_vm9, %v2602_v29  ;;  %2387 = vrot.lane.b32.xlu1 %v2312_v45, %s4284_s14 }
 0x3c2   : > { %4190 = vmatprep.mubr.msk.bf16.mxu0 %vm3158_vm12, %v3106_v51  ;;  %2587 = vrot.lane.b32.xlu0 %v2509_v62, %s4283_s13 }
 0x3c3   : > { %v2950_v24 = vpop.permute.xlu1 %2949 }
 0x3c4   : > { %3044 = vst.msk [vmem:[#allocation3 + $0x10] sm:$0xff] %vm7060_vm11, %v2950_v24  ;;  %v2606_v58 = vpop.permute.xlu0 %2605 }
 0x3c5   : > { %2679 = vst.msk [vmem:[#allocation3 + $0xb8] sm:$0xff] %vm2655_vm9, %v2606_v58  ;;  %2577 = vrot.lane.b32.xlu1 %v5312_v38, %s4283_s13 }
 0x3c6   : > { %2776 = vrot.lane.b32.xlu0 %v2122_v20, %s4282_s12 }
 0x3c7   : > { %v2402_v32 = vpop.permute.xlu1 %2401 }
 0x3c8   : > { %2480 = vst.msk [vmem:[#allocation3 + $0x90] sm:$0xff] %vm2461_vm8, %v2402_v32  ;;  %v2795_v30 = vpop.permute.xlu0 %2794  ;;  %v2908_v32 = vld [vmem:[#allocation2 + $0x172] sm:$0xff] }
 0x3c9   : > { %2870 = vst.msk [vmem:[#allocation3 + $0xa8] sm:$0xff] %vm2848_vm10, %v2795_v30  ;;  %2581 = vrot.lane.b32.xlu1 %v5317_v46, %s4283_s13 }
 0x3ca   : > { %2228 = vrot.lane.b32.xlu0 %v5900_v19, %s4285_s15 }
 0x3cb   : > { %v2592_v59 = vpop.permute.xlu1 %2591  ;;  %v3076_v1 = vld [vmem:[#allocation3 + $0x10] sm:$0xff] }
 0x3cc   : > { %2672 = vst.msk [vmem:[#allocation3 + $0x80] sm:$0xff] %vm2655_vm9, %v2592_v59  ;;  %v2799_v38 = vpop.permute.xlu0 %2798  ;;  %v3107_v39 = vpack.c.bf16 %v3077_v0, %v3076_v1  ;;  %v2316_v1 = vld [vmem:[#allocation2 + $0xca] sm:$0xff] }
 0x3cd   : > { %2872 = vst.msk [vmem:[#allocation3 + $0xb8] sm:$0xff] %vm2848_vm10, %v2799_v38  ;;  %2770 = vrot.lane.b32.xlu1 %v2119_v2, %s4282_s12 }
 0x3ce   : > { %4191 = vmatmul.mubr.msk.bf16.vlgmr.msra.gmra.mxu0 %vm3158_vm12, %v3107_v39  ;;  %2780 = vrot.lane.b32.xlu0 %v5719_v57, %s4282_s12  ;;  %v2138_v57 = vld [vmem:[#allocation2 + $0x181] sm:$0xff] }
 0x3cf   : > { %v2596_v46 = vpop.permute.xlu1 %2595  ;;  %v3081_v39 = vld [vmem:[#allocation3 + $0x38] sm:$0xff] }
 0x3d0   : > { %2674 = vst.msk [vmem:[#allocation3 + $0x90] sm:$0xff] %vm2655_vm9, %v2596_v46  ;;  %v2988_v17 = vpop.permute.xlu0 %2987 }
 0x3d1   : > { %3063 = vst.msk [vmem:[#allocation3 + $0xa8] sm:$0xff] %vm7060_vm11, %v2988_v17  ;;  %2222 = vrot.lane.b32.xlu1 %v2133_v42, %s4285_s15  ;;  %v2508_v17 = vld [vmem:[#allocation2 + $0xc8] sm:$0xff] }
 0x3d2   : > { %2969 = vrot.lane.b32.xlu0 %v2315_v40, %s4281_s11 }
 0x3d3   : > { %v2785_v12 = vpop.permute.xlu1 %2784 }
 0x3d4   : > { %2865 = vst.msk [vmem:[#allocation3 + $0x80] sm:$0xff] %vm2848_vm10, %v2785_v12  ;;  %v2382_v54 = vpop.permute.xlu0 %2381 }
 0x3d5   : > { %2470 = vst.msk [vmem:[#allocation3 + $0x40] sm:$0xff] %vm2461_vm8, %v2382_v54  ;;  %2774 = vrot.lane.b32.xlu1 %v5963_v18, %s4282_s12 }
 0x3d6   : > { %2232 = vrot.lane.b32.xlu0 %v2138_v57, %s4285_s15 }
 0x3d7   : > { %v2789_v63 = vpop.permute.xlu1 %2788 }
 0x3d8   : > { %2867 = vst.msk [vmem:[#allocation3 + $0x90] sm:$0xff] %vm2848_vm10, %v2789_v63  ;;  %v5970_v28 = vpop.permute.xlu0 %2989 }
 0x3d9   : > { %2963 = vrot.lane.b32.xlu1 %v2312_v45, %s4281_s11  ;;  %v3079_v45 = vld [vmem:[#allocation3 + $0x28] sm:$0xff] }
 0x3da   : > { %2421 = vrot.lane.b32.xlu0 %v5921_v16, %s4284_s14 }
 0x3db   : > { %v2978_v26 = vpop.permute.xlu1 %2977 }
 0x3dc   : > { %3058 = vst.msk [vmem:[#allocation3 + $0x80] sm:$0xff] %vm7060_vm11, %v2978_v26  ;;  %v2386_v37 = vpop.permute.xlu0 %2385 }
 0x3dd   : > { %2472 = vst.msk [vmem:[#allocation3 + $0x50] sm:$0xff] %vm2461_vm8, %v2386_v37  ;;  %2226 = vrot.lane.b32.xlu1 %v2135_v27, %s4285_s15 }
 0x3de   : > { %2973 = vrot.lane.b32.xlu0 %v2895_v31, %s4281_s11 }
 0x3df   : > { %v2374_v3 = vpop.permute.xlu1 %2373 }
 0x3e0   : > { %2466 = vst.msk [vmem:[#allocation3 + $0x20] sm:$0xff] %vm2461_vm8, %v2374_v3  ;;  %v2576_v53 = vpop.permute.xlu0 %2575  ;;  %v2703_v3 = vld [vmem:[#allocation2 + $0xe1] sm:$0xff] }
 0x3e1   : > { %2664 = vst.msk [vmem:[#allocation3 + $0x40] sm:$0xff] %vm2655_vm9, %v2576_v53  ;;  %2415 = vrot.lane.b32.xlu1 %v5930_v55, %s4284_s14 }
 0x3e2   : > { %2425 = vrot.lane.b32.xlu0 %v2331_v25, %s4284_s14 }
 0x3e3   : > { %v2982_v7 = vpop.permute.xlu1 %2981  ;;  %v3090_v34 = vld [vmem:[#allocation3 + $0x80] sm:$0xff] }
 0x3e4   : > { %3060 = vst.msk [vmem:[#allocation3 + $0x90] sm:$0xff] %vm7060_vm11, %v2982_v7  ;;  %v2580_v11 = vpop.permute.xlu0 %2579  ;;  %v3114_v36 = vpack.c.bf16 %v3091_v50, %v3090_v34  ;;  %v3095_v34 = vld [vmem:[#allocation3 + $0xa8] sm:$0xff] }
 0x3e5   : > { %2666 = vst.msk [vmem:[#allocation3 + $0x50] sm:$0xff] %vm2655_vm9, %v2580_v11  ;;  %2967 = vrot.lane.b32.xlu1 %v5985_v8, %s4281_s11  ;;  %v2139_v11 = vld [vmem:[#allocation2 + $0x189] sm:$0xff] }
 0x3e6   : > { %2615 = vrot.lane.b32.xlu0 %v2523_v13, %s4283_s13  ;;  %4206 = vmatprep.mubr.msk.bf16.mxu1 %vm3158_vm12, %v3114_v36 }
 0x3e7   : > { %v2378_v49 = vpop.permute.xlu1 %2377 }
 0x3e8   : > { %2468 = vst.msk [vmem:[#allocation3 + $0x30] sm:$0xff] %vm2461_vm8, %v2378_v49  ;;  %v2769_v15 = vpop.permute.xlu0 %2768 }
 0x3e9   : > { %2857 = vst.msk [vmem:[#allocation3 + $0x40] sm:$0xff] %vm2848_vm10, %v2769_v15  ;;  %2419 = vrot.lane.b32.xlu1 %v2328_v10, %s4284_s14  ;;  %v2896_v15 = vld [vmem:[#allocation2 + $0xe2] sm:$0xff] }
 0x3ea   : > { %2619 = vrot.lane.b32.xlu0 %v2525_v43, %s4283_s13 }
 0x3eb   : > { %v2568_v14 = vpop.permute.xlu1 %2567  ;;  %v3092_v19 = vld [vmem:[#allocation3 + $0x90] sm:$0xff] }
 0x3ec   : > { %2660 = vst.msk [vmem:[#allocation3 + $0x20] sm:$0xff] %vm2655_vm9, %v2568_v14  ;;  %v2221_v21 = vpop.permute.xlu0 %2220  ;;  %v3115_v5 = vpack.c.bf16 %v3093_v33, %v3092_v19 }
 0x3ed   : > { %2293 = vst.msk [vmem:[#allocation3 + $0xc0] sm:$0xff] %vm2268_vm6, %v2221_v21  ;;  %2609 = vrot.lane.b32.xlu1 %v2520_v61, %s4283_s13  ;;  %v2332_v21 = vld [vmem:[#allocation2 + $0x18a] sm:$0xff] }
 0x3ee   : > { %2808 = vrot.lane.b32.xlu0 %v2138_v57, %s4282_s12  ;;  %4207 = vmatmul.mubr.msk.bf16.vlgmr.msra.gmra.mxu1 %vm3158_vm12, %v3115_v5 }
 0x3ef   : > { %v2572_v20 = vpop.permute.xlu1 %2571 }
 0x3f0   : > { %2662 = vst.msk [vmem:[#allocation3 + $0x30] sm:$0xff] %vm2655_vm9, %v2572_v20  ;;  %v2773_v22 = vpop.permute.xlu0 %2772 }
 0x3f1   : > { %2859 = vst.msk [vmem:[#allocation3 + $0x50] sm:$0xff] %vm2848_vm10, %v2773_v22  ;;  %2613 = vrot.lane.b32.xlu1 %v2522_v44, %s4283_s13  ;;  %v2526_v22 = vld [vmem:[#allocation2 + $0x1a0] sm:$0xff] }
 0x3f2   : > { %2812 = vrot.lane.b32.xlu0 %v2718_v4, %s4282_s12  ;;  %v2524_v4 = vld [vmem:[#allocation2 + $0x188] sm:$0xff] }
 0x3f3   : > { %v2761_v6 = vpop.permute.xlu1 %2760 }
 0x3f4   : > { %2853 = vst.msk [vmem:[#allocation3 + $0x20] sm:$0xff] %vm2848_vm10, %v2761_v6  ;;  %v2962_v2 = vpop.permute.xlu0 %2961 }
 0x3f5   : > { %3050 = vst.msk [vmem:[#allocation3 + $0x40] sm:$0xff] %vm7060_vm11, %v2962_v2  ;;  %2802 = vrot.lane.b32.xlu1 %v2135_v27, %s4282_s12 }
 0x3f6   : > { %3001 = vrot.lane.b32.xlu0 %v2331_v25, %s4281_s11 }
 0x3f7   : > { %v2213_v16 = vpop.permute.xlu1 %2212 }
 0x3f8   : > { %2289 = vst.msk [vmem:[#allocation3 + $0xa0] sm:$0xff] %vm2268_vm6, %v2213_v16  ;;  %v2225_v47 = vpop.permute.xlu0 %2224 }
 0x3f9   : > { %2295 = vst.msk [vmem:[#allocation3 + $0xd0] sm:$0xff] %vm2268_vm6, %v2225_v47  ;;  %2198 = vrot.lane.b32.xlu1 %v5963_v18, %s4285_s15  ;;  %v2510_v18 = vld [vmem:[#allocation2 + $0xe0] sm:$0xff] }
 0x3fa   : > { %3005 = vrot.lane.b32.xlu0 %v2911_v56, %s4281_s11  ;;  %v2719_v56 = vld [vmem:[#allocation2 + $0x1a1] sm:$0xff] }
 0x3fb   : > { %v2765_v9 = vpop.permute.xlu1 %2764 }
 0x3fc   : > { %2855 = vst.msk [vmem:[#allocation3 + $0x30] sm:$0xff] %vm2848_vm10, %v2765_v9  ;;  %v2414_v40 = vpop.permute.xlu0 %2413 }
 0x3fd   : > { %2486 = vst.msk [vmem:[#allocation3 + $0xc0] sm:$0xff] %vm2461_vm8, %v2414_v40  ;;  %2806 = vrot.lane.b32.xlu1 %v2715_v23, %s4282_s12 }
 0x3ff   : > { %v2954_v48 = vpop.permute.xlu1 %2953 }
 0x400   : > { %3046 = vst.msk [vmem:[#allocation3 + $0x20] sm:$0xff] %vm7060_vm11, %v2954_v48  ;;  %v2966_v55 = vpop.permute.xlu0 %2965  ;;  %v2912_v48 = vld [vmem:[#allocation2 + $0x1a2] sm:$0xff] }
 0x401   : > { %3052 = vst.msk [vmem:[#allocation3 + $0x50] sm:$0xff] %vm7060_vm11, %v2966_v55  ;;  %2995 = vrot.lane.b32.xlu1 %v2328_v10, %s4281_s11 }
 0x403   : > { %v2217_v35 = vpop.permute.xlu1 %2216 }
 0x404   : > { %2291 = vst.msk [vmem:[#allocation3 + $0xb0] sm:$0xff] %vm2268_vm6, %v2217_v35  ;;  %v2418_v52 = vpop.permute.xlu0 %2417 }
 0x405   : > { %2488 = vst.msk [vmem:[#allocation3 + $0xd0] sm:$0xff] %vm2461_vm8, %v2418_v52  ;;  %2202 = vrot.lane.b32.xlu1 %v2123_v41, %s4285_s15 }
 0x407   : > { %v2406_v60 = vpop.permute.xlu1 %2405  ;;  %v3078_v29 = vld [vmem:[#allocation3 + $0x20] sm:$0xff] }
 0x408   : > { %2482 = vst.msk [vmem:[#allocation3 + $0xa0] sm:$0xff] %vm2461_vm8, %v2406_v60  ;;  %v2608_v51 = vpop.permute.xlu0 %2607  ;;  %v3108_v62 = vpack.c.bf16 %v3079_v45, %v3078_v29 }
 0x409   : > { %2680 = vst.msk [vmem:[#allocation3 + $0xc0] sm:$0xff] %vm2655_vm9, %v2608_v51  ;;  %2391 = vrot.lane.b32.xlu1 %v5985_v8, %s4284_s14 }
 0x40a   : > { %4194 = vmatprep.mubr.msk.bf16.mxu0 %vm3158_vm12, %v3108_v62 }
 0x40b   : > { %v2958_v24 = vpop.permute.xlu1 %2957 }
 0x40c   : > { %3048 = vst.msk [vmem:[#allocation3 + $0x30] sm:$0xff] %vm7060_vm11, %v2958_v24  ;;  %v2612_v58 = vpop.permute.xlu0 %2611 }
 0x40d   : > { %2682 = vst.msk [vmem:[#allocation3 + $0xd0] sm:$0xff] %vm2655_vm9, %v2612_v58  ;;  %2999 = vrot.lane.b32.xlu1 %v2908_v32, %s4281_s11 }
 0x40f   : > { %v2410_v30 = vpop.permute.xlu1 %2409 }
 0x410   : > { %2484 = vst.msk [vmem:[#allocation3 + $0xb0] sm:$0xff] %vm2461_vm8, %v2410_v30  ;;  %v2801_v59 = vpop.permute.xlu0 %2800  ;;  %v3084_v30 = vld [vmem:[#allocation3 + $0x50] sm:$0xff] }
 0x411   : > { %2873 = vst.msk [vmem:[#allocation3 + $0xc0] sm:$0xff] %vm2848_vm10, %v2801_v59  ;;  %2395 = vrot.lane.b32.xlu1 %v2316_v1, %s4284_s14 }
 0x413   : > { %v2600_v0 = vpop.permute.xlu1 %2599  ;;  %v3080_v38 = vld [vmem:[#allocation3 + $0x30] sm:$0xff] }
 0x414   : > { %2676 = vst.msk [vmem:[#allocation3 + $0xa0] sm:$0xff] %vm2655_vm9, %v2600_v0  ;;  %v2197_v46 = vpop.permute.xlu0 %2196  ;;  %v3109_v42 = vpack.c.bf16 %v3081_v39, %v3080_v38 }
 0x415   : > { %2281 = vst.msk [vmem:[#allocation3 + $0x60] sm:$0xff] %vm2268_vm6, %v2197_v46  ;;  %2585 = vrot.lane.b32.xlu1 %v2508_v17, %s4283_s13 }
 0x416   : > { %4195 = vmatmul.mubr.msk.bf16.gmra.mxu0 %vm3158_vm12, %v3109_v42 }
 0x417   : > { %v2604_v12 = vpop.permute.xlu1 %2603 }
 0x418   : > { %2678 = vst.msk [vmem:[#allocation3 + $0xb0] sm:$0xff] %vm2655_vm9, %v2604_v12  ;;  %v2805_v54 = vpop.permute.xlu0 %2804 }
 0x419   : > { %2875 = vst.msk [vmem:[#allocation3 + $0xd0] sm:$0xff] %vm2848_vm10, %v2805_v54  ;;  %2589 = vrot.lane.b32.xlu1 %v2510_v18, %s4283_s13 }
 0x41b   : > { %v2793_v57 = vpop.permute.xlu1 %2792 }
 0x41c   : > { %2869 = vst.msk [vmem:[#allocation3 + $0xa0] sm:$0xff] %vm2848_vm10, %v2793_v57  ;;  %v2994_v63 = vpop.permute.xlu0 %2993 }
 0x41d   : > { %3066 = vst.msk [vmem:[#allocation3 + $0xc0] sm:$0xff] %vm7060_vm11, %v2994_v63  ;;  %2778 = vrot.lane.b32.xlu1 %v2123_v41, %s4282_s12  ;;  %v3082_v41 = vld [vmem:[#allocation3 + $0x40] sm:$0xff] }
 0x41f   : > { %v2797_v26 = vpop.permute.xlu1 %2796 }
 0x420   : > { %2871 = vst.msk [vmem:[#allocation3 + $0xb0] sm:$0xff] %vm2848_vm10, %v2797_v26  ;;  %v2201_v37 = vpop.permute.xlu0 %2200 }
 0x421   : > { %3064 = vst.msk [vmem:[#allocation3 + $0xb0] sm:$0xff] %vm7060_vm11, %v5970_v28  ;;  %2230 = vrot.lane.b32.xlu1 %v2715_v23, %s4285_s15 }
 0x422   : > { %2283 = vst.msk [vmem:[#allocation3 + $0x70] sm:$0xff] %vm2268_vm6, %v2201_v37 }
 0x423   : > { %v2986_v27 = vpop.permute.xlu1 %2985 }
 0x424   : > { %3062 = vst.msk [vmem:[#allocation3 + $0xa0] sm:$0xff] %vm7060_vm11, %v2986_v27  ;;  %v2390_v31 = vpop.permute.xlu0 %2389  ;;  %v3098_v26 = vld [vmem:[#allocation3 + $0xc0] sm:$0xff] }
 0x425   : > { %2474 = vst.msk [vmem:[#allocation3 + $0x60] sm:$0xff] %vm2461_vm8, %v2390_v31  ;;  %2782 = vrot.lane.b32.xlu1 %v2703_v3, %s4282_s12 }
 0x427   : > { %v2195_v53 = vpop.permute.xlu1 %2194 }
 0x428   : > { %2280 = vst.msk [vmem:[#allocation3 + $0x58] sm:$0xff] %vm2268_vm6, %v2195_v53  ;;  %v2998_v25 = vpop.permute.xlu0 %2997  ;;  %v3096_v14 = vld [vmem:[#allocation3 + $0xb0] sm:$0xff] }
 0x429   : > { %3068 = vst.msk [vmem:[#allocation3 + $0xd0] sm:$0xff] %vm7060_vm11, %v2998_v25  ;;  %2971 = vrot.lane.b32.xlu1 %v2316_v1, %s4281_s11 }
 0x42b   : > { %v2384_v28 = vpop.permute.xlu1 %2383  ;;  %v3094_v7 = vld [vmem:[#allocation3 + $0xa0] sm:$0xff] }
 0x42c   : > { %2471 = vst.msk [vmem:[#allocation3 + $0x48] sm:$0xff] %vm2461_vm8, %v2384_v28  ;;  %v2394_v50 = vpop.permute.xlu0 %2393  ;;  %v3116_v8 = vpack.c.bf16 %v3095_v34, %v3094_v7 }
 0x42d   : > { %2476 = vst.msk [vmem:[#allocation3 + $0x70] sm:$0xff] %vm2461_vm8, %v2394_v50  ;;  %2234 = vrot.lane.b32.xlu1 %v2139_v11, %s4285_s15 }
 0x42e   : > { %4210 = vmatprep.mubr.msk.bf16.mxu1 %vm3158_vm12, %v3116_v8 }
 0x42f   : > { %v2992_v36 = vpop.permute.xlu1 %2991 }
 0x430   : > { %3065 = vst.msk [vmem:[#allocation3 + $0xb8] sm:$0xff] %vm7060_vm11, %v2992_v36  ;;  %v2584_v13 = vpop.permute.xlu0 %2583  ;;  %v3100_v25 = vld [vmem:[#allocation3 + $0xd0] sm:$0xff] }
 0x431   : > { %2668 = vst.msk [vmem:[#allocation3 + $0x60] sm:$0xff] %vm2655_vm9, %v2584_v13  ;;  %2423 = vrot.lane.b32.xlu1 %v2908_v32, %s4284_s14 }
 0x433   : > { %v2388_v49 = vpop.permute.xlu1 %2387 }
 0x434   : > { %2473 = vst.msk [vmem:[#allocation3 + $0x58] sm:$0xff] %vm2461_vm8, %v2388_v49  ;;  %v2588_v43 = vpop.permute.xlu0 %2587 }
 0x435   : > { %2670 = vst.msk [vmem:[#allocation3 + $0x70] sm:$0xff] %vm2655_vm9, %v2588_v43  ;;  %2975 = vrot.lane.b32.xlu1 %v2896_v15, %s4281_s11 }
 0x437   : > { %v2578_v10 = vpop.permute.xlu1 %2577  ;;  %v3097_v19 = vld [vmem:[#allocation3 + $0xb8] sm:$0xff] }
 0x438   : > { %2665 = vst.msk [vmem:[#allocation3 + $0x48] sm:$0xff] %vm2655_vm9, %v2578_v10  ;;  %v2777_v33 = vpop.permute.xlu0 %2776  ;;  %v3117_v61 = vpack.c.bf16 %v3097_v19, %v3096_v14 }
 0x439   : > { %2861 = vst.msk [vmem:[#allocation3 + $0x60] sm:$0xff] %vm2848_vm10, %v2777_v33  ;;  %2427 = vrot.lane.b32.xlu1 %v2332_v21, %s4284_s14 }
 0x43a   : > { %4211 = vmatmul.mubr.msk.bf16.gmra.mxu1 %vm3158_vm12, %v3117_v61 }
 0x43b   : > { %v2582_v5 = vpop.permute.xlu1 %2581 }
 0x43c   : > { %2667 = vst.msk [vmem:[#allocation3 + $0x58] sm:$0xff] %vm2655_vm9, %v2582_v5  ;;  %v2229_v20 = vpop.permute.xlu0 %2228 }
 0x43d   : > { %2297 = vst.msk [vmem:[#allocation3 + $0xe0] sm:$0xff] %vm2268_vm6, %v2229_v20  ;;  %2617 = vrot.lane.b32.xlu1 %v2524_v4, %s4283_s13 }
 0x43f   : > { %v2771_v44 = vpop.permute.xlu1 %2770 }
 0x440   : > { %2858 = vst.msk [vmem:[#allocation3 + $0x48] sm:$0xff] %vm2848_vm10, %v2771_v44  ;;  %v2781_v6 = vpop.permute.xlu0 %2780 }
 0x441   : > { %2863 = vst.msk [vmem:[#allocation3 + $0x70] sm:$0xff] %vm2848_vm10, %v2781_v6  ;;  %2621 = vrot.lane.b32.xlu1 %v2526_v22, %s4283_s13 }
 0x443   : > { %v2223_v2 = vpop.permute.xlu1 %2222 }
 0x444   : > { %2294 = vst.msk [vmem:[#allocation3 + $0xc8] sm:$0xff] %vm2268_vm6, %v2223_v2  ;;  %v2970_v16 = vpop.permute.xlu0 %2969 }
 0x445   : > { %3054 = vst.msk [vmem:[#allocation3 + $0x60] sm:$0xff] %vm7060_vm11, %v2970_v16  ;;  %2810 = vrot.lane.b32.xlu1 %v2139_v11, %s4282_s12 }
 0x447   : > { %v2775_v47 = vpop.permute.xlu1 %2774 }
 0x448   : > { %2860 = vst.msk [vmem:[#allocation3 + $0x58] sm:$0xff] %vm2848_vm10, %v2775_v47  ;;  %v2233_v9 = vpop.permute.xlu0 %2232 }
 0x449   : > { %2299 = vst.msk [vmem:[#allocation3 + $0xf0] sm:$0xff] %vm2268_vm6, %v2233_v9  ;;  %2814 = vrot.lane.b32.xlu1 %v2719_v56, %s4282_s12 }
 0x44b   : > { %v2964_v40 = vpop.permute.xlu1 %2963 }
 0x44c   : > { %3051 = vst.msk [vmem:[#allocation3 + $0x48] sm:$0xff] %vm7060_vm11, %v2964_v40  ;;  %v2422_v23 = vpop.permute.xlu0 %2421  ;;  %v3086_v43 = vld [vmem:[#allocation3 + $0x60] sm:$0xff] }
 0x44d   : > { %2490 = vst.msk [vmem:[#allocation3 + $0xe0] sm:$0xff] %vm2461_vm8, %v2422_v23  ;;  %3003 = vrot.lane.b32.xlu1 %v2332_v21, %s4281_s11 }
 0x44f   : > { %v2227_v55 = vpop.permute.xlu1 %2226 }
 0x450   : > { %2296 = vst.msk [vmem:[#allocation3 + $0xd8] sm:$0xff] %vm2268_vm6, %v2227_v55  ;;  %v2974_v35 = vpop.permute.xlu0 %2973 }
 0x451   : > { %3056 = vst.msk [vmem:[#allocation3 + $0x70] sm:$0xff] %vm7060_vm11, %v2974_v35  ;;  %3007 = vrot.lane.b32.xlu1 %v2912_v48, %s4281_s11 }
 0x453   : > { %v2416_v52 = vpop.permute.xlu1 %2415  ;;  %v3083_v60 = vld [vmem:[#allocation3 + $0x48] sm:$0xff] }
 0x454   : > { %2487 = vst.msk [vmem:[#allocation3 + $0xc8] sm:$0xff] %vm2461_vm8, %v2416_v52  ;;  %v2426_v29 = vpop.permute.xlu0 %2425  ;;  %v3110_v45 = vpack.c.bf16 %v3083_v60, %v3082_v41 }
 0x455   : > { %2492 = vst.msk [vmem:[#allocation3 + $0xf0] sm:$0xff] %vm2461_vm8, %v2426_v29 }
 0x456   : > { %4198 = vmatprep.mubr.msk.bf16.mxu0 %vm3158_vm12, %v3110_v45 }
 0x457   : > { %v2968_v51 = vpop.permute.xlu1 %2967 }
 0x458   : > { %3053 = vst.msk [vmem:[#allocation3 + $0x58] sm:$0xff] %vm7060_vm11, %v2968_v51  ;;  %v2616_v62 = vpop.permute.xlu0 %2615  ;;  %v3088_v21 = vld [vmem:[#allocation3 + $0x70] sm:$0xff] }
 0x459   : > { %2684 = vst.msk [vmem:[#allocation3 + $0xe0] sm:$0xff] %vm2655_vm9, %v2616_v62 }
 0x45b   : > { %v2420_v24 = vpop.permute.xlu1 %2419 }
 0x45c   : > { %2489 = vst.msk [vmem:[#allocation3 + $0xd8] sm:$0xff] %vm2461_vm8, %v2420_v24  ;;  %v2620_v58 = vpop.permute.xlu0 %2619 }
 0x45d   : > { %2686 = vst.msk [vmem:[#allocation3 + $0xf0] sm:$0xff] %vm2655_vm9, %v2620_v58 }
 0x45f   : > { %v2610_v32 = vpop.permute.xlu1 %2609  ;;  %v3085_v59 = vld [vmem:[#allocation3 + $0x58] sm:$0xff] }
 0x460   : > { %2681 = vst.msk [vmem:[#allocation3 + $0xc8] sm:$0xff] %vm2655_vm9, %v2610_v32  ;;  %v2809_v1 = vpop.permute.xlu0 %2808  ;;  %v3111_v0 = vpack.c.bf16 %v3085_v59, %v3084_v30 }
 0x461   : > { %2877 = vst.msk [vmem:[#allocation3 + $0xe0] sm:$0xff] %vm2848_vm10, %v2809_v1 }
 0x462   : > { %4199 = vmatmul.mubr.msk.bf16.gmra.mxu0 %vm3158_vm12, %v3111_v0 }
 0x463   : > { %v2614_v38 = vpop.permute.xlu1 %2613 }
 0x464   : > { %2683 = vst.msk [vmem:[#allocation3 + $0xd8] sm:$0xff] %vm2655_vm9, %v2614_v38  ;;  %v2813_v39 = vpop.permute.xlu0 %2812 }
 0x465   : > { %2879 = vst.msk [vmem:[#allocation3 + $0xf0] sm:$0xff] %vm2848_vm10, %v2813_v39 }
 0x467   : > { %v2803_v46 = vpop.permute.xlu1 %2802 }
 0x468   : > { %2874 = vst.msk [vmem:[#allocation3 + $0xc8] sm:$0xff] %vm2848_vm10, %v2803_v46  ;;  %v3002_v17 = vpop.permute.xlu0 %3001 }
 0x469   : > { %3070 = vst.msk [vmem:[#allocation3 + $0xe0] sm:$0xff] %vm7060_vm11, %v3002_v17 }
 0x46b   : > { %v2199_v42 = vpop.permute.xlu1 %2198 }
 0x46c   : > { %2282 = vst.msk [vmem:[#allocation3 + $0x68] sm:$0xff] %vm2268_vm6, %v2199_v42  ;;  %v3006_v12 = vpop.permute.xlu0 %3005 }
 0x46d   : > { %3072 = vst.msk [vmem:[#allocation3 + $0xf0] sm:$0xff] %vm7060_vm11, %v3006_v12 }
 0x46f   : > { %v2807_v54 = vpop.permute.xlu1 %2806 }
 0x470   : > { %2876 = vst.msk [vmem:[#allocation3 + $0xd8] sm:$0xff] %vm2848_vm10, %v2807_v54  ;;  %v3102_v2 = vld [vmem:[#allocation3 + $0xe0] sm:$0xff] }
 0x473   : > { %v2996_v18 = vpop.permute.xlu1 %2995 }
 0x474   : > { %3067 = vst.msk [vmem:[#allocation3 + $0xc8] sm:$0xff] %vm7060_vm11, %v2996_v18  ;;  %v3104_v9 = vld [vmem:[#allocation3 + $0xf0] sm:$0xff] }
 0x477   : > { %v2203_v57 = vpop.permute.xlu1 %2202 }
 0x478   : > { %2284 = vst.msk [vmem:[#allocation3 + $0x78] sm:$0xff] %vm2268_vm6, %v2203_v57 }
 0x47b   : > { %v2392_v63 = vpop.permute.xlu1 %2391  ;;  %v3099_v37 = vld [vmem:[#allocation3 + $0xc8] sm:$0xff] }
 0x47c   : > { %2475 = vst.msk [vmem:[#allocation3 + $0x68] sm:$0xff] %vm2461_vm8, %v2392_v63  ;;  %v3118_v27 = vpack.c.bf16 %v3099_v37, %v3098_v26 }
 0x47e   : > { %4214 = vmatprep.mubr.msk.bf16.mxu1 %vm3158_vm12, %v3118_v27 }
 0x47f   : > { %v3000_v31 = vpop.permute.xlu1 %2999 }
 0x480   : > { %3069 = vst.msk [vmem:[#allocation3 + $0xd8] sm:$0xff] %vm7060_vm11, %v3000_v31 }
 0x483   : > { %v2396_v3 = vpop.permute.xlu1 %2395 }
 0x484   : > { %2477 = vst.msk [vmem:[#allocation3 + $0x78] sm:$0xff] %vm2461_vm8, %v2396_v3 }
 0x487   : > { %v2586_v53 = vpop.permute.xlu1 %2585  ;;  %v3101_v28 = vld [vmem:[#allocation3 + $0xd8] sm:$0xff] }
 0x488   : > { %2669 = vst.msk [vmem:[#allocation3 + $0x68] sm:$0xff] %vm2655_vm9, %v2586_v53  ;;  %v3119_v7 = vpack.c.bf16 %v3101_v28, %v3100_v25 }
 0x48a   : > { %4215 = vmatmul.mubr.msk.bf16.gmra.mxu1 %vm3158_vm12, %v3119_v7 }
 0x48b   : > { %v2590_v34 = vpop.permute.xlu1 %2589 }
 0x48c   : > { %2671 = vst.msk [vmem:[#allocation3 + $0x78] sm:$0xff] %vm2655_vm9, %v2590_v34 }
 0x48e   : > { %v6129_v56 = vpop.f32.mrf.mxu0 }
 0x48f   : > { %v2779_v50 = vpop.permute.xlu1 %2778 }
 0x490   : > { %2862 = vst.msk [vmem:[#allocation3 + $0x68] sm:$0xff] %vm2848_vm10, %v2779_v50  ;;  %v6132_v23 = vpop.f32.mrf.mxu0 }
 0x492   : > { %v6135_v55 = vpop.f32.mrf.mxu0 }
 0x493   : > { %v2231_v11 = vpop.permute.xlu1 %2230  ;;  %v6146_v29 = vrot.slane %v6135_v55, 7 }
 0x494   : > { %2298 = vst.msk [vmem:[#allocation3 + $0xe8] sm:$0xff] %vm2268_vm6, %v2231_v11  ;;  %v6137_v35 = vpop.f32.mrf.mxu0 }
 0x495   : > { %7067 = vst [vmem:[#allocation4_spill] sm:$0xff] %v6137_v35  ;;  %7068 = vst [vmem:[#allocation5_spill] sm:$0xff] %v6146_v29  ;;  %v3806_v24 = vsel %vm3562_vm13, %v6146_v29, %v6137_v35  ;;  %v3841_v58 = vsel %vm3565_vm14, %v6146_v29, %v6137_v35  ;;  %v3869_v32 = vsel %vm3568_vm15, %v6146_v29, %v6137_v35 }
 0x496   : > { %v3897_v38 = vsel %vm3571_vm0, %v6146_v29, %v6137_v35  ;;  %v3925_v39 = vsel %vm3574_vm7, %v6146_v29, %v6137_v35 }
 0x497   : > { %v2783_v8 = vpop.permute.xlu1 %2782 }
 0x498   : > { %2864 = vst.msk [vmem:[#allocation3 + $0x78] sm:$0xff] %vm2848_vm10, %v2783_v8 }
 0x49b   : > { %v2972_v36 = vpop.permute.xlu1 %2971 }
 0x49c   : > { %3055 = vst.msk [vmem:[#allocation3 + $0x68] sm:$0xff] %vm7060_vm11, %v2972_v36 }
 0x49f   : > { %v2235_v13 = vpop.permute.xlu1 %2234 }
 0x4a0   : > { %2300 = vst.msk [vmem:[#allocation3 + $0xf8] sm:$0xff] %vm2268_vm6, %v2235_v13 }
 0x4a3   : > { %v2424_v49 = vpop.permute.xlu1 %2423  ;;  %v3087_v15 = vld [vmem:[#allocation3 + $0x68] sm:$0xff] }
 0x4a4   : > { %2491 = vst.msk [vmem:[#allocation3 + $0xe8] sm:$0xff] %vm2461_vm8, %v2424_v49  ;;  %v3112_v10 = vpack.c.bf16 %v3087_v15, %v3086_v43 }
 0x4a6   : > { %4202 = vmatprep.mubr.msk.bf16.mxu0 %vm3158_vm12, %v3112_v10 }
 0x4a7   : > { %v2976_v14 = vpop.permute.xlu1 %2975 }
 0x4a8   : > { %3057 = vst.msk [vmem:[#allocation3 + $0x78] sm:$0xff] %vm7060_vm11, %v2976_v14  ;;  %v3442_v14 = vmul.f32 %v6137_v35, %v6137_v35 }
 0x4ab   : > { %v2428_v19 = vpop.permute.xlu1 %2427 }
 0x4ac   : > { %2493 = vst.msk [vmem:[#allocation3 + $0xf8] sm:$0xff] %vm2461_vm8, %v2428_v19  ;;  %v3373_v19 = vsel %vm262_vm1, %v6137_v35, 0.0 }
 0x4af   : > { %v2618_v33 = vpop.permute.xlu1 %2617  ;;  %v3089_v61 = vld [vmem:[#allocation3 + $0x78] sm:$0xff] }
 0x4b0   : > { %2685 = vst.msk [vmem:[#allocation3 + $0xe8] sm:$0xff] %vm2655_vm9, %v2618_v33  ;;  %v3113_v5 = vpack.c.bf16 %v3089_v61, %v3088_v21  ;;  %v3441_v33 = vmul.f32 %v6132_v23, %v6132_v23  ;;  %v3372_v21 = vsel %vm262_vm1, %v6132_v23, 0.0  ;;  %v3474_v61 = vsel %vm262_vm1, %v3442_v14, 0.0 }
 0x4b2   : > { %4203 = vmatmul.mubr.msk.bf16.gmra.mxu0 %vm3158_vm12, %v3113_v5  ;;  %v3374_v5 = vadd.f32 %v3373_v19, %v3372_v21 }
 0x4b3   : > { %v2622_v20 = vpop.permute.xlu1 %2621 }
 0x4b4   : > { %2687 = vst.msk [vmem:[#allocation3 + $0xf8] sm:$0xff] %vm2655_vm9, %v2622_v20  ;;  %v3443_v20 = vmul.f32 %v6129_v56, %v6129_v56 }
 0x4b7   : > { %v2811_v4 = vpop.permute.xlu1 %2810 }
 0x4b8   : > { %2878 = vst.msk [vmem:[#allocation3 + $0xe8] sm:$0xff] %vm2848_vm10, %v2811_v4  ;;  %v3473_v4 = vsel %vm262_vm1, %v3441_v33, 0.0 }
 0x4bb   : > { %v2815_v22 = vpop.permute.xlu1 %2814 }
 0x4bc   : > { %2880 = vst.msk [vmem:[#allocation3 + $0xf8] sm:$0xff] %vm2848_vm10, %v2815_v22  ;;  %v3475_v22 = vadd.f32 %v3474_v61, %v3473_v4 }
 0x4bf   : > { %v3004_v44 = vpop.permute.xlu1 %3003 }
 0x4c0   : > { %3071 = vst.msk [vmem:[#allocation3 + $0xe8] sm:$0xff] %vm7060_vm11, %v3004_v44  ;;  %v3375_v44 = vsel %vm262_vm1, %v6129_v56, 0.0 }
 0x4c3   : > { %v3008_v6 = vpop.permute.xlu1 %3007 }
 0x4c4   : > { %3073 = vst.msk [vmem:[#allocation3 + $0xf8] sm:$0xff] %vm7060_vm11, %v3008_v6  ;;  %vm3580_vm11 = vcmask 1047559   ;;  %v3376_v6 = vadd.f32 %v3375_v44, %v3374_v5 }
 0x4c7   : > { %v3103_v16 = vld [vmem:[#allocation3 + $0xe8] sm:$0xff] }
 0x4c8   : > { %v3120_v47 = vpack.c.bf16 %v3103_v16, %v3102_v2  ;;  %v3476_v2 = vsel %vm262_vm1, %v3443_v20, 0.0  ;;  %v3444_v16 = vmul.f32 %v6135_v55, %v6135_v55 }
 0x4ca   : > { %4218 = vmatprep.mubr.msk.bf16.mxu1 %vm3158_vm12, %v3120_v47 }
 0x4cb   : > { %v3105_v40 = vld [vmem:[#allocation3 + $0xf8] sm:$0xff] }
 0x4cc   : > { %v3121_v48 = vpack.c.bf16 %v3105_v40, %v3104_v9  ;;  %v3477_v9 = vadd.f32 %v3476_v2, %v3475_v22  ;;  %v3377_v40 = vsel %vm262_vm1, %v6135_v55, 0.0 }
 0x4ce   : > { %4219 = vmatmul.mubr.msk.bf16.gmra.mxu1 %vm3158_vm12, %v3121_v48  ;;  %vm3577_vm12 = vcmask 1046534  }
 0x4d6   : > { %v6139_v52 = vpop.f32.mrf.mxu0 }
 0x4d8   : > { %v6141_v41 = vpop.f32.mrf.mxu0 }
 0x4d9   : > { %v3445_v47 = vmul.f32 %v6141_v41, %v6141_v41  ;;  %v3379_v48 = vsel %vm262_vm1, %v6141_v41, 0.0  ;;  %v6295_v61 = vrot.slane %v6141_v41, 6 }
 0x4da   : > { %v6143_v60 = vpop.f32.mrf.mxu0 }
 0x4db   : > { %v3809_v62 = vrot.slane %v6143_v60, 5 }
 0x4dc   : > { %v6148_v45 = vpop.f32.mrf.mxu0 }
 0x4dd   : > { %v6151_v51 = vrot.slane %v6148_v45, 6 }
 0x4df   : > { %7069 = vst [vmem:[#allocation6_spill] sm:$0xff] %v6151_v51  ;;  %v3808_v30 = vsel %vm3565_vm14, %v6151_v51, %v3806_v24  ;;  %v3842_v59 = vsel %vm3568_vm15, %v6151_v51, %v3841_v58  ;;  %v3870_v1 = vsel %vm3571_vm0, %v6151_v51, %v3869_v32  ;;  %v3898_v42 = vsel %vm3574_vm7, %v6151_v51, %v3897_v38 }
 0x4e0   : > { %v3810_v0 = vsel %vm3568_vm15, %v3809_v62, %v3808_v30  ;;  %v3843_v46 = vsel %vm3571_vm0, %v3809_v62, %v3842_v59  ;;  %v3871_v17 = vsel %vm3574_vm7, %v3809_v62, %v3870_v1  ;;  %v3926_v12 = vsel %vm3577_vm12, %v6151_v51, %v3925_v39 }
 0x4e1   : > { %v6183_v54 = vsel %vm3577_vm12, %v3809_v62, %v3898_v42  ;;  %v6186_v18 = vsel %vm3580_vm11, %v3809_v62, %v3926_v12  ;;  %v4009_v57 = vsel %vm3562_vm13, %v6151_v51, %v6146_v29  ;;  %v3982_v8 = vsel %vm3562_vm13, %v3809_v62, %v6151_v51 }
 0x4e2   : > { %7070 = vst [vmem:[#allocation7_spill] sm:$0xff] %v6183_v54  ;;  %7071 = vst [vmem:[#allocation8_spill] sm:$0xff] %v6186_v18  ;;  %v4010_v63 = vsel %vm3565_vm14, %v3809_v62, %v4009_v57  ;;  %v3378_v24 = vadd.f32 %v3377_v40, %v3376_v6  ;;  %v3478_v58 = vsel %vm262_vm1, %v3444_v16, 0.0  ;;  %v3480_v32 = vsel %vm262_vm1, %v3445_v47, 0.0 }
 0x4e3   : > { %v3381_v30 = vsel %vm262_vm1, %v6148_v45, 0.0  ;;  %v3479_v1 = vadd.f32 %v3478_v58, %v3477_v9  ;;  %v3447_v39 = vmul.f32 %v6139_v52, %v6139_v52  ;;  %v3383_v42 = vsel %vm262_vm1, %v6139_v52, 0.0 }
 0x4e4   : > { %v3380_v59 = vadd.f32 %v3379_v48, %v3378_v24  ;;  %v6316_v9 = vrot.slane %v6139_v52, 5 }
 0x4e5   : > { %v3481_v38 = vadd.f32 %v3480_v32, %v3479_v1  ;;  %v3484_v57 = vsel %vm262_vm1, %v3447_v39, 0.0 }
 0x4e6   : > { %v3382_v55 = vadd.f32 %v3381_v30, %v3380_v59 }
 0x4e8   : > { %v3384_v12 = vadd.f32 %v3383_v42, %v3382_v55 }
 0x522   : > { %v6192_v26 = vpop.f32.mrf.mxu0 }
 0x523   : > { %v3451_v44 = vmul.f32 %v6192_v26, %v6192_v26  ;;  %v3391_v40 = vsel %vm262_vm1, %v6192_v26, 0.0  ;;  %v6350_v39 = vrot.slane %v6192_v26, 3 }
 0x524   : > { %v6194_v37 = vpop.f32.mrf.mxu0 }
 0x525   : > { %v6311_v2 = vrot.slane %v6194_v37, 4  ;;  %v3492_v1 = vsel %vm262_vm1, %v3451_v44, 0.0 }
 0x526   : > { %v6196_v27 = vpop.f32.mrf.mxu0 }
 0x527   : > { %v6201_v53 = vrot.slane %v6196_v27, 3 }
 0x528   : > { %v3280_v31 = vpop.f32.mrf.mxu0 }
 0x529   : > { %v6198_v3 = vrot.slane %v3280_v31, 4  ;;  %v3389_v33 = vsel %vm262_vm1, %v3280_v31, 0.0 }
 0x52b   : > { %7072 = vst [vmem:[#allocation9_spill] sm:$0xff] %v6198_v3  ;;  %v3812_v25 = vsel %vm3571_vm0, %v6198_v3, %v3810_v0  ;;  %v3844_v28 = vsel %vm3574_vm7, %v6198_v3, %v3843_v46  ;;  %v3872_v50 = vsel %vm3577_vm12, %v6198_v3, %v3871_v17  ;;  %v3955_v11 = vsel %vm3562_vm13, %v6198_v3, %v3809_v62  ;;  %v4208_v46 = vpop.f32.mrf.mxu1 }
 0x52c   : > { %v6209_v7 = vsel %vm3574_vm7, %v6201_v53, %v3812_v25  ;;  %v6213_v34 = vsel %vm3577_vm12, %v6201_v53, %v3844_v28  ;;  %v6223_v36 = vsel %vm3580_vm11, %v6201_v53, %v3872_v50  ;;  %v6227_v13 = vsel %vm3565_vm14, %v6201_v53, %v3955_v11 }
 0x52d   : > { %v3983_v49 = vsel %vm3565_vm14, %v6198_v3, %v3982_v8  ;;  %v4011_v15 = vsel %vm3568_vm15, %v6198_v3, %v4010_v63  ;;  %v3446_v62 = vmul.f32 %v6148_v45, %v6148_v45  ;;  %v3448_v45 = vmul.f32 %v6143_v60, %v6143_v60  ;;  %v6280_v25 = vpop.f32.mrf.mxu1 }
 0x52e   : > { %v6233_v43 = vsel %vm3568_vm15, %v6201_v53, %v3983_v49  ;;  %v6239_v10 = vsel %vm3571_vm0, %v6201_v53, %v4011_v15  ;;  %v3449_v63 = vmul.f32 %v6194_v37, %v6194_v37  ;;  %v3385_v50 = vsel %vm262_vm1, %v6143_v60, 0.0 }
 0x52f   : > { %v3482_v0 = vsel %vm262_vm1, %v3446_v62, 0.0  ;;  %v3387_v11 = vsel %vm262_vm1, %v6194_v37, 0.0  ;;  %v3450_v8 = vmul.f32 %v3280_v31, %v3280_v31  ;;  %v3386_v49 = vadd.f32 %v3385_v50, %v3384_v12  ;;  %v6292_v21 = vpop.f32.mrf.mxu1 }
 0x530   : > { %v3483_v17 = vadd.f32 %v3482_v0, %v3481_v38  ;;  %v6287_v15 = vrot.slane %v6129_v56, 7  ;;  %v3486_v14 = vsel %vm262_vm1, %v3448_v45, 0.0  ;;  %v3488_v19 = vsel %vm262_vm1, %v3449_v63, 0.0 }
 0x531   : > { %v3388_v60 = vadd.f32 %v3387_v11, %v3386_v49  ;;  %v3490_v20 = vsel %vm262_vm1, %v3450_v8, 0.0  ;;  %v3459_v41 = vmul.f32 %v4208_v46, %v4208_v46  ;;  %v6308_v6 = vpop.f32.mrf.mxu1  ;;  %v6327_v37 = vsel %vm262_vm1, %v4208_v46, 0.0 }
 0x532   : > { %v3485_v28 = vadd.f32 %v3484_v57, %v3483_v17  ;;  %v6301_v56 = vsel %vm3562_vm13, %v6287_v15, %v6132_v23  ;;  %v3600_v31 = vsel %vm3565_vm14, %v6287_v15, %v6132_v23  ;;  %v3627_v48 = vsel %vm3568_vm15, %v6287_v15, %v6132_v23 }
 0x533   : > { %v3390_v22 = vadd.f32 %v3389_v33, %v3388_v60  ;;  %v3601_v47 = vsel %vm3568_vm15, %v6295_v61, %v3600_v31  ;;  %v3654_v62 = vsel %vm3571_vm0, %v6287_v15, %v6132_v23  ;;  %v6329_v24 = vpop.f32.mrf.mxu1  ;;  %v3681_v52 = vsel %vm3574_vm7, %v6287_v15, %v6132_v23 }
 0x534   : > { %v3487_v5 = vadd.f32 %v3486_v14, %v3485_v28  ;;  %v6337_v30 = vsel %vm3577_vm12, %v6287_v15, %v6132_v23  ;;  %v6339_v59 = vrot.slane %v4208_v46, 7  ;;  %v3452_v0 = vmul.f32 %v6196_v27, %v6196_v27 }
 0x535   : > { %v3392_v58 = vadd.f32 %v3391_v40, %v3390_v22  ;;  %v3602_v38 = vsel %vm3571_vm0, %v6316_v9, %v3601_v47  ;;  %v6347_v55 = vsel %vm262_vm1, %v3459_v41, 0.0  ;;  %v3393_v12 = vsel %vm262_vm1, %v6196_v27, 0.0  ;;  %v6361_v50 = vpop.f32.mrf.mxu1 }
 0x536   : > { %v3489_v4 = vadd.f32 %v3488_v19, %v3487_v5  ;;  %v3603_v46 = vsel %vm3574_vm7, %v6311_v2, %v3602_v38  ;;  %v3460_v28 = vmul.f32 %v6292_v21, %v6292_v21  ;;  %v3403_v8 = vsel %vm262_vm1, %v6280_v25, 0.0 }
 0x537   : > { %v3394_v26 = vadd.f32 %v3393_v12, %v3392_v58  ;;  %v3457_v49 = vmul.f32 %v6280_v25, %v6280_v25  ;;  %v3494_v27 = vsel %vm262_vm1, %v3452_v0, 0.0  ;;  %v3604_v19 = vsel %vm3577_vm12, %v6350_v39, %v3603_v46  ;;  %v6391_v40 = vpop.f32.mrf.mxu1 }
 0x538   : > { %v3491_v16 = vadd.f32 %v3490_v20, %v3489_v4  ;;  %v6376_v33 = vsel %vm3562_vm13, %v6339_v59, %v6280_v25  ;;  %v6380_v60 = vsel %vm262_vm1, %v6292_v21, 0.0  ;;  %v6389_v47 = vsel %vm262_vm1, %v3460_v28, 0.0 }
 0x539   : > { %v3504_v0 = vsel %vm262_vm1, %v3457_v49, 0.0  ;;  %v3628_v46 = vsel %vm3571_vm0, %v6295_v61, %v3627_v48  ;;  %v3655_v28 = vsel %vm3574_vm7, %v6295_v61, %v3654_v62  ;;  %v3566_v48 = vsel %vm3565_vm14, %v6295_v61, %v6301_v56 }
 0x53a   : > { %v3493_v17 = vadd.f32 %v3492_v1, %v3491_v16  ;;  %v3458_v16 = vmul.f32 %v6308_v6, %v6308_v6  ;;  %v3629_v62 = vsel %vm3574_vm7, %v6316_v9, %v3628_v46 }
 0x53c   : > { %v3495_v20 = vadd.f32 %v3494_v27, %v3493_v17  ;;  %v3506_v27 = vsel %vm262_vm1, %v3458_v16, 0.0 }
 0x572   : > { %v4204_v32 = vpop.f32.mrf.mxu0 }
 0x573   : > { %v3455_v44 = vmul.f32 %v4204_v32, %v4204_v32  ;;  %v3399_v38 = vsel %vm262_vm1, %v4204_v32, 0.0 }
 0x574   : > { %v3293_v42 = vpop.f32.mrf.mxu0 }
 0x575   : > { %v3395_v57 = vsel %vm262_vm1, %v3293_v42, 0.0  ;;  %v3453_v45 = vmul.f32 %v3293_v42, %v3293_v42  ;;  %v6357_v63 = vrot.slane %v3293_v42, 2 }
 0x576   : > { %v6363_v11 = vpop.f32.mrf.mxu0  ;;  %v3396_v5 = vadd.f32 %v3395_v57, %v3394_v26  ;;  %v3405_v57 = vsel %vm262_vm1, %v6308_v6, 0.0  ;;  %v3500_v26 = vsel %vm262_vm1, %v3455_v44, 0.0  ;;  %v6419_v44 = vrot.slane %v4204_v32, 1 }
 0x577   : > { %v3496_v14 = vsel %vm262_vm1, %v3453_v45, 0.0  ;;  %v3605_v4 = vsel %vm3580_vm11, %v6357_v63, %v3604_v19  ;;  %v3456_v17 = vmul.f32 %v6363_v11, %v6363_v11  ;;  %v3401_v49 = vsel %vm262_vm1, %v6363_v11, 0.0  ;;  %v6413_v19 = vpop.f32.mrf.mxu1 }
 0x578   : > { %v3296_v22 = vpop.f32.mrf.mxu0  ;;  %3613 = vrot.lane.b32.xlu0 %v3605_v4, %s4288_s21  ;;  %v3497_v58 = vadd.f32 %v3496_v14, %v3495_v20  ;;  %v3682_v14 = vsel %vm3577_vm12, %v6295_v61, %v3681_v52  ;;  %v3463_v4 = vmul.f32 %v6329_v24, %v6329_v24  ;;  %v3656_v52 = vsel %vm3577_vm12, %v6316_v9, %v3655_v28 }
 0x579   : > { %v3397_v31 = vsel %vm262_vm1, %v3296_v22, 0.0  ;;  %v3454_v41 = vmul.f32 %v3296_v22, %v3296_v22  ;;  %v3461_v32 = vmul.f32 %v6361_v50, %v6361_v50  ;;  %v6458_v28 = vrot.slane %v6329_v24, 5 }
 0x57a   : > { %v3398_v1 = vadd.f32 %v3397_v31, %v3396_v5  ;;  %v3502_v31 = vsel %vm262_vm1, %v3456_v17, 0.0  ;;  %v3632_v17 = vsel %vm3562_vm13, %v6419_v44, %v6357_v63 }
 0x57b   : > { %v3498_v42 = vsel %vm262_vm1, %v3454_v41, 0.0  ;;  %v6424_v41 = vpop.f32.mrf.mxu1 }
 0x57c   : > { %v3400_v12 = vadd.f32 %v3399_v38, %v3398_v1  ;;  %v3499_v45 = vadd.f32 %v3498_v42, %v3497_v58  ;;  %v6428_v58 = vsel %vm3580_vm11, %v6316_v9, %v3682_v14  ;;  %v6433_v1 = vsel %vm3580_vm11, %v6295_v61, %v6337_v30 }
 0x57d   : > { %v6437_v38 = vrot.slane %v3296_v22, 2  ;;  %v6448_v42 = vrot.slane %v6361_v50, 6  ;;  %v3415_v22 = vsel %vm262_vm1, %v6329_v24, 0.0  ;;  %v3512_v24 = vsel %vm262_vm1, %v3461_v32, 0.0 }
 0x57e   : > { %v3402_v5 = vadd.f32 %v3401_v49, %v3400_v12  ;;  %v3501_v20 = vadd.f32 %v3500_v26, %v3499_v45  ;;  %v6452_v12 = vsel %vm3568_vm15, %v6316_v9, %v3566_v48  ;;  %v3516_v45 = vsel %vm262_vm1, %v3463_v4, 0.0  ;;  %v3341_v49 = vpop.f32.mrf.mxu1 }
 0x57f   : > { %v3464_v26 = vmul.f32 %v6391_v40, %v6391_v40  ;;  %v3633_v48 = vsel %vm3565_vm14, %v6280_v25, %v3632_v17 }
 0x580   : > { %v3404_v56 = vadd.f32 %v3403_v8, %v3402_v5  ;;  %v3503_v16 = vadd.f32 %v3502_v31, %v3501_v20  ;;  %v6445_v8 = vsel %vm3562_vm13, %v6316_v9, %v6295_v61  ;;  %v3411_v5 = vsel %vm262_vm1, %v6361_v50, 0.0  ;;  %v6500_v32 = vpop.f32.mrf.mxu1 }
 0x581   : > { %v3462_v20 = vmul.f32 %v6413_v19, %v6413_v19  ;;  %v3585_v50 = vsel %vm3565_vm14, %v6448_v42, %v6376_v33 }
 0x582   : > { %v3406_v46 = vadd.f32 %v3405_v57, %v3404_v56  ;;  %v3505_v30 = vadd.f32 %v3504_v0, %v3503_v16  ;;  %v3606_v0 = vsel %vm3562_vm13, %v6280_v25, %v6419_v44  ;;  %v3634_v16 = vsel %vm3568_vm15, %v6339_v59, %v3633_v48 }
 0x583   : > { %v3607_v56 = vsel %vm3565_vm14, %v6339_v59, %v3606_v0  ;;  %v3630_v48 = vsel %vm3577_vm12, %v6311_v2, %v3629_v62  ;;  %v3658_v62 = vsel %vm3562_vm13, %v6357_v63, %v6350_v39 }
 0x584   : > { %v3408_v14 = vadd.f32 %v6327_v37, %v3406_v46  ;;  %v3507_v57 = vadd.f32 %v3506_v27, %v3505_v30  ;;  %v6476_v37 = vsel %vm3577_vm12, %v6437_v38, %v6209_v7  ;;  %v3417_v27 = vsel %vm262_vm1, %v6391_v40, 0.0 }
 0x585   : > { %v6492_v7 = vsel %vm3580_vm11, %v6437_v38, %v6213_v34  ;;  %v3928_v46 = vsel %vm3562_vm13, %v6201_v53, %v6198_v3  ;;  %v3413_v34 = vsel %vm262_vm1, %v6413_v19, 0.0  ;;  %v3514_v30 = vsel %vm262_vm1, %v3462_v20, 0.0 }
 0x586   : > { %v3410_v4 = vadd.f32 %v6380_v60, %v3408_v14  ;;  %v3509_v31 = vadd.f32 %v6347_v55, %v3507_v57  ;;  %v6497_v60 = vsel %vm3562_vm13, %v6437_v38, %v6201_v53  ;;  %v3518_v55 = vsel %vm262_vm1, %v3464_v26, 0.0 }
 0x587   : > { %v6511_v14 = vsel %vm3565_vm14, %v6437_v38, %v3928_v46  ;;  %v6515_v26 = vsel %vm3568_vm15, %v6458_v28, %v3585_v50  ;;  %v3635_v53 = vsel %vm3571_vm0, %v6448_v42, %v3634_v16  ;;  %v3684_v20 = vsel %vm3562_vm13, %v6350_v39, %v6311_v2 }
 0x588   : > { %v3412_v33 = vadd.f32 %v3411_v5, %v3410_v4  ;;  %v3511_v17 = vadd.f32 %v6389_v47, %v3509_v31  ;;  %v3608_v47 = vsel %vm3568_vm15, %v6448_v42, %v3607_v56  ;;  %v6525_v5 = vsel %vm3580_vm11, %v6311_v2, %v3656_v52  ;;  %v6535_v31 = vpop.f32.mrf.mxu1 }
 0x589   : > { %v3467_v4 = vmul.f32 %v6424_v41, %v6424_v41  ;;  %v3465_v52 = vmul.f32 %v3341_v49, %v3341_v49  ;;  %v3609_v16 = vsel %vm3571_vm0, %v6458_v28, %v3608_v47  ;;  %v6550_v46 = vrot.slane %v6424_v41, 3 }
 0x58a   : > { %v3513_v57 = vadd.f32 %v3512_v24, %v3511_v17  ;;  %v3414_v0 = vadd.f32 %v3413_v34, %v3412_v33  ;;  %v3710_v24 = vsel %vm3562_vm13, %v6311_v2, %v6316_v9  ;;  %v3636_v33 = vsel %vm3574_vm7, %v6458_v28, %v3635_v53 }
 0x58b   : > { %v6547_v17 = vsel %vm3568_vm15, %v6437_v38, %v6227_v13  ;;  %v3466_v47 = vmul.f32 %v6535_v31, %v6535_v31  ;;  %v3659_v53 = vsel %vm3565_vm14, %v6419_v44, %v3658_v62  ;;  %v3468_v62 = vmul.f32 %v6500_v32, %v6500_v32 }
 0x58c   : > { %v3416_v50 = vadd.f32 %v3415_v22, %v3414_v0  ;;  %v3515_v56 = vadd.f32 %v3514_v30, %v3513_v57  ;;  %v6552_v22 = vrot.slane %v3341_v49, 4  ;;  %v3419_v0 = vsel %vm262_vm1, %v3341_v49, 0.0 }
 0x58d   : > { %v3421_v49 = vsel %vm262_vm1, %v6535_v31, 0.0 }
 0x58e   : > { %v4220_v34 = vpop.f32.mrf.mxu1  ;;  %v3418_v30 = vadd.f32 %v3417_v27, %v3416_v50  ;;  %v3517_v57 = vadd.f32 %v3516_v45, %v3515_v56  ;;  %v3610_v18 = vsel %vm3574_vm7, %v6552_v22, %v3609_v16  ;;  %v3637_v27 = vsel %vm3577_vm12, %v6552_v22, %v3636_v33 }
 0x58f   : > { %v6557_v51 = vrot.slane %v4220_v34, 1  ;;  %v3520_v45 = vsel %vm262_vm1, %v3465_v52, 0.0  ;;  %v3685_v56 = vsel %vm3565_vm14, %v6357_v63, %v3684_v20  ;;  %v3660_v20 = vsel %vm3568_vm15, %v6280_v25, %v3659_v53 }
 0x590   : > { %v3357_v13 = vpop.f32.mrf.mxu1  ;;  %v3420_v29 = vadd.f32 %v3419_v0, %v3418_v30  ;;  %v3519_v35 = vadd.f32 %v3518_v55, %v3517_v57  ;;  %v3423_v55 = vsel %vm262_vm1, %v6424_v41, 0.0  ;;  %v3522_v30 = vsel %vm262_vm1, %v3466_v47, 0.0 }
 0x591   : > { %v6568_v50 = vrot.slane %v3357_v13, 2  ;;  %3617 = vrot.lane.b32.xlu0 %v6557_v51, %s4288_s21  ;;  %v3611_v57 = vsel %vm3577_vm12, %v6550_v46, %v3610_v18  ;;  %v3638_v0 = vsel %vm3580_vm11, %v6550_v46, %v3637_v27  ;;  %v3524_v47 = vsel %vm262_vm1, %v3467_v4, 0.0 }
 0x592   : > { %v3422_v16 = vadd.f32 %v3421_v49, %v3420_v29  ;;  %v3521_v33 = vadd.f32 %v3520_v45, %v3519_v35  ;;  %v6578_v52 = vpop.f32.mrf.mxu1  ;;  %v3686_v35 = vsel %vm3568_vm15, %v6419_v44, %v3685_v56  ;;  %v3425_v18 = vsel %vm262_vm1, %v6500_v32, 0.0 }
 0x593   : > { %v3612_v54 = vsel %vm3580_vm11, %v6568_v50, %v3611_v57  ;;  %v3469_v45 = vmul.f32 %v3357_v13, %v3357_v13  ;;  %v3737_v53 = vsel %vm3565_vm14, %v6311_v2, %v6445_v8  ;;  %v3526_v27 = vsel %vm262_vm1, %v3468_v62, 0.0 }
 0x594   : > { %v3424_v3 = vadd.f32 %v3423_v55, %v3422_v16  ;;  %v3523_v41 = vadd.f32 %v3522_v30, %v3521_v33  ;;  %v6589_v29 = vpop.f32.mrf.mxu1  ;;  %3615 = vrot.lane.b32.xlu1 %v3612_v54, %s4288_s21  ;;  %v3631_v56 = vsel %vm3580_vm11, %v6350_v39, %v3630_v48  ;;  %v3427_v4 = vsel %vm262_vm1, %v3357_v13, 0.0 }
 0x595   : > { %3642 = vrot.lane.b32.xlu0 %v3638_v0, %s4287_s17  ;;  %v3470_v16 = vmul.f32 %v6589_v29, %v6589_v29  ;;  %v3661_v54 = vsel %vm3571_vm0, %v6339_v59, %v3660_v20  ;;  %v3687_v33 = vsel %vm3571_vm0, %v6280_v25, %v3686_v35  ;;  %v3738_v62 = vsel %vm3568_vm15, %v6350_v39, %v3737_v53 }
 0x596   : > { %v3426_v49 = vadd.f32 %v3425_v18, %v3424_v3  ;;  %v3525_v55 = vadd.f32 %v3524_v47, %v3523_v41  ;;  %v3711_v3 = vsel %vm3565_vm14, %v6350_v39, %v3710_v24  ;;  %v3471_v48 = vmul.f32 %v4220_v34, %v4220_v34 }
 0x597   : > { %v3528_v13 = vsel %vm262_vm1, %v3469_v45, 0.0  ;;  %v3429_v57 = vsel %vm262_vm1, %v6589_v29, 0.0  ;;  %v3665_v0 = vsel %vm3562_vm13, %v6568_v50, %v6550_v46  ;;  %v3662_v41 = vsel %vm3574_vm7, %v6448_v42, %v3661_v54 }
 0x598   : > { %v3428_v30 = vadd.f32 %v3427_v4, %v3426_v49  ;;  %v3527_v8 = vadd.f32 %v3526_v27, %v3525_v55  ;;  %3640 = vrot.lane.b32.xlu1 %v3631_v56, %s4287_s17  ;;  %v3688_v35 = vsel %vm3574_vm7, %v6339_v59, %v3687_v33  ;;  %v3431_v47 = vsel %vm262_vm1, %v4220_v34, 0.0 }
 0x599   : > { %3667 = vrot.lane.b32.xlu0 %v6525_v5, %s4286_s16  ;;  %v3472_v18 = vmul.f32 %v6578_v52, %v6578_v52  ;;  %v3530_v45 = vsel %vm262_vm1, %v3470_v16, 0.0  ;;  %v3572_v5 = vsel %vm3571_vm0, %v6311_v2, %v6452_v12  ;;  %v3639_v49 = vsel %vm3562_vm13, %v6557_v51, %v6568_v50 }
 0x59a   : > { %v3529_v20 = vadd.f32 %v3528_v13, %v3527_v8  ;;  %v3430_v24 = vadd.f32 %v3429_v57, %v3428_v30  ;;  %v3666_v55 = vsel %vm3565_vm14, %v6557_v51, %v3665_v0  ;;  %v3532_v34 = vsel %vm262_vm1, %v3471_v48, 0.0 }
 0x59b   : > { %v3433_v56 = vsel %vm262_vm1, %v6578_v52, 0.0  ;;  %v3663_v12 = vsel %vm3577_vm12, %v6458_v28, %v3662_v41  ;;  %v3689_v4 = vsel %vm3577_vm12, %v6448_v42, %v3688_v35  ;;  %v3717_v33 = vsel %vm3562_vm13, %v6552_v22, %v6458_v28 }
 0x59c   : > { %v3432_v53 = vadd.f32 %v3431_v47, %v3430_v24  ;;  %v3531_v27 = vadd.f32 %v3530_v45, %v3529_v20  ;;  %3644 = vrot.lane.b32.xlu1 %v3639_v49, %s4287_s17  ;;  %v3712_v30 = vsel %vm3568_vm15, %v6357_v63, %v3711_v3  ;;  %v3534_v8 = vsel %vm262_vm1, %v3472_v18, 0.0 }
 0x59d   : > { %3671 = vrot.lane.b32.xlu0 %v3666_v55, %s4286_s16  ;;  %v6658_v48 = vsel %vm3571_vm0, %v6437_v38, %v6233_v43  ;;  %v6663_v13 = vsel %vm3574_vm7, %v6437_v38, %v6239_v10  ;;  %v3589_v57 = vsel %vm3571_vm0, %v6552_v22, %v6515_v26  ;;  %v3664_v3 = vsel %vm3580_vm11, %v6552_v22, %v3663_v12 }
 0x59e   : > { %v3434_v16 = vadd.f32 %v3433_v56, %v3432_v53  ;;  %v3533_v54 = vadd.f32 %v3532_v34, %v3531_v27  ;;  %v3690_v24 = vsel %vm3580_vm11, %v6458_v28, %v3689_v4  ;;  %v3691_v43 = vsel %vm3562_vm13, %v6550_v46, %v6552_v22 }
 0x59f   : > { %v3713_v10 = vsel %vm3571_vm0, %v6419_v44, %v3712_v30  ;;  %v3575_v26 = vsel %vm3574_vm7, %v6350_v39, %v3572_v5  ;;  %v3591_v18 = vsel %vm3574_vm7, %v6550_v46, %v3589_v57  ;;  %v3718_v45 = vsel %vm3565_vm14, %v6550_v46, %v3717_v33 }
 0x5a0   : > { %v3435_v0 = vrot.slane %v3434_v16, 4  ;;  %v3535_v20 = vadd.f32 %v3534_v8, %v3533_v54  ;;  %3669 = vrot.lane.b32.xlu1 %v3664_v3, %s4286_s16  ;;  %v3578_v47 = vsel %vm3577_vm12, %v6357_v63, %v3575_v26  ;;  %v3739_v53 = vsel %vm3571_vm0, %v6357_v63, %v3738_v62 }
 0x5a1   : > { %3696 = vrot.lane.b32.xlu0 %v3690_v24, %s4285_s15  ;;  %v3581_v27 = vsel %vm3580_vm11, %v6419_v44, %v3578_v47  ;;  %v3593_v5 = vsel %vm3577_vm12, %v6568_v50, %v3591_v18  ;;  %v3714_v34 = vsel %vm3574_vm7, %v6280_v25, %v3713_v10  ;;  %v6708_v12 = vrot.slane %v6292_v21, 7 }
 0x5a2   : > { %v3436_v41 = vadd.f32 %v3435_v0, %v3434_v16  ;;  %v3536_v35 = vrot.slane %v3535_v20, 4  ;;  %3598 = vst.msk [vmem:[%s6677_s27] sm:$0xff] %vm262_vm1, %v3581_v27  ;;  %v3595_v56 = vsel %vm3580_vm11, %v6557_v51, %v3593_v5  ;;  %v3692_v62 = vsel %vm3565_vm14, %v6568_v50, %v3691_v43 }
 0x5a3   : > { %v3719_v4 = vsel %vm3568_vm15, %v6568_v50, %v3718_v45  ;;  %3599 = vst.msk [vmem:[%s6677_s27 + $0x8] sm:$0xff] %vm262_vm1, %v3595_v56  ;;  %v3740_v54 = vsel %vm3574_vm7, %v6419_v44, %v3739_v53  ;;  %v6734_v33 = vrot.slane %v6363_v11, 1  ;;  %v3715_v30 = vsel %vm3577_vm12, %v6339_v59, %v3714_v34 }
 0x5a4   : > { %v3437_v49 = vrot.slane %v3436_v41, 2  ;;  %v3537_v55 = vadd.f32 %v3536_v35, %v3535_v20  ;;  %3694 = vrot.lane.b32.xlu1 %v6428_v58, %s4285_s15  ;;  %v3762_v58 = vsel %vm3562_vm13, %v6295_v61, %v6287_v15  ;;  %v3769_v8 = vsel %vm3562_vm13, %v6448_v42, %v6339_v59 }
 0x5a5   : > { %3721 = vrot.lane.b32.xlu0 %v6433_v1, %s4284_s14  ;;  %v6731_v1 = vrot.slane %v6413_v19, 6  ;;  %v3693_v20 = vsel %vm3568_vm15, %v6557_v51, %v3692_v62  ;;  %v3720_v61 = vsel %vm3571_vm0, %v6557_v51, %v3719_v4  ;;  %v3741_v11 = vsel %vm3577_vm12, %v6280_v25, %v3740_v54 }
 0x5a6   : > { %v3438_v21 = vadd.f32 %v3437_v49, %v3436_v41  ;;  %v3538_v16 = vrot.slane %v3537_v55, 2  ;;  %v3743_v3 = vsel %vm3562_vm13, %v6458_v28, %v6448_v42  ;;  %v3763_v24 = vsel %vm3565_vm14, %v6316_v9, %v3762_v58 }
 0x5a7   : > { %v3820_v43 = vsel %vm3562_vm13, %v6708_v12, %v6308_v6  ;;  %vm3542_vm1 = vcmask 1040384   ;;  %v3716_v10 = vsel %vm3580_vm11, %v6448_v42, %v3715_v30  ;;  %v3770_v26 = vsel %vm3565_vm14, %v6458_v28, %v3769_v8 }
 0x5a8   : > { %v3439_v57 = vrot.slane %v3438_v21, 1  ;;  %v3539_v0 = vadd.f32 %v3538_v16, %v3537_v55  ;;  %3698 = vrot.lane.b32.xlu1 %v3693_v20, %s4285_s15  ;;  %v3822_v41 = vsel %vm3565_vm14, %v6731_v1, %v3820_v43  ;;  %s238_s15 = scalar_lea.vmem %s7059_s5, %s4133_s20  ;;  %v3742_v47 = vsel %vm3580_vm11, %v6339_v59, %v3741_v11 }
 0x5a9   : > { %3725 = vrot.lane.b32.xlu0 %v3720_v61, %s4284_s14  ;;  %v3847_v18 = vsel %vm3562_vm13, %v6308_v6, %v6734_v33  ;;  %v6773_v42 = vrot.slane %v6535_v31, 4  ;;  %v3744_v28 = vsel %vm3565_vm14, %v6552_v22, %v3743_v3  ;;  %v3771_v45 = vsel %vm3568_vm15, %v6552_v22, %v3770_v26  ;;  %v7074_v26 = vld [vmem:[#allocation9_spill] sm:$0xff] }
 0x5aa   : > { %v3540_v19 = vrot.slane %v3539_v0, 1  ;;  %v3440_v35 = vadd.f32 %v3439_v57, %v3438_v21  ;;  %v3764_v59 = vsel %vm3568_vm15, %v6311_v2, %v3763_v24  ;;  %v6784_v53 = vrot.slane %v6391_v40, 5 }
 0x5ab   : > { %v3735_v31 = vsel %vm3580_vm11, %v6287_v15, %v6132_v23  ;;  %v3848_v5 = vsel %vm3565_vm14, %v6708_v12, %v3847_v18  ;;  %v3745_v22 = vsel %vm3568_vm15, %v6550_v46, %v3744_v28  ;;  %v3772_v2 = vsel %vm3571_vm0, %v6550_v46, %v3771_v45 }
 0x5ac   : > { %v3541_v9 = vadd.f32 %v3540_v19, %v3539_v0  ;;  %3723 = vrot.lane.b32.xlu1 %v3716_v10, %s4284_s14  ;;  %v3765_v40 = vsel %vm3571_vm0, %v6350_v39, %v3764_v59  ;;  %v3824_v49 = vsel %vm3568_vm15, %v6784_v53, %v3822_v41  ;;  %v6802_v55 = vrot.slane %v6589_v29, 2  ;;  %v7073_v10 = vld [vmem:[#allocation7_spill] sm:$0xff] }
 0x5ad   : > { %3750 = vrot.lane.b32.xlu0 %v3742_v47, %s4283_s13  ;;  %v3746_v15 = vsel %vm3571_vm0, %v6568_v50, %v3745_v22  ;;  %v3773_v46 = vsel %vm3574_vm7, %v6568_v50, %v3772_v2  ;;  %v3826_v39 = vsel %vm3571_vm0, %v6773_v42, %v3824_v49  ;;  %v6814_v34 = vrot.slane %v6500_v32, 3  ;;  %v7076_v49 = vld [vmem:[#allocation4_spill] sm:$0xff] }
 0x5ae   : > { %v3543_v27 = vsel %vm3542_vm1, %v3440_v35, %v3541_v9  ;;  %v3766_v29 = vsel %vm3574_vm7, %v6357_v63, %v3765_v40  ;;  %v3849_v56 = vsel %vm3568_vm15, %v6731_v1, %v3848_v5  ;;  %v3774_v62 = vsel %vm3577_vm12, %v6557_v51, %v3773_v46 }
 0x5af   : > { %3544 = vst.msk [vmem:[%s238_s15] sm:$0x3] %vm265_vm2, %v3543_v27  ;;  %v3828_v50 = vsel %vm3574_vm7, %v6814_v34, %v3826_v39  ;;  %v3767_v32 = vsel %vm3577_vm12, %v6419_v44, %v3766_v29  ;;  %v3850_v4 = vsel %vm3571_vm0, %v6784_v53, %v3849_v56  ;;  %v6835_v21 = vrot.slane %v6578_v52, 1  ;;  %v7078_v39 = vld [vmem:[#allocation6_spill] sm:$0xff] }
 0x5b0   : > { %3748 = vrot.lane.b32.xlu1 %v3735_v31, %s4283_s13  ;;  %v3830_v63 = vsel %vm3577_vm12, %v6802_v55, %v3828_v50  ;;  %v3768_v16 = vsel %vm3580_vm11, %v6280_v25, %v3767_v32  ;;  %v3851_v44 = vsel %vm3574_vm7, %v6773_v42, %v3850_v4  ;;  %v3818_v58 = vsel %vm3580_vm11, %v6734_v33, %v6476_v37 }
 0x5b1   : > { %3775 = vrot.lane.b32.xlu0 %v6132_v23, %s4282_s12  ;;  %v3747_v23 = vsel %vm3574_vm7, %v6557_v51, %v3746_v15  ;;  %v3874_v51 = vsel %vm3562_vm13, %v6734_v33, %v6437_v38  ;;  %v3832_v54 = vsel %vm3580_vm11, %v6835_v21, %v3830_v63  ;;  %v3902_v38 = vsel %vm3565_vm14, %v6734_v33, %v6497_v60  ;;  %v7077_v15 = vld [vmem:[#allocation5_spill] sm:$0xff] }
 0x5b2   : > { %v3875_v52 = vsel %vm3565_vm14, %v6308_v6, %v3874_v51  ;;  %v3852_v25 = vsel %vm3577_vm12, %v6814_v34, %v3851_v44  ;;  %v3903_v57 = vsel %vm3568_vm15, %v6308_v6, %v3902_v38  ;;  %v3881_v61 = vsel %vm3562_vm13, %v6835_v21, %v6802_v55 }
 0x5b3   : > { %v3853_v30 = vsel %vm3580_vm11, %v6802_v55, %v3852_v25  ;;  %v3876_v8 = vsel %vm3568_vm15, %v6708_v12, %v3875_v52  ;;  %v3904_v0 = vsel %vm3571_vm0, %v6708_v12, %v3903_v57  ;;  %v3930_v3 = vsel %vm3568_vm15, %v6734_v33, %v6511_v14  ;;  %v7075_v14 = vld [vmem:[#allocation8_spill] sm:$0xff] }
 0x5b4   : > { %3752 = vrot.lane.b32.xlu1 %v3747_v23, %s4283_s13  ;;  %v3877_v60 = vsel %vm3571_vm0, %v6731_v1, %v3876_v8  ;;  %v3905_v20 = vsel %vm3574_vm7, %v6731_v1, %v3904_v0  ;;  %v3931_v24 = vsel %vm3571_vm0, %v6308_v6, %v3930_v3  ;;  %v3958_v43 = vsel %vm3571_vm0, %v6734_v33, %v6547_v17 }
 0x5b5   : > { %3779 = vrot.lane.b32.xlu0 %v3774_v62, %s4282_s12  ;;  %v3878_v37 = vsel %vm3574_vm7, %v6784_v53, %v3877_v60  ;;  %v3900_v41 = vsel %vm3580_vm11, %v7074_v26, %v7073_v10  ;;  %v3935_v35 = vsel %vm3562_vm13, %v6814_v34, %v6773_v42  ;;  %v3908_v9 = vsel %vm3562_vm13, %v6802_v55, %v6814_v34 }
 0x5b6   : > { %v3936_v17 = vsel %vm3565_vm14, %v6802_v55, %v3935_v35  ;;  %v3932_v47 = vsel %vm3574_vm7, %v6708_v12, %v3931_v24  ;;  %v3959_v18 = vsel %vm3574_vm7, %v6308_v6, %v3958_v43  ;;  %v3909_v28 = vsel %vm3565_vm14, %v6835_v21, %v3908_v9 }
 0x5b7   : > { %v3937_v45 = vsel %vm3568_vm15, %v6835_v21, %v3936_v17  ;;  %v3933_v59 = vsel %vm3577_vm12, %v6731_v1, %v3932_v47  ;;  %v3960_v27 = vsel %vm3577_vm12, %v6708_v12, %v3959_v18  ;;  %v3989_v22 = vsel %vm3562_vm13, %v6784_v53, %v6731_v1 }
 0x5b8   : > { %3777 = vrot.lane.b32.xlu1 %v3768_v16, %s4282_s12  ;;  %v3934_v31 = vsel %vm3580_vm11, %v6784_v53, %v3933_v59  ;;  %v3961_v5 = vsel %vm3580_vm11, %v6731_v1, %v3960_v27  ;;  %v3962_v2 = vsel %vm3562_vm13, %v6773_v42, %v6784_v53  ;;  %v3990_v40 = vsel %vm3565_vm14, %v6773_v42, %v3989_v22 }
 0x5b9   : > { %3835 = vrot.lane.b32.xlu0 %v3832_v54, %s4281_s11  ;;  %v3953_v46 = vsel %vm3577_vm12, %v7077_v15, %v7076_v49  ;;  %v3981_v56 = vsel %vm3580_vm11, %v7077_v15, %v7076_v49  ;;  %v3963_v23 = vsel %vm3565_vm14, %v6814_v34, %v3962_v2  ;;  %v3991_v62 = vsel %vm3568_vm15, %v6814_v34, %v3990_v40 }
 0x5ba   : > { %v3954_v29 = vsel %vm3580_vm11, %v7078_v39, %v3953_v46  ;;  %v3964_v50 = vsel %vm3568_vm15, %v6802_v55, %v3963_v23  ;;  %v3992_v32 = vsel %vm3571_vm0, %v6802_v55, %v3991_v62  ;;  %v3986_v63 = vsel %vm3574_vm7, %v6734_v33, %v6658_v48 }
 0x5bb   : > { %v3965_v4 = vsel %vm3571_vm0, %v6835_v21, %v3964_v50  ;;  %v3993_v51 = vsel %vm3574_vm7, %v6835_v21, %v3992_v32  ;;  %v3987_v16 = vsel %vm3577_vm12, %v6308_v6, %v3986_v63  ;;  %v4014_v54 = vsel %vm3577_vm12, %v6734_v33, %v6663_v13 }
 0x5bc   : > { %3833 = vrot.lane.b32.xlu1 %v3818_v58, %s4281_s11  ;;  %v4016_v48 = vsel %vm3562_vm13, %v6731_v1, %v6708_v12  ;;  %v3988_v44 = vsel %vm3580_vm11, %v6708_v12, %v3987_v16  ;;  %v4015_v52 = vsel %vm3580_vm11, %v6308_v6, %v4014_v54  ;;  %vm3622_vm2 = vcmask 130113  }
 0x5bd   : > { %3856 = vrot.lane.b32.xlu0 %v3853_v30, %s4280_s10  ;;  %v4017_v38 = vsel %vm3565_vm14, %v6784_v53, %v4016_v48  ;;  %vm3649_vm13 = vcmask 195714   ;;  %vm3676_vm14 = vcmask 261315   ;;  %vm3784_vm1 = vcmask 523719  }
 0x5be   : > { %v4018_v13 = vsel %vm3568_vm15, %v6773_v42, %v4017_v38  ;;  %vm3652_vm15 = vcmask 189568  }
 0x5bf   : > { %v4019_v1 = vsel %vm3571_vm0, %v6814_v34, %v4018_v13  ;;  %vm3703_vm0 = vcmask 326916  }
 0x5c0   : > { %3854 = vrot.lane.b32.xlu1 %v6492_v7, %s4280_s10  ;;  %v3879_v7 = vsel %vm3577_vm12, %v6773_v42, %v3878_v37  ;;  %v4020_v6 = vsel %vm3574_vm7, %v6802_v55, %v4019_v1  ;;  %vm3730_vm7 = vcmask 392517  }
 0x5c1   : > { %3882 = vrot.lane.b32.xlu0 %v6223_v36, %s4279_s9  ;;  %v3906_v36 = vsel %vm3577_vm12, %v6784_v53, %v3905_v20  ;;  %v3880_v11 = vsel %vm3580_vm11, %v6814_v34, %v3879_v7  ;;  %v4021_v12 = vsel %vm3577_vm12, %v6835_v21, %v4020_v6  ;;  %vm3757_vm12 = vcmask 458118  }
 0x5c2   : > { %v3907_v19 = vsel %vm3580_vm11, %v6773_v42, %v3906_v36  ;;  %vm3625_vm11 = vcmask 122944  }
 0x5c4   : > { %3858 = vrot.lane.b32.xlu1 %v6835_v21, %s4280_s10 }
 0x5c5   : > { %3886 = vrot.lane.b32.xlu0 %v3881_v61, %s4279_s9 }
 0x5c8   : > { %3884 = vrot.lane.b32.xlu1 %v3880_v11, %s4279_s9 }
 0x5c9   : > { %3912 = vrot.lane.b32.xlu0 %v3907_v19, %s4277_s8 }
 0x5cc   : > { %3910 = vrot.lane.b32.xlu1 %v3900_v41, %s4277_s8 }
 0x5cd   : > { %3938 = vrot.lane.b32.xlu0 %v7075_v14, %s4276_s7 }
 0x5d0   : > { %3914 = vrot.lane.b32.xlu1 %v3909_v28, %s4277_s8 }
 0x5d1   : > { %3942 = vrot.lane.b32.xlu0 %v3937_v45, %s4276_s7 }
 0x5d4   : > { %3940 = vrot.lane.b32.xlu1 %v3934_v31, %s4276_s7 }
 0x5d5   : > { %3968 = vrot.lane.b32.xlu0 %v3961_v5, %s4275_s6 }
 0x5d8   : > { %3966 = vrot.lane.b32.xlu1 %v3954_v29, %s4275_s6 }
 0x5d9   : > { %3994 = vrot.lane.b32.xlu0 %v3981_v56, %s4274_s30 }
 0x5dc   : > { %3970 = vrot.lane.b32.xlu1 %v3965_v4, %s4275_s6 }
 0x5dd   : > { %3998 = vrot.lane.b32.xlu0 %v3993_v51, %s4274_s30 }
 0x5e0   : > { %3996 = vrot.lane.b32.xlu1 %v3988_v44, %s4274_s30 }
 0x5e1   : > { %4024 = vrot.lane.b32.xlu0 %v4015_v52, %s4273_s29 }
 0x5e4   : > { %4022 = vrot.lane.b32.xlu1 %v7076_v49, %s4273_s29 }
 0x5e8   : > { %4026 = vrot.lane.b32.xlu1 %v4021_v12, %s4273_s29 }
 0x5ea   : > { %v3614_v33 = vpop.permute.xlu0 %3613 }
 0x5eb   : > { %3623 = vst.msk [vmem:[%s6677_s27 - $0x1] sm:$0xfe] %vm3622_vm2, %v3614_v33  ;;  %vm7079_vm2 = vcmask 589312  }
 0x603   : > { %v3618_v42 = vpop.permute.xlu0 %3617 }
 0x604   : > { %3626 = vst.msk [vmem:[%s6677_s27 + $0xf] sm:$0x1] %vm3625_vm11, %v3618_v42  ;;  %vm3863_vm11 = vcmask 654913  }
 0x606   : > { %v3616_v53 = vpop.permute.xlu1 %3615 }
 0x607   : > { %v3643_v34 = vpop.permute.xlu0 %3642  ;;  %3624 = vst.msk [vmem:[%s6677_s27 + $0x7] sm:$0xff] %vm1689_vm3, %v3616_v53  ;;  %vm3679_vm3 = vcmask 256192  }
 0x608   : > { %3651 = vst.msk [vmem:[%s6677_s27 + $0x6] sm:$0xff] %vm1882_vm4, %v3643_v34  ;;  %vm3706_vm4 = vcmask 322816  }
 0x60a   : > { %v3641_v55 = vpop.permute.xlu1 %3640 }
 0x60b   : > { %v3668_v21 = vpop.permute.xlu0 %3667  ;;  %3650 = vst.msk [vmem:[%s6677_s27 - $0x2] sm:$0xfc] %vm3649_vm13, %v3641_v55  ;;  %vm3865_vm13 = vcmask 654912  }
 0x60c   : > { %3677 = vst.msk [vmem:[%s6677_s27 - $0x3] sm:$0xf8] %vm3676_vm14, %v3668_v21  ;;  %vm3891_vm14 = vcmask 720514  }
 0x60e   : > { %v3645_v25 = vpop.permute.xlu1 %3644 }
 0x60f   : > { %v3672_v58 = vpop.permute.xlu0 %3671  ;;  %3653 = vst.msk [vmem:[%s6677_s27 + $0xe] sm:$0x3] %vm3652_vm15, %v3645_v25  ;;  %vm3867_vm15 = vcmask 647744  }
 0x610   : > { %3680 = vst.msk [vmem:[%s6677_s27 + $0xd] sm:$0x7] %vm3679_vm3, %v3672_v58  ;;  %vm3895_vm3 = vcmask 714368  }
 0x612   : > { %v3670_v30 = vpop.permute.xlu1 %3669 }
 0x613   : > { %v3697_v8 = vpop.permute.xlu0 %3696  ;;  %3678 = vst.msk [vmem:[%s6677_s27 + $0x5] sm:$0xff] %vm2075_vm5, %v3670_v30  ;;  %vm3733_vm5 = vcmask 389440  }
 0x614   : > { %3705 = vst.msk [vmem:[%s6677_s27 + $0x4] sm:$0xff] %vm2268_vm6, %v3697_v8  ;;  %vm3760_vm6 = vcmask 456064  }
 0x616   : > { %v3695_v57 = vpop.permute.xlu1 %3694 }
 0x617   : > { %v3722_v60 = vpop.permute.xlu0 %3721  ;;  %3704 = vst.msk [vmem:[%s6677_s27 - $0x4] sm:$0xf0] %vm3703_vm0, %v3695_v57  ;;  %vm3919_vm0 = vcmask 786115  }
 0x618   : > { %3731 = vst.msk [vmem:[%s6677_s27 - $0x5] sm:$0xe0] %vm3730_vm7, %v3722_v60  ;;  %vm3921_vm7 = vcmask 786112  }
 0x61a   : > { %v3699_v0 = vpop.permute.xlu1 %3698 }
 0x61b   : > { %v3726_v37 = vpop.permute.xlu0 %3725  ;;  %3707 = vst.msk [vmem:[%s6677_s27 + $0xc] sm:$0xf] %vm3706_vm4, %v3699_v0  ;;  %vm3947_vm4 = vcmask 851716  }
 0x61c   : > { %3734 = vst.msk [vmem:[%s6677_s27 + $0xb] sm:$0x1f] %vm3733_vm5, %v3726_v37  ;;  %vm3923_vm5 = vcmask 780992  }
 0x61e   : > { %v3724_v20 = vpop.permute.xlu1 %3723 }
 0x61f   : > { %v3751_v61 = vpop.permute.xlu0 %3750  ;;  %3732 = vst.msk [vmem:[%s6677_s27 + $0x3] sm:$0xff] %vm2461_vm8, %v3724_v20  ;;  %vm3787_vm8 = vcmask 522688  }
 0x620   : > { %3759 = vst.msk [vmem:[%s6677_s27 + $0x2] sm:$0xff] %vm2655_vm9, %v3751_v61  ;;  %vm7080_vm9 = vmmov %vm7079_vm2 }
 0x622   : > { %v3749_v7 = vpop.permute.xlu1 %3748 }
 0x623   : > { %v3776_v36 = vpop.permute.xlu0 %3775  ;;  %3758 = vst.msk [vmem:[%s6677_s27 - $0x6] sm:$0xc0] %vm3757_vm12, %v3749_v7  ;;  %vm3949_vm12 = vcmask 851712  }
 0x624   : > { %3785 = vst.msk [vmem:[%s6677_s27 - $0x7] sm:$0x80] %vm3784_vm1, %v3776_v36  ;;  %vm3951_vm1 = vcmask 847616  }
 0x626   : > { %v3753_v11 = vpop.permute.xlu1 %3752 }
 0x627   : > { %v3780_v19 = vpop.permute.xlu0 %3779  ;;  %3761 = vst.msk [vmem:[%s6677_s27 + $0xa] sm:$0x3f] %vm3760_vm6, %v3753_v11  ;;  %vm3975_vm6 = vcmask 917317  }
 0x628   : > { %3788 = vst.msk [vmem:[%s6677_s27 + $0x9] sm:$0x7f] %vm3787_vm8, %v3780_v19  ;;  %vm3977_vm8 = vcmask 917312  }
 0x62a   : > { %v3778_v3 = vpop.permute.xlu1 %3777 }
 0x62b   : > { %v3836_v24 = vpop.permute.xlu0 %3835  ;;  %3786 = vst.msk [vmem:[%s6677_s27 + $0x1] sm:$0xff] %vm2848_vm10, %v3778_v3  ;;  %vm3893_vm10 = vcmask 720512  }
 0x62c   : > { %3840 = vst.msk [vmem:[%s6677_s27 + $0x8] sm:$0xff] %vm7080_vm9, %v3836_v24  ;;  %vm3979_vm9 = vcmask 914240  }
 0x62e   : > { %v3834_v43 = vpop.permute.xlu1 %3833 }
 0x62f   : > { %v3857_v10 = vpop.permute.xlu0 %3856  ;;  %3839 = vst.msk [vmem:[%s6677_s27] sm:$0xff] %vm7079_vm2, %v3834_v43  ;;  %vm4003_vm2 = vcmask 982918  }
 0x630   : > { %3866 = vst.msk [vmem:[%s6677_s27 + $0x7] sm:$0xff] %vm3865_vm13, %v3857_v10  ;;  %vm4007_vm13 = vcmask 980864  }
 0x632   : > { %v3855_v26 = vpop.permute.xlu1 %3854 }
 0x633   : > { %v3883_v41 = vpop.permute.xlu0 %3882  ;;  %3864 = vst.msk [vmem:[%s6677_s27 - $0x1] sm:$0xfe] %vm3863_vm11, %v3855_v26  ;;  %vm4005_vm11 = vcmask 982912  }
 0x634   : > { %3892 = vst.msk [vmem:[%s6677_s27 - $0x2] sm:$0xfc] %vm3891_vm14, %v3883_v41  ;;  %vm4031_vm14 = vcmask 1048519  }
 0x636   : > { %v3859_v35 = vpop.permute.xlu1 %3858 }
 0x637   : > { %v3887_v14 = vpop.permute.xlu0 %3886  ;;  %3868 = vst.msk [vmem:[%s6677_s27 + $0xf] sm:$0x1] %vm3867_vm15, %v3859_v35  ;;  %vm4033_vm15 = vcmask 1048512  }
 0x638   : > { %3896 = vst.msk [vmem:[%s6677_s27 + $0xe] sm:$0x3] %vm3895_vm3, %v3887_v14 }
 0x63a   : > { %v3885_v9 = vpop.permute.xlu1 %3884 }
 0x63b   : > { %v3913_v17 = vpop.permute.xlu0 %3912  ;;  %3894 = vst.msk [vmem:[%s6677_s27 + $0x6] sm:$0xff] %vm3893_vm10, %v3885_v9  ;;  %vm4035_vm10 = vcmask 1047488  }
 0x63c   : > { %3922 = vst.msk [vmem:[%s6677_s27 + $0x5] sm:$0xff] %vm3921_vm7, %v3913_v17 }
 0x63e   : > { %v3911_v47 = vpop.permute.xlu1 %3910 }
 0x63f   : > { %v3939_v18 = vpop.permute.xlu0 %3938  ;;  %3920 = vst.msk [vmem:[%s6677_s27 - $0x3] sm:$0xf8] %vm3919_vm0, %v3911_v47 }
 0x640   : > { %3948 = vst.msk [vmem:[%s6677_s27 - $0x4] sm:$0xf0] %vm3947_vm4, %v3939_v18 }
 0x642   : > { %v3915_v28 = vpop.permute.xlu1 %3914 }
 0x643   : > { %v3943_v45 = vpop.permute.xlu0 %3942  ;;  %3924 = vst.msk [vmem:[%s6677_s27 + $0xd] sm:$0x7] %vm3923_vm5, %v3915_v28 }
 0x644   : > { %3952 = vst.msk [vmem:[%s6677_s27 + $0xc] sm:$0xf] %vm3951_vm1, %v3943_v45 }
 0x646   : > { %v3941_v59 = vpop.permute.xlu1 %3940 }
 0x647   : > { %v3969_v27 = vpop.permute.xlu0 %3968  ;;  %3950 = vst.msk [vmem:[%s6677_s27 + $0x4] sm:$0xff] %vm3949_vm12, %v3941_v59 }
 0x648   : > { %3978 = vst.msk [vmem:[%s6677_s27 + $0x3] sm:$0xff] %vm3977_vm8, %v3969_v27 }
 0x64a   : > { %v3967_v31 = vpop.permute.xlu1 %3966 }
 0x64b   : > { %v3995_v5 = vpop.permute.xlu0 %3994  ;;  %3976 = vst.msk [vmem:[%s6677_s27 - $0x5] sm:$0xe0] %vm3975_vm6, %v3967_v31 }
 0x64c   : > { %4004 = vst.msk [vmem:[%s6677_s27 - $0x6] sm:$0xc0] %vm4003_vm2, %v3995_v5 }
 0x64e   : > { %v3971_v22 = vpop.permute.xlu1 %3970 }
 0x64f   : > { %3980 = vst.msk [vmem:[%s6677_s27 + $0xb] sm:$0x1f] %vm3979_vm9, %v3971_v22  ;;  %v3999_v2 = vpop.permute.xlu0 %3998 }
 0x650   : > { %4008 = vst.msk [vmem:[%s6677_s27 + $0xa] sm:$0x3f] %vm4007_vm13, %v3999_v2 }
 0x652   : > { %v3997_v40 = vpop.permute.xlu1 %3996 }
 0x653   : > { %4006 = vst.msk [vmem:[%s6677_s27 + $0x2] sm:$0xff] %vm4005_vm11, %v3997_v40  ;;  %v4025_v15 = vpop.permute.xlu0 %4024 }
 0x654   : > { %4034 = vst.msk [vmem:[%s6677_s27 + $0x1] sm:$0xff] %vm4033_vm15, %v4025_v15 }
 0x656   : > { %v4023_v49 = vpop.permute.xlu1 %4022 }
 0x657   : > { %4032 = vst.msk [vmem:[%s6677_s27 - $0x7] sm:$0x80] %vm4031_vm14, %v4023_v49 }
 0x65a   : > { %v4027_v46 = vpop.permute.xlu1 %4026 }
 0x65b   : > { %4036 = vst.msk [vmem:[%s6677_s27 + $0x9] sm:$0x7f] %vm4035_vm10, %v4027_v46 }
 0x65c PF: > { %s16_s18 = sadd.s32 1, %s4270_s18  }
 0x65d   : > { %p13_p5 = scmp.ge.s32.totalorder %s16_s18, 4  }
 0x65f   :  { %15 = sbr.rel (!%p13_p5) target bundleno = 1 (0x1), region = 81 }

</bundles_post_ra>
